<compile_context>
chip_gen: v7x
topology: tpu7x:2x2x1
jax: 0.10.0
libtpu: 0.0.40
codegen_flags: <defaults>
</compile_context>

<pallas_src>
import jax
import jax.numpy as jnp
from jax.experimental import pallas as pl
from jax.experimental.pallas import tpu as pltpu

_NEG = -1e30  # "minus infinity" that stays NaN-free under exp/log arithmetic


def _round_up(x, m):
    return ((x + m - 1) // m) * m


def ctc_loss(log_probs, targets, input_lengths, target_lengths, blank=0,
             t_blk_max=32, lp_dtype=jnp.bfloat16):
    """torch.nn.CTCLoss(blank=0, reduction='mean', zero_infinity=False) forward."""
    T, N, C = log_probs.shape
    L = targets.shape[1]
    S = 2 * L + 1

    f32 = jnp.float32
    n_blk = 16                                  # sublane tile (bf16-friendly)
    N_pad = _round_up(N, n_blk)
    S_pad = _round_up(S, 128)
    C_pad = _round_up(C, 128)
    # T_BLK sized conservatively (fits v7x's 64 MiB VMEM with room to spare).
    t_blk = min(t_blk_max, _round_up(T, 8))
    T_pad = _round_up(T, t_blk)

    log_probs = log_probs.astype(f32)
    targets = targets.astype(jnp.int32)
    input_lengths = input_lengths.astype(jnp.int32)
    target_lengths = target_lengths.astype(jnp.int32)

    # ---- plain-JAX preprocessing: tiny (N, S)-sized tables + ONE fused
    # transpose/pad/cast pass over the big log-prob tensor ---------------------
    ext = jnp.full((N, S), blank, jnp.int32).at[:, 1::2].set(targets)
    prev2 = jnp.concatenate([jnp.full((N, 2), -1, jnp.int32), ext[:, :-2]], axis=1)
    s_idx = jnp.arange(S)[None, :]
    tl = target_lengths[:, None]

    skip = (s_idx >= 2) & (ext != blank) & (ext != prev2)          # s-2 allowed
    init = (s_idx == 0) | ((s_idx == 1) & (tl >= 1))               # t=0 states
    fin = (s_idx == 2 * tl) | ((s_idx == 2 * tl - 1) & (tl >= 1))  # final states
    sh1 = jnp.broadcast_to(s_idx >= 1, (N, S))                     # s-1 allowed

    def bias(mask):
        # additive bias: 0 where allowed, NEG elsewhere; NEG on all padding so
        # the circular roll wraparound and padded lanes stay pinned at ~NEG.
        b = jnp.where(mask, 0.0, _NEG).astype(f32)
        return jnp.pad(b, ((0, N_pad - N), (0, S_pad - S)), constant_values=_NEG)

    sh1_b, sk2_b, ini_b, fin_b = bias(sh1), bias(skip), bias(init), bias(fin)

    # One-hot gather table for the in-kernel MXU gather (padded rows are zero).
    onehot = (ext[:, :, None] == jnp.arange(C)[None, None, :]).astype(lp_dtype)
    onehot = jnp.pad(onehot, ((0, N_pad - N), (0, S_pad - S), (0, C_pad - C)))

    # (T,N,C) -> (N_pad,T_pad,C_pad) bf16: XLA fuses transpose+pad+cast into one
    # pass; this replaces the old take_along_axis gather pass entirely.
    lp = jnp.transpose(log_probs, (1, 0, 2))
    lp = jnp.pad(lp, ((0, N_pad - N), (0, T_pad - T), (0, C_pad - C)))
    lp = lp.astype(lp_dtype)

    in_len = jnp.pad(input_lengths, (0, N_pad - N))[:, None]       # (N_pad,1) i32

    def kernel(lp_ref, oh_ref, sh1_ref, sk2_ref, ini_ref, fin_ref, len_ref,
               out_ref, alpha_ref, lpsc_ref):
        ti = pl.program_id(1)

        @pl.when(ti == 0)
        def _():
            alpha_ref[...] = jnp.full_like(alpha_ref, _NEG)

        # Fused label gather: batched one-hot matmul on the MXU for the whole
        # time block: (n, t, c) x (n, s, c) -> (n, t, s), f32 accumulation.
        lpsc_ref[...] = jax.lax.dot_general(
            lp_ref[...], oh_ref[...],
            dimension_numbers=(((2,), (2,)), ((0,), (0,))),
            preferred_element_type=jnp.float32)

        sh1v = sh1_ref[...]
        sk2v = sk2_ref[...]
        lens = len_ref[...]                                    # (n_blk, 1) i32
        alpha = alpha_ref[...]
        t_base = ti * t_blk

        for j in range(t_blk):                                  # static, unrolled
            t_abs = t_base + j
            lp_t = lpsc_ref[:, j, :]                            # (n_blk, S_pad) f32
            a1 = pltpu.roll(alpha, shift=1, axis=1) + sh1v
            a2 = pltpu.roll(alpha, shift=2, axis=1) + sk2v
            m12 = jnp.maximum(a1, a2)
            m = jnp.maximum(alpha, m12)
            # 3-way logsumexp with only 2 exps + 1 log: the max term is 1.
            take_a = alpha >= m12
            d1 = jnp.where(take_a, a1, alpha) - m
            d2 = jnp.where(take_a | (a1 >= a2), a2, a1) - m
            new_alpha = m + jnp.log(1.0 + jnp.exp(d1) + jnp.exp(d2)) + lp_t
            if j == 0:  # only the very first frame can be t == 0
                new_alpha = jnp.where(t_abs == 0, lp_t + ini_ref[...], new_alpha)
            # absolute-time gating (also guards input_length == 0 at t == 0)
            alpha = jnp.where(t_abs < lens, new_alpha, alpha)

        alpha_ref[...] = alpha

        @pl.when(ti == pl.num_programs(1) - 1)
        def _():
            # nll_n = -logsumexp over the final states at t = input_len_n - 1
            fin_a = alpha + fin_ref[...]
            mx = jnp.max(fin_a, axis=-1, keepdims=True)
            sm = jnp.sum(jnp.exp(fin_a - mx), axis=-1, keepdims=True)
            nll = -(mx + jnp.log(sm))                           # (n_blk, 1)
            out_ref[...] = jnp.broadcast_to(nll, out_ref.shape)

    grid = (N_pad // n_blk, T_pad // t_blk)
    cost = pl.CostEstimate(
        flops=2 * N_pad * T_pad * S_pad * C_pad + 14 * T_pad * N_pad * S_pad,
        transcendentals=3 * T_pad * N_pad * S_pad,
        bytes_accessed=(lp.size * lp.dtype.itemsize
                        + onehot.size * onehot.dtype.itemsize
                        + 4 * 4 * N_pad * S_pad + 4 * N_pad + 4 * N_pad * 128))

    out = pl.pallas_call(
        kernel,
        out_shape=jax.ShapeDtypeStruct((N_pad, 128), f32),      # lane-dense
        grid_spec=pltpu.PrefetchScalarGridSpec(
            num_scalar_prefetch=0,
            grid=grid,
            in_specs=[
                pl.BlockSpec((n_blk, t_blk, C_pad), lambda ni, ti: (ni, ti, 0)),
                pl.BlockSpec((n_blk, S_pad, C_pad), lambda ni, ti: (ni, 0, 0)),
                pl.BlockSpec((n_blk, S_pad), lambda ni, ti: (ni, 0)),
                pl.BlockSpec((n_blk, S_pad), lambda ni, ti: (ni, 0)),
                pl.BlockSpec((n_blk, S_pad), lambda ni, ti: (ni, 0)),
                pl.BlockSpec((n_blk, S_pad), lambda ni, ti: (ni, 0)),
                pl.BlockSpec((n_blk, 1), lambda ni, ti: (ni, 0)),
            ],
            out_specs=pl.BlockSpec((n_blk, 128), lambda ni, ti: (ni, 0)),
            scratch_shapes=[pltpu.VMEM((n_blk, S_pad), f32),            # alpha
                            pltpu.VMEM((n_blk, t_blk, S_pad), f32)],    # gathered lp
        ),
        compiler_params=pltpu.CompilerParams(
            dimension_semantics=("parallel", "arbitrary"),  # batch || , time seq
            vmem_limit_bytes=48 * 1024 * 1024),             # fits v7x's 64 MiB
        cost_estimate=cost,
    )(lp, onehot, sh1_b, sk2_b, ini_b, fin_b, in_len)

    nll = out[:N, 0]
    # reduction='mean': each sample's loss divided by its target length, then
    # averaged over the batch (PyTorch CTCLoss default).
    return jnp.mean(nll / jnp.maximum(target_lengths, 1).astype(f32))


def recognition_loss(gt, pred):
    """Forward of FOTS RecognitionLoss: CTCLoss()(pred[0], gt[0], pred[1], gt[1])."""
    return ctc_loss(pred[0], gt[0], pred[1], gt[1])


def _ctc_loss_reference(log_probs, targets, input_lengths, target_lengths, blank=0):
    """Pure-JAX (f32) CTC forward with identical semantics, for checking."""
    T, N, C = log_probs.shape
    L = targets.shape[1]
    S = 2 * L + 1
    ext = jnp.full((N, S), blank, jnp.int32).at[:, 1::2].set(targets.astype(jnp.int32))
    idx = jnp.broadcast_to(ext[None], (T, N, S))
    lp = jnp.take_along_axis(log_probs.astype(jnp.float32), idx, axis=2)
    s_idx = jnp.arange(S)[None, :]
    tl = target_lengths[:, None]
    prev2 = jnp.concatenate([jnp.full((N, 2), -1, jnp.int32), ext[:, :-2]], axis=1)
    skip = (s_idx >= 2) & (ext != blank) & (ext != prev2)
    alpha = jnp.where((s_idx == 0) | ((s_idx == 1) & (tl >= 1)), lp[0], _NEG)

    def step(alpha, xs):
        lp_t, t = xs
        a1 = jnp.where(s_idx >= 1, jnp.roll(alpha, 1, axis=1), _NEG)
        a2 = jnp.where(skip, jnp.roll(alpha, 2, axis=1), _NEG)
        m = jnp.maximum(jnp.maximum(alpha, a1), a2)
        lse = m + jnp.log(jnp.exp(alpha - m) + jnp.exp(a1 - m) + jnp.exp(a2 - m))
        return jnp.where(t < input_lengths[:, None], lse + lp_t, alpha), None

    alpha, _ = jax.lax.scan(step, alpha, (lp[1:], jnp.arange(1, T)))
    fin = jnp.where((s_idx == 2 * tl) | ((s_idx == 2 * tl - 1) & (tl >= 1)),
                    alpha, _NEG)
    m = jnp.max(fin, axis=1)
    nll = -(m + jnp.log(jnp.sum(jnp.exp(fin - m[:, None]), axis=1)))
    return jnp.mean(nll / jnp.maximum(target_lengths, 1).astype(jnp.float32))


if __name__ == "__main__":
    key = jax.random.PRNGKey(0)
    k1, k2 = jax.random.split(key)

    # time steps, batch, classes (blank=0), max label length
    T, N, C, L = 48, 3, 37, 5

    log_probs = jax.nn.log_softmax(
        jax.random.normal(k1, (T, N, C), jnp.float32), axis=-1)
    targets = jax.random.randint(k2, (N, L), 1, C, dtype=jnp.int32)   # no blanks
    input_lengths = jnp.array([48, 40, 33], dtype=jnp.int32)
    target_lengths = jnp.array([5, 4, 3], dtype=jnp.int32)

    gt = (targets, target_lengths)
    pred = (log_probs, input_lengths)

    loss = recognition_loss(gt, pred)
    jax.block_until_ready(loss)

    ref = _ctc_loss_reference(log_probs, targets, input_lengths, target_lengths)
    assert loss.shape == () and bool(jnp.isfinite(loss))
    # Tolerance covers the bf16 log-prob streaming (~0.2-0.4% relative).
    assert bool(jnp.allclose(loss, ref, rtol=2e-2, atol=2e-2)), (loss, ref)
    print("KERNEL_OK")
</pallas_src>

<mosaic_0001>
module attributes {stable_mosaic.version = 11 : i64} {
  func.func @kernel(%arg0: i32, %arg1: i32, %arg2: memref<16x32x128xbf16, #tpu.memory_space<vmem>>, %arg3: memref<16x128x128xbf16, #tpu.memory_space<vmem>>, %arg4: memref<16x128xf32, #tpu.memory_space<vmem>>, %arg5: memref<16x128xf32, #tpu.memory_space<vmem>>, %arg6: memref<16x128xf32, #tpu.memory_space<vmem>>, %arg7: memref<16x128xf32, #tpu.memory_space<vmem>>, %arg8: memref<16x1xi32, #tpu.memory_space<vmem>>, %arg9: memref<16x128xf32, #tpu.memory_space<vmem>>, %arg10: memref<16x128xf32, #tpu.memory_space<vmem>>, %arg11: memref<16x32x128xf32, #tpu.memory_space<vmem>>) attributes {dimension_semantics = [#tpu.dimension_semantics<parallel>, #tpu.dimension_semantics<arbitrary>], iteration_bounds = array<i64: 1, 2>, scalar_prefetch = 0 : i64, scratch_operands = 2 : i64, tpu.core_type = #tpu.core_type<tc>, window_params = [{transform_indices = @transform_0, window_bounds = array<i64: 16, 32, 128>}, {transform_indices = @transform_1, window_bounds = array<i64: 16, 128, 128>}, {transform_indices = @transform_2, window_bounds = array<i64: 16, 128>}, {transform_indices = @transform_3, window_bounds = array<i64: 16, 128>}, {transform_indices = @transform_4, window_bounds = array<i64: 16, 128>}, {transform_indices = @transform_5, window_bounds = array<i64: 16, 128>}, {transform_indices = @transform_6, window_bounds = array<i64: 16, 1>}, {transform_indices = @transform_7, window_bounds = array<i64: 16, 128>}]} {
    %c0_i32 = arith.constant 0 : i32
    %0 = arith.cmpi eq, %arg1, %c0_i32 : i32
    %1 = arith.extui %0 : i1 to i32
    %c0_i32_0 = arith.constant 0 : i32
    %2 = arith.cmpi ne, %1, %c0_i32_0 : i32
    scf.if %2 {
      %cst_186 = arith.constant -1.000000e+30 : f32
      %948 = vector.broadcast %cst_186 : f32 to vector<16x128xf32>
      %c0_187 = arith.constant 0 : index
      %c0_188 = arith.constant 0 : index
      %949 = vector.load %arg10[%c0_187, %c0_188] : memref<16x128xf32, #tpu.memory_space<vmem>>, vector<16x128xf32>
      tpu.vector_store %arg10[%c0_187, %c0_188], %948 {strides = array<i32>} : memref<16x128xf32, #tpu.memory_space<vmem>>, vector<16x128xf32>,
    } else {
    }
    %c0 = arith.constant 0 : index
    %c0_1 = arith.constant 0 : index
    %c0_2 = arith.constant 0 : index
    %3 = vector.load %arg2[%c0, %c0_1, %c0_2] : memref<16x32x128xbf16, #tpu.memory_space<vmem>>, vector<16x32x128xbf16>
    %c0_3 = arith.constant 0 : index
    %c0_4 = arith.constant 0 : index
    %c0_5 = arith.constant 0 : index
    %4 = vector.load %arg3[%c0_3, %c0_4, %c0_5] : memref<16x128x128xbf16, #tpu.memory_space<vmem>>, vector<16x128x128xbf16>
    %cst = arith.constant dense<0.000000e+00> : vector<16x32x128xf32>
    %5 = tpu.matmul %3, %4, %cst {dimension_numbers = #tpu.dot_dimension_numbers<[2], [2], [1], [1], [0, 0, 0, 1, 1, 1], [0], [0]>} : vector<16x32x128xbf16>, vector<16x128x128xbf16>, vector<16x32x128xf32> -> vector<16x32x128xf32>
    %c0_6 = arith.constant 0 : index
    %c0_7 = arith.constant 0 : index
    %c0_8 = arith.constant 0 : index
    %6 = vector.load %arg11[%c0_6, %c0_7, %c0_8] : memref<16x32x128xf32, #tpu.memory_space<vmem>>, vector<16x32x128xf32>
    tpu.vector_store %arg11[%c0_6, %c0_7, %c0_8], %5 {strides = array<i32>} : memref<16x32x128xf32, #tpu.memory_space<vmem>>, vector<16x32x128xf32>,
    %c0_9 = arith.constant 0 : index
    %c0_10 = arith.constant 0 : index
    %7 = vector.load %arg4[%c0_9, %c0_10] : memref<16x128xf32, #tpu.memory_space<vmem>>, vector<16x128xf32>
    %c0_11 = arith.constant 0 : index
    %c0_12 = arith.constant 0 : index
    %8 = vector.load %arg5[%c0_11, %c0_12] : memref<16x128xf32, #tpu.memory_space<vmem>>, vector<16x128xf32>
    %c0_13 = arith.constant 0 : index
    %c0_14 = arith.constant 0 : index
    %9 = vector.load %arg8[%c0_13, %c0_14] : memref<16x1xi32, #tpu.memory_space<vmem>>, vector<16x1xi32>
    %c0_15 = arith.constant 0 : index
    %c0_16 = arith.constant 0 : index
    %10 = vector.load %arg10[%c0_15, %c0_16] : memref<16x128xf32, #tpu.memory_space<vmem>>, vector<16x128xf32>
    %c32_i32 = arith.constant 32 : i32
    %11 = arith.muli %arg1, %c32_i32 : i32
    %c0_i32_17 = arith.constant 0 : i32
    %12 = arith.addi %11, %c0_i32_17 : i32
    %c0_18 = arith.constant 0 : index
    %c0_19 = arith.constant 0 : index
    %c0_20 = arith.constant 0 : index
    %13 = vector.load %arg11[%c0_18, %c0_19, %c0_20] : memref<16x32x128xf32, #tpu.memory_space<vmem>>, vector<16x1x128xf32>
    %14 = vector.shape_cast %13 : vector<16x1x128xf32> to vector<16x128xf32>
    %c1_i32 = arith.constant 1 : i32
    %15 = tpu.dynamic_rotate %10 by %c1_i32 dim 1 : vector<16x128xf32>, i32 -> vector<16x128xf32>
    %16 = arith.addf %15, %7 : vector<16x128xf32>
    %c2_i32 = arith.constant 2 : i32
    %17 = tpu.dynamic_rotate %10 by %c2_i32 dim 1 : vector<16x128xf32>, i32 -> vector<16x128xf32>
    %18 = arith.addf %17, %8 : vector<16x128xf32>
    %19 = arith.maximumf %16, %18 : vector<16x128xf32>
    %20 = arith.maximumf %10, %19 : vector<16x128xf32>
    %21 = arith.cmpf oge, %10, %19 : vector<16x128xf32>
    %22 = arith.select %21, %16, %10 : vector<16x128xi1>, vector<16x128xf32>
    %23 = arith.subf %22, %20 : vector<16x128xf32>
    %24 = arith.cmpf oge, %16, %18 : vector<16x128xf32>
    %25 = arith.ori %21, %24 : vector<16x128xi1>
    %26 = arith.select %25, %18, %16 : vector<16x128xi1>, vector<16x128xf32>
    %27 = arith.subf %26, %20 : vector<16x128xf32>
    %28 = math.exp %23 : vector<16x128xf32>
    %cst_21 = arith.constant 1.000000e+00 : f32
    %29 = vector.broadcast %cst_21 : f32 to vector<16x128xf32>
    %30 = arith.addf %29, %28 : vector<16x128xf32>
    %31 = math.exp %27 : vector<16x128xf32>
    %32 = arith.addf %30, %31 : vector<16x128xf32>
    %33 = math.log %32 : vector<16x128xf32>
    %34 = arith.addf %20, %33 : vector<16x128xf32>
    %35 = arith.addf %34, %14 : vector<16x128xf32>
    %c0_i32_22 = arith.constant 0 : i32
    %36 = arith.cmpi eq, %12, %c0_i32_22 : i32
    %c0_23 = arith.constant 0 : index
    %c0_24 = arith.constant 0 : index
    %37 = vector.load %arg6[%c0_23, %c0_24] : memref<16x128xf32, #tpu.memory_space<vmem>>, vector<16x128xf32>
    %38 = arith.addf %14, %37 : vector<16x128xf32>
    %39 = arith.select %36, %38, %35 : vector<16x128xf32>
    %40 = vector.broadcast %12 : i32 to vector<16x1xi32>
    %41 = arith.cmpi slt, %40, %9 : vector<16x1xi32>
    %42 = vector.shape_cast %41 : vector<16x1xi1> to vector<16x1xi1>
    %43 = vector.broadcast %42 : vector<16x1xi1> to vector<16x128xi1>
    %44 = arith.select %43, %39, %10 : vector<16x128xi1>, vector<16x128xf32>
    %c1_i32_25 = arith.constant 1 : i32
    %45 = arith.addi %11, %c1_i32_25 : i32
    %c0_26 = arith.constant 0 : index
    %c1 = arith.constant 1 : index
    %c0_27 = arith.constant 0 : index
    %46 = vector.load %arg11[%c0_26, %c1, %c0_27] : memref<16x32x128xf32, #tpu.memory_space<vmem>>, vector<16x1x128xf32>
    %47 = vector.shape_cast %46 : vector<16x1x128xf32> to vector<16x128xf32>
    %c1_i32_28 = arith.constant 1 : i32
    %48 = tpu.dynamic_rotate %44 by %c1_i32_28 dim 1 : vector<16x128xf32>, i32 -> vector<16x128xf32>
    %49 = arith.addf %48, %7 : vector<16x128xf32>
    %c2_i32_29 = arith.constant 2 : i32
    %50 = tpu.dynamic_rotate %44 by %c2_i32_29 dim 1 : vector<16x128xf32>, i32 -> vector<16x128xf32>
    %51 = arith.addf %50, %8 : vector<16x128xf32>
    %52 = arith.maximumf %49, %51 : vector<16x128xf32>
    %53 = arith.maximumf %44, %52 : vector<16x128xf32>
    %54 = arith.cmpf oge, %44, %52 : vector<16x128xf32>
    %55 = arith.select %54, %49, %44 : vector<16x128xi1>, vector<16x128xf32>
    %56 = arith.subf %55, %53 : vector<16x128xf32>
    %57 = arith.cmpf oge, %49, %51 : vector<16x128xf32>
    %58 = arith.ori %54, %57 : vector<16x128xi1>
    %59 = arith.select %58, %51, %49 : vector<16x128xi1>, vector<16x128xf32>
    %60 = arith.subf %59, %53 : vector<16x128xf32>
    %61 = math.exp %56 : vector<16x128xf32>
    %cst_30 = arith.constant 1.000000e+00 : f32
    %62 = vector.broadcast %cst_30 : f32 to vector<16x128xf32>
    %63 = arith.addf %62, %61 : vector<16x128xf32>
    %64 = math.exp %60 : vector<16x128xf32>
    %65 = arith.addf %63, %64 : vector<16x128xf32>
    %66 = math.log %65 : vector<16x128xf32>
    %67 = arith.addf %53, %66 : vector<16x128xf32>
    %68 = arith.addf %67, %47 : vector<16x128xf32>
    %69 = vector.broadcast %45 : i32 to vector<16x1xi32>
    %70 = arith.cmpi slt, %69, %9 : vector<16x1xi32>
    %71 = vector.shape_cast %70 : vector<16x1xi1> to vector<16x1xi1>
    %72 = vector.broadcast %71 : vector<16x1xi1> to vector<16x128xi1>
    %73 = arith.select %72, %68, %44 : vector<16x128xi1>, vector<16x128xf32>
    %c2_i32_31 = arith.constant 2 : i32
    %74 = arith.addi %11, %c2_i32_31 : i32
    %c0_32 = arith.constant 0 : index
    %c2 = arith.constant 2 : index
    %c0_33 = arith.constant 0 : index
    %75 = vector.load %arg11[%c0_32, %c2, %c0_33] : memref<16x32x128xf32, #tpu.memory_space<vmem>>, vector<16x1x128xf32>
    %76 = vector.shape_cast %75 : vector<16x1x128xf32> to vector<16x128xf32>
    %c1_i32_34 = arith.constant 1 : i32
    %77 = tpu.dynamic_rotate %73 by %c1_i32_34 dim 1 : vector<16x128xf32>, i32 -> vector<16x128xf32>
    %78 = arith.addf %77, %7 : vector<16x128xf32>
    %c2_i32_35 = arith.constant 2 : i32
    %79 = tpu.dynamic_rotate %73 by %c2_i32_35 dim 1 : vector<16x128xf32>, i32 -> vector<16x128xf32>
    %80 = arith.addf %79, %8 : vector<16x128xf32>
    %81 = arith.maximumf %78, %80 : vector<16x128xf32>
    %82 = arith.maximumf %73, %81 : vector<16x128xf32>
    %83 = arith.cmpf oge, %73, %81 : vector<16x128xf32>
    %84 = arith.select %83, %78, %73 : vector<16x128xi1>, vector<16x128xf32>
    %85 = arith.subf %84, %82 : vector<16x128xf32>
    %86 = arith.cmpf oge, %78, %80 : vector<16x128xf32>
    %87 = arith.ori %83, %86 : vector<16x128xi1>
    %88 = arith.select %87, %80, %78 : vector<16x128xi1>, vector<16x128xf32>
    %89 = arith.subf %88, %82 : vector<16x128xf32>
    %90 = math.exp %85 : vector<16x128xf32>
    %cst_36 = arith.constant 1.000000e+00 : f32
    %91 = vector.broadcast %cst_36 : f32 to vector<16x128xf32>
    %92 = arith.addf %91, %90 : vector<16x128xf32>
    %93 = math.exp %89 : vector<16x128xf32>
    %94 = arith.addf %92, %93 : vector<16x128xf32>
    %95 = math.log %94 : vector<16x128xf32>
    %96 = arith.addf %82, %95 : vector<16x128xf32>
    %97 = arith.addf %96, %76 : vector<16x128xf32>
    %98 = vector.broadcast %74 : i32 to vector<16x1xi32>
    %99 = arith.cmpi slt, %98, %9 : vector<16x1xi32>
    %100 = vector.shape_cast %99 : vector<16x1xi1> to vector<16x1xi1>
    %101 = vector.broadcast %100 : vector<16x1xi1> to vector<16x128xi1>
    %102 = arith.select %101, %97, %73 : vector<16x128xi1>, vector<16x128xf32>
    %c3_i32 = arith.constant 3 : i32
    %103 = arith.addi %11, %c3_i32 : i32
    %c0_37 = arith.constant 0 : index
    %c3 = arith.constant 3 : index
    %c0_38 = arith.constant 0 : index
    %104 = vector.load %arg11[%c0_37, %c3, %c0_38] : memref<16x32x128xf32, #tpu.memory_space<vmem>>, vector<16x1x128xf32>
    %105 = vector.shape_cast %104 : vector<16x1x128xf32> to vector<16x128xf32>
    %c1_i32_39 = arith.constant 1 : i32
    %106 = tpu.dynamic_rotate %102 by %c1_i32_39 dim 1 : vector<16x128xf32>, i32 -> vector<16x128xf32>
    %107 = arith.addf %106, %7 : vector<16x128xf32>
    %c2_i32_40 = arith.constant 2 : i32
    %108 = tpu.dynamic_rotate %102 by %c2_i32_40 dim 1 : vector<16x128xf32>, i32 -> vector<16x128xf32>
    %109 = arith.addf %108, %8 : vector<16x128xf32>
    %110 = arith.maximumf %107, %109 : vector<16x128xf32>
    %111 = arith.maximumf %102, %110 : vector<16x128xf32>
    %112 = arith.cmpf oge, %102, %110 : vector<16x128xf32>
    %113 = arith.select %112, %107, %102 : vector<16x128xi1>, vector<16x128xf32>
    %114 = arith.subf %113, %111 : vector<16x128xf32>
    %115 = arith.cmpf oge, %107, %109 : vector<16x128xf32>
    %116 = arith.ori %112, %115 : vector<16x128xi1>
    %117 = arith.select %116, %109, %107 : vector<16x128xi1>, vector<16x128xf32>
    %118 = arith.subf %117, %111 : vector<16x128xf32>
    %119 = math.exp %114 : vector<16x128xf32>
    %cst_41 = arith.constant 1.000000e+00 : f32
    %120 = vector.broadcast %cst_41 : f32 to vector<16x128xf32>
    %121 = arith.addf %120, %119 : vector<16x128xf32>
    %122 = math.exp %118 : vector<16x128xf32>
    %123 = arith.addf %121, %122 : vector<16x128xf32>
    %124 = math.log %123 : vector<16x128xf32>
    %125 = arith.addf %111, %124 : vector<16x128xf32>
    %126 = arith.addf %125, %105 : vector<16x128xf32>
    %127 = vector.broadcast %103 : i32 to vector<16x1xi32>
    %128 = arith.cmpi slt, %127, %9 : vector<16x1xi32>
    %129 = vector.shape_cast %128 : vector<16x1xi1> to vector<16x1xi1>
    %130 = vector.broadcast %129 : vector<16x1xi1> to vector<16x128xi1>
    %131 = arith.select %130, %126, %102 : vector<16x128xi1>, vector<16x128xf32>
    %c4_i32 = arith.constant 4 : i32
    %132 = arith.addi %11, %c4_i32 : i32
    %c0_42 = arith.constant 0 : index
    %c4 = arith.constant 4 : index
    %c0_43 = arith.constant 0 : index
    %133 = vector.load %arg11[%c0_42, %c4, %c0_43] : memref<16x32x128xf32, #tpu.memory_space<vmem>>, vector<16x1x128xf32>
    %134 = vector.shape_cast %133 : vector<16x1x128xf32> to vector<16x128xf32>
    %c1_i32_44 = arith.constant 1 : i32
    %135 = tpu.dynamic_rotate %131 by %c1_i32_44 dim 1 : vector<16x128xf32>, i32 -> vector<16x128xf32>
    %136 = arith.addf %135, %7 : vector<16x128xf32>
    %c2_i32_45 = arith.constant 2 : i32
    %137 = tpu.dynamic_rotate %131 by %c2_i32_45 dim 1 : vector<16x128xf32>, i32 -> vector<16x128xf32>
    %138 = arith.addf %137, %8 : vector<16x128xf32>
    %139 = arith.maximumf %136, %138 : vector<16x128xf32>
    %140 = arith.maximumf %131, %139 : vector<16x128xf32>
    %141 = arith.cmpf oge, %131, %139 : vector<16x128xf32>
    %142 = arith.select %141, %136, %131 : vector<16x128xi1>, vector<16x128xf32>
    %143 = arith.subf %142, %140 : vector<16x128xf32>
    %144 = arith.cmpf oge, %136, %138 : vector<16x128xf32>
    %145 = arith.ori %141, %144 : vector<16x128xi1>
    %146 = arith.select %145, %138, %136 : vector<16x128xi1>, vector<16x128xf32>
    %147 = arith.subf %146, %140 : vector<16x128xf32>
    %148 = math.exp %143 : vector<16x128xf32>
    %cst_46 = arith.constant 1.000000e+00 : f32
    %149 = vector.broadcast %cst_46 : f32 to vector<16x128xf32>
    %150 = arith.addf %149, %148 : vector<16x128xf32>
    %151 = math.exp %147 : vector<16x128xf32>
    %152 = arith.addf %150, %151 : vector<16x128xf32>
    %153 = math.log %152 : vector<16x128xf32>
    %154 = arith.addf %140, %153 : vector<16x128xf32>
    %155 = arith.addf %154, %134 : vector<16x128xf32>
    %156 = vector.broadcast %132 : i32 to vector<16x1xi32>
    %157 = arith.cmpi slt, %156, %9 : vector<16x1xi32>
    %158 = vector.shape_cast %157 : vector<16x1xi1> to vector<16x1xi1>
    %159 = vector.broadcast %158 : vector<16x1xi1> to vector<16x128xi1>
    %160 = arith.select %159, %155, %131 : vector<16x128xi1>, vector<16x128xf32>
    %c5_i32 = arith.constant 5 : i32
    %161 = arith.addi %11, %c5_i32 : i32
    %c0_47 = arith.constant 0 : index
    %c5 = arith.constant 5 : index
    %c0_48 = arith.constant 0 : index
    %162 = vector.load %arg11[%c0_47, %c5, %c0_48] : memref<16x32x128xf32, #tpu.memory_space<vmem>>, vector<16x1x128xf32>
    %163 = vector.shape_cast %162 : vector<16x1x128xf32> to vector<16x128xf32>
    %c1_i32_49 = arith.constant 1 : i32
    %164 = tpu.dynamic_rotate %160 by %c1_i32_49 dim 1 : vector<16x128xf32>, i32 -> vector<16x128xf32>
    %165 = arith.addf %164, %7 : vector<16x128xf32>
    %c2_i32_50 = arith.constant 2 : i32
    %166 = tpu.dynamic_rotate %160 by %c2_i32_50 dim 1 : vector<16x128xf32>, i32 -> vector<16x128xf32>
    %167 = arith.addf %166, %8 : vector<16x128xf32>
    %168 = arith.maximumf %165, %167 : vector<16x128xf32>
    %169 = arith.maximumf %160, %168 : vector<16x128xf32>
    %170 = arith.cmpf oge, %160, %168 : vector<16x128xf32>
    %171 = arith.select %170, %165, %160 : vector<16x128xi1>, vector<16x128xf32>
    %172 = arith.subf %171, %169 : vector<16x128xf32>
    %173 = arith.cmpf oge, %165, %167 : vector<16x128xf32>
    %174 = arith.ori %170, %173 : vector<16x128xi1>
    %175 = arith.select %174, %167, %165 : vector<16x128xi1>, vector<16x128xf32>
    %176 = arith.subf %175, %169 : vector<16x128xf32>
    %177 = math.exp %172 : vector<16x128xf32>
    %cst_51 = arith.constant 1.000000e+00 : f32
    %178 = vector.broadcast %cst_51 : f32 to vector<16x128xf32>
    %179 = arith.addf %178, %177 : vector<16x128xf32>
    %180 = math.exp %176 : vector<16x128xf32>
    %181 = arith.addf %179, %180 : vector<16x128xf32>
    %182 = math.log %181 : vector<16x128xf32>
    %183 = arith.addf %169, %182 : vector<16x128xf32>
    %184 = arith.addf %183, %163 : vector<16x128xf32>
    %185 = vector.broadcast %161 : i32 to vector<16x1xi32>
    %186 = arith.cmpi slt, %185, %9 : vector<16x1xi32>
    %187 = vector.shape_cast %186 : vector<16x1xi1> to vector<16x1xi1>
    %188 = vector.broadcast %187 : vector<16x1xi1> to vector<16x128xi1>
    %189 = arith.select %188, %184, %160 : vector<16x128xi1>, vector<16x128xf32>
    %c6_i32 = arith.constant 6 : i32
    %190 = arith.addi %11, %c6_i32 : i32
    %c0_52 = arith.constant 0 : index
    %c6 = arith.constant 6 : index
    %c0_53 = arith.constant 0 : index
    %191 = vector.load %arg11[%c0_52, %c6, %c0_53] : memref<16x32x128xf32, #tpu.memory_space<vmem>>, vector<16x1x128xf32>
    %192 = vector.shape_cast %191 : vector<16x1x128xf32> to vector<16x128xf32>
    %c1_i32_54 = arith.constant 1 : i32
    %193 = tpu.dynamic_rotate %189 by %c1_i32_54 dim 1 : vector<16x128xf32>, i32 -> vector<16x128xf32>
    %194 = arith.addf %193, %7 : vector<16x128xf32>
    %c2_i32_55 = arith.constant 2 : i32
    %195 = tpu.dynamic_rotate %189 by %c2_i32_55 dim 1 : vector<16x128xf32>, i32 -> vector<16x128xf32>
    %196 = arith.addf %195, %8 : vector<16x128xf32>
    %197 = arith.maximumf %194, %196 : vector<16x128xf32>
    %198 = arith.maximumf %189, %197 : vector<16x128xf32>
    %199 = arith.cmpf oge, %189, %197 : vector<16x128xf32>
    %200 = arith.select %199, %194, %189 : vector<16x128xi1>, vector<16x128xf32>
    %201 = arith.subf %200, %198 : vector<16x128xf32>
    %202 = arith.cmpf oge, %194, %196 : vector<16x128xf32>
    %203 = arith.ori %199, %202 : vector<16x128xi1>
    %204 = arith.select %203, %196, %194 : vector<16x128xi1>, vector<16x128xf32>
    %205 = arith.subf %204, %198 : vector<16x128xf32>
    %206 = math.exp %201 : vector<16x128xf32>
    %cst_56 = arith.constant 1.000000e+00 : f32
    %207 = vector.broadcast %cst_56 : f32 to vector<16x128xf32>
    %208 = arith.addf %207, %206 : vector<16x128xf32>
    %209 = math.exp %205 : vector<16x128xf32>
    %210 = arith.addf %208, %209 : vector<16x128xf32>
    %211 = math.log %210 : vector<16x128xf32>
    %212 = arith.addf %198, %211 : vector<16x128xf32>
    %213 = arith.addf %212, %192 : vector<16x128xf32>
    %214 = vector.broadcast %190 : i32 to vector<16x1xi32>
    %215 = arith.cmpi slt, %214, %9 : vector<16x1xi32>
    %216 = vector.shape_cast %215 : vector<16x1xi1> to vector<16x1xi1>
    %217 = vector.broadcast %216 : vector<16x1xi1> to vector<16x128xi1>
    %218 = arith.select %217, %213, %189 : vector<16x128xi1>, vector<16x128xf32>
    %c7_i32 = arith.constant 7 : i32
    %219 = arith.addi %11, %c7_i32 : i32
    %c0_57 = arith.constant 0 : index
    %c7 = arith.constant 7 : index
    %c0_58 = arith.constant 0 : index
    %220 = vector.load %arg11[%c0_57, %c7, %c0_58] : memref<16x32x128xf32, #tpu.memory_space<vmem>>, vector<16x1x128xf32>
    %221 = vector.shape_cast %220 : vector<16x1x128xf32> to vector<16x128xf32>
    %c1_i32_59 = arith.constant 1 : i32
    %222 = tpu.dynamic_rotate %218 by %c1_i32_59 dim 1 : vector<16x128xf32>, i32 -> vector<16x128xf32>
    %223 = arith.addf %222, %7 : vector<16x128xf32>
    %c2_i32_60 = arith.constant 2 : i32
    %224 = tpu.dynamic_rotate %218 by %c2_i32_60 dim 1 : vector<16x128xf32>, i32 -> vector<16x128xf32>
    %225 = arith.addf %224, %8 : vector<16x128xf32>
    %226 = arith.maximumf %223, %225 : vector<16x128xf32>
    %227 = arith.maximumf %218, %226 : vector<16x128xf32>
    %228 = arith.cmpf oge, %218, %226 : vector<16x128xf32>
    %229 = arith.select %228, %223, %218 : vector<16x128xi1>, vector<16x128xf32>
    %230 = arith.subf %229, %227 : vector<16x128xf32>
    %231 = arith.cmpf oge, %223, %225 : vector<16x128xf32>
    %232 = arith.ori %228, %231 : vector<16x128xi1>
    %233 = arith.select %232, %225, %223 : vector<16x128xi1>, vector<16x128xf32>
    %234 = arith.subf %233, %227 : vector<16x128xf32>
    %235 = math.exp %230 : vector<16x128xf32>
    %cst_61 = arith.constant 1.000000e+00 : f32
    %236 = vector.broadcast %cst_61 : f32 to vector<16x128xf32>
    %237 = arith.addf %236, %235 : vector<16x128xf32>
    %238 = math.exp %234 : vector<16x128xf32>
    %239 = arith.addf %237, %238 : vector<16x128xf32>
    %240 = math.log %239 : vector<16x128xf32>
    %241 = arith.addf %227, %240 : vector<16x128xf32>
    %242 = arith.addf %241, %221 : vector<16x128xf32>
    %243 = vector.broadcast %219 : i32 to vector<16x1xi32>
    %244 = arith.cmpi slt, %243, %9 : vector<16x1xi32>
    %245 = vector.shape_cast %244 : vector<16x1xi1> to vector<16x1xi1>
    %246 = vector.broadcast %245 : vector<16x1xi1> to vector<16x128xi1>
    %247 = arith.select %246, %242, %218 : vector<16x128xi1>, vector<16x128xf32>
    %c8_i32 = arith.constant 8 : i32
    %248 = arith.addi %11, %c8_i32 : i32
    %c0_62 = arith.constant 0 : index
    %c8 = arith.constant 8 : index
    %c0_63 = arith.constant 0 : index
    %249 = vector.load %arg11[%c0_62, %c8, %c0_63] : memref<16x32x128xf32, #tpu.memory_space<vmem>>, vector<16x1x128xf32>
    %250 = vector.shape_cast %249 : vector<16x1x128xf32> to vector<16x128xf32>
    %c1_i32_64 = arith.constant 1 : i32
    %251 = tpu.dynamic_rotate %247 by %c1_i32_64 dim 1 : vector<16x128xf32>, i32 -> vector<16x128xf32>
    %252 = arith.addf %251, %7 : vector<16x128xf32>
    %c2_i32_65 = arith.constant 2 : i32
    %253 = tpu.dynamic_rotate %247 by %c2_i32_65 dim 1 : vector<16x128xf32>, i32 -> vector<16x128xf32>
    %254 = arith.addf %253, %8 : vector<16x128xf32>
    %255 = arith.maximumf %252, %254 : vector<16x128xf32>
    %256 = arith.maximumf %247, %255 : vector<16x128xf32>
    %257 = arith.cmpf oge, %247, %255 : vector<16x128xf32>
    %258 = arith.select %257, %252, %247 : vector<16x128xi1>, vector<16x128xf32>
    %259 = arith.subf %258, %256 : vector<16x128xf32>
    %260 = arith.cmpf oge, %252, %254 : vector<16x128xf32>
    %261 = arith.ori %257, %260 : vector<16x128xi1>
    %262 = arith.select %261, %254, %252 : vector<16x128xi1>, vector<16x128xf32>
    %263 = arith.subf %262, %256 : vector<16x128xf32>
    %264 = math.exp %259 : vector<16x128xf32>
    %cst_66 = arith.constant 1.000000e+00 : f32
    %265 = vector.broadcast %cst_66 : f32 to vector<16x128xf32>
    %266 = arith.addf %265, %264 : vector<16x128xf32>
    %267 = math.exp %263 : vector<16x128xf32>
    %268 = arith.addf %266, %267 : vector<16x128xf32>
    %269 = math.log %268 : vector<16x128xf32>
    %270 = arith.addf %256, %269 : vector<16x128xf32>
    %271 = arith.addf %270, %250 : vector<16x128xf32>
    %272 = vector.broadcast %248 : i32 to vector<16x1xi32>
    %273 = arith.cmpi slt, %272, %9 : vector<16x1xi32>
    %274 = vector.shape_cast %273 : vector<16x1xi1> to vector<16x1xi1>
    %275 = vector.broadcast %274 : vector<16x1xi1> to vector<16x128xi1>
    %276 = arith.select %275, %271, %247 : vector<16x128xi1>, vector<16x128xf32>
    %c9_i32 = arith.constant 9 : i32
    %277 = arith.addi %11, %c9_i32 : i32
    %c0_67 = arith.constant 0 : index
    %c9 = arith.constant 9 : index
    %c0_68 = arith.constant 0 : index
    %278 = vector.load %arg11[%c0_67, %c9, %c0_68] : memref<16x32x128xf32, #tpu.memory_space<vmem>>, vector<16x1x128xf32>
    %279 = vector.shape_cast %278 : vector<16x1x128xf32> to vector<16x128xf32>
    %c1_i32_69 = arith.constant 1 : i32
    %280 = tpu.dynamic_rotate %276 by %c1_i32_69 dim 1 : vector<16x128xf32>, i32 -> vector<16x128xf32>
    %281 = arith.addf %280, %7 : vector<16x128xf32>
    %c2_i32_70 = arith.constant 2 : i32
    %282 = tpu.dynamic_rotate %276 by %c2_i32_70 dim 1 : vector<16x128xf32>, i32 -> vector<16x128xf32>
    %283 = arith.addf %282, %8 : vector<16x128xf32>
    %284 = arith.maximumf %281, %283 : vector<16x128xf32>
    %285 = arith.maximumf %276, %284 : vector<16x128xf32>
    %286 = arith.cmpf oge, %276, %284 : vector<16x128xf32>
    %287 = arith.select %286, %281, %276 : vector<16x128xi1>, vector<16x128xf32>
    %288 = arith.subf %287, %285 : vector<16x128xf32>
    %289 = arith.cmpf oge, %281, %283 : vector<16x128xf32>
    %290 = arith.ori %286, %289 : vector<16x128xi1>
    %291 = arith.select %290, %283, %281 : vector<16x128xi1>, vector<16x128xf32>
    %292 = arith.subf %291, %285 : vector<16x128xf32>
    %293 = math.exp %288 : vector<16x128xf32>
    %cst_71 = arith.constant 1.000000e+00 : f32
    %294 = vector.broadcast %cst_71 : f32 to vector<16x128xf32>
    %295 = arith.addf %294, %293 : vector<16x128xf32>
    %296 = math.exp %292 : vector<16x128xf32>
    %297 = arith.addf %295, %296 : vector<16x128xf32>
    %298 = math.log %297 : vector<16x128xf32>
    %299 = arith.addf %285, %298 : vector<16x128xf32>
    %300 = arith.addf %299, %279 : vector<16x128xf32>
    %301 = vector.broadcast %277 : i32 to vector<16x1xi32>
    %302 = arith.cmpi slt, %301, %9 : vector<16x1xi32>
    %303 = vector.shape_cast %302 : vector<16x1xi1> to vector<16x1xi1>
    %304 = vector.broadcast %303 : vector<16x1xi1> to vector<16x128xi1>
    %305 = arith.select %304, %300, %276 : vector<16x128xi1>, vector<16x128xf32>
    %c10_i32 = arith.constant 10 : i32
    %306 = arith.addi %11, %c10_i32 : i32
    %c0_72 = arith.constant 0 : index
    %c10 = arith.constant 10 : index
    %c0_73 = arith.constant 0 : index
    %307 = vector.load %arg11[%c0_72, %c10, %c0_73] : memref<16x32x128xf32, #tpu.memory_space<vmem>>, vector<16x1x128xf32>
    %308 = vector.shape_cast %307 : vector<16x1x128xf32> to vector<16x128xf32>
    %c1_i32_74 = arith.constant 1 : i32
    %309 = tpu.dynamic_rotate %305 by %c1_i32_74 dim 1 : vector<16x128xf32>, i32 -> vector<16x128xf32>
    %310 = arith.addf %309, %7 : vector<16x128xf32>
    %c2_i32_75 = arith.constant 2 : i32
    %311 = tpu.dynamic_rotate %305 by %c2_i32_75 dim 1 : vector<16x128xf32>, i32 -> vector<16x128xf32>
    %312 = arith.addf %311, %8 : vector<16x128xf32>
    %313 = arith.maximumf %310, %312 : vector<16x128xf32>
    %314 = arith.maximumf %305, %313 : vector<16x128xf32>
    %315 = arith.cmpf oge, %305, %313 : vector<16x128xf32>
    %316 = arith.select %315, %310, %305 : vector<16x128xi1>, vector<16x128xf32>
    %317 = arith.subf %316, %314 : vector<16x128xf32>
    %318 = arith.cmpf oge, %310, %312 : vector<16x128xf32>
    %319 = arith.ori %315, %318 : vector<16x128xi1>
    %320 = arith.select %319, %312, %310 : vector<16x128xi1>, vector<16x128xf32>
    %321 = arith.subf %320, %314 : vector<16x128xf32>
    %322 = math.exp %317 : vector<16x128xf32>
    %cst_76 = arith.constant 1.000000e+00 : f32
    %323 = vector.broadcast %cst_76 : f32 to vector<16x128xf32>
    %324 = arith.addf %323, %322 : vector<16x128xf32>
    %325 = math.exp %321 : vector<16x128xf32>
    %326 = arith.addf %324, %325 : vector<16x128xf32>
    %327 = math.log %326 : vector<16x128xf32>
    %328 = arith.addf %314, %327 : vector<16x128xf32>
    %329 = arith.addf %328, %308 : vector<16x128xf32>
    %330 = vector.broadcast %306 : i32 to vector<16x1xi32>
    %331 = arith.cmpi slt, %330, %9 : vector<16x1xi32>
    %332 = vector.shape_cast %331 : vector<16x1xi1> to vector<16x1xi1>
    %333 = vector.broadcast %332 : vector<16x1xi1> to vector<16x128xi1>
    %334 = arith.select %333, %329, %305 : vector<16x128xi1>, vector<16x128xf32>
    %c11_i32 = arith.constant 11 : i32
    %335 = arith.addi %11, %c11_i32 : i32
    %c0_77 = arith.constant 0 : index
    %c11 = arith.constant 11 : index
    %c0_78 = arith.constant 0 : index
    %336 = vector.load %arg11[%c0_77, %c11, %c0_78] : memref<16x32x128xf32, #tpu.memory_space<vmem>>, vector<16x1x128xf32>
    %337 = vector.shape_cast %336 : vector<16x1x128xf32> to vector<16x128xf32>
    %c1_i32_79 = arith.constant 1 : i32
    %338 = tpu.dynamic_rotate %334 by %c1_i32_79 dim 1 : vector<16x128xf32>, i32 -> vector<16x128xf32>
    %339 = arith.addf %338, %7 : vector<16x128xf32>
    %c2_i32_80 = arith.constant 2 : i32
    %340 = tpu.dynamic_rotate %334 by %c2_i32_80 dim 1 : vector<16x128xf32>, i32 -> vector<16x128xf32>
    %341 = arith.addf %340, %8 : vector<16x128xf32>
    %342 = arith.maximumf %339, %341 : vector<16x128xf32>
    %343 = arith.maximumf %334, %342 : vector<16x128xf32>
    %344 = arith.cmpf oge, %334, %342 : vector<16x128xf32>
    %345 = arith.select %344, %339, %334 : vector<16x128xi1>, vector<16x128xf32>
    %346 = arith.subf %345, %343 : vector<16x128xf32>
    %347 = arith.cmpf oge, %339, %341 : vector<16x128xf32>
    %348 = arith.ori %344, %347 : vector<16x128xi1>
    %349 = arith.select %348, %341, %339 : vector<16x128xi1>, vector<16x128xf32>
    %350 = arith.subf %349, %343 : vector<16x128xf32>
    %351 = math.exp %346 : vector<16x128xf32>
    %cst_81 = arith.constant 1.000000e+00 : f32
    %352 = vector.broadcast %cst_81 : f32 to vector<16x128xf32>
    %353 = arith.addf %352, %351 : vector<16x128xf32>
    %354 = math.exp %350 : vector<16x128xf32>
    %355 = arith.addf %353, %354 : vector<16x128xf32>
    %356 = math.log %355 : vector<16x128xf32>
    %357 = arith.addf %343, %356 : vector<16x128xf32>
    %358 = arith.addf %357, %337 : vector<16x128xf32>
    %359 = vector.broadcast %335 : i32 to vector<16x1xi32>
    %360 = arith.cmpi slt, %359, %9 : vector<16x1xi32>
    %361 = vector.shape_cast %360 : vector<16x1xi1> to vector<16x1xi1>
    %362 = vector.broadcast %361 : vector<16x1xi1> to vector<16x128xi1>
    %363 = arith.select %362, %358, %334 : vector<16x128xi1>, vector<16x128xf32>
    %c12_i32 = arith.constant 12 : i32
    %364 = arith.addi %11, %c12_i32 : i32
    %c0_82 = arith.constant 0 : index
    %c12 = arith.constant 12 : index
    %c0_83 = arith.constant 0 : index
    %365 = vector.load %arg11[%c0_82, %c12, %c0_83] : memref<16x32x128xf32, #tpu.memory_space<vmem>>, vector<16x1x128xf32>
    %366 = vector.shape_cast %365 : vector<16x1x128xf32> to vector<16x128xf32>
    %c1_i32_84 = arith.constant 1 : i32
    %367 = tpu.dynamic_rotate %363 by %c1_i32_84 dim 1 : vector<16x128xf32>, i32 -> vector<16x128xf32>
    %368 = arith.addf %367, %7 : vector<16x128xf32>
    %c2_i32_85 = arith.constant 2 : i32
    %369 = tpu.dynamic_rotate %363 by %c2_i32_85 dim 1 : vector<16x128xf32>, i32 -> vector<16x128xf32>
    %370 = arith.addf %369, %8 : vector<16x128xf32>
    %371 = arith.maximumf %368, %370 : vector<16x128xf32>
    %372 = arith.maximumf %363, %371 : vector<16x128xf32>
    %373 = arith.cmpf oge, %363, %371 : vector<16x128xf32>
    %374 = arith.select %373, %368, %363 : vector<16x128xi1>, vector<16x128xf32>
    %375 = arith.subf %374, %372 : vector<16x128xf32>
    %376 = arith.cmpf oge, %368, %370 : vector<16x128xf32>
    %377 = arith.ori %373, %376 : vector<16x128xi1>
    %378 = arith.select %377, %370, %368 : vector<16x128xi1>, vector<16x128xf32>
    %379 = arith.subf %378, %372 : vector<16x128xf32>
    %380 = math.exp %375 : vector<16x128xf32>
    %cst_86 = arith.constant 1.000000e+00 : f32
    %381 = vector.broadcast %cst_86 : f32 to vector<16x128xf32>
    %382 = arith.addf %381, %380 : vector<16x128xf32>
    %383 = math.exp %379 : vector<16x128xf32>
    %384 = arith.addf %382, %383 : vector<16x128xf32>
    %385 = math.log %384 : vector<16x128xf32>
    %386 = arith.addf %372, %385 : vector<16x128xf32>
    %387 = arith.addf %386, %366 : vector<16x128xf32>
    %388 = vector.broadcast %364 : i32 to vector<16x1xi32>
    %389 = arith.cmpi slt, %388, %9 : vector<16x1xi32>
    %390 = vector.shape_cast %389 : vector<16x1xi1> to vector<16x1xi1>
    %391 = vector.broadcast %390 : vector<16x1xi1> to vector<16x128xi1>
    %392 = arith.select %391, %387, %363 : vector<16x128xi1>, vector<16x128xf32>
    %c13_i32 = arith.constant 13 : i32
    %393 = arith.addi %11, %c13_i32 : i32
    %c0_87 = arith.constant 0 : index
    %c13 = arith.constant 13 : index
    %c0_88 = arith.constant 0 : index
    %394 = vector.load %arg11[%c0_87, %c13, %c0_88] : memref<16x32x128xf32, #tpu.memory_space<vmem>>, vector<16x1x128xf32>
    %395 = vector.shape_cast %394 : vector<16x1x128xf32> to vector<16x128xf32>
    %c1_i32_89 = arith.constant 1 : i32
    %396 = tpu.dynamic_rotate %392 by %c1_i32_89 dim 1 : vector<16x128xf32>, i32 -> vector<16x128xf32>
    %397 = arith.addf %396, %7 : vector<16x128xf32>
    %c2_i32_90 = arith.constant 2 : i32
    %398 = tpu.dynamic_rotate %392 by %c2_i32_90 dim 1 : vector<16x128xf32>, i32 -> vector<16x128xf32>
    %399 = arith.addf %398, %8 : vector<16x128xf32>
    %400 = arith.maximumf %397, %399 : vector<16x128xf32>
    %401 = arith.maximumf %392, %400 : vector<16x128xf32>
    %402 = arith.cmpf oge, %392, %400 : vector<16x128xf32>
    %403 = arith.select %402, %397, %392 : vector<16x128xi1>, vector<16x128xf32>
    %404 = arith.subf %403, %401 : vector<16x128xf32>
    %405 = arith.cmpf oge, %397, %399 : vector<16x128xf32>
    %406 = arith.ori %402, %405 : vector<16x128xi1>
    %407 = arith.select %406, %399, %397 : vector<16x128xi1>, vector<16x128xf32>
    %408 = arith.subf %407, %401 : vector<16x128xf32>
    %409 = math.exp %404 : vector<16x128xf32>
    %cst_91 = arith.constant 1.000000e+00 : f32
    %410 = vector.broadcast %cst_91 : f32 to vector<16x128xf32>
    %411 = arith.addf %410, %409 : vector<16x128xf32>
    %412 = math.exp %408 : vector<16x128xf32>
    %413 = arith.addf %411, %412 : vector<16x128xf32>
    %414 = math.log %413 : vector<16x128xf32>
    %415 = arith.addf %401, %414 : vector<16x128xf32>
    %416 = arith.addf %415, %395 : vector<16x128xf32>
    %417 = vector.broadcast %393 : i32 to vector<16x1xi32>
    %418 = arith.cmpi slt, %417, %9 : vector<16x1xi32>
    %419 = vector.shape_cast %418 : vector<16x1xi1> to vector<16x1xi1>
    %420 = vector.broadcast %419 : vector<16x1xi1> to vector<16x128xi1>
    %421 = arith.select %420, %416, %392 : vector<16x128xi1>, vector<16x128xf32>
    %c14_i32 = arith.constant 14 : i32
    %422 = arith.addi %11, %c14_i32 : i32
    %c0_92 = arith.constant 0 : index
    %c14 = arith.constant 14 : index
    %c0_93 = arith.constant 0 : index
    %423 = vector.load %arg11[%c0_92, %c14, %c0_93] : memref<16x32x128xf32, #tpu.memory_space<vmem>>, vector<16x1x128xf32>
    %424 = vector.shape_cast %423 : vector<16x1x128xf32> to vector<16x128xf32>
    %c1_i32_94 = arith.constant 1 : i32
    %425 = tpu.dynamic_rotate %421 by %c1_i32_94 dim 1 : vector<16x128xf32>, i32 -> vector<16x128xf32>
    %426 = arith.addf %425, %7 : vector<16x128xf32>
    %c2_i32_95 = arith.constant 2 : i32
    %427 = tpu.dynamic_rotate %421 by %c2_i32_95 dim 1 : vector<16x128xf32>, i32 -> vector<16x128xf32>
    %428 = arith.addf %427, %8 : vector<16x128xf32>
    %429 = arith.maximumf %426, %428 : vector<16x128xf32>
    %430 = arith.maximumf %421, %429 : vector<16x128xf32>
    %431 = arith.cmpf oge, %421, %429 : vector<16x128xf32>
    %432 = arith.select %431, %426, %421 : vector<16x128xi1>, vector<16x128xf32>
    %433 = arith.subf %432, %430 : vector<16x128xf32>
    %434 = arith.cmpf oge, %426, %428 : vector<16x128xf32>
    %435 = arith.ori %431, %434 : vector<16x128xi1>
    %436 = arith.select %435, %428, %426 : vector<16x128xi1>, vector<16x128xf32>
    %437 = arith.subf %436, %430 : vector<16x128xf32>
    %438 = math.exp %433 : vector<16x128xf32>
    %cst_96 = arith.constant 1.000000e+00 : f32
    %439 = vector.broadcast %cst_96 : f32 to vector<16x128xf32>
    %440 = arith.addf %439, %438 : vector<16x128xf32>
    %441 = math.exp %437 : vector<16x128xf32>
    %442 = arith.addf %440, %441 : vector<16x128xf32>
    %443 = math.log %442 : vector<16x128xf32>
    %444 = arith.addf %430, %443 : vector<16x128xf32>
    %445 = arith.addf %444, %424 : vector<16x128xf32>
    %446 = vector.broadcast %422 : i32 to vector<16x1xi32>
    %447 = arith.cmpi slt, %446, %9 : vector<16x1xi32>
    %448 = vector.shape_cast %447 : vector<16x1xi1> to vector<16x1xi1>
    %449 = vector.broadcast %448 : vector<16x1xi1> to vector<16x128xi1>
    %450 = arith.select %449, %445, %421 : vector<16x128xi1>, vector<16x128xf32>
    %c15_i32 = arith.constant 15 : i32
    %451 = arith.addi %11, %c15_i32 : i32
    %c0_97 = arith.constant 0 : index
    %c15 = arith.constant 15 : index
    %c0_98 = arith.constant 0 : index
    %452 = vector.load %arg11[%c0_97, %c15, %c0_98] : memref<16x32x128xf32, #tpu.memory_space<vmem>>, vector<16x1x128xf32>
    %453 = vector.shape_cast %452 : vector<16x1x128xf32> to vector<16x128xf32>
    %c1_i32_99 = arith.constant 1 : i32
    %454 = tpu.dynamic_rotate %450 by %c1_i32_99 dim 1 : vector<16x128xf32>, i32 -> vector<16x128xf32>
    %455 = arith.addf %454, %7 : vector<16x128xf32>
    %c2_i32_100 = arith.constant 2 : i32
    %456 = tpu.dynamic_rotate %450 by %c2_i32_100 dim 1 : vector<16x128xf32>, i32 -> vector<16x128xf32>
    %457 = arith.addf %456, %8 : vector<16x128xf32>
    %458 = arith.maximumf %455, %457 : vector<16x128xf32>
    %459 = arith.maximumf %450, %458 : vector<16x128xf32>
    %460 = arith.cmpf oge, %450, %458 : vector<16x128xf32>
    %461 = arith.select %460, %455, %450 : vector<16x128xi1>, vector<16x128xf32>
    %462 = arith.subf %461, %459 : vector<16x128xf32>
    %463 = arith.cmpf oge, %455, %457 : vector<16x128xf32>
    %464 = arith.ori %460, %463 : vector<16x128xi1>
    %465 = arith.select %464, %457, %455 : vector<16x128xi1>, vector<16x128xf32>
    %466 = arith.subf %465, %459 : vector<16x128xf32>
    %467 = math.exp %462 : vector<16x128xf32>
    %cst_101 = arith.constant 1.000000e+00 : f32
    %468 = vector.broadcast %cst_101 : f32 to vector<16x128xf32>
    %469 = arith.addf %468, %467 : vector<16x128xf32>
    %470 = math.exp %466 : vector<16x128xf32>
    %471 = arith.addf %469, %470 : vector<16x128xf32>
    %472 = math.log %471 : vector<16x128xf32>
    %473 = arith.addf %459, %472 : vector<16x128xf32>
    %474 = arith.addf %473, %453 : vector<16x128xf32>
    %475 = vector.broadcast %451 : i32 to vector<16x1xi32>
    %476 = arith.cmpi slt, %475, %9 : vector<16x1xi32>
    %477 = vector.shape_cast %476 : vector<16x1xi1> to vector<16x1xi1>
    %478 = vector.broadcast %477 : vector<16x1xi1> to vector<16x128xi1>
    %479 = arith.select %478, %474, %450 : vector<16x128xi1>, vector<16x128xf32>
    %c16_i32 = arith.constant 16 : i32
    %480 = arith.addi %11, %c16_i32 : i32
    %c0_102 = arith.constant 0 : index
    %c16 = arith.constant 16 : index
    %c0_103 = arith.constant 0 : index
    %481 = vector.load %arg11[%c0_102, %c16, %c0_103] : memref<16x32x128xf32, #tpu.memory_space<vmem>>, vector<16x1x128xf32>
    %482 = vector.shape_cast %481 : vector<16x1x128xf32> to vector<16x128xf32>
    %c1_i32_104 = arith.constant 1 : i32
    %483 = tpu.dynamic_rotate %479 by %c1_i32_104 dim 1 : vector<16x128xf32>, i32 -> vector<16x128xf32>
    %484 = arith.addf %483, %7 : vector<16x128xf32>
    %c2_i32_105 = arith.constant 2 : i32
    %485 = tpu.dynamic_rotate %479 by %c2_i32_105 dim 1 : vector<16x128xf32>, i32 -> vector<16x128xf32>
    %486 = arith.addf %485, %8 : vector<16x128xf32>
    %487 = arith.maximumf %484, %486 : vector<16x128xf32>
    %488 = arith.maximumf %479, %487 : vector<16x128xf32>
    %489 = arith.cmpf oge, %479, %487 : vector<16x128xf32>
    %490 = arith.select %489, %484, %479 : vector<16x128xi1>, vector<16x128xf32>
    %491 = arith.subf %490, %488 : vector<16x128xf32>
    %492 = arith.cmpf oge, %484, %486 : vector<16x128xf32>
    %493 = arith.ori %489, %492 : vector<16x128xi1>
    %494 = arith.select %493, %486, %484 : vector<16x128xi1>, vector<16x128xf32>
    %495 = arith.subf %494, %488 : vector<16x128xf32>
    %496 = math.exp %491 : vector<16x128xf32>
    %cst_106 = arith.constant 1.000000e+00 : f32
    %497 = vector.broadcast %cst_106 : f32 to vector<16x128xf32>
    %498 = arith.addf %497, %496 : vector<16x128xf32>
    %499 = math.exp %495 : vector<16x128xf32>
    %500 = arith.addf %498, %499 : vector<16x128xf32>
    %501 = math.log %500 : vector<16x128xf32>
    %502 = arith.addf %488, %501 : vector<16x128xf32>
    %503 = arith.addf %502, %482 : vector<16x128xf32>
    %504 = vector.broadcast %480 : i32 to vector<16x1xi32>
    %505 = arith.cmpi slt, %504, %9 : vector<16x1xi32>
    %506 = vector.shape_cast %505 : vector<16x1xi1> to vector<16x1xi1>
    %507 = vector.broadcast %506 : vector<16x1xi1> to vector<16x128xi1>
    %508 = arith.select %507, %503, %479 : vector<16x128xi1>, vector<16x128xf32>
    %c17_i32 = arith.constant 17 : i32
    %509 = arith.addi %11, %c17_i32 : i32
    %c0_107 = arith.constant 0 : index
    %c17 = arith.constant 17 : index
    %c0_108 = arith.constant 0 : index
    %510 = vector.load %arg11[%c0_107, %c17, %c0_108] : memref<16x32x128xf32, #tpu.memory_space<vmem>>, vector<16x1x128xf32>
    %511 = vector.shape_cast %510 : vector<16x1x128xf32> to vector<16x128xf32>
    %c1_i32_109 = arith.constant 1 : i32
    %512 = tpu.dynamic_rotate %508 by %c1_i32_109 dim 1 : vector<16x128xf32>, i32 -> vector<16x128xf32>
    %513 = arith.addf %512, %7 : vector<16x128xf32>
    %c2_i32_110 = arith.constant 2 : i32
    %514 = tpu.dynamic_rotate %508 by %c2_i32_110 dim 1 : vector<16x128xf32>, i32 -> vector<16x128xf32>
    %515 = arith.addf %514, %8 : vector<16x128xf32>
    %516 = arith.maximumf %513, %515 : vector<16x128xf32>
    %517 = arith.maximumf %508, %516 : vector<16x128xf32>
    %518 = arith.cmpf oge, %508, %516 : vector<16x128xf32>
    %519 = arith.select %518, %513, %508 : vector<16x128xi1>, vector<16x128xf32>
    %520 = arith.subf %519, %517 : vector<16x128xf32>
    %521 = arith.cmpf oge, %513, %515 : vector<16x128xf32>
    %522 = arith.ori %518, %521 : vector<16x128xi1>
    %523 = arith.select %522, %515, %513 : vector<16x128xi1>, vector<16x128xf32>
    %524 = arith.subf %523, %517 : vector<16x128xf32>
    %525 = math.exp %520 : vector<16x128xf32>
    %cst_111 = arith.constant 1.000000e+00 : f32
    %526 = vector.broadcast %cst_111 : f32 to vector<16x128xf32>
    %527 = arith.addf %526, %525 : vector<16x128xf32>
    %528 = math.exp %524 : vector<16x128xf32>
    %529 = arith.addf %527, %528 : vector<16x128xf32>
    %530 = math.log %529 : vector<16x128xf32>
    %531 = arith.addf %517, %530 : vector<16x128xf32>
    %532 = arith.addf %531, %511 : vector<16x128xf32>
    %533 = vector.broadcast %509 : i32 to vector<16x1xi32>
    %534 = arith.cmpi slt, %533, %9 : vector<16x1xi32>
    %535 = vector.shape_cast %534 : vector<16x1xi1> to vector<16x1xi1>
    %536 = vector.broadcast %535 : vector<16x1xi1> to vector<16x128xi1>
    %537 = arith.select %536, %532, %508 : vector<16x128xi1>, vector<16x128xf32>
    %c18_i32 = arith.constant 18 : i32
    %538 = arith.addi %11, %c18_i32 : i32
    %c0_112 = arith.constant 0 : index
    %c18 = arith.constant 18 : index
    %c0_113 = arith.constant 0 : index
    %539 = vector.load %arg11[%c0_112, %c18, %c0_113] : memref<16x32x128xf32, #tpu.memory_space<vmem>>, vector<16x1x128xf32>
    %540 = vector.shape_cast %539 : vector<16x1x128xf32> to vector<16x128xf32>
    %c1_i32_114 = arith.constant 1 : i32
    %541 = tpu.dynamic_rotate %537 by %c1_i32_114 dim 1 : vector<16x128xf32>, i32 -> vector<16x128xf32>
    %542 = arith.addf %541, %7 : vector<16x128xf32>
    %c2_i32_115 = arith.constant 2 : i32
    %543 = tpu.dynamic_rotate %537 by %c2_i32_115 dim 1 : vector<16x128xf32>, i32 -> vector<16x128xf32>
    %544 = arith.addf %543, %8 : vector<16x128xf32>
    %545 = arith.maximumf %542, %544 : vector<16x128xf32>
    %546 = arith.maximumf %537, %545 : vector<16x128xf32>
    %547 = arith.cmpf oge, %537, %545 : vector<16x128xf32>
    %548 = arith.select %547, %542, %537 : vector<16x128xi1>, vector<16x128xf32>
    %549 = arith.subf %548, %546 : vector<16x128xf32>
    %550 = arith.cmpf oge, %542, %544 : vector<16x128xf32>
    %551 = arith.ori %547, %550 : vector<16x128xi1>
    %552 = arith.select %551, %544, %542 : vector<16x128xi1>, vector<16x128xf32>
    %553 = arith.subf %552, %546 : vector<16x128xf32>
    %554 = math.exp %549 : vector<16x128xf32>
    %cst_116 = arith.constant 1.000000e+00 : f32
    %555 = vector.broadcast %cst_116 : f32 to vector<16x128xf32>
    %556 = arith.addf %555, %554 : vector<16x128xf32>
    %557 = math.exp %553 : vector<16x128xf32>
    %558 = arith.addf %556, %557 : vector<16x128xf32>
    %559 = math.log %558 : vector<16x128xf32>
    %560 = arith.addf %546, %559 : vector<16x128xf32>
    %561 = arith.addf %560, %540 : vector<16x128xf32>
    %562 = vector.broadcast %538 : i32 to vector<16x1xi32>
    %563 = arith.cmpi slt, %562, %9 : vector<16x1xi32>
    %564 = vector.shape_cast %563 : vector<16x1xi1> to vector<16x1xi1>
    %565 = vector.broadcast %564 : vector<16x1xi1> to vector<16x128xi1>
    %566 = arith.select %565, %561, %537 : vector<16x128xi1>, vector<16x128xf32>
    %c19_i32 = arith.constant 19 : i32
    %567 = arith.addi %11, %c19_i32 : i32
    %c0_117 = arith.constant 0 : index
    %c19 = arith.constant 19 : index
    %c0_118 = arith.constant 0 : index
    %568 = vector.load %arg11[%c0_117, %c19, %c0_118] : memref<16x32x128xf32, #tpu.memory_space<vmem>>, vector<16x1x128xf32>
    %569 = vector.shape_cast %568 : vector<16x1x128xf32> to vector<16x128xf32>
    %c1_i32_119 = arith.constant 1 : i32
    %570 = tpu.dynamic_rotate %566 by %c1_i32_119 dim 1 : vector<16x128xf32>, i32 -> vector<16x128xf32>
    %571 = arith.addf %570, %7 : vector<16x128xf32>
    %c2_i32_120 = arith.constant 2 : i32
    %572 = tpu.dynamic_rotate %566 by %c2_i32_120 dim 1 : vector<16x128xf32>, i32 -> vector<16x128xf32>
    %573 = arith.addf %572, %8 : vector<16x128xf32>
    %574 = arith.maximumf %571, %573 : vector<16x128xf32>
    %575 = arith.maximumf %566, %574 : vector<16x128xf32>
    %576 = arith.cmpf oge, %566, %574 : vector<16x128xf32>
    %577 = arith.select %576, %571, %566 : vector<16x128xi1>, vector<16x128xf32>
    %578 = arith.subf %577, %575 : vector<16x128xf32>
    %579 = arith.cmpf oge, %571, %573 : vector<16x128xf32>
    %580 = arith.ori %576, %579 : vector<16x128xi1>
    %581 = arith.select %580, %573, %571 : vector<16x128xi1>, vector<16x128xf32>
    %582 = arith.subf %581, %575 : vector<16x128xf32>
    %583 = math.exp %578 : vector<16x128xf32>
    %cst_121 = arith.constant 1.000000e+00 : f32
    %584 = vector.broadcast %cst_121 : f32 to vector<16x128xf32>
    %585 = arith.addf %584, %583 : vector<16x128xf32>
    %586 = math.exp %582 : vector<16x128xf32>
    %587 = arith.addf %585, %586 : vector<16x128xf32>
    %588 = math.log %587 : vector<16x128xf32>
    %589 = arith.addf %575, %588 : vector<16x128xf32>
    %590 = arith.addf %589, %569 : vector<16x128xf32>
    %591 = vector.broadcast %567 : i32 to vector<16x1xi32>
    %592 = arith.cmpi slt, %591, %9 : vector<16x1xi32>
    %593 = vector.shape_cast %592 : vector<16x1xi1> to vector<16x1xi1>
    %594 = vector.broadcast %593 : vector<16x1xi1> to vector<16x128xi1>
    %595 = arith.select %594, %590, %566 : vector<16x128xi1>, vector<16x128xf32>
    %c20_i32 = arith.constant 20 : i32
    %596 = arith.addi %11, %c20_i32 : i32
    %c0_122 = arith.constant 0 : index
    %c20 = arith.constant 20 : index
    %c0_123 = arith.constant 0 : index
    %597 = vector.load %arg11[%c0_122, %c20, %c0_123] : memref<16x32x128xf32, #tpu.memory_space<vmem>>, vector<16x1x128xf32>
    %598 = vector.shape_cast %597 : vector<16x1x128xf32> to vector<16x128xf32>
    %c1_i32_124 = arith.constant 1 : i32
    %599 = tpu.dynamic_rotate %595 by %c1_i32_124 dim 1 : vector<16x128xf32>, i32 -> vector<16x128xf32>
    %600 = arith.addf %599, %7 : vector<16x128xf32>
    %c2_i32_125 = arith.constant 2 : i32
    %601 = tpu.dynamic_rotate %595 by %c2_i32_125 dim 1 : vector<16x128xf32>, i32 -> vector<16x128xf32>
    %602 = arith.addf %601, %8 : vector<16x128xf32>
    %603 = arith.maximumf %600, %602 : vector<16x128xf32>
    %604 = arith.maximumf %595, %603 : vector<16x128xf32>
    %605 = arith.cmpf oge, %595, %603 : vector<16x128xf32>
    %606 = arith.select %605, %600, %595 : vector<16x128xi1>, vector<16x128xf32>
    %607 = arith.subf %606, %604 : vector<16x128xf32>
    %608 = arith.cmpf oge, %600, %602 : vector<16x128xf32>
    %609 = arith.ori %605, %608 : vector<16x128xi1>
    %610 = arith.select %609, %602, %600 : vector<16x128xi1>, vector<16x128xf32>
    %611 = arith.subf %610, %604 : vector<16x128xf32>
    %612 = math.exp %607 : vector<16x128xf32>
    %cst_126 = arith.constant 1.000000e+00 : f32
    %613 = vector.broadcast %cst_126 : f32 to vector<16x128xf32>
    %614 = arith.addf %613, %612 : vector<16x128xf32>
    %615 = math.exp %611 : vector<16x128xf32>
    %616 = arith.addf %614, %615 : vector<16x128xf32>
    %617 = math.log %616 : vector<16x128xf32>
    %618 = arith.addf %604, %617 : vector<16x128xf32>
    %619 = arith.addf %618, %598 : vector<16x128xf32>
    %620 = vector.broadcast %596 : i32 to vector<16x1xi32>
    %621 = arith.cmpi slt, %620, %9 : vector<16x1xi32>
    %622 = vector.shape_cast %621 : vector<16x1xi1> to vector<16x1xi1>
    %623 = vector.broadcast %622 : vector<16x1xi1> to vector<16x128xi1>
    %624 = arith.select %623, %619, %595 : vector<16x128xi1>, vector<16x128xf32>
    %c21_i32 = arith.constant 21 : i32
    %625 = arith.addi %11, %c21_i32 : i32
    %c0_127 = arith.constant 0 : index
    %c21 = arith.constant 21 : index
    %c0_128 = arith.constant 0 : index
    %626 = vector.load %arg11[%c0_127, %c21, %c0_128] : memref<16x32x128xf32, #tpu.memory_space<vmem>>, vector<16x1x128xf32>
    %627 = vector.shape_cast %626 : vector<16x1x128xf32> to vector<16x128xf32>
    %c1_i32_129 = arith.constant 1 : i32
    %628 = tpu.dynamic_rotate %624 by %c1_i32_129 dim 1 : vector<16x128xf32>, i32 -> vector<16x128xf32>
    %629 = arith.addf %628, %7 : vector<16x128xf32>
    %c2_i32_130 = arith.constant 2 : i32
    %630 = tpu.dynamic_rotate %624 by %c2_i32_130 dim 1 : vector<16x128xf32>, i32 -> vector<16x128xf32>
    %631 = arith.addf %630, %8 : vector<16x128xf32>
    %632 = arith.maximumf %629, %631 : vector<16x128xf32>
    %633 = arith.maximumf %624, %632 : vector<16x128xf32>
    %634 = arith.cmpf oge, %624, %632 : vector<16x128xf32>
    %635 = arith.select %634, %629, %624 : vector<16x128xi1>, vector<16x128xf32>
    %636 = arith.subf %635, %633 : vector<16x128xf32>
    %637 = arith.cmpf oge, %629, %631 : vector<16x128xf32>
    %638 = arith.ori %634, %637 : vector<16x128xi1>
    %639 = arith.select %638, %631, %629 : vector<16x128xi1>, vector<16x128xf32>
    %640 = arith.subf %639, %633 : vector<16x128xf32>
    %641 = math.exp %636 : vector<16x128xf32>
    %cst_131 = arith.constant 1.000000e+00 : f32
    %642 = vector.broadcast %cst_131 : f32 to vector<16x128xf32>
    %643 = arith.addf %642, %641 : vector<16x128xf32>
    %644 = math.exp %640 : vector<16x128xf32>
    %645 = arith.addf %643, %644 : vector<16x128xf32>
    %646 = math.log %645 : vector<16x128xf32>
    %647 = arith.addf %633, %646 : vector<16x128xf32>
    %648 = arith.addf %647, %627 : vector<16x128xf32>
    %649 = vector.broadcast %625 : i32 to vector<16x1xi32>
    %650 = arith.cmpi slt, %649, %9 : vector<16x1xi32>
    %651 = vector.shape_cast %650 : vector<16x1xi1> to vector<16x1xi1>
    %652 = vector.broadcast %651 : vector<16x1xi1> to vector<16x128xi1>
    %653 = arith.select %652, %648, %624 : vector<16x128xi1>, vector<16x128xf32>
    %c22_i32 = arith.constant 22 : i32
    %654 = arith.addi %11, %c22_i32 : i32
    %c0_132 = arith.constant 0 : index
    %c22 = arith.constant 22 : index
    %c0_133 = arith.constant 0 : index
    %655 = vector.load %arg11[%c0_132, %c22, %c0_133] : memref<16x32x128xf32, #tpu.memory_space<vmem>>, vector<16x1x128xf32>
    %656 = vector.shape_cast %655 : vector<16x1x128xf32> to vector<16x128xf32>
    %c1_i32_134 = arith.constant 1 : i32
    %657 = tpu.dynamic_rotate %653 by %c1_i32_134 dim 1 : vector<16x128xf32>, i32 -> vector<16x128xf32>
    %658 = arith.addf %657, %7 : vector<16x128xf32>
    %c2_i32_135 = arith.constant 2 : i32
    %659 = tpu.dynamic_rotate %653 by %c2_i32_135 dim 1 : vector<16x128xf32>, i32 -> vector<16x128xf32>
    %660 = arith.addf %659, %8 : vector<16x128xf32>
    %661 = arith.maximumf %658, %660 : vector<16x128xf32>
    %662 = arith.maximumf %653, %661 : vector<16x128xf32>
    %663 = arith.cmpf oge, %653, %661 : vector<16x128xf32>
    %664 = arith.select %663, %658, %653 : vector<16x128xi1>, vector<16x128xf32>
    %665 = arith.subf %664, %662 : vector<16x128xf32>
    %666 = arith.cmpf oge, %658, %660 : vector<16x128xf32>
    %667 = arith.ori %663, %666 : vector<16x128xi1>
    %668 = arith.select %667, %660, %658 : vector<16x128xi1>, vector<16x128xf32>
    %669 = arith.subf %668, %662 : vector<16x128xf32>
    %670 = math.exp %665 : vector<16x128xf32>
    %cst_136 = arith.constant 1.000000e+00 : f32
    %671 = vector.broadcast %cst_136 : f32 to vector<16x128xf32>
    %672 = arith.addf %671, %670 : vector<16x128xf32>
    %673 = math.exp %669 : vector<16x128xf32>
    %674 = arith.addf %672, %673 : vector<16x128xf32>
    %675 = math.log %674 : vector<16x128xf32>
    %676 = arith.addf %662, %675 : vector<16x128xf32>
    %677 = arith.addf %676, %656 : vector<16x128xf32>
    %678 = vector.broadcast %654 : i32 to vector<16x1xi32>
    %679 = arith.cmpi slt, %678, %9 : vector<16x1xi32>
    %680 = vector.shape_cast %679 : vector<16x1xi1> to vector<16x1xi1>
    %681 = vector.broadcast %680 : vector<16x1xi1> to vector<16x128xi1>
    %682 = arith.select %681, %677, %653 : vector<16x128xi1>, vector<16x128xf32>
    %c23_i32 = arith.constant 23 : i32
    %683 = arith.addi %11, %c23_i32 : i32
    %c0_137 = arith.constant 0 : index
    %c23 = arith.constant 23 : index
    %c0_138 = arith.constant 0 : index
    %684 = vector.load %arg11[%c0_137, %c23, %c0_138] : memref<16x32x128xf32, #tpu.memory_space<vmem>>, vector<16x1x128xf32>
    %685 = vector.shape_cast %684 : vector<16x1x128xf32> to vector<16x128xf32>
    %c1_i32_139 = arith.constant 1 : i32
    %686 = tpu.dynamic_rotate %682 by %c1_i32_139 dim 1 : vector<16x128xf32>, i32 -> vector<16x128xf32>
    %687 = arith.addf %686, %7 : vector<16x128xf32>
    %c2_i32_140 = arith.constant 2 : i32
    %688 = tpu.dynamic_rotate %682 by %c2_i32_140 dim 1 : vector<16x128xf32>, i32 -> vector<16x128xf32>
    %689 = arith.addf %688, %8 : vector<16x128xf32>
    %690 = arith.maximumf %687, %689 : vector<16x128xf32>
    %691 = arith.maximumf %682, %690 : vector<16x128xf32>
    %692 = arith.cmpf oge, %682, %690 : vector<16x128xf32>
    %693 = arith.select %692, %687, %682 : vector<16x128xi1>, vector<16x128xf32>
    %694 = arith.subf %693, %691 : vector<16x128xf32>
    %695 = arith.cmpf oge, %687, %689 : vector<16x128xf32>
    %696 = arith.ori %692, %695 : vector<16x128xi1>
    %697 = arith.select %696, %689, %687 : vector<16x128xi1>, vector<16x128xf32>
    %698 = arith.subf %697, %691 : vector<16x128xf32>
    %699 = math.exp %694 : vector<16x128xf32>
    %cst_141 = arith.constant 1.000000e+00 : f32
    %700 = vector.broadcast %cst_141 : f32 to vector<16x128xf32>
    %701 = arith.addf %700, %699 : vector<16x128xf32>
    %702 = math.exp %698 : vector<16x128xf32>
    %703 = arith.addf %701, %702 : vector<16x128xf32>
    %704 = math.log %703 : vector<16x128xf32>
    %705 = arith.addf %691, %704 : vector<16x128xf32>
    %706 = arith.addf %705, %685 : vector<16x128xf32>
    %707 = vector.broadcast %683 : i32 to vector<16x1xi32>
    %708 = arith.cmpi slt, %707, %9 : vector<16x1xi32>
    %709 = vector.shape_cast %708 : vector<16x1xi1> to vector<16x1xi1>
    %710 = vector.broadcast %709 : vector<16x1xi1> to vector<16x128xi1>
    %711 = arith.select %710, %706, %682 : vector<16x128xi1>, vector<16x128xf32>
    %c24_i32 = arith.constant 24 : i32
    %712 = arith.addi %11, %c24_i32 : i32
    %c0_142 = arith.constant 0 : index
    %c24 = arith.constant 24 : index
    %c0_143 = arith.constant 0 : index
    %713 = vector.load %arg11[%c0_142, %c24, %c0_143] : memref<16x32x128xf32, #tpu.memory_space<vmem>>, vector<16x1x128xf32>
    %714 = vector.shape_cast %713 : vector<16x1x128xf32> to vector<16x128xf32>
    %c1_i32_144 = arith.constant 1 : i32
    %715 = tpu.dynamic_rotate %711 by %c1_i32_144 dim 1 : vector<16x128xf32>, i32 -> vector<16x128xf32>
    %716 = arith.addf %715, %7 : vector<16x128xf32>
    %c2_i32_145 = arith.constant 2 : i32
    %717 = tpu.dynamic_rotate %711 by %c2_i32_145 dim 1 : vector<16x128xf32>, i32 -> vector<16x128xf32>
    %718 = arith.addf %717, %8 : vector<16x128xf32>
    %719 = arith.maximumf %716, %718 : vector<16x128xf32>
    %720 = arith.maximumf %711, %719 : vector<16x128xf32>
    %721 = arith.cmpf oge, %711, %719 : vector<16x128xf32>
    %722 = arith.select %721, %716, %711 : vector<16x128xi1>, vector<16x128xf32>
    %723 = arith.subf %722, %720 : vector<16x128xf32>
    %724 = arith.cmpf oge, %716, %718 : vector<16x128xf32>
    %725 = arith.ori %721, %724 : vector<16x128xi1>
    %726 = arith.select %725, %718, %716 : vector<16x128xi1>, vector<16x128xf32>
    %727 = arith.subf %726, %720 : vector<16x128xf32>
    %728 = math.exp %723 : vector<16x128xf32>
    %cst_146 = arith.constant 1.000000e+00 : f32
    %729 = vector.broadcast %cst_146 : f32 to vector<16x128xf32>
    %730 = arith.addf %729, %728 : vector<16x128xf32>
    %731 = math.exp %727 : vector<16x128xf32>
    %732 = arith.addf %730, %731 : vector<16x128xf32>
    %733 = math.log %732 : vector<16x128xf32>
    %734 = arith.addf %720, %733 : vector<16x128xf32>
    %735 = arith.addf %734, %714 : vector<16x128xf32>
    %736 = vector.broadcast %712 : i32 to vector<16x1xi32>
    %737 = arith.cmpi slt, %736, %9 : vector<16x1xi32>
    %738 = vector.shape_cast %737 : vector<16x1xi1> to vector<16x1xi1>
    %739 = vector.broadcast %738 : vector<16x1xi1> to vector<16x128xi1>
    %740 = arith.select %739, %735, %711 : vector<16x128xi1>, vector<16x128xf32>
    %c25_i32 = arith.constant 25 : i32
    %741 = arith.addi %11, %c25_i32 : i32
    %c0_147 = arith.constant 0 : index
    %c25 = arith.constant 25 : index
    %c0_148 = arith.constant 0 : index
    %742 = vector.load %arg11[%c0_147, %c25, %c0_148] : memref<16x32x128xf32, #tpu.memory_space<vmem>>, vector<16x1x128xf32>
    %743 = vector.shape_cast %742 : vector<16x1x128xf32> to vector<16x128xf32>
    %c1_i32_149 = arith.constant 1 : i32
    %744 = tpu.dynamic_rotate %740 by %c1_i32_149 dim 1 : vector<16x128xf32>, i32 -> vector<16x128xf32>
    %745 = arith.addf %744, %7 : vector<16x128xf32>
    %c2_i32_150 = arith.constant 2 : i32
    %746 = tpu.dynamic_rotate %740 by %c2_i32_150 dim 1 : vector<16x128xf32>, i32 -> vector<16x128xf32>
    %747 = arith.addf %746, %8 : vector<16x128xf32>
    %748 = arith.maximumf %745, %747 : vector<16x128xf32>
    %749 = arith.maximumf %740, %748 : vector<16x128xf32>
    %750 = arith.cmpf oge, %740, %748 : vector<16x128xf32>
    %751 = arith.select %750, %745, %740 : vector<16x128xi1>, vector<16x128xf32>
    %752 = arith.subf %751, %749 : vector<16x128xf32>
    %753 = arith.cmpf oge, %745, %747 : vector<16x128xf32>
    %754 = arith.ori %750, %753 : vector<16x128xi1>
    %755 = arith.select %754, %747, %745 : vector<16x128xi1>, vector<16x128xf32>
    %756 = arith.subf %755, %749 : vector<16x128xf32>
    %757 = math.exp %752 : vector<16x128xf32>
    %cst_151 = arith.constant 1.000000e+00 : f32
    %758 = vector.broadcast %cst_151 : f32 to vector<16x128xf32>
    %759 = arith.addf %758, %757 : vector<16x128xf32>
    %760 = math.exp %756 : vector<16x128xf32>
    %761 = arith.addf %759, %760 : vector<16x128xf32>
    %762 = math.log %761 : vector<16x128xf32>
    %763 = arith.addf %749, %762 : vector<16x128xf32>
    %764 = arith.addf %763, %743 : vector<16x128xf32>
    %765 = vector.broadcast %741 : i32 to vector<16x1xi32>
    %766 = arith.cmpi slt, %765, %9 : vector<16x1xi32>
    %767 = vector.shape_cast %766 : vector<16x1xi1> to vector<16x1xi1>
    %768 = vector.broadcast %767 : vector<16x1xi1> to vector<16x128xi1>
    %769 = arith.select %768, %764, %740 : vector<16x128xi1>, vector<16x128xf32>
    %c26_i32 = arith.constant 26 : i32
    %770 = arith.addi %11, %c26_i32 : i32
    %c0_152 = arith.constant 0 : index
    %c26 = arith.constant 26 : index
    %c0_153 = arith.constant 0 : index
    %771 = vector.load %arg11[%c0_152, %c26, %c0_153] : memref<16x32x128xf32, #tpu.memory_space<vmem>>, vector<16x1x128xf32>
    %772 = vector.shape_cast %771 : vector<16x1x128xf32> to vector<16x128xf32>
    %c1_i32_154 = arith.constant 1 : i32
    %773 = tpu.dynamic_rotate %769 by %c1_i32_154 dim 1 : vector<16x128xf32>, i32 -> vector<16x128xf32>
    %774 = arith.addf %773, %7 : vector<16x128xf32>
    %c2_i32_155 = arith.constant 2 : i32
    %775 = tpu.dynamic_rotate %769 by %c2_i32_155 dim 1 : vector<16x128xf32>, i32 -> vector<16x128xf32>
    %776 = arith.addf %775, %8 : vector<16x128xf32>
    %777 = arith.maximumf %774, %776 : vector<16x128xf32>
    %778 = arith.maximumf %769, %777 : vector<16x128xf32>
    %779 = arith.cmpf oge, %769, %777 : vector<16x128xf32>
    %780 = arith.select %779, %774, %769 : vector<16x128xi1>, vector<16x128xf32>
    %781 = arith.subf %780, %778 : vector<16x128xf32>
    %782 = arith.cmpf oge, %774, %776 : vector<16x128xf32>
    %783 = arith.ori %779, %782 : vector<16x128xi1>
    %784 = arith.select %783, %776, %774 : vector<16x128xi1>, vector<16x128xf32>
    %785 = arith.subf %784, %778 : vector<16x128xf32>
    %786 = math.exp %781 : vector<16x128xf32>
    %cst_156 = arith.constant 1.000000e+00 : f32
    %787 = vector.broadcast %cst_156 : f32 to vector<16x128xf32>
    %788 = arith.addf %787, %786 : vector<16x128xf32>
    %789 = math.exp %785 : vector<16x128xf32>
    %790 = arith.addf %788, %789 : vector<16x128xf32>
    %791 = math.log %790 : vector<16x128xf32>
    %792 = arith.addf %778, %791 : vector<16x128xf32>
    %793 = arith.addf %792, %772 : vector<16x128xf32>
    %794 = vector.broadcast %770 : i32 to vector<16x1xi32>
    %795 = arith.cmpi slt, %794, %9 : vector<16x1xi32>
    %796 = vector.shape_cast %795 : vector<16x1xi1> to vector<16x1xi1>
    %797 = vector.broadcast %796 : vector<16x1xi1> to vector<16x128xi1>
    %798 = arith.select %797, %793, %769 : vector<16x128xi1>, vector<16x128xf32>
    %c27_i32 = arith.constant 27 : i32
    %799 = arith.addi %11, %c27_i32 : i32
    %c0_157 = arith.constant 0 : index
    %c27 = arith.constant 27 : index
    %c0_158 = arith.constant 0 : index
    %800 = vector.load %arg11[%c0_157, %c27, %c0_158] : memref<16x32x128xf32, #tpu.memory_space<vmem>>, vector<16x1x128xf32>
    %801 = vector.shape_cast %800 : vector<16x1x128xf32> to vector<16x128xf32>
    %c1_i32_159 = arith.constant 1 : i32
    %802 = tpu.dynamic_rotate %798 by %c1_i32_159 dim 1 : vector<16x128xf32>, i32 -> vector<16x128xf32>
    %803 = arith.addf %802, %7 : vector<16x128xf32>
    %c2_i32_160 = arith.constant 2 : i32
    %804 = tpu.dynamic_rotate %798 by %c2_i32_160 dim 1 : vector<16x128xf32>, i32 -> vector<16x128xf32>
    %805 = arith.addf %804, %8 : vector<16x128xf32>
    %806 = arith.maximumf %803, %805 : vector<16x128xf32>
    %807 = arith.maximumf %798, %806 : vector<16x128xf32>
    %808 = arith.cmpf oge, %798, %806 : vector<16x128xf32>
    %809 = arith.select %808, %803, %798 : vector<16x128xi1>, vector<16x128xf32>
    %810 = arith.subf %809, %807 : vector<16x128xf32>
    %811 = arith.cmpf oge, %803, %805 : vector<16x128xf32>
    %812 = arith.ori %808, %811 : vector<16x128xi1>
    %813 = arith.select %812, %805, %803 : vector<16x128xi1>, vector<16x128xf32>
    %814 = arith.subf %813, %807 : vector<16x128xf32>
    %815 = math.exp %810 : vector<16x128xf32>
    %cst_161 = arith.constant 1.000000e+00 : f32
    %816 = vector.broadcast %cst_161 : f32 to vector<16x128xf32>
    %817 = arith.addf %816, %815 : vector<16x128xf32>
    %818 = math.exp %814 : vector<16x128xf32>
    %819 = arith.addf %817, %818 : vector<16x128xf32>
    %820 = math.log %819 : vector<16x128xf32>
    %821 = arith.addf %807, %820 : vector<16x128xf32>
    %822 = arith.addf %821, %801 : vector<16x128xf32>
    %823 = vector.broadcast %799 : i32 to vector<16x1xi32>
    %824 = arith.cmpi slt, %823, %9 : vector<16x1xi32>
    %825 = vector.shape_cast %824 : vector<16x1xi1> to vector<16x1xi1>
    %826 = vector.broadcast %825 : vector<16x1xi1> to vector<16x128xi1>
    %827 = arith.select %826, %822, %798 : vector<16x128xi1>, vector<16x128xf32>
    %c28_i32 = arith.constant 28 : i32
    %828 = arith.addi %11, %c28_i32 : i32
    %c0_162 = arith.constant 0 : index
    %c28 = arith.constant 28 : index
    %c0_163 = arith.constant 0 : index
    %829 = vector.load %arg11[%c0_162, %c28, %c0_163] : memref<16x32x128xf32, #tpu.memory_space<vmem>>, vector<16x1x128xf32>
    %830 = vector.shape_cast %829 : vector<16x1x128xf32> to vector<16x128xf32>
    %c1_i32_164 = arith.constant 1 : i32
    %831 = tpu.dynamic_rotate %827 by %c1_i32_164 dim 1 : vector<16x128xf32>, i32 -> vector<16x128xf32>
    %832 = arith.addf %831, %7 : vector<16x128xf32>
    %c2_i32_165 = arith.constant 2 : i32
    %833 = tpu.dynamic_rotate %827 by %c2_i32_165 dim 1 : vector<16x128xf32>, i32 -> vector<16x128xf32>
    %834 = arith.addf %833, %8 : vector<16x128xf32>
    %835 = arith.maximumf %832, %834 : vector<16x128xf32>
    %836 = arith.maximumf %827, %835 : vector<16x128xf32>
    %837 = arith.cmpf oge, %827, %835 : vector<16x128xf32>
    %838 = arith.select %837, %832, %827 : vector<16x128xi1>, vector<16x128xf32>
    %839 = arith.subf %838, %836 : vector<16x128xf32>
    %840 = arith.cmpf oge, %832, %834 : vector<16x128xf32>
    %841 = arith.ori %837, %840 : vector<16x128xi1>
    %842 = arith.select %841, %834, %832 : vector<16x128xi1>, vector<16x128xf32>
    %843 = arith.subf %842, %836 : vector<16x128xf32>
    %844 = math.exp %839 : vector<16x128xf32>
    %cst_166 = arith.constant 1.000000e+00 : f32
    %845 = vector.broadcast %cst_166 : f32 to vector<16x128xf32>
    %846 = arith.addf %845, %844 : vector<16x128xf32>
    %847 = math.exp %843 : vector<16x128xf32>
    %848 = arith.addf %846, %847 : vector<16x128xf32>
    %849 = math.log %848 : vector<16x128xf32>
    %850 = arith.addf %836, %849 : vector<16x128xf32>
    %851 = arith.addf %850, %830 : vector<16x128xf32>
    %852 = vector.broadcast %828 : i32 to vector<16x1xi32>
    %853 = arith.cmpi slt, %852, %9 : vector<16x1xi32>
    %854 = vector.shape_cast %853 : vector<16x1xi1> to vector<16x1xi1>
    %855 = vector.broadcast %854 : vector<16x1xi1> to vector<16x128xi1>
    %856 = arith.select %855, %851, %827 : vector<16x128xi1>, vector<16x128xf32>
    %c29_i32 = arith.constant 29 : i32
    %857 = arith.addi %11, %c29_i32 : i32
    %c0_167 = arith.constant 0 : index
    %c29 = arith.constant 29 : index
    %c0_168 = arith.constant 0 : index
    %858 = vector.load %arg11[%c0_167, %c29, %c0_168] : memref<16x32x128xf32, #tpu.memory_space<vmem>>, vector<16x1x128xf32>
    %859 = vector.shape_cast %858 : vector<16x1x128xf32> to vector<16x128xf32>
    %c1_i32_169 = arith.constant 1 : i32
    %860 = tpu.dynamic_rotate %856 by %c1_i32_169 dim 1 : vector<16x128xf32>, i32 -> vector<16x128xf32>
    %861 = arith.addf %860, %7 : vector<16x128xf32>
    %c2_i32_170 = arith.constant 2 : i32
    %862 = tpu.dynamic_rotate %856 by %c2_i32_170 dim 1 : vector<16x128xf32>, i32 -> vector<16x128xf32>
    %863 = arith.addf %862, %8 : vector<16x128xf32>
    %864 = arith.maximumf %861, %863 : vector<16x128xf32>
    %865 = arith.maximumf %856, %864 : vector<16x128xf32>
    %866 = arith.cmpf oge, %856, %864 : vector<16x128xf32>
    %867 = arith.select %866, %861, %856 : vector<16x128xi1>, vector<16x128xf32>
    %868 = arith.subf %867, %865 : vector<16x128xf32>
    %869 = arith.cmpf oge, %861, %863 : vector<16x128xf32>
    %870 = arith.ori %866, %869 : vector<16x128xi1>
    %871 = arith.select %870, %863, %861 : vector<16x128xi1>, vector<16x128xf32>
    %872 = arith.subf %871, %865 : vector<16x128xf32>
    %873 = math.exp %868 : vector<16x128xf32>
    %cst_171 = arith.constant 1.000000e+00 : f32
    %874 = vector.broadcast %cst_171 : f32 to vector<16x128xf32>
    %875 = arith.addf %874, %873 : vector<16x128xf32>
    %876 = math.exp %872 : vector<16x128xf32>
    %877 = arith.addf %875, %876 : vector<16x128xf32>
    %878 = math.log %877 : vector<16x128xf32>
    %879 = arith.addf %865, %878 : vector<16x128xf32>
    %880 = arith.addf %879, %859 : vector<16x128xf32>
    %881 = vector.broadcast %857 : i32 to vector<16x1xi32>
    %882 = arith.cmpi slt, %881, %9 : vector<16x1xi32>
    %883 = vector.shape_cast %882 : vector<16x1xi1> to vector<16x1xi1>
    %884 = vector.broadcast %883 : vector<16x1xi1> to vector<16x128xi1>
    %885 = arith.select %884, %880, %856 : vector<16x128xi1>, vector<16x128xf32>
    %c30_i32 = arith.constant 30 : i32
    %886 = arith.addi %11, %c30_i32 : i32
    %c0_172 = arith.constant 0 : index
    %c30 = arith.constant 30 : index
    %c0_173 = arith.constant 0 : index
    %887 = vector.load %arg11[%c0_172, %c30, %c0_173] : memref<16x32x128xf32, #tpu.memory_space<vmem>>, vector<16x1x128xf32>
    %888 = vector.shape_cast %887 : vector<16x1x128xf32> to vector<16x128xf32>
    %c1_i32_174 = arith.constant 1 : i32
    %889 = tpu.dynamic_rotate %885 by %c1_i32_174 dim 1 : vector<16x128xf32>, i32 -> vector<16x128xf32>
    %890 = arith.addf %889, %7 : vector<16x128xf32>
    %c2_i32_175 = arith.constant 2 : i32
    %891 = tpu.dynamic_rotate %885 by %c2_i32_175 dim 1 : vector<16x128xf32>, i32 -> vector<16x128xf32>
    %892 = arith.addf %891, %8 : vector<16x128xf32>
    %893 = arith.maximumf %890, %892 : vector<16x128xf32>
    %894 = arith.maximumf %885, %893 : vector<16x128xf32>
    %895 = arith.cmpf oge, %885, %893 : vector<16x128xf32>
    %896 = arith.select %895, %890, %885 : vector<16x128xi1>, vector<16x128xf32>
    %897 = arith.subf %896, %894 : vector<16x128xf32>
    %898 = arith.cmpf oge, %890, %892 : vector<16x128xf32>
    %899 = arith.ori %895, %898 : vector<16x128xi1>
    %900 = arith.select %899, %892, %890 : vector<16x128xi1>, vector<16x128xf32>
    %901 = arith.subf %900, %894 : vector<16x128xf32>
    %902 = math.exp %897 : vector<16x128xf32>
    %cst_176 = arith.constant 1.000000e+00 : f32
    %903 = vector.broadcast %cst_176 : f32 to vector<16x128xf32>
    %904 = arith.addf %903, %902 : vector<16x128xf32>
    %905 = math.exp %901 : vector<16x128xf32>
    %906 = arith.addf %904, %905 : vector<16x128xf32>
    %907 = math.log %906 : vector<16x128xf32>
    %908 = arith.addf %894, %907 : vector<16x128xf32>
    %909 = arith.addf %908, %888 : vector<16x128xf32>
    %910 = vector.broadcast %886 : i32 to vector<16x1xi32>
    %911 = arith.cmpi slt, %910, %9 : vector<16x1xi32>
    %912 = vector.shape_cast %911 : vector<16x1xi1> to vector<16x1xi1>
    %913 = vector.broadcast %912 : vector<16x1xi1> to vector<16x128xi1>
    %914 = arith.select %913, %909, %885 : vector<16x128xi1>, vector<16x128xf32>
    %c31_i32 = arith.constant 31 : i32
    %915 = arith.addi %11, %c31_i32 : i32
    %c0_177 = arith.constant 0 : index
    %c31 = arith.constant 31 : index
    %c0_178 = arith.constant 0 : index
    %916 = vector.load %arg11[%c0_177, %c31, %c0_178] : memref<16x32x128xf32, #tpu.memory_space<vmem>>, vector<16x1x128xf32>
    %917 = vector.shape_cast %916 : vector<16x1x128xf32> to vector<16x128xf32>
    %c1_i32_179 = arith.constant 1 : i32
    %918 = tpu.dynamic_rotate %914 by %c1_i32_179 dim 1 : vector<16x128xf32>, i32 -> vector<16x128xf32>
    %919 = arith.addf %918, %7 : vector<16x128xf32>
    %c2_i32_180 = arith.constant 2 : i32
    %920 = tpu.dynamic_rotate %914 by %c2_i32_180 dim 1 : vector<16x128xf32>, i32 -> vector<16x128xf32>
    %921 = arith.addf %920, %8 : vector<16x128xf32>
    %922 = arith.maximumf %919, %921 : vector<16x128xf32>
    %923 = arith.maximumf %914, %922 : vector<16x128xf32>
    %924 = arith.cmpf oge, %914, %922 : vector<16x128xf32>
    %925 = arith.select %924, %919, %914 : vector<16x128xi1>, vector<16x128xf32>
    %926 = arith.subf %925, %923 : vector<16x128xf32>
    %927 = arith.cmpf oge, %919, %921 : vector<16x128xf32>
    %928 = arith.ori %924, %927 : vector<16x128xi1>
    %929 = arith.select %928, %921, %919 : vector<16x128xi1>, vector<16x128xf32>
    %930 = arith.subf %929, %923 : vector<16x128xf32>
    %931 = math.exp %926 : vector<16x128xf32>
    %cst_181 = arith.constant 1.000000e+00 : f32
    %932 = vector.broadcast %cst_181 : f32 to vector<16x128xf32>
    %933 = arith.addf %932, %931 : vector<16x128xf32>
    %934 = math.exp %930 : vector<16x128xf32>
    %935 = arith.addf %933, %934 : vector<16x128xf32>
    %936 = math.log %935 : vector<16x128xf32>
    %937 = arith.addf %923, %936 : vector<16x128xf32>
    %938 = arith.addf %937, %917 : vector<16x128xf32>
    %939 = vector.broadcast %915 : i32 to vector<16x1xi32>
    %940 = arith.cmpi slt, %939, %9 : vector<16x1xi32>
    %941 = vector.shape_cast %940 : vector<16x1xi1> to vector<16x1xi1>
    %942 = vector.broadcast %941 : vector<16x1xi1> to vector<16x128xi1>
    %943 = arith.select %942, %938, %914 : vector<16x128xi1>, vector<16x128xf32>
    %c0_182 = arith.constant 0 : index
    %c0_183 = arith.constant 0 : index
    %944 = vector.load %arg10[%c0_182, %c0_183] : memref<16x128xf32, #tpu.memory_space<vmem>>, vector<16x128xf32>
    tpu.vector_store %arg10[%c0_182, %c0_183], %943 {strides = array<i32>} : memref<16x128xf32, #tpu.memory_space<vmem>>, vector<16x128xf32>,
    %c1_i32_184 = arith.constant 1 : i32
    %945 = arith.cmpi eq, %arg1, %c1_i32_184 : i32
    %946 = arith.extui %945 : i1 to i32
    %c0_i32_185 = arith.constant 0 : i32
    %947 = arith.cmpi ne, %946, %c0_i32_185 : i32
    scf.if %947 {
      %c0_186 = arith.constant 0 : index
      %c0_187 = arith.constant 0 : index
      %948 = vector.load %arg7[%c0_186, %c0_187] : memref<16x128xf32, #tpu.memory_space<vmem>>, vector<16x128xf32>
      %949 = arith.addf %943, %948 : vector<16x128xf32>
      %cst_188 = arith.constant dense<0xFF800000> : vector<16xf32>
      %950 = vector.multi_reduction <maximumf>, %949, %cst_188 [1] : vector<16x128xf32> to vector<16xf32>
      %951 = vector.shape_cast %950 : vector<16xf32> to vector<16x1xf32>
      %952 = vector.broadcast %951 : vector<16x1xf32> to vector<16x128xf32>
      %953 = arith.subf %949, %952 : vector<16x128xf32>
      %954 = math.exp %953 : vector<16x128xf32>
      %cst_189 = arith.constant dense<0.000000e+00> : vector<16xf32>
      %955 = vector.multi_reduction <add>, %954, %cst_189 [1] : vector<16x128xf32> to vector<16xf32>
      %956 = vector.shape_cast %955 : vector<16xf32> to vector<16x1xf32>
      %957 = math.log %956 : vector<16x1xf32>
      %958 = arith.addf %951, %957 : vector<16x1xf32>
      %cst_190 = arith.constant 0.000000e+00 : f32
      %959 = vector.broadcast %cst_190 : f32 to vector<16x1xf32>
      %960 = arith.subf %959, %958 : vector<16x1xf32>
      %961 = vector.shape_cast %960 : vector<16x1xf32> to vector<16x1xf32>
      %962 = vector.broadcast %961 : vector<16x1xf32> to vector<16x128xf32>
      %c0_191 = arith.constant 0 : index
      %c0_192 = arith.constant 0 : index
      %963 = vector.load %arg9[%c0_191, %c0_192] : memref<16x128xf32, #tpu.memory_space<vmem>>, vector<16x128xf32>
      tpu.vector_store %arg9[%c0_191, %c0_192], %962 {strides = array<i32>} : memref<16x128xf32, #tpu.memory_space<vmem>>, vector<16x128xf32>,
    } else {
    }
    return
  }
  func.func @transform_0(%arg0: i32, %arg1: i32) -> (i32, i32, i32) {
    %c0_i32 = arith.constant 0 : i32
    %c0_i32_0 = arith.constant 0 : i32
    return %arg0, %arg1, %c0_i32 : i32, i32, i32
  }
  func.func @transform_1(%arg0: i32, %arg1: i32) -> (i32, i32, i32) {
    %c0_i32 = arith.constant 0 : i32
    %c0_i32_0 = arith.constant 0 : i32
    %c0_i32_1 = arith.constant 0 : i32
    return %arg0, %c0_i32, %c0_i32_0 : i32, i32, i32
  }
  func.func @transform_2(%arg0: i32, %arg1: i32) -> (i32, i32) {
    %c0_i32 = arith.constant 0 : i32
    %c0_i32_0 = arith.constant 0 : i32
    return %arg0, %c0_i32 : i32, i32
  }
  func.func @transform_3(%arg0: i32, %arg1: i32) -> (i32, i32) {
    %c0_i32 = arith.constant 0 : i32
    %c0_i32_0 = arith.constant 0 : i32
    return %arg0, %c0_i32 : i32, i32
  }
  func.func @transform_4(%arg0: i32, %arg1: i32) -> (i32, i32) {
    %c0_i32 = arith.constant 0 : i32
    %c0_i32_0 = arith.constant 0 : i32
    return %arg0, %c0_i32 : i32, i32
  }
  func.func @transform_5(%arg0: i32, %arg1: i32) -> (i32, i32) {
    %c0_i32 = arith.constant 0 : i32
    %c0_i32_0 = arith.constant 0 : i32
    return %arg0, %c0_i32 : i32, i32
  }
  func.func @transform_6(%arg0: i32, %arg1: i32) -> (i32, i32) {
    %c0_i32 = arith.constant 0 : i32
    %c0_i32_0 = arith.constant 0 : i32
    return %arg0, %c0_i32 : i32, i32
  }
  func.func @transform_7(%arg0: i32, %arg1: i32) -> (i32, i32) {
    %c0_i32 = arith.constant 0 : i32
    %c0_i32_0 = arith.constant 0 : i32
    return %arg0, %c0_i32 : i32, i32
  }
}

</mosaic_0001>

<bundles_post_ra>
// kernel: tpu_custom_call.1
= control target key start
LH: loop header
LB: loop body
LE: loop exit
PB: predicated region body
PF: predicated region fallthrough
CT: control target
= control target key end

     0   :  { %s10679_s0 = inlined_call_operand.hbm [shape: bf16[16,64,128], index: 0, kind: input, shape index: {}]   ;;  %s10680_s1 = inlined_call_operand.hbm [shape: bf16[16,128,128], index: 1, kind: input, shape index: {}]   ;;  %s10681_s2 = inlined_call_operand.vmem [shape: f32[16,128], index: 2, kind: input, shape index: {}]   ;;  %s10682_s3 = inlined_call_operand.hbm [shape: f32[16,128], index: 3, kind: input, shape index: {}]   ;;  %s10683_s4 = inlined_call_operand.vmem [shape: f32[16,128], index: 4, kind: input, shape index: {}]   ;;  %s10684_s5 = inlined_call_operand.hbm [shape: f32[16,128], index: 5, kind: input, shape index: {}]   ;;  %s10685_s6 = inlined_call_operand.vmem [shape: s32[16,1], index: 6, kind: input, shape index: {}]   ;;  %s10686_s7 = inlined_call_operand.hbm [shape: f32[16,128], index: 7, kind: output, shape index: {}]  }
   0x1   :  { %10695 = sst [smem:[#allocation22_spill]] %s10680_s1 }
   0x2   :  { %10696 = sst [smem:[#allocation23_spill]] %s10686_s7 }
   0x3   :  { %12 = vsyncpa [#allocation5], 0 }
   0x4   :  { %14 = vsyncpa [#allocation5 + $0x1], 0 }
   0x5   :  { %15 = vsyncpa [#allocation8], 0 }
   0x6   :  { %16 = vsyncpa [#allocation11], 0 }
   0x7   :  { %17 = vsyncpa [#allocation6], 0  ;;  %s8659_s24 = smov 0   ;;  %s8661_s25 = smov 0  }
   0x8   :  { %s8663_s26 = smov 0   ;;  %s8665_s27 = smov 0  }
   0x9   :  { %s8667_s28 = smov 0   ;;  %s8669_s29 = smov 0  }
   0xa LB: > { %s10692_s30 = sadd.s32 4294967295, %s8598_s29   ;;  %s32_s8 = sadd.s32 1, %s8594_s28  ;;  %s8598_s29 = sphi %s8669_s29, %s23_s29   ;;  %s8594_s28 = sphi %s8667_s28, %s10721_s28   ;;  %s8590_s27 = sphi %s8665_s27, %s10720_s27   ;;  %s8586_s26 = sphi %s8663_s26, %s10719_s26   ;;  %s8582_s25 = sphi %s8661_s25, %s10718_s25   ;;  %s8578_s24 = sphi %s8659_s24, %s10717_s24  }
   0xb   : > { %p33_p0 = scmp.ge.s32.totalorder %s32_s8, 2  ;;  %s44_s9 = sadd.s32 1, %s8586_s26 }
   0xc   : > { %p51_p1 = scmp.ne.s32.totalorder %s8586_s26, %s8582_s25  ;;  %p52_p2 = scmp.eq.s32.totalorder %s8598_s29, 0 }
   0xd   : > { %s10723_s8 = smov (%p33_p0, %s32_s8), 0  ;;  %p57_p4 = scmp.ne.s32.totalorder %s8582_s25, %s8578_s24 }
   0xe   : > { %10697 = sst [smem:[#allocation20_spill]] %s10723_s8  ;;  %p8695_p3 = por %p52_p2, %p51_p1 }
   0xf   : > { %s40_s11 = ssub.s32 %s8594_s28, %s10723_s8  ;;  %p8704_p5 = scmp.eq.s32.totalorder %s10692_s30, 0 }
  0x10   : > { %s10698_s10 = scalar_select %p8695_p3, 1, 0 }
  0x11   : > { %s10699_s12 = scalar_select %p8704_p5, 1, 0 }
  0x12   : > { %p42_p6 = scmp.eq.s32.totalorder %s40_s11, 0  ;;  %p7058_p7 = scmp.ge.s32.totalorder %s8598_s29, 1 }
  0x13   : > { %p8711_p8 = por %p8704_p5, %p57_p4  ;;  %p250_p9 = scmp.lt.s32.totalorder %s8598_s29, 3 }
  0x14   : > { %s8717_s14 = scalar_select %p42_p6, %s8586_s26, %s44_s9  }
  0x15   : > { %s10700_s13 = scalar_select %p8711_p8, 1, 0 }
  0x16   : > { %10701 = sst [smem:[#allocation21_spill]] %s8717_s14  ;;  %p8719_p10 = pnand %p7058_p7, %p250_p9 }
  0x17   : > { %s8600_s16 = smov [#allocation7]   ;;  %s8601_s19 = smov [#allocation9]  }
  0x18   : > { %s10702_s15 = scalar_select %p8719_p10, 1, 0 }
  0x19   : > { %p7749_p11 = pneg %p8719_p10  ;;  %s266_s17 = sshll.u32 %s8600_s16, 4  ;;  %s267_s17 = int_to_ptr.vmem [resolvable:$true] %s266_s17 }
  0x1a   : > { %s291_s20 = sshll.u32 %s8601_s19, 4  ;;  %s10704_s1 = sld [smem:[#allocation22_spill]]  ;;  %s8731_s20 = int_to_ptr.vmem [resolvable:$true] %s291_s20 }
  0x1b   : > { %p8727_p12 = pnand %p7749_p11, %p8704_p5 }
  0x1d   : > { %p8741_p0 = pneg %p8727_p12 }
  0x20   : > { %s8426_s23 = scalar_lea.hbm %s10704_s1, 16384 }
  0x21   : > { %p8427_p13 = scmp.ne.s32.totalorder %s10704_s1, %s8426_s23  ;;  %p8433_p4 = scmp.lt.u32.totalorder %s8426_s23, %s10704_s1 }
  0x23   : > { %p8429_p1 = pnand %p8741_p0, %p8427_p13 }
  0x25   : > { %p8430_p2 = pneg %p8429_p1 }
  0x27   : > { %p8435_p6 = pnand %p8433_p4, %p8430_p2 }
  0x29   : > { %8438 = shalt.err (!%p8435_p6)
}
  0x2a   : > { %s8439_s21 = scalar_lea.vmem %s267_s17, 16384  ;;  %p8447_p5 = scmp.lt.s32.totalorder %s267_s17, %s267_s17 }
  0x2b   : > { %p8440_p7 = scmp.ne.s32.totalorder %s267_s17, %s8439_s21  ;;  %p8448_p8 = scmp.lt.s32.totalorder %s8439_s21, %s8439_s21 }
  0x2d   : > { %p8442_p9 = pnand %p8440_p7, %p8741_p0  ;;  %p8449_p10 = por %p8448_p8, %p8447_p5 }
  0x2f   : > { %p8443_p11 = pneg %p8442_p9 }
  0x31   : > { %p8450_p3 = pnand %p8449_p10, %p8443_p11 }
  0x33   : > { %8453 = shalt.err (!%p8450_p3)
}
  0x34   : > { %s8602_s22 = smov 64   ;;  %s8603_s24 = smov 4  }
  0x35   : > { %7752 = dma.hbm_to_vmem [thread:$0]  (!%p8727_p12), %s10704_s1, 16384, %s267_s17, [#allocation8], %s8602_s22, %s8602_s22, %s8603_s24  }
  0x36   : > { %s8454_s30 = scalar_lea.hbm %s10682_s3, 256 }
  0x37   : > { %p8455_p13 = scmp.ne.s32.totalorder %s10682_s3, %s8454_s30  ;;  %p8461_p8 = scmp.lt.u32.totalorder %s8454_s30, %s10682_s3 }
  0x39   : > { %p8457_p5 = pnand %p8455_p13, %p8741_p0 }
  0x3b   : > { %p8458_p3 = pneg %p8457_p5 }
  0x3d   : > { %p8463_p10 = pnand %p8461_p8, %p8458_p3 }
  0x3f   : > { %8466 = shalt.err (!%p8463_p10)
}
  0x40   : > { %s8467_s17 = scalar_lea.vmem %s8731_s20, 256  ;;  %p8475_p6 = scmp.lt.s32.totalorder %s8731_s20, %s8731_s20 }
  0x41   : > { %p8468_p1 = scmp.ne.s32.totalorder %s8731_s20, %s8467_s17  ;;  %p8476_p7 = scmp.lt.s32.totalorder %s8467_s17, %s8467_s17 }
  0x43   : > { %p8470_p2 = pnand %p8468_p1, %p8741_p0  ;;  %p8477_p9 = por %p8476_p7, %p8475_p6 }
  0x45   : > { %p8471_p4 = pneg %p8470_p2 }
  0x47   : > { %p8478_p11 = pnand %p8477_p9, %p8471_p4 }
  0x49   : > { %8481 = shalt.err (!%p8478_p11)
}
  0x4a   : > { %s8604_s8 = smov 128   ;;  %s8605_s7 = smov 8  }
  0x4b   : > { %7755 = dma.hbm_to_vmem [thread:$0]  (!%p8727_p12), %s10682_s3, 256, %s8731_s20, [#allocation8], %s8604_s8, %s8604_s8, %s8605_s7  }
  0x4c   : > { %s8606_s22 = smov [#allocation10]   ;;  %s8482_s16 = scalar_lea.hbm %s10684_s5, 256 }
  0x4d   : > { %s316_s24 = sshll.u32 %s8606_s22, 4  ;;  %p8483_p13 = scmp.ne.s32.totalorder %s10684_s5, %s8482_s16  ;;  %s317_s24 = int_to_ptr.vmem [resolvable:$true] %s316_s24 }
  0x4e   : > { %p8489_p8 = scmp.lt.u32.totalorder %s8482_s16, %s10684_s5 }
  0x4f   : > { %p8485_p5 = pnand %p8483_p13, %p8741_p0 }
  0x51   : > { %p8486_p3 = pneg %p8485_p5 }
  0x53   : > { %p8491_p10 = pnand %p8489_p8, %p8486_p3 }
  0x55   : > { %8494 = shalt.err (!%p8491_p10)
}
  0x56   : > { %s8495_s20 = scalar_lea.vmem %s317_s24, 256  ;;  %p8503_p6 = scmp.lt.s32.totalorder %s317_s24, %s317_s24 }
  0x57   : > { %p8496_p1 = scmp.ne.s32.totalorder %s317_s24, %s8495_s20  ;;  %p8504_p7 = scmp.lt.s32.totalorder %s8495_s20, %s8495_s20 }
  0x59   : > { %p8498_p2 = pnand %p8496_p1, %p8741_p0  ;;  %p8505_p9 = por %p8504_p7, %p8503_p6 }
  0x5b   : > { %p8499_p4 = pneg %p8498_p2 }
  0x5d   : > { %p8506_p11 = pnand %p8505_p9, %p8499_p4 }
  0x5f   : > { %8509 = shalt.err (!%p8506_p11)
}
  0x60   : > { %7758 = dma.hbm_to_vmem [thread:$0]  (!%p8727_p12), %s10684_s5, 256, %s317_s24, [#allocation11], %s8604_s8, %s8604_s8, %s8605_s7  }
  0x61   : > { %p7065_p13 = scmp.ge.s32.totalorder %s8598_s29, 2 }
  0x63   : > { %335 = sbr.rel (%p7065_p13) target bundleno = 120 (0x78), region = 40 }
  0x6a   : > { %s339_s1 = sand.u32 1, %s8586_s26   ;;  %s7243_s22 = sshll.u32 %s8594_s28, 8 }
  0x6b   : > { %s7066_s11 = sshll.u32 %s339_s1, 8  ;;  %p10706_p0 = scmp.ne.s32.totalorder %s10698_s10, 0 }
  0x6c   : > { %s352_s8 = scalar_lea.hbm %s10679_s0, %s7243_s22  ;;  %s343_s24 = scalar_lea.vmem [#allocation4], %s7066_s11 }
  0x6d   : > { %s7730_s18 = scalar_select %p10706_p0, [#allocation0], [#allocation15] }
  0x6e   : > { %s365_s16 = sshll.u32 %s343_s24, 4  ;;  %s8607_s19 = smov 512   ;;  %s366_s16 = int_to_ptr.vmem [resolvable:$true] %s365_s16 }
  0x6f   : > { %s357_s7 = sld [smem:[%s7730_s18]]   ;;  %s8608_s21 = smov 256  }
  0x70   : > { %7731 = sst [smem:[#allocation14]] (%p10706_p0), %s8607_s19  ;;  %s8609_s17 = smov 4  }
  0x71   : > { %7732 = sst [smem:[#allocation14 + $0x1]] (%p10706_p0), %s8608_s21  ;;  %s8610_s20 = smov 64  }
  0x72   : > { %7733 = sst [smem:[#allocation14 + $0x2]] (%p10706_p0), %s8609_s17  ;;  %s340_s11 = scalar_lea.sflag [#allocation5], %s339_s1 }
  0x73   : > { %7734 = sst [smem:[#allocation14 + $0x3]] (%p10706_p0), %s8610_s20  ;;  %s8611_s22 = smov [#allocation13]  }
  0x74   : > { %7735 = sst [smem:[#allocation14 + $0x4]] (%p10706_p0), %s8610_s20 }
  0x75   : > { %s7069_s30 = sshll.u32 %s357_s7, 26  ;;  %7736 = sst [smem:[#allocation14 + $0x5]] (%p10706_p0), %s8609_s17 }
  0x76   : > { %s7070_s14 = sadd.s32 134217728, %s7069_s30 }
  0x77   : > { %7737 = dma.general (%p10706_p0), %s352_s8, 4096, %s366_s16, %s340_s11, %s8611_s22, [#allocation14], %s7070_s14, 0  }
  0x78 PF: > { %p10707_p12 = scmp.ne.s32.totalorder %s10702_s15, 0 }
  0x79   : > { %s392_s18 = sand.u32 (!%p10707_p12), 1, %s8582_s25   ;;  %p10708_p5 = scmp.ne.s32.totalorder (!%p10707_p12), %s10700_s13, 0 }
  0x7a   : > { %390 = sbr.rel (%p10707_p12) target bundleno = 6270 (0x187e), region = 48  ;;  %s7072_s9 = sshll.u32 (!%p10707_p12), %s392_s18, 8 }
  0x7b   : > { %s393_s23 = scalar_lea.sflag (!%p10707_p12), [#allocation5], %s392_s18  ;;  %s8823_s24 = scalar_lea.vmem (!%p10707_p12), [#allocation4], %s7072_s9 }
  0x81   : > { %8561 = dma.done.wait (%p10708_p5), %s393_s23, 4096  }
  0x82   : > { %8563 = vsyncadd (%p10708_p5), %s393_s23, 4294963200  ;;  %p10709_p3 = scmp.ne.s32.totalorder %s10699_s12, 0 }
  0x84   : > { %8565 = dma.done.wait (%p10709_p3), [#allocation8], 16640  }
  0x85   : > { %8567 = vsyncadd (%p10709_p3), [#allocation8], 4294950656 }
  0x86   : > { %8569 = dma.done.wait (%p10709_p3), [#allocation11], 256  }
  0x87   : > { %8571 = vsyncadd (%p10709_p3), [#allocation11], 4294967040  ;;  %p7076_p8 = scmp.ne.s32.totalorder %s8590_s27, 0 }
  0x88   : > { %v8612_v0 = vmov (!%p7076_p8), -1e+30  }
  0x89   : > { %477 = sbr.rel (%p7076_p8) target bundleno = 144 (0x90), region = 68  ;;  %478 = vst [vmem:[#allocation2] sm:$0xff] (!%p7076_p8), %v8612_v0  ;;  %479 = vst [vmem:[#allocation2 + $0x8] sm:$0xff] (!%p7076_p8), %v8612_v0 }
  0x90 PF: > { %v7836_v1 = vld [vmem:[#allocation7] sm:$0xff]   ;;  %v7838_v3 = vld [vmem:[#allocation7 + $0x8] sm:$0xff]   ;;  %v7840_v5 = vld [vmem:[#allocation7 + $0x10] sm:$0xff]   ;;  %s8613_s10 = smov 2   ;;  %s8614_s12 = smov 1   ;;  %vm2698_vm5 = vcmask 1041409  }
  0x91   : > { %v7837_v2 = vld [vmem:[#allocation7 + $0x40] sm:$0xff]   ;;  %7404 = vmatprep.subr.bf16.mxu0 %v7836_v1  ;;  %v7839_v4 = vld [vmem:[#allocation7 + $0x48] sm:$0xff]   ;;  %v7841_v6 = vld [vmem:[#allocation7 + $0x50] sm:$0xff]   ;;  %s8864_s1 = sshll.u32 %s8590_s27, 5  ;;  %vm2701_vm6 = vcmask 1042434   ;;  %vm2704_vm7 = vcmask 1043459  }
  0x92   : > { %7424 = vmatprep.subr.bf16.mxu1 %v7837_v2  ;;  %7405 = vmatpush3.bf16.xpose.msra.mxu0 %v7836_v1  ;;  %v7842_v7 = vld [vmem:[#allocation7 + $0x18] sm:$0xff]   ;;  %v7852_v9 = vld [vmem:[%s8823_s24] sm:$0xff]   ;;  %v7853_v10 = vld [vmem:[%s8823_s24 + $0x10] sm:$0xff]   ;;  %p2736_p10 = scmp.eq.s32.totalorder %s8864_s1, 0  ;;  %vm2707_vm8 = vcmask 1044484   ;;  %vm2710_vm9 = vcmask 1045509  }
  0x93   : > { %7425 = vmatpush3.bf16.xpose.msra.mxu1 %v7837_v2  ;;  %7406 = vmatprep.subr.bf16.mxu0 %v7838_v3  ;;  %v7843_v8 = vld [vmem:[#allocation7 + $0x58] sm:$0xff]   ;;  %v7844_v11 = vld [vmem:[#allocation7 + $0x20] sm:$0xff]   ;;  %v7846_v13 = vld [vmem:[#allocation7 + $0x28] sm:$0xff]   ;;  %vm2713_vm10 = vcmask 1046534   ;;  %vm2716_vm11 = vcmask 1047559   ;;  %s2899_s30 = sadd.s32 1, %s8864_s1 }
  0x94   : > { %7426 = vmatprep.subr.bf16.mxu1 %v7839_v4  ;;  %7420 = vmatprep.mubr.bf16.mxu0 %v7852_v9  ;;  %v7845_v12 = vld [vmem:[#allocation7 + $0x60] sm:$0xff]   ;;  %v7847_v14 = vld [vmem:[#allocation7 + $0x68] sm:$0xff]   ;;  %v7848_v15 = vld [vmem:[#allocation7 + $0x30] sm:$0xff]   ;;  %s2787_s20 = scalar_select %p2736_p10, 1, 0 }
  0x95   : > { %7440 = vmatprep.mubr.bf16.mxu1 %v7853_v10  ;;  %v7849_v16 = vld [vmem:[#allocation7 + $0x70] sm:$0xff]   ;;  %v7850_v17 = vld [vmem:[#allocation7 + $0x38] sm:$0xff]   ;;  %v7856_v19 = vld [vmem:[#allocation7 + $0x80] sm:$0xff]   ;;  %s3027_s14 = sadd.s32 2, %s8864_s1  ;;  %s3155_s13 = sadd.s32 3, %s8864_s1 }
  0x96   : > { %v7851_v18 = vld [vmem:[#allocation7 + $0x78] sm:$0xff]   ;;  %v7857_v20 = vld [vmem:[#allocation7 + $0xc0] sm:$0xff]   ;;  %v7854_v21 = vld [vmem:[%s8823_s24 + $0x8] sm:$0xff]   ;;  %s3283_s19 = sadd.s32 4, %s8864_s1  ;;  %s3411_s21 = sadd.s32 5, %s8864_s1 }
  0x97   : > { %v7855_v22 = vld [vmem:[%s8823_s24 + $0x18] sm:$0xff]   ;;  %v7858_v23 = vld [vmem:[#allocation7 + $0x88] sm:$0xff]   ;;  %v7872_v25 = vld [vmem:[%s8823_s24 + $0x20] sm:$0xff]   ;;  %s3539_s17 = sadd.s32 6, %s8864_s1  ;;  %s3667_s22 = sadd.s32 7, %s8864_s1 }
  0x98   : > { %v7859_v24 = vld [vmem:[#allocation7 + $0xc8] sm:$0xff]   ;;  %v7873_v26 = vld [vmem:[%s8823_s24 + $0x30] sm:$0xff]   ;;  %v7862_v29 = vld [vmem:[#allocation7 + $0x98] sm:$0xff]   ;;  %s3795_s18 = sadd.s32 8, %s8864_s1  ;;  %s3923_s15 = sadd.s32 9, %s8864_s1 }
  0x99   : > { %v7860_v27 = vld [vmem:[#allocation7 + $0x90] sm:$0xff]   ;;  %v7863_v30 = vld [vmem:[#allocation7 + $0xd8] sm:$0xff]   ;;  %v7864_v31 = vld [vmem:[#allocation7 + $0xa0] sm:$0xff]   ;;  %s4051_s8 = sadd.s32 10, %s8864_s1  ;;  %s4179_s7 = sadd.s32 11, %s8864_s1 }
  0x9a   : > { %7407 = vmatpush3.bf16.xpose.msra.mxu0 %v7838_v3  ;;  %v7861_v28 = vld [vmem:[#allocation7 + $0xd0] sm:$0xff]   ;;  %v7865_v32 = vld [vmem:[#allocation7 + $0xe0] sm:$0xff]   ;;  %v7866_v33 = vld [vmem:[#allocation7 + $0xa8] sm:$0xff]   ;;  %s4563_s9 = sadd.s32 14, %s8864_s1  ;;  %s4691_s23 = sadd.s32 15, %s8864_s1 }
  0x9b   : > { %7427 = vmatpush3.bf16.xpose.msra.mxu1 %v7839_v4  ;;  %7408 = vmatprep.subr.bf16.mxu0 %v7840_v5  ;;  %v7867_v34 = vld [vmem:[#allocation7 + $0xe8] sm:$0xff]   ;;  %v7868_v35 = vld [vmem:[#allocation7 + $0xb0] sm:$0xff]   ;;  %v7870_v37 = vld [vmem:[#allocation7 + $0xb8] sm:$0xff]   ;;  %s4947_s16 = sadd.s32 17, %s8864_s1  ;;  %s5331_s11 = sadd.s32 20, %s8864_s1 }
  0x9c   : > { %7428 = vmatprep.subr.bf16.mxu1 %v7841_v6  ;;  %v7869_v36 = vld [vmem:[#allocation7 + $0xf0] sm:$0xff]   ;;  %v7871_v38 = vld [vmem:[#allocation7 + $0xf8] sm:$0xff]   ;;  %v7876_v39 = vld [vmem:[#allocation7 + $0x100] sm:$0xff]   ;;  %p7238_p1 = scmp.ne.s32.totalorder %s8590_s27, 1 }
  0x9d   : > { %v7877_v40 = vld [vmem:[#allocation7 + $0x140] sm:$0xff]   ;;  %v7874_v41 = vld [vmem:[%s8823_s24 + $0x28] sm:$0xff]   ;;  %v7875_v42 = vld [vmem:[%s8823_s24 + $0x38] sm:$0xff]  }
  0x9e   : > { %v7878_v43 = vld [vmem:[#allocation7 + $0x108] sm:$0xff]   ;;  %v7892_v45 = vld [vmem:[%s8823_s24 + $0x40] sm:$0xff]   ;;  %v7893_v46 = vld [vmem:[%s8823_s24 + $0x50] sm:$0xff]  }
  0x9f   : > { %v7879_v44 = vld [vmem:[#allocation7 + $0x148] sm:$0xff]   ;;  %v7880_v47 = vld [vmem:[#allocation7 + $0x110] sm:$0xff]   ;;  %v7882_v49 = vld [vmem:[#allocation7 + $0x118] sm:$0xff]  }
  0xa0   : > { %v7881_v48 = vld [vmem:[#allocation7 + $0x150] sm:$0xff]   ;;  %v7883_v50 = vld [vmem:[#allocation7 + $0x158] sm:$0xff]   ;;  %v7884_v51 = vld [vmem:[#allocation7 + $0x120] sm:$0xff]  }
  0xa1   : > { %v7885_v52 = vld [vmem:[#allocation7 + $0x160] sm:$0xff]   ;;  %v7886_v53 = vld [vmem:[#allocation7 + $0x128] sm:$0xff]   ;;  %v7888_v55 = vld [vmem:[#allocation7 + $0x130] sm:$0xff]  }
  0xa2   : > { %7409 = vmatpush3.bf16.xpose.msra.mxu0 %v7840_v5  ;;  %v7887_v54 = vld [vmem:[#allocation7 + $0x168] sm:$0xff]   ;;  %v7889_v56 = vld [vmem:[#allocation7 + $0x170] sm:$0xff]   ;;  %v7890_v57 = vld [vmem:[#allocation7 + $0x138] sm:$0xff]  }
  0xa3   : > { %7429 = vmatpush3.bf16.xpose.msra.mxu1 %v7841_v6  ;;  %7410 = vmatprep.subr.bf16.mxu0 %v7842_v7  ;;  %v7891_v58 = vld [vmem:[#allocation7 + $0x178] sm:$0xff]   ;;  %v7896_v59 = vld [vmem:[#allocation7 + $0x180] sm:$0xff]   ;;  %v7894_v61 = vld [vmem:[%s8823_s24 + $0x48] sm:$0xff]  }
  0xa4   : > { %7430 = vmatprep.subr.bf16.mxu1 %v7843_v8  ;;  %v7897_v60 = vld [vmem:[#allocation7 + $0x1c0] sm:$0xff]   ;;  %v7895_v62 = vld [vmem:[%s8823_s24 + $0x58] sm:$0xff]   ;;  %v7898_v63 = vld [vmem:[#allocation7 + $0x188] sm:$0xff]  }
  0xa5   : > { %v7899_v0 = vld [vmem:[#allocation7 + $0x1c8] sm:$0xff]   ;;  %v7912_v1 = vld [vmem:[%s8823_s24 + $0x60] sm:$0xff]   ;;  %v7913_v2 = vld [vmem:[%s8823_s24 + $0x70] sm:$0xff]  }
  0xa6   : > { %v8852_v3 = vld [vmem:[#allocation2] sm:$0xff]  ;;  %v7902_v6 = vld [vmem:[#allocation7 + $0x198] sm:$0xff]   ;;  %v7905_v9 = vld [vmem:[#allocation7 + $0x1e0] sm:$0xff]  }
  0xa7   : > { %2639 = vrot.lane.b32.xlu1 %v8852_v3, %s8613_s10  ;;  %2633 = vrot.lane.b32.xlu0 %v8852_v3, %s8614_s12  ;;  %v7900_v4 = vld [vmem:[#allocation7 + $0x190] sm:$0xff]   ;;  %v7906_v10 = vld [vmem:[#allocation7 + $0x1a8] sm:$0xff]  }
  0xa8   : > { %v7901_v5 = vld [vmem:[#allocation7 + $0x1d0] sm:$0xff]  }
  0xaa   : > { %7411 = vmatpush3.bf16.xpose.msra.mxu0 %v7842_v7  ;;  %v7903_v7 = vld [vmem:[#allocation7 + $0x1d8] sm:$0xff]  }
  0xab   : > { %7431 = vmatpush3.bf16.xpose.msra.mxu1 %v7843_v8  ;;  %7412 = vmatprep.subr.bf16.mxu0 %v7844_v11  ;;  %v7904_v8 = vld [vmem:[#allocation7 + $0x1a0] sm:$0xff]  }
  0xac   : > { %7432 = vmatprep.subr.bf16.mxu1 %v7845_v12 }
  0xb2   : > { %7413 = vmatpush3.bf16.xpose.msra.mxu0 %v7844_v11  ;;  %v7907_v11 = vld [vmem:[#allocation7 + $0x1e8] sm:$0xff]  }
  0xb3   : > { %7433 = vmatpush3.bf16.xpose.msra.mxu1 %v7845_v12  ;;  %7414 = vmatprep.subr.bf16.mxu0 %v7846_v13  ;;  %v7908_v12 = vld [vmem:[#allocation7 + $0x1b0] sm:$0xff]  }
  0xb4   : > { %7434 = vmatprep.subr.bf16.mxu1 %v7847_v14 }
  0xba   : > { %7415 = vmatpush3.bf16.xpose.msra.mxu0 %v7846_v13  ;;  %v7909_v13 = vld [vmem:[#allocation7 + $0x1f0] sm:$0xff]  }
  0xbb   : > { %7435 = vmatpush3.bf16.xpose.msra.mxu1 %v7847_v14  ;;  %7416 = vmatprep.subr.bf16.mxu0 %v7848_v15  ;;  %v2615_v14 = vld [vmem:[#allocation2 + $0x8] sm:$0xff] }
  0xbc   : > { %7436 = vmatprep.subr.bf16.mxu1 %v7849_v16  ;;  %2635 = vrot.lane.b32.xlu0 %v2615_v14, %s8614_s12 }
  0xbd   : > { %2641 = vrot.lane.b32.xlu1 %v2615_v14, %s8613_s10  ;;  %v7950_v14 = vld [vmem:[#allocation7 + $0x2b8] sm:$0xff]  }
  0xc2   : > { %7417 = vmatpush3.bf16.xpose.msra.mxu0 %v7848_v15  ;;  %v8861_v15 = vld [vmem:[%s10685_s6] sm:$0xff] }
  0xc3   : > { %7437 = vmatpush3.bf16.xpose.msra.mxu1 %v7849_v16  ;;  %7418 = vmatprep.subr.bf16.mxu0 %v7850_v17  ;;  %v2838_v16 = vstv %s8864_s1 }
  0xc4   : > { %7438 = vmatprep.subr.bf16.mxu1 %v7851_v18  ;;  %vm2839_vm0 = vcmp.lt.s32.totalorder %v2838_v16, %v8861_v15 }
  0xca   : > { %7419 = vmatpush3.bf16.xpose.msra.mxu0 %v7850_v17  ;;  %v8615_v17 = vmov 0  }
  0xcb   : > { %7439 = vmatpush3.bf16.xpose.msra.mxu1 %v7851_v18  ;;  %7444 = vmatprep.subr.bf16.mxu0 %v7856_v19  ;;  %v2841_v18 = vsel %vm2839_vm0, 1, %v8615_v17 }
  0xcc   : > { %7464 = vmatprep.subr.bf16.mxu1 %v7857_v20  ;;  %7834 = vset.pattern.permute.xlu0 %v8615_v17 }
  0xcd   : > { %7835 = vset.pattern.permute.xlu1 %v8615_v17  ;;  %2844 = vperm.xlu0 %7834, %v2841_v18   ;;  %v7956_v18 = vld [vmem:[#allocation7 + $0x300] sm:$0xff]  }
  0xd1   : > { %7421 = vmatmul.mubr.bf16.vlgmr.msra.gmra.mrb[0].mxu0 %v7854_v21  ;;  %v7916_v21 = vld [vmem:[#allocation7 + $0x200] sm:$0xff]  }
  0xd2   : > { %7441 = vmatmul.mubr.bf16.vlgmr.msra.gmra.mrb[0].mxu1 %v7855_v22  ;;  %7445 = vmatpush3.bf16.xpose.msra.mxu0 %v7856_v19  ;;  %v7910_v19 = vld [vmem:[#allocation7 + $0x1b8] sm:$0xff]   ;;  %v7917_v22 = vld [vmem:[#allocation7 + $0x240] sm:$0xff]  }
  0xd3   : > { %7465 = vmatpush3.bf16.xpose.msra.mxu1 %v7857_v20  ;;  %7446 = vmatprep.subr.bf16.mxu0 %v7858_v23  ;;  %v7911_v20 = vld [vmem:[#allocation7 + $0x1f8] sm:$0xff]  }
  0xd4   : > { %7466 = vmatprep.subr.bf16.mxu1 %v7859_v24  ;;  %7460 = vmatprep.mubr.bf16.mxu0 %v7872_v25  ;;  %v7918_v25 = vld [vmem:[#allocation7 + $0x208] sm:$0xff]  }
  0xd5   : > { %7480 = vmatprep.mubr.bf16.mxu1 %v7873_v26  ;;  %v7919_v26 = vld [vmem:[#allocation7 + $0x248] sm:$0xff]  }
  0xda   : > { %7447 = vmatpush3.bf16.xpose.msra.mxu0 %v7858_v23  ;;  %v7914_v23 = vld [vmem:[%s8823_s24 + $0x68] sm:$0xff]  }
  0xdb   : > { %7467 = vmatpush3.bf16.xpose.msra.mxu1 %v7859_v24  ;;  %7448 = vmatprep.subr.bf16.mxu0 %v7860_v27  ;;  %v7915_v24 = vld [vmem:[%s8823_s24 + $0x78] sm:$0xff]  }
  0xdc   : > { %7468 = vmatprep.subr.bf16.mxu1 %v7861_v28 }
  0xe2   : > { %7449 = vmatpush3.bf16.xpose.msra.mxu0 %v7860_v27  ;;  %v7932_v27 = vld [vmem:[%s8823_s24 + $0x80] sm:$0xff]  }
  0xe3   : > { %7469 = vmatpush3.bf16.xpose.msra.mxu1 %v7861_v28  ;;  %7450 = vmatprep.subr.bf16.mxu0 %v7862_v29  ;;  %v7933_v28 = vld [vmem:[%s8823_s24 + $0x90] sm:$0xff]  }
  0xe4   : > { %7470 = vmatprep.subr.bf16.mxu1 %v7863_v30 }
  0xea   : > { %7451 = vmatpush3.bf16.xpose.msra.mxu0 %v7862_v29  ;;  %v7920_v29 = vld [vmem:[#allocation7 + $0x210] sm:$0xff]  }
  0xeb   : > { %7471 = vmatpush3.bf16.xpose.msra.mxu1 %v7863_v30  ;;  %7452 = vmatprep.subr.bf16.mxu0 %v7864_v31  ;;  %v7921_v30 = vld [vmem:[#allocation7 + $0x250] sm:$0xff]  }
  0xec   : > { %7472 = vmatprep.subr.bf16.mxu1 %v7865_v32 }
  0xf2   : > { %7453 = vmatpush3.bf16.xpose.msra.mxu0 %v7864_v31  ;;  %v7922_v31 = vld [vmem:[#allocation7 + $0x218] sm:$0xff]  }
  0xf3   : > { %7473 = vmatpush3.bf16.xpose.msra.mxu1 %v7865_v32  ;;  %7454 = vmatprep.subr.bf16.mxu0 %v7866_v33  ;;  %v7923_v32 = vld [vmem:[#allocation7 + $0x258] sm:$0xff]  }
  0xf4   : > { %7474 = vmatprep.subr.bf16.mxu1 %v7867_v34 }
  0xfa   : > { %7455 = vmatpush3.bf16.xpose.msra.mxu0 %v7866_v33 }
  0xfb   : > { %7475 = vmatpush3.bf16.xpose.msra.mxu1 %v7867_v34  ;;  %7456 = vmatprep.subr.bf16.mxu0 %v7868_v35 }
  0xfc   : > { %7476 = vmatprep.subr.bf16.mxu1 %v7869_v36 }
 0x102   : > { %7457 = vmatpush3.bf16.xpose.msra.mxu0 %v7868_v35 }
 0x103   : > { %7477 = vmatpush3.bf16.xpose.msra.mxu1 %v7869_v36  ;;  %7458 = vmatprep.subr.bf16.mxu0 %v7870_v37 }
 0x104   : > { %7478 = vmatprep.subr.bf16.mxu1 %v7871_v38 }
 0x10a   : > { %7459 = vmatpush3.bf16.xpose.msra.mxu0 %v7870_v37 }
 0x10b   : > { %7479 = vmatpush3.bf16.xpose.msra.mxu1 %v7871_v38  ;;  %7484 = vmatprep.subr.bf16.mxu0 %v7876_v39 }
 0x10c   : > { %7504 = vmatprep.subr.bf16.mxu1 %v7877_v40 }
 0x111   : > { %7461 = vmatmul.mubr.bf16.vlgmr.msra.gmra.mrb[4].mxu0 %v7874_v41 }
 0x112   : > { %7481 = vmatmul.mubr.bf16.vlgmr.msra.gmra.mrb[4].mxu1 %v7875_v42  ;;  %7485 = vmatpush3.bf16.xpose.msra.mxu0 %v7876_v39  ;;  %v7925_v42 = vld [vmem:[#allocation7 + $0x260] sm:$0xff]  }
 0x113   : > { %7505 = vmatpush3.bf16.xpose.msra.mxu1 %v7877_v40  ;;  %7486 = vmatprep.subr.bf16.mxu0 %v7878_v43  ;;  %v7924_v40 = vld [vmem:[#allocation7 + $0x220] sm:$0xff]  }
 0x114   : > { %7506 = vmatprep.subr.bf16.mxu1 %v7879_v44  ;;  %7500 = vmatprep.mubr.bf16.mxu0 %v7892_v45  ;;  %v7928_v45 = vld [vmem:[#allocation7 + $0x230] sm:$0xff]  }
 0x115   : > { %7520 = vmatprep.mubr.bf16.mxu1 %v7893_v46  ;;  %v7929_v46 = vld [vmem:[#allocation7 + $0x270] sm:$0xff]  }
 0x11a   : > { %7487 = vmatpush3.bf16.xpose.msra.mxu0 %v7878_v43  ;;  %v7926_v43 = vld [vmem:[#allocation7 + $0x228] sm:$0xff]  }
 0x11b   : > { %7507 = vmatpush3.bf16.xpose.msra.mxu1 %v7879_v44  ;;  %7488 = vmatprep.subr.bf16.mxu0 %v7880_v47  ;;  %v7927_v44 = vld [vmem:[#allocation7 + $0x268] sm:$0xff]  }
 0x11c   : > { %7508 = vmatprep.subr.bf16.mxu1 %v7881_v48 }
 0x122   : > { %7489 = vmatpush3.bf16.xpose.msra.mxu0 %v7880_v47  ;;  %v7930_v47 = vld [vmem:[#allocation7 + $0x238] sm:$0xff]  }
 0x123   : > { %7509 = vmatpush3.bf16.xpose.msra.mxu1 %v7881_v48  ;;  %7490 = vmatprep.subr.bf16.mxu0 %v7882_v49  ;;  %v7931_v48 = vld [vmem:[#allocation7 + $0x278] sm:$0xff]  }
 0x124   : > { %7510 = vmatprep.subr.bf16.mxu1 %v7883_v50 }
 0x12a   : > { %7491 = vmatpush3.bf16.xpose.msra.mxu0 %v7882_v49  ;;  %v7936_v49 = vld [vmem:[#allocation7 + $0x280] sm:$0xff]  }
 0x12b   : > { %7511 = vmatpush3.bf16.xpose.msra.mxu1 %v7883_v50  ;;  %7492 = vmatprep.subr.bf16.mxu0 %v7884_v51  ;;  %v7937_v50 = vld [vmem:[#allocation7 + $0x2c0] sm:$0xff]  }
 0x12c   : > { %7512 = vmatprep.subr.bf16.mxu1 %v7885_v52 }
 0x132   : > { %7493 = vmatpush3.bf16.xpose.msra.mxu0 %v7884_v51  ;;  %v7934_v51 = vld [vmem:[%s8823_s24 + $0x88] sm:$0xff]  }
 0x133   : > { %7513 = vmatpush3.bf16.xpose.msra.mxu1 %v7885_v52  ;;  %7494 = vmatprep.subr.bf16.mxu0 %v7886_v53  ;;  %v7935_v52 = vld [vmem:[%s8823_s24 + $0x98] sm:$0xff]  }
 0x134   : > { %7514 = vmatprep.subr.bf16.mxu1 %v7887_v54 }
 0x13a   : > { %7495 = vmatpush3.bf16.xpose.msra.mxu0 %v7886_v53  ;;  %v7938_v53 = vld [vmem:[#allocation7 + $0x288] sm:$0xff]  }
 0x13b   : > { %7515 = vmatpush3.bf16.xpose.msra.mxu1 %v7887_v54  ;;  %7496 = vmatprep.subr.bf16.mxu0 %v7888_v55  ;;  %v7939_v54 = vld [vmem:[#allocation7 + $0x2c8] sm:$0xff]  }
 0x13c   : > { %7516 = vmatprep.subr.bf16.mxu1 %v7889_v56 }
 0x142   : > { %7497 = vmatpush3.bf16.xpose.msra.mxu0 %v7888_v55  ;;  %v7952_v55 = vld [vmem:[%s8823_s24 + $0xa0] sm:$0xff]  }
 0x143   : > { %7517 = vmatpush3.bf16.xpose.msra.mxu1 %v7889_v56  ;;  %7498 = vmatprep.subr.bf16.mxu0 %v7890_v57  ;;  %v7953_v56 = vld [vmem:[%s8823_s24 + $0xb0] sm:$0xff]  }
 0x144   : > { %7518 = vmatprep.subr.bf16.mxu1 %v7891_v58 }
 0x14a   : > { %7499 = vmatpush3.bf16.xpose.msra.mxu0 %v7890_v57  ;;  %v7940_v57 = vld [vmem:[#allocation7 + $0x290] sm:$0xff]  }
 0x14b   : > { %7519 = vmatpush3.bf16.xpose.msra.mxu1 %v7891_v58  ;;  %7524 = vmatprep.subr.bf16.mxu0 %v7896_v59  ;;  %v7941_v58 = vld [vmem:[#allocation7 + $0x2d0] sm:$0xff]  }
 0x14c   : > { %7544 = vmatprep.subr.bf16.mxu1 %v7897_v60 }
 0x151   : > { %7501 = vmatmul.mubr.bf16.vlgmr.msra.gmra.mrb[8].mxu0 %v7894_v61 }
 0x152   : > { %7521 = vmatmul.mubr.bf16.vlgmr.msra.gmra.mrb[8].mxu1 %v7895_v62  ;;  %7525 = vmatpush3.bf16.xpose.msra.mxu0 %v7896_v59  ;;  %v7942_v59 = vld [vmem:[#allocation7 + $0x298] sm:$0xff]  }
 0x153   : > { %7545 = vmatpush3.bf16.xpose.msra.mxu1 %v7897_v60  ;;  %7526 = vmatprep.subr.bf16.mxu0 %v7898_v63  ;;  %v7943_v60 = vld [vmem:[#allocation7 + $0x2d8] sm:$0xff]  }
 0x154   : > { %7546 = vmatprep.subr.bf16.mxu1 %v7899_v0  ;;  %7540 = vmatprep.mubr.bf16.mxu0 %v7912_v1 }
 0x155   : > { %7560 = vmatprep.mubr.bf16.mxu1 %v7913_v2 }
 0x15a   : > { %7527 = vmatpush3.bf16.xpose.msra.mxu0 %v7898_v63 }
 0x15b   : > { %7547 = vmatpush3.bf16.xpose.msra.mxu1 %v7899_v0  ;;  %7528 = vmatprep.subr.bf16.mxu0 %v7900_v4 }
 0x15c   : > { %7548 = vmatprep.subr.bf16.mxu1 %v7901_v5 }
 0x162   : > { %7529 = vmatpush3.bf16.xpose.msra.mxu0 %v7900_v4 }
 0x163   : > { %7549 = vmatpush3.bf16.xpose.msra.mxu1 %v7901_v5  ;;  %7530 = vmatprep.subr.bf16.mxu0 %v7902_v6  ;;  %v7944_v5 = vld [vmem:[#allocation7 + $0x2a0] sm:$0xff]  }
 0x164   : > { %7550 = vmatprep.subr.bf16.mxu1 %v7903_v7 }
 0x16a   : > { %7531 = vmatpush3.bf16.xpose.msra.mxu0 %v7902_v6 }
 0x16b   : > { %7551 = vmatpush3.bf16.xpose.msra.mxu1 %v7903_v7  ;;  %7532 = vmatprep.subr.bf16.mxu0 %v7904_v8  ;;  %v7945_v7 = vld [vmem:[#allocation7 + $0x2e0] sm:$0xff]  }
 0x16c   : > { %7552 = vmatprep.subr.bf16.mxu1 %v7905_v9 }
 0x172   : > { %7533 = vmatpush3.bf16.xpose.msra.mxu0 %v7904_v8  ;;  %v8886_v8 = vld [vmem:[%s10685_s6 + $0x8] sm:$0xff] }
 0x173   : > { %7553 = vmatpush3.bf16.xpose.msra.mxu1 %v7905_v9  ;;  %7534 = vmatprep.subr.bf16.mxu0 %v7906_v10  ;;  %vm2840_vm1 = vcmp.lt.s32.totalorder %v2838_v16, %v8886_v8  ;;  %v7951_v16 = vld [vmem:[#allocation7 + $0x2f8] sm:$0xff]  }
 0x174   : > { %7554 = vmatprep.subr.bf16.mxu1 %v7907_v11  ;;  %v2842_v9 = vsel %vm2840_vm1, 1, %v8615_v17 }
 0x175   : > { %2847 = vperm.xlu1 %7835, %v2842_v9   ;;  %v7980_v9 = vld [vmem:[#allocation7 + $0x390] sm:$0xff]  }
 0x17a   : > { %7535 = vmatpush3.bf16.xpose.msra.mxu0 %v7906_v10  ;;  %v7946_v10 = vld [vmem:[#allocation7 + $0x2a8] sm:$0xff]  }
 0x17b   : > { %7555 = vmatpush3.bf16.xpose.msra.mxu1 %v7907_v11  ;;  %7536 = vmatprep.subr.bf16.mxu0 %v7908_v12  ;;  %v7947_v11 = vld [vmem:[#allocation7 + $0x2e8] sm:$0xff]  }
 0x17c   : > { %7556 = vmatprep.subr.bf16.mxu1 %v7909_v13 }
 0x182   : > { %7537 = vmatpush3.bf16.xpose.msra.mxu0 %v7908_v12  ;;  %v7948_v12 = vld [vmem:[#allocation7 + $0x2b0] sm:$0xff]  }
 0x183   : > { %7557 = vmatpush3.bf16.xpose.msra.mxu1 %v7909_v13  ;;  %7538 = vmatprep.subr.bf16.mxu0 %v7910_v19  ;;  %v7949_v13 = vld [vmem:[#allocation7 + $0x2f0] sm:$0xff]  }
 0x184   : > { %7558 = vmatprep.subr.bf16.mxu1 %v7911_v20 }
 0x18a   : > { %7539 = vmatpush3.bf16.xpose.msra.mxu0 %v7910_v19  ;;  %v7957_v19 = vld [vmem:[#allocation7 + $0x340] sm:$0xff]  }
 0x18b   : > { %7559 = vmatpush3.bf16.xpose.msra.mxu1 %v7911_v20  ;;  %7564 = vmatprep.subr.bf16.mxu0 %v7916_v21  ;;  %v7954_v20 = vld [vmem:[%s8823_s24 + $0xa8] sm:$0xff]  }
 0x18c   : > { %7584 = vmatprep.subr.bf16.mxu1 %v7917_v22 }
 0x191   : > { %7541 = vmatmul.mubr.bf16.vlgmr.msra.gmra.mrb[12].mxu0 %v7914_v23  ;;  %v7959_v23 = vld [vmem:[#allocation7 + $0x348] sm:$0xff]  }
 0x192   : > { %7561 = vmatmul.mubr.bf16.vlgmr.msra.gmra.mrb[12].mxu1 %v7915_v24  ;;  %7565 = vmatpush3.bf16.xpose.msra.mxu0 %v7916_v21  ;;  %v7955_v21 = vld [vmem:[%s8823_s24 + $0xb8] sm:$0xff]   ;;  %v7972_v24 = vld [vmem:[%s8823_s24 + $0xc0] sm:$0xff]  }
 0x193   : > { %7585 = vmatpush3.bf16.xpose.msra.mxu1 %v7917_v22  ;;  %7566 = vmatprep.subr.bf16.mxu0 %v7918_v25  ;;  %v7958_v22 = vld [vmem:[#allocation7 + $0x308] sm:$0xff]  }
 0x194   : > { %7586 = vmatprep.subr.bf16.mxu1 %v7919_v26  ;;  %7580 = vmatprep.mubr.bf16.mxu0 %v7932_v27  ;;  %v7961_v27 = vld [vmem:[#allocation7 + $0x350] sm:$0xff]  }
 0x195   : > { %7600 = vmatprep.mubr.bf16.mxu1 %v7933_v28  ;;  %v7962_v28 = vld [vmem:[#allocation7 + $0x318] sm:$0xff]  }
 0x19a   : > { %7567 = vmatpush3.bf16.xpose.msra.mxu0 %v7918_v25  ;;  %v7973_v25 = vld [vmem:[%s8823_s24 + $0xd0] sm:$0xff]  }
 0x19b   : > { %7587 = vmatpush3.bf16.xpose.msra.mxu1 %v7919_v26  ;;  %7568 = vmatprep.subr.bf16.mxu0 %v7920_v29  ;;  %v7960_v26 = vld [vmem:[#allocation7 + $0x310] sm:$0xff]  }
 0x19c   : > { %7588 = vmatprep.subr.bf16.mxu1 %v7921_v30 }
 0x1a2   : > { %7569 = vmatpush3.bf16.xpose.msra.mxu0 %v7920_v29  ;;  %v7963_v29 = vld [vmem:[#allocation7 + $0x358] sm:$0xff]  }
 0x1a3   : > { %7589 = vmatpush3.bf16.xpose.msra.mxu1 %v7921_v30  ;;  %7570 = vmatprep.subr.bf16.mxu0 %v7922_v31 }
 0x1a4   : > { %v7422_v33 = vpop.f32.mrb[0].mxu0  ;;  %7590 = vmatprep.subr.bf16.mxu1 %v7923_v32 }
 0x1a5   : > { %2546 = vst [vmem:[#allocation3 + $0x10] sm:$0xff] %v7422_v33  ;;  %v7442_v34 = vpop.f32.mrb[0].mxu1  ;;  %v894_v35 = vpop.f32.mrb[1].mxu0 }
 0x1a6   : > { %2550 = vst [vmem:[#allocation3 + $0x30] sm:$0xff] %v7442_v34  ;;  %2544 = vst [vmem:[#allocation3] sm:$0xff] %v894_v35  ;;  %v1003_v36 = vpop.f32.mrb[1].mxu1  ;;  %v7423_v37 = vpop.f32.mrb[2].mxu0 }
 0x1a7   : > { %2548 = vst [vmem:[#allocation3 + $0x20] sm:$0xff] %v1003_v36  ;;  %2547 = vst [vmem:[#allocation3 + $0x18] sm:$0xff] %v7423_v37  ;;  %v7443_v38 = vpop.f32.mrb[2].mxu1  ;;  %v897_v39 = vpop.f32.mrb[3].mxu0  ;;  %v7964_v37 = vld [vmem:[#allocation7 + $0x320] sm:$0xff]  }
 0x1a8   : > { %2551 = vst [vmem:[#allocation3 + $0x38] sm:$0xff] %v7443_v38  ;;  %2545 = vst [vmem:[#allocation3 + $0x8] sm:$0xff] %v897_v39  ;;  %v1006_v41 = vpop.f32.mrb[3].mxu1  ;;  %v7965_v39 = vld [vmem:[#allocation7 + $0x360] sm:$0xff]  }
 0x1a9   : > { %2549 = vst [vmem:[#allocation3 + $0x28] sm:$0xff] %v1006_v41  ;;  %v2640_v41 = vpop.permute.xlu1 %2639 }
 0x1aa   : > { %7571 = vmatpush3.bf16.xpose.msra.mxu0 %v7922_v31 }
 0x1ab   : > { %7591 = vmatpush3.bf16.xpose.msra.mxu1 %v7923_v32  ;;  %7572 = vmatprep.subr.bf16.mxu0 %v7924_v40 }
 0x1ac   : > { %7592 = vmatprep.subr.bf16.mxu1 %v7925_v42 }
 0x1b2   : > { %7573 = vmatpush3.bf16.xpose.msra.mxu0 %v7924_v40  ;;  %v7966_v40 = vld [vmem:[#allocation7 + $0x328] sm:$0xff]  }
 0x1b3   : > { %7593 = vmatpush3.bf16.xpose.msra.mxu1 %v7925_v42  ;;  %7574 = vmatprep.subr.bf16.mxu0 %v7926_v43  ;;  %v8896_v42 = vld [vmem:[#allocation9] sm:$0xff] }
 0x1b4   : > { %7594 = vmatprep.subr.bf16.mxu1 %v7927_v44 }
 0x1ba   : > { %7575 = vmatpush3.bf16.xpose.msra.mxu0 %v7926_v43  ;;  %v2634_v43 = vpop.permute.xlu0 %2633 }
 0x1bb   : > { %7595 = vmatpush3.bf16.xpose.msra.mxu1 %v7927_v44  ;;  %7576 = vmatprep.subr.bf16.mxu0 %v7928_v45  ;;  %v8901_v44 = vld [vmem:[%s10681_s2] sm:$0xff] }
 0x1bc   : > { %7596 = vmatprep.subr.bf16.mxu1 %v7929_v46 }
 0x1c2   : > { %7577 = vmatpush3.bf16.xpose.msra.mxu0 %v7928_v45  ;;  %v7967_v45 = vld [vmem:[#allocation7 + $0x368] sm:$0xff]  }
 0x1c3   : > { %7597 = vmatpush3.bf16.xpose.msra.mxu1 %v7929_v46  ;;  %7578 = vmatprep.subr.bf16.mxu0 %v7930_v47  ;;  %v2643_v46 = vadd.f32 %v2640_v41, %v8896_v42 }
 0x1c4   : > { %7598 = vmatprep.subr.bf16.mxu1 %v7931_v48 }
 0x1ca   : > { %7579 = vmatpush3.bf16.xpose.msra.mxu0 %v7930_v47  ;;  %v2637_v47 = vadd.f32 %v2634_v43, %v8901_v44 }
 0x1cb   : > { %7599 = vmatpush3.bf16.xpose.msra.mxu1 %v7931_v48  ;;  %7604 = vmatprep.subr.bf16.mxu0 %v7936_v49 }
 0x1cc   : > { %7624 = vmatprep.subr.bf16.mxu1 %v7937_v50  ;;  %v2645_v48 = vmax.f32 %v2637_v47, %v2643_v46  ;;  %vm2655_vm3 = vcmp.ge.f32.partialorder %v2637_v47, %v2643_v46 }
 0x1ce   : > { %vm2649_vm2 = vcmp.ge.f32.partialorder %v8852_v3, %v2645_v48 }
 0x1cf   : > { %vm2657_vm4 = vmor %vm2649_vm2, %vm2655_vm3 }
 0x1d1   : > { %7581 = vmatmul.mubr.bf16.vlgmr.msra.gmra.mrb[16].mxu0 %v7934_v51  ;;  %v8907_v51 = vmax.f32 %v8852_v3, %v2645_v48 }
 0x1d2   : > { %7601 = vmatmul.mubr.bf16.vlgmr.msra.gmra.mrb[16].mxu1 %v7935_v52  ;;  %7605 = vmatpush3.bf16.xpose.msra.mxu0 %v7936_v49  ;;  %v7968_v49 = vld [vmem:[#allocation7 + $0x330] sm:$0xff]   ;;  %v2651_v52 = vsel %vm2649_vm2, %v2637_v47, %v8852_v3 }
 0x1d3   : > { %7625 = vmatpush3.bf16.xpose.msra.mxu1 %v7937_v50  ;;  %7606 = vmatprep.subr.bf16.mxu0 %v7938_v53  ;;  %v7969_v50 = vld [vmem:[#allocation7 + $0x370] sm:$0xff]  }
 0x1d4   : > { %7626 = vmatprep.subr.bf16.mxu1 %v7939_v54  ;;  %7620 = vmatprep.mubr.bf16.mxu0 %v7952_v55  ;;  %v7971_v55 = vld [vmem:[#allocation7 + $0x378] sm:$0xff]  }
 0x1d5   : > { %7640 = vmatprep.mubr.bf16.mxu1 %v7953_v56  ;;  %v2659_v56 = vsel %vm2657_vm4, %v2643_v46, %v2637_v47 }
 0x1da   : > { %7607 = vmatpush3.bf16.xpose.msra.mxu0 %v7938_v53  ;;  %v7970_v53 = vld [vmem:[#allocation7 + $0x338] sm:$0xff]  }
 0x1db   : > { %7627 = vmatpush3.bf16.xpose.msra.mxu1 %v7939_v54  ;;  %7608 = vmatprep.subr.bf16.mxu0 %v7940_v57  ;;  %v2653_v54 = vsub.f32 %v2651_v52, %v8907_v51  ;;  %v7986_v52 = vld [vmem:[#allocation7 + $0x3a8] sm:$0xff]  }
 0x1dc   : > { %7628 = vmatprep.subr.bf16.mxu1 %v7941_v58 }
 0x1e2   : > { %7609 = vmatpush3.bf16.xpose.msra.mxu0 %v7940_v57  ;;  %v2661_v57 = vsub.f32 %v2659_v56, %v8907_v51 }
 0x1e3   : > { %7629 = vmatpush3.bf16.xpose.msra.mxu1 %v7941_v58  ;;  %7610 = vmatprep.subr.bf16.mxu0 %v7942_v59  ;;  %v2663_v58 = vmul.f32 1.442695, %v2653_v54 }
 0x1e4   : > { %v7462_v61 = vpop.f32.mrb[4].mxu0  ;;  %7630 = vmatprep.subr.bf16.mxu1 %v7943_v60 }
 0x1e5   : > { %2554 = vst [vmem:[#allocation3 + $0x50] sm:$0xff] %v7462_v61  ;;  %v7482_v62 = vpop.f32.mrb[4].mxu1  ;;  %v1112_v63 = vpop.f32.mrb[5].mxu0  ;;  %7996 = vpow2.f32 %v2663_v58  ;;  %v7977_v61 = vld [vmem:[#allocation7 + $0x3c0] sm:$0xff]   ;;  %v2788_v58 = vstv %s2787_s20  ;;  %s4307_s20 = sadd.s32 12, %s8864_s1 }
 0x1e6   : > { %2558 = vst [vmem:[#allocation3 + $0x70] sm:$0xff] %v7482_v62  ;;  %2552 = vst [vmem:[#allocation3 + $0x40] sm:$0xff] %v1112_v63  ;;  %v1221_v0 = vpop.f32.mrb[5].mxu1  ;;  %v7463_v1 = vpop.f32.mrb[6].mxu0  ;;  %v7974_v62 = vld [vmem:[%s8823_s24 + $0xc8] sm:$0xff]   ;;  %v7975_v63 = vld [vmem:[%s8823_s24 + $0xd8] sm:$0xff]  }
 0x1e7   : > { %2556 = vst [vmem:[#allocation3 + $0x60] sm:$0xff] %v1221_v0  ;;  %2555 = vst [vmem:[#allocation3 + $0x58] sm:$0xff] %v7463_v1  ;;  %v7483_v2 = vpop.f32.mrb[6].mxu1  ;;  %v1115_v4 = vpop.f32.mrb[7].mxu0  ;;  %v7978_v0 = vld [vmem:[#allocation7 + $0x388] sm:$0xff]   ;;  %vm8943_vm12 = vcmp.eq.s32.totalorder %v2788_v58, 1 }
 0x1e8   : > { %2559 = vst [vmem:[#allocation3 + $0x78] sm:$0xff] %v7483_v2  ;;  %2553 = vst [vmem:[#allocation3 + $0x48] sm:$0xff] %v1115_v4  ;;  %v1224_v6 = vpop.f32.mrb[7].mxu1  ;;  %v7979_v1 = vld [vmem:[#allocation7 + $0x3c8] sm:$0xff]   ;;  %v7992_v2 = vld [vmem:[%s8823_s24 + $0xe0] sm:$0xff]  }
 0x1e9   : > { %2557 = vst [vmem:[#allocation3 + $0x68] sm:$0xff] %v1224_v6  ;;  %v7993_v4 = vld [vmem:[%s8823_s24 + $0xf0] sm:$0xff]  }
 0x1ea   : > { %7611 = vmatpush3.bf16.xpose.msra.mxu0 %v7942_v59  ;;  %v7976_v59 = vld [vmem:[#allocation7 + $0x380] sm:$0xff]  }
 0x1eb   : > { %7631 = vmatpush3.bf16.xpose.msra.mxu1 %v7943_v60  ;;  %7612 = vmatprep.subr.bf16.mxu0 %v7944_v5  ;;  %v2669_v60 = vmul.f32 1.442695, %v2661_v57  ;;  %v7987_v57 = vld [vmem:[#allocation7 + $0x3e8] sm:$0xff]  }
 0x1ec   : > { %7632 = vmatprep.subr.bf16.mxu1 %v7945_v7 }
 0x1ed   : > { %7998 = vpow2.f32 %v2669_v60 }
 0x1f2   : > { %7613 = vmatpush3.bf16.xpose.msra.mxu0 %v7944_v5  ;;  %v7997_v5 = vpop.eup %7996 }
 0x1f3   : > { %7633 = vmatpush3.bf16.xpose.msra.mxu1 %v7945_v7  ;;  %7614 = vmatprep.subr.bf16.mxu0 %v7946_v10  ;;  %v2667_v6 = vadd.f32 1.0, %v7997_v5 }
 0x1f4   : > { %7634 = vmatprep.subr.bf16.mxu1 %v7947_v11 }
 0x1f7   : > { %v7999_v7 = vpop.eup %7998 }
 0x1fa   : > { %7615 = vmatpush3.bf16.xpose.msra.mxu0 %v7946_v10  ;;  %v7981_v10 = vld [vmem:[#allocation7 + $0x3d0] sm:$0xff]  }
 0x1fb   : > { %7635 = vmatpush3.bf16.xpose.msra.mxu1 %v7947_v11  ;;  %7616 = vmatprep.subr.bf16.mxu0 %v7948_v12  ;;  %v2673_v11 = vadd.f32 %v7999_v7, %v2667_v6  ;;  %v8949_v7 = vpop.permute.xlu0 %2635 }
 0x1fc   : > { %7636 = vmatprep.subr.bf16.mxu1 %v7949_v13 }
 0x1fd   : > { %8000 = vlog2.f32 %v2673_v11 }
 0x202   : > { %7617 = vmatpush3.bf16.xpose.msra.mxu0 %v7948_v12  ;;  %v7982_v12 = vld [vmem:[#allocation7 + $0x398] sm:$0xff]  }
 0x203   : > { %7637 = vmatpush3.bf16.xpose.msra.mxu1 %v7949_v13  ;;  %7618 = vmatprep.subr.bf16.mxu0 %v7950_v14  ;;  %v7983_v13 = vld [vmem:[#allocation7 + $0x3d8] sm:$0xff]  }
 0x204   : > { %7638 = vmatprep.subr.bf16.mxu1 %v7951_v16 }
 0x20a   : > { %7619 = vmatpush3.bf16.xpose.msra.mxu0 %v7950_v14  ;;  %v8916_v14 = vld [vmem:[#allocation3 + $0x20] sm:$0x1] }
 0x20b   : > { %7639 = vmatpush3.bf16.xpose.msra.mxu1 %v7951_v16  ;;  %7644 = vmatprep.subr.bf16.mxu0 %v7956_v18  ;;  %v8918_v16 = vld [vmem:[#allocation3 + $0x40] sm:$0x1] }
 0x20c   : > { %7664 = vmatprep.subr.bf16.mxu1 %v7957_v19 }
 0x211   : > { %7621 = vmatmul.mubr.bf16.vlgmr.msra.gmra.mrb[20].mxu0 %v7954_v20  ;;  %v8921_v20 = vld [vmem:[#allocation3 + $0x60] sm:$0x1] }
 0x212   : > { %7641 = vmatmul.mubr.bf16.vlgmr.msra.gmra.mrb[20].mxu1 %v7955_v21  ;;  %7645 = vmatpush3.bf16.xpose.msra.mxu0 %v7956_v18  ;;  %v2697_v18 = vrot.slane %v8916_v14, 7  ;;  %v2700_v21 = vrot.slane %v8918_v16, 6 }
 0x213   : > { %7665 = vmatpush3.bf16.xpose.msra.mxu1 %v7957_v19  ;;  %7646 = vmatprep.subr.bf16.mxu0 %v7958_v22 }
 0x214   : > { %7666 = vmatprep.subr.bf16.mxu1 %v7959_v23  ;;  %7660 = vmatprep.mubr.bf16.mxu0 %v7972_v24 }
 0x215   : > { %7680 = vmatprep.mubr.bf16.mxu1 %v7973_v25 }
 0x21a   : > { %7647 = vmatpush3.bf16.xpose.msra.mxu0 %v7958_v22 }
 0x21b   : > { %7667 = vmatpush3.bf16.xpose.msra.mxu1 %v7959_v23  ;;  %7648 = vmatprep.subr.bf16.mxu0 %v7960_v26 }
 0x21c   : > { %7668 = vmatprep.subr.bf16.mxu1 %v7961_v27 }
 0x222   : > { %7649 = vmatpush3.bf16.xpose.msra.mxu0 %v7960_v26 }
 0x223   : > { %7669 = vmatpush3.bf16.xpose.msra.mxu1 %v7961_v27  ;;  %7650 = vmatprep.subr.bf16.mxu0 %v7962_v28  ;;  %v2617_v27 = vld [vmem:[#allocation3] sm:$0x1] }
 0x224   : > { %v7502_v30 = vpop.f32.mrb[8].mxu0  ;;  %7670 = vmatprep.subr.bf16.mxu1 %v7963_v29 }
 0x225   : > { %2562 = vst [vmem:[#allocation3 + $0x90] sm:$0xff] %v7502_v30  ;;  %v7522_v31 = vpop.f32.mrb[8].mxu1  ;;  %v1330_v32 = vpop.f32.mrb[9].mxu0 }
 0x226   : > { %2566 = vst [vmem:[#allocation3 + $0xb0] sm:$0xff] %v7522_v31  ;;  %2560 = vst [vmem:[#allocation3 + $0x80] sm:$0xff] %v1330_v32  ;;  %v1439_v33 = vpop.f32.mrb[9].mxu1  ;;  %v7503_v34 = vpop.f32.mrb[10].mxu0  ;;  %v7984_v31 = vld [vmem:[#allocation7 + $0x3a0] sm:$0xff]   ;;  %v2699_v32 = vsel %vm2698_vm5, %v2697_v18, %v2617_v27 }
 0x227   : > { %2564 = vst [vmem:[#allocation3 + $0xa0] sm:$0xff] %v1439_v33  ;;  %2563 = vst [vmem:[#allocation3 + $0x98] sm:$0xff] %v7503_v34  ;;  %v7523_v35 = vpop.f32.mrb[10].mxu1  ;;  %v1333_v36 = vpop.f32.mrb[11].mxu0  ;;  %v2703_v33 = vrot.slane %v8921_v20, 5 }
 0x228   : > { %2567 = vst [vmem:[#allocation3 + $0xb8] sm:$0xff] %v7523_v35  ;;  %2561 = vst [vmem:[#allocation3 + $0x88] sm:$0xff] %v1333_v36  ;;  %v1442_v38 = vpop.f32.mrb[11].mxu1  ;;  %v7985_v35 = vld [vmem:[#allocation7 + $0x3e0] sm:$0xff]  }
 0x229   : > { %2565 = vst [vmem:[#allocation3 + $0xa8] sm:$0xff] %v1442_v38 }
 0x22a   : > { %7651 = vmatpush3.bf16.xpose.msra.mxu0 %v7962_v28  ;;  %v8001_v28 = vpop.eup %8000 }
 0x22b   : > { %7671 = vmatpush3.bf16.xpose.msra.mxu1 %v7963_v29  ;;  %7652 = vmatprep.subr.bf16.mxu0 %v7964_v37 }
 0x22c   : > { %7672 = vmatprep.subr.bf16.mxu1 %v7965_v39 }
 0x22d   : > { %v8924_v24 = vld [vmem:[#allocation3 + $0x80] sm:$0x1] }
 0x22e   : > { %v2622_v36 = vld [vmem:[#allocation3 + $0xa0] sm:$0x1]  ;;  %v2706_v38 = vrot.slane %v8924_v24, 4 }
 0x22f   : > { %v2709_v43 = vrot.slane %v2622_v36, 3 }
 0x232   : > { %7653 = vmatpush3.bf16.xpose.msra.mxu0 %v7964_v37  ;;  %v2702_v37 = vsel %vm2701_vm6, %v2700_v21, %v2699_v32 }
 0x233   : > { %7673 = vmatpush3.bf16.xpose.msra.mxu1 %v7965_v39  ;;  %7654 = vmatprep.subr.bf16.mxu0 %v7966_v40  ;;  %v2676_v39 = vmul.f32 0.6931472, %v8001_v28  ;;  %v2705_v41 = vsel %vm2704_vm7, %v2703_v33, %v2702_v37 }
 0x234   : > { %7674 = vmatprep.subr.bf16.mxu1 %v7967_v45 }
 0x235   : > { %v2679_v47 = vadd.f32 %v2676_v39, %v8907_v51 }
 0x23a   : > { %7655 = vmatpush3.bf16.xpose.msra.mxu0 %v7966_v40  ;;  %v2737_v40 = vld [vmem:[%s10683_s4] sm:$0xff] }
 0x23b   : > { %7675 = vmatpush3.bf16.xpose.msra.mxu1 %v7967_v45  ;;  %7656 = vmatprep.subr.bf16.mxu0 %v7968_v49  ;;  %v2708_v45 = vsel %vm2707_vm8, %v2706_v38, %v2705_v41  ;;  %v2741_v48 = vrot.slane %v2737_v40, 1  ;;  %v2743_v54 = vrot.slane %v2737_v40, 3  ;;  %v2744_v60 = vrot.slane %v2737_v40, 4 }
 0x23c   : > { %7676 = vmatprep.subr.bf16.mxu1 %v7969_v50  ;;  %v2746_v51 = vrot.slane %v2737_v40, 6 }
 0x23d   : > { %v2774_v6 = vadd.f32 %v2743_v54, %v8921_v20 }
 0x242   : > { %7657 = vmatpush3.bf16.xpose.msra.mxu0 %v7968_v49 }
 0x243   : > { %7677 = vmatpush3.bf16.xpose.msra.mxu1 %v7969_v50  ;;  %7658 = vmatprep.subr.bf16.mxu0 %v7970_v53 }
 0x244   : > { %7678 = vmatprep.subr.bf16.mxu1 %v7971_v55 }
 0x24a   : > { %7659 = vmatpush3.bf16.xpose.msra.mxu0 %v7970_v53  ;;  %v2742_v53 = vrot.slane %v2737_v40, 2 }
 0x24b   : > { %7679 = vmatpush3.bf16.xpose.msra.mxu1 %v7971_v55  ;;  %7684 = vmatprep.subr.bf16.mxu0 %v7976_v59  ;;  %v2711_v55 = vsel %vm2710_vm9, %v2709_v43, %v2708_v45 }
 0x24c   : > { %7704 = vmatprep.subr.bf16.mxu1 %v7977_v61  ;;  %v2773_v5 = vadd.f32 %v2742_v53, %v8918_v16  ;;  %v8979_v53 = vstv %s2899_s30  ;;  %s4435_s30 = sadd.s32 13, %s8864_s1 }
 0x24d   : > { %vm3013_vm14 = vcmp.lt.s32.totalorder %v8979_v53, %v8861_v15 }
 0x24e   : > { %v3015_v54 = vsel %vm3013_vm14, 1, %v8615_v17 }
 0x251   : > { %7661 = vmatmul.mubr.bf16.vlgmr.msra.gmra.mrb[24].mxu0 %v7974_v62 }
 0x252   : > { %7681 = vmatmul.mubr.bf16.vlgmr.msra.gmra.mrb[24].mxu1 %v7975_v63  ;;  %7685 = vmatpush3.bf16.xpose.msra.mxu0 %v7976_v59 }
 0x253   : > { %7705 = vmatpush3.bf16.xpose.msra.mxu1 %v7977_v61  ;;  %7686 = vmatprep.subr.bf16.mxu0 %v7978_v0  ;;  %v2745_v61 = vrot.slane %v2737_v40, 5 }
 0x254   : > { %7706 = vmatprep.subr.bf16.mxu1 %v7979_v1  ;;  %7700 = vmatprep.mubr.bf16.mxu0 %v7992_v2  ;;  %v2747_v2 = vrot.slane %v2737_v40, 7 }
 0x255   : > { %7720 = vmatprep.mubr.bf16.mxu1 %v7993_v4 }
 0x25a   : > { %7687 = vmatpush3.bf16.xpose.msra.mxu0 %v7978_v0  ;;  %v2771_v0 = vadd.f32 %v2737_v40, %v2617_v27  ;;  %v7988_v27 = vld [vmem:[#allocation7 + $0x3b0] sm:$0xff]  }
 0x25b   : > { %7707 = vmatpush3.bf16.xpose.msra.mxu1 %v7979_v1  ;;  %7688 = vmatprep.subr.bf16.mxu0 %v7980_v9  ;;  %v2772_v1 = vadd.f32 %v2741_v48, %v8916_v14  ;;  %v2776_v14 = vadd.f32 %v2745_v61, %v2622_v36 }
 0x25c   : > { %7708 = vmatprep.subr.bf16.mxu1 %v7981_v10 }
 0x262   : > { %7689 = vmatpush3.bf16.xpose.msra.mxu0 %v7980_v9 }
 0x263   : > { %7709 = vmatpush3.bf16.xpose.msra.mxu1 %v7981_v10  ;;  %7690 = vmatprep.subr.bf16.mxu0 %v7982_v12 }
 0x264   : > { %v7542_v19 = vpop.f32.mrb[12].mxu0  ;;  %7710 = vmatprep.subr.bf16.mxu1 %v7983_v13 }
 0x265   : > { %2570 = vst [vmem:[#allocation3 + $0xd0] sm:$0xff] %v7542_v19  ;;  %v7562_v22 = vpop.f32.mrb[12].mxu1  ;;  %v1548_v23 = vpop.f32.mrb[13].mxu0 }
 0x266   : > { %2574 = vst [vmem:[#allocation3 + $0xf0] sm:$0xff] %v7562_v22  ;;  %2568 = vst [vmem:[#allocation3 + $0xc0] sm:$0xff] %v1548_v23  ;;  %v1657_v25 = vpop.f32.mrb[13].mxu1  ;;  %v7543_v26 = vpop.f32.mrb[14].mxu0 }
 0x267   : > { %2572 = vst [vmem:[#allocation3 + $0xe0] sm:$0xff] %v1657_v25  ;;  %2571 = vst [vmem:[#allocation3 + $0xd8] sm:$0xff] %v7543_v26  ;;  %v7563_v29 = vpop.f32.mrb[14].mxu1  ;;  %v1551_v30 = vpop.f32.mrb[15].mxu0 }
 0x268   : > { %2575 = vst [vmem:[#allocation3 + $0xf8] sm:$0xff] %v7563_v29  ;;  %2569 = vst [vmem:[#allocation3 + $0xc8] sm:$0xff] %v1551_v30  ;;  %v1660_v34 = vpop.f32.mrb[15].mxu1 }
 0x269   : > { %2573 = vst [vmem:[#allocation3 + $0xe8] sm:$0xff] %v1660_v34 }
 0x26a   : > { %7691 = vmatpush3.bf16.xpose.msra.mxu0 %v7982_v12 }
 0x26b   : > { %7711 = vmatpush3.bf16.xpose.msra.mxu1 %v7983_v13  ;;  %7692 = vmatprep.subr.bf16.mxu0 %v7984_v31  ;;  %v2775_v13 = vadd.f32 %v2744_v60, %v8924_v24 }
 0x26c   : > { %7712 = vmatprep.subr.bf16.mxu1 %v7985_v35 }
 0x26d   : > { %v2623_v46 = vld [vmem:[#allocation3 + $0xc0] sm:$0x1] }
 0x26e   : > { %v2624_v49 = vld [vmem:[#allocation3 + $0xe0] sm:$0x1]  ;;  %v2712_v50 = vrot.slane %v2623_v46, 2  ;;  %v2777_v23 = vadd.f32 %v2746_v51, %v2623_v46 }
 0x26f   : > { %v2715_v56 = vrot.slane %v2624_v49, 1  ;;  %v2778_v24 = vadd.f32 %v2747_v2, %v2624_v49  ;;  %v7990_v49 = vld [vmem:[#allocation7 + $0x3b8] sm:$0xff]  }
 0x270   : > { %v2714_v59 = vsel %vm2713_vm10, %v2712_v50, %v2711_v55  ;;  %v7995_v55 = vld [vmem:[%s8823_s24 + $0xf8] sm:$0xff]  }
 0x271   : > { %v2717_v62 = vsel %vm2716_vm11, %v2715_v56, %v2714_v59 }
 0x272   : > { %7693 = vmatpush3.bf16.xpose.msra.mxu0 %v7984_v31  ;;  %v2734_v63 = vadd.f32 %v2717_v62, %v2679_v47  ;;  %v7989_v31 = vld [vmem:[#allocation7 + $0x3f0] sm:$0xff]  }
 0x273   : > { %7713 = vmatpush3.bf16.xpose.msra.mxu1 %v7985_v35  ;;  %7694 = vmatprep.subr.bf16.mxu0 %v7986_v52  ;;  %v2845_v35 = vpop.permute.xlu0 %2844 }
 0x274   : > { %7714 = vmatprep.subr.bf16.mxu1 %v7987_v57  ;;  %v2792_v9 = vrot.slane %v2734_v63, 1  ;;  %v2793_v10 = vrot.slane %v2734_v63, 2  ;;  %v2794_v11 = vrot.slane %v2734_v63, 3  ;;  %v2795_v12 = vrot.slane %v2734_v63, 4 }
 0x275   : > { %v2796_v18 = vrot.slane %v2734_v63, 5  ;;  %v2797_v19 = vrot.slane %v2734_v63, 6  ;;  %v2798_v21 = vrot.slane %v2734_v63, 7  ;;  %v2822_v28 = vsel %vm8943_vm12, %v2771_v0, %v2734_v63  ;;  %v8990_v63 = vpop.permute.xlu1 %2641 }
 0x276   : > { %v2823_v22 = vsel %vm8943_vm12, %v2772_v1, %v2792_v9  ;;  %v2824_v16 = vsel %vm8943_vm12, %v2773_v5, %v2793_v10  ;;  %v2825_v20 = vsel %vm8943_vm12, %v2774_v6, %v2794_v11  ;;  %v2826_v25 = vsel %vm8943_vm12, %v2775_v13, %v2795_v12 }
 0x277   : > { %v2867_v26 = vrot.slane %v2823_v22, 7  ;;  %v2827_v29 = vsel %vm8943_vm12, %v2776_v14, %v2796_v18  ;;  %v2869_v30 = vrot.slane %v2824_v16, 6  ;;  %v2828_v32 = vsel %vm8943_vm12, %v2777_v23, %v2797_v19 }
 0x278   : > { %v2871_v34 = vrot.slane %v2825_v20, 5  ;;  %v2829_v36 = vsel %vm8943_vm12, %v2778_v24, %v2798_v21  ;;  %v2873_v38 = vrot.slane %v2826_v25, 4  ;;  %v2875_v40 = vrot.slane %v2827_v29, 3  ;;  %v2901_v24 = vld [vmem:[#allocation3 + $0x21] sm:$0x1] }
 0x279   : > { %v2868_v33 = vsel %vm2698_vm5, %v2867_v26, %v2822_v28  ;;  %v2877_v43 = vrot.slane %v2828_v32, 2  ;;  %vm2849_vm13 = vcmp.eq.s32.totalorder %v2845_v35, 1  ;;  %v2879_v46 = vrot.slane %v2829_v36, 1  ;;  %v8992_v11 = vpop.permute.xlu1 %2847  ;;  %v2904_v35 = vld [vmem:[#allocation3 + $0x81] sm:$0x1] }
 0x27a   : > { %7695 = vmatpush3.bf16.xpose.msra.mxu0 %v7986_v52  ;;  %v2870_v37 = vsel %vm2701_vm6, %v2869_v30, %v2868_v33  ;;  %v7991_v52 = vld [vmem:[#allocation7 + $0x3f8] sm:$0xff]   ;;  %v2902_v30 = vld [vmem:[#allocation3 + $0x41] sm:$0x1]  ;;  %v2980_v32 = vrot.slane %v2901_v24, 7 }
 0x27b   : > { %7715 = vmatpush3.bf16.xpose.msra.mxu1 %v7987_v57  ;;  %v2872_v39 = vsel %vm2704_vm7, %v2871_v34, %v2870_v37  ;;  %7696 = vmatprep.subr.bf16.mxu0 %v7988_v27  ;;  %v2903_v33 = vld [vmem:[#allocation3 + $0x61] sm:$0x1]  ;;  %v2982_v34 = vrot.slane %v2902_v30, 6 }
 0x27c   : > { %v2874_v41 = vsel %vm2707_vm8, %v2873_v38, %v2872_v39  ;;  %7716 = vmatprep.subr.bf16.mxu1 %v7989_v31  ;;  %v2900_v36 = vld [vmem:[#allocation3 + $0x1] sm:$0x1]  ;;  %v2984_v38 = vrot.slane %v2903_v33, 5 }
 0x27d   : > { %v2876_v45 = vsel %vm2710_vm9, %v2875_v40, %v2874_v41  ;;  %v2981_v37 = vsel %vm2698_vm5, %v2980_v32, %v2900_v36  ;;  %v2905_v39 = vld [vmem:[#allocation3 + $0xa1] sm:$0x1]  ;;  %v2986_v41 = vrot.slane %v2904_v35, 4 }
 0x27e   : > { %v2878_v47 = vsel %vm2713_vm10, %v2877_v43, %v2876_v45  ;;  %v2983_v40 = vsel %vm2701_vm6, %v2982_v34, %v2981_v37  ;;  %v2906_v43 = vld [vmem:[#allocation3 + $0xc1] sm:$0x1] }
 0x27f   : > { %v2880_v48 = vsel %vm2716_vm11, %v2879_v46, %v2878_v47  ;;  %v2985_v45 = vsel %vm2704_vm7, %v2984_v38, %v2983_v40  ;;  %v2988_v46 = vrot.slane %v2905_v39, 3  ;;  %v2907_v47 = vld [vmem:[#allocation3 + $0xe1] sm:$0x1] }
 0x280   : > { %v8977_v50 = vsel %vm2849_vm13, %v2880_v48, %v8852_v3  ;;  %v7994_v3 = vld [vmem:[%s8823_s24 + $0xe8] sm:$0xff]   ;;  %v2987_v48 = vsel %vm2707_vm8, %v2986_v41, %v2985_v45  ;;  %s4819_s24 = sadd.s32 16, %s8864_s1 }
 0x281   : > { %2916 = vrot.lane.b32.xlu1 %v8977_v50, %s8614_s12 }
 0x282   : > { %7697 = vmatpush3.bf16.xpose.msra.mxu0 %v7988_v27 }
 0x283   : > { %7717 = vmatpush3.bf16.xpose.msra.mxu1 %v7989_v31  ;;  %7698 = vmatprep.subr.bf16.mxu0 %v7990_v49 }
 0x284   : > { %7718 = vmatprep.subr.bf16.mxu1 %v7991_v52 }
 0x285   : > { %2922 = vrot.lane.b32.xlu1 %v8977_v50, %s8613_s10 }
 0x289   : > { %3018 = vperm.xlu1 %7835, %v3015_v54   ;;  %v2989_v54 = vsel %vm2710_vm9, %v2988_v46, %v2987_v48 }
 0x28a   : > { %7699 = vmatpush3.bf16.xpose.msra.mxu0 %v7990_v49  ;;  %v2990_v49 = vrot.slane %v2906_v43, 2 }
 0x28b   : > { %7719 = vmatpush3.bf16.xpose.msra.mxu1 %v7991_v52 }
 0x291   : > { %7701 = vmatmul.mubr.bf16.vlgmr.msra.gmra.mrb[28].mxu0 %v7994_v3  ;;  %v2992_v3 = vrot.slane %v2907_v47, 1 }
 0x292   : > { %7721 = vmatmul.mubr.bf16.vlgmr.msra.gmra.mrb[28].mxu1 %v7995_v55 }
 0x2a4   : > { %v7582_v56 = vpop.f32.mrb[16].mxu0 }
 0x2a5   : > { %2578 = vst [vmem:[#allocation3 + $0x110] sm:$0xff] %v7582_v56  ;;  %v7602_v57 = vpop.f32.mrb[16].mxu1  ;;  %v1766_v58 = vpop.f32.mrb[17].mxu0  ;;  %v2991_v56 = vsel %vm2713_vm10, %v2990_v49, %v2989_v54 }
 0x2a6   : > { %2582 = vst [vmem:[#allocation3 + $0x130] sm:$0xff] %v7602_v57  ;;  %2576 = vst [vmem:[#allocation3 + $0x100] sm:$0xff] %v1766_v58  ;;  %v1875_v15 = vpop.f32.mrb[17].mxu1  ;;  %v7583_v59 = vpop.f32.mrb[18].mxu0 }
 0x2a7   : > { %2580 = vst [vmem:[#allocation3 + $0x120] sm:$0xff] %v1875_v15  ;;  %2579 = vst [vmem:[#allocation3 + $0x118] sm:$0xff] %v7583_v59  ;;  %v7603_v60 = vpop.f32.mrb[18].mxu1  ;;  %v1769_v61 = vpop.f32.mrb[19].mxu0  ;;  %v2993_v15 = vsel %vm2716_vm11, %v2992_v3, %v2991_v56  ;;  %v2738_v56 = vld [vmem:[%s10683_s4 + $0x8] sm:$0xff] }
 0x2a8   : > { %2583 = vst [vmem:[#allocation3 + $0x138] sm:$0xff] %v7603_v60  ;;  %2577 = vst [vmem:[#allocation3 + $0x108] sm:$0xff] %v1769_v61  ;;  %v1878_v62 = vpop.f32.mrb[19].mxu1  ;;  %v9010_v61 = vstv %s3027_s14  ;;  %s5203_s14 = sadd.s32 19, %s8864_s1 }
 0x2a9   : > { %2581 = vst [vmem:[#allocation3 + $0x128] sm:$0xff] %v1878_v62 }
 0x2ad   : > { %v2625_v40 = vld [vmem:[#allocation3 + $0x100] sm:$0x1] }
 0x2e4   : > { %v7622_v51 = vpop.f32.mrb[20].mxu0 }
 0x2e5   : > { %2586 = vst [vmem:[#allocation3 + $0x150] sm:$0xff] %v7622_v51  ;;  %v7642_v0 = vpop.f32.mrb[20].mxu1  ;;  %v1984_v1 = vpop.f32.mrb[21].mxu0 }
 0x2e6   : > { %2590 = vst [vmem:[#allocation3 + $0x170] sm:$0xff] %v7642_v0  ;;  %2584 = vst [vmem:[#allocation3 + $0x140] sm:$0xff] %v1984_v1  ;;  %v2093_v2 = vpop.f32.mrb[21].mxu1  ;;  %v7623_v5 = vpop.f32.mrb[22].mxu0  ;;  %v9017_v1 = vld [vmem:[%s10685_s6] sm:$0xff] }
 0x2e7   : > { %2588 = vst [vmem:[#allocation3 + $0x160] sm:$0xff] %v2093_v2  ;;  %2587 = vst [vmem:[#allocation3 + $0x158] sm:$0xff] %v7623_v5  ;;  %v7643_v6 = vpop.f32.mrb[22].mxu1  ;;  %v1987_v9 = vpop.f32.mrb[23].mxu0  ;;  %vm3141_vm3 = vcmp.lt.s32.totalorder %v9010_v61, %v9017_v1 }
 0x2e8   : > { %2591 = vst [vmem:[#allocation3 + $0x178] sm:$0xff] %v7643_v6  ;;  %2585 = vst [vmem:[#allocation3 + $0x148] sm:$0xff] %v1987_v9  ;;  %v2096_v10 = vpop.f32.mrb[23].mxu1 }
 0x2e9   : > { %2589 = vst [vmem:[#allocation3 + $0x168] sm:$0xff] %v2096_v10  ;;  %v3143_v10 = vsel %vm3141_vm3, 1, %v8615_v17 }
 0x2ed   : > { %v2627_v30 = vld [vmem:[#allocation3 + $0x140] sm:$0x1] }
 0x2ee   : > { %v2628_v33 = vld [vmem:[#allocation3 + $0x160] sm:$0x1]  ;;  %v2720_v34 = vrot.slane %v2627_v30, 6 }
 0x2ef   : > { %v2722_v46 = vrot.slane %v2628_v33, 5 }
 0x2f3   : > { %v2917_v12 = vpop.permute.xlu1 %2916 }
 0x2f4   : > { %v2920_v14 = vadd.f32 %v2917_v12, %v8901_v44  ;;  %v9027_v12 = vld [vmem:[%s10681_s2 + $0x8] sm:$0xff] }
 0x2f7   : > { %v2923_v13 = vpop.permute.xlu1 %2922 }
 0x2f8   : > { %v2926_v18 = vadd.f32 %v2923_v13, %v8896_v42  ;;  %v9029_v13 = vld [vmem:[#allocation9 + $0x8] sm:$0xff] }
 0x2fa   : > { %v2928_v19 = vmax.f32 %v2920_v14, %v2926_v18  ;;  %vm2938_vm0 = vcmp.ge.f32.partialorder %v2920_v14, %v2926_v18 }
 0x2fc   : > { %v2930_v21 = vmax.f32 %v8977_v50, %v2928_v19  ;;  %vm2932_vm15 = vcmp.ge.f32.partialorder %v8977_v50, %v2928_v19 }
 0x2fd   : > { %v2934_v22 = vsel %vm2932_vm15, %v2920_v14, %v8977_v50  ;;  %vm2940_vm1 = vmor %vm2932_vm15, %vm2938_vm0  ;;  %vm2850_vm15 = vcmp.eq.s32.totalorder %v8992_v11, 1 }
 0x2fe   : > { %v2936_v16 = vsub.f32 %v2934_v22, %v2930_v21  ;;  %v2942_v20 = vsel %vm2940_vm1, %v2926_v18, %v2920_v14  ;;  %v2638_v14 = vadd.f32 %v8949_v7, %v9027_v12  ;;  %v2644_v18 = vadd.f32 %v8990_v63, %v9029_v13 }
 0x2ff   : > { %v2944_v23 = vsub.f32 %v2942_v20, %v2930_v21 }
 0x300   : > { %v2946_v25 = vmul.f32 1.442695, %v2936_v16  ;;  %v2646_v19 = vmax.f32 %v2638_v14, %v2644_v18  ;;  %vm2656_vm13 = vcmp.ge.f32.partialorder %v2638_v14, %v2644_v18 }
 0x301   : > { %v2952_v26 = vmul.f32 1.442695, %v2944_v23 }
 0x302   : > { %8002 = vpow2.f32 %v2946_v25 }
 0x303   : > { %8004 = vpow2.f32 %v2952_v26 }
 0x308   : > { %v3019_v57 = vpop.permute.xlu1 %3018 }
 0x309   : > { %vm3023_vm2 = vcmp.eq.s32.totalorder %v3019_v57, 1 }
 0x30c   : > { %v8003_v27 = vpop.eup %8002 }
 0x30d   : > { %v8005_v28 = vpop.eup %8004  ;;  %v2950_v29 = vadd.f32 1.0, %v8003_v27 }
 0x30f   : > { %v2956_v31 = vadd.f32 %v8005_v28, %v2950_v29  ;;  %v2626_v29 = vld [vmem:[#allocation3 + $0x120] sm:$0x1] }
 0x311   : > { %8006 = vlog2.f32 %v2956_v31  ;;  %v2718_v31 = vrot.slane %v2626_v29, 7 }
 0x313   : > { %v2719_v45 = vsel %vm2698_vm5, %v2718_v31, %v2625_v40 }
 0x314   : > { %v2721_v49 = vsel %vm2701_vm6, %v2720_v34, %v2719_v45 }
 0x315   : > { %v2723_v3 = vsel %vm2704_vm7, %v2722_v46, %v2721_v49 }
 0x31b   : > { %v8007_v52 = vpop.eup %8006 }
 0x31c   : > { %v2959_v55 = vmul.f32 0.6931472, %v8007_v52 }
 0x31e   : > { %v2962_v58 = vadd.f32 %v2959_v55, %v2930_v21  ;;  %v9035_v21 = vld [vmem:[#allocation2 + $0x8] sm:$0xff] }
 0x31f   : > { %vm2650_vm4 = vcmp.ge.f32.partialorder %v9035_v21, %v2646_v19  ;;  %v2648_v22 = vmax.f32 %v9035_v21, %v2646_v19 }
 0x320   : > { %v3010_v59 = vadd.f32 %v2993_v15, %v2962_v58  ;;  %v2652_v16 = vsel %vm2650_vm4, %v2638_v14, %v9035_v21  ;;  %vm2658_vm14 = vmor %vm2650_vm4, %vm2656_vm13 }
 0x321   : > { %v2654_v20 = vsub.f32 %v2652_v16, %v2648_v22  ;;  %v2660_v23 = vsel %vm2658_vm14, %v2644_v18, %v2638_v14  ;;  %v2751_v14 = vrot.slane %v2738_v56, 4  ;;  %v2752_v18 = vrot.slane %v2738_v56, 5 }
 0x322   : > { %v9008_v60 = vsel %vm3023_vm2, %v3010_v59, %v8977_v50  ;;  %v2662_v25 = vsub.f32 %v2660_v23, %v2648_v22  ;;  %v2779_v16 = vadd.f32 %v2738_v56, %v2625_v40  ;;  %v2753_v23 = vrot.slane %v2738_v56, 6 }
 0x323   : > { %3044 = vrot.lane.b32.xlu1 %v9008_v60, %s8614_s12  ;;  %v2665_v26 = vmul.f32 1.442695, %v2654_v20 }
 0x324   : > { %v7662_v62 = vpop.f32.mrb[24].mxu0  ;;  %v2671_v7 = vmul.f32 1.442695, %v2662_v25  ;;  %v2754_v25 = vrot.slane %v2738_v56, 7 }
 0x325   : > { %2594 = vst [vmem:[#allocation3 + $0x190] sm:$0xff] %v7662_v62  ;;  %v7682_v51 = vpop.f32.mrb[24].mxu1  ;;  %v2202_v0 = vpop.f32.mrb[25].mxu0  ;;  %8008 = vpow2.f32 %v2665_v26 }
 0x326   : > { %2598 = vst [vmem:[#allocation3 + $0x1b0] sm:$0xff] %v7682_v51  ;;  %2592 = vst [vmem:[#allocation3 + $0x180] sm:$0xff] %v2202_v0  ;;  %v2311_v50 = vpop.f32.mrb[25].mxu1  ;;  %v7663_v2 = vpop.f32.mrb[26].mxu0  ;;  %8010 = vpow2.f32 %v2671_v7  ;;  %v2748_v51 = vrot.slane %v2738_v56, 1 }
 0x327   : > { %2596 = vst [vmem:[#allocation3 + $0x1a0] sm:$0xff] %v2311_v50  ;;  %2595 = vst [vmem:[#allocation3 + $0x198] sm:$0xff] %v7663_v2  ;;  %v7683_v5 = vpop.f32.mrb[26].mxu1  ;;  %3050 = vrot.lane.b32.xlu1 %v9008_v60, %s8613_s10  ;;  %v2205_v6 = vpop.f32.mrb[27].mxu0  ;;  %v2749_v2 = vrot.slane %v2738_v56, 2 }
 0x328   : > { %2599 = vst [vmem:[#allocation3 + $0x1b8] sm:$0xff] %v7683_v5  ;;  %v2314_v9 = vpop.f32.mrb[27].mxu1  ;;  %2593 = vst [vmem:[#allocation3 + $0x188] sm:$0xff] %v2205_v6  ;;  %v2750_v5 = vrot.slane %v2738_v56, 3  ;;  %v2780_v20 = vadd.f32 %v2748_v51, %v2626_v29 }
 0x329   : > { %2597 = vst [vmem:[#allocation3 + $0x1a8] sm:$0xff] %v2314_v9  ;;  %v2781_v26 = vadd.f32 %v2749_v2, %v2627_v30 }
 0x32a   : > { %v2782_v7 = vadd.f32 %v2750_v5, %v2628_v33 }
 0x32b   : > { %3146 = vperm.xlu1 %7835, %v3143_v10  }
 0x32d   : > { %v2629_v37 = vld [vmem:[#allocation3 + $0x180] sm:$0x1] }
 0x32e   : > { %v2630_v48 = vld [vmem:[#allocation3 + $0x1a0] sm:$0x1]  ;;  %v2724_v52 = vrot.slane %v2629_v37, 4  ;;  %v2783_v31 = vadd.f32 %v2751_v14, %v2629_v37 }
 0x32f   : > { %v8009_v27 = vpop.eup %8008  ;;  %v2726_v55 = vrot.slane %v2630_v48, 3 }
 0x330   : > { %v2668_v63 = vadd.f32 1.0, %v8009_v27  ;;  %v8011_v24 = vpop.eup %8010  ;;  %v2725_v58 = vsel %vm2707_vm8, %v2724_v52, %v2723_v3 }
 0x331   : > { %v2727_v0 = vsel %vm2710_vm9, %v2726_v55, %v2725_v58 }
 0x332   : > { %v2674_v28 = vadd.f32 %v8011_v24, %v2668_v63 }
 0x334   : > { %8012 = vlog2.f32 %v2674_v28 }
 0x33e   : > { %v8013_v54 = vpop.eup %8012 }
 0x33f   : > { %v2678_v57 = vmul.f32 0.6931472, %v8013_v54 }
 0x341   : > { %v2680_v6 = vadd.f32 %v2678_v57, %v2648_v22 }
 0x364   : > { %v7702_v32 = vpop.f32.mrb[28].mxu0 }
 0x365   : > { %2602 = vst [vmem:[#allocation3 + $0x1d0] sm:$0xff] %v7702_v32  ;;  %v7722_v35 = vpop.f32.mrb[28].mxu1  ;;  %v2420_v36 = vpop.f32.mrb[29].mxu0  ;;  %v2784_v32 = vadd.f32 %v2752_v18, %v2630_v48 }
 0x366   : > { %2606 = vst [vmem:[#allocation3 + $0x1f0] sm:$0xff] %v7722_v35  ;;  %2600 = vst [vmem:[#allocation3 + $0x1c0] sm:$0xff] %v2420_v36  ;;  %v2529_v38 = vpop.f32.mrb[29].mxu1  ;;  %v7703_v39 = vpop.f32.mrb[30].mxu0 }
 0x367   : > { %2604 = vst [vmem:[#allocation3 + $0x1e0] sm:$0xff] %v2529_v38  ;;  %2603 = vst [vmem:[#allocation3 + $0x1d8] sm:$0xff] %v7703_v39  ;;  %v7723_v41 = vpop.f32.mrb[30].mxu1  ;;  %v2423_v43 = vpop.f32.mrb[31].mxu0 }
 0x368   : > { %2607 = vst [vmem:[#allocation3 + $0x1f8] sm:$0xff] %v7723_v41  ;;  %2601 = vst [vmem:[#allocation3 + $0x1c8] sm:$0xff] %v2423_v43  ;;  %v2532_v47 = vpop.f32.mrb[31].mxu1 }
 0x369   : > { %2605 = vst [vmem:[#allocation3 + $0x1e8] sm:$0xff] %v2532_v47 }
 0x36d   : > { %v2631_v15 = vld [vmem:[#allocation3 + $0x1c0] sm:$0x1] }
 0x36e   : > { %v2632_v59 = vld [vmem:[#allocation3 + $0x1e0] sm:$0x1]  ;;  %v2728_v62 = vrot.slane %v2631_v15, 2  ;;  %v2785_v30 = vadd.f32 %v2753_v23, %v2631_v15  ;;  %v3031_v23 = vld [vmem:[#allocation3 + $0x62] sm:$0x1] }
 0x36f   : > { %v2730_v50 = vrot.slane %v2632_v59, 1  ;;  %v2786_v40 = vadd.f32 %v2754_v25, %v2632_v59 }
 0x370   : > { %v2729_v9 = vsel %vm2713_vm10, %v2728_v62, %v2727_v0 }
 0x371   : > { %v2731_v10 = vsel %vm2716_vm11, %v2730_v50, %v2729_v9 }
 0x372   : > { %v2735_v19 = vadd.f32 %v2731_v10, %v2680_v6 }
 0x374   : > { %v2799_v27 = vrot.slane %v2735_v19, 1  ;;  %v2800_v63 = vrot.slane %v2735_v19, 2  ;;  %v2801_v24 = vrot.slane %v2735_v19, 3  ;;  %v2802_v28 = vrot.slane %v2735_v19, 4 }
 0x375   : > { %v2803_v22 = vrot.slane %v2735_v19, 5  ;;  %v2804_v34 = vrot.slane %v2735_v19, 6  ;;  %v2805_v35 = vrot.slane %v2735_v19, 7  ;;  %v2830_v37 = vsel %vm8943_vm12, %v2779_v16, %v2735_v19  ;;  %v3030_v19 = vld [vmem:[#allocation3 + $0x42] sm:$0x1] }
 0x376   : > { %v2831_v36 = vsel %vm8943_vm12, %v2780_v20, %v2799_v27  ;;  %v2832_v38 = vsel %vm8943_vm12, %v2781_v26, %v2800_v63  ;;  %v2833_v29 = vsel %vm8943_vm12, %v2782_v7, %v2801_v24  ;;  %v2834_v33 = vsel %vm8943_vm12, %v2783_v31, %v2802_v28  ;;  %v3032_v26 = vld [vmem:[#allocation3 + $0x82] sm:$0x1] }
 0x377   : > { %v2881_v39 = vrot.slane %v2831_v36, 7  ;;  %v2835_v41 = vsel %vm8943_vm12, %v2784_v32, %v2803_v22  ;;  %v2883_v43 = vrot.slane %v2832_v38, 6  ;;  %v2836_v45 = vsel %vm8943_vm12, %v2785_v30, %v2804_v34  ;;  %v3028_v7 = vld [vmem:[#allocation3 + $0x2] sm:$0x1] }
 0x378   : > { %v2885_v47 = vrot.slane %v2833_v29, 5  ;;  %v2837_v48 = vsel %vm8943_vm12, %v2786_v40, %v2805_v35  ;;  %v2887_v52 = vrot.slane %v2834_v33, 4  ;;  %v2889_v3 = vrot.slane %v2835_v41, 3  ;;  %v3033_v24 = vld [vmem:[#allocation3 + $0xa2] sm:$0x1] }
 0x379   : > { %v2882_v46 = vsel %vm2698_vm5, %v2881_v39, %v2830_v37  ;;  %v2891_v56 = vrot.slane %v2836_v45, 2  ;;  %v2893_v58 = vrot.slane %v2837_v48, 1  ;;  %vm3014_vm12 = vcmp.lt.s32.totalorder %v8979_v53, %v8886_v8  ;;  %v3034_v32 = vld [vmem:[#allocation3 + $0xc2] sm:$0x1] }
 0x37a   : > { %v2884_v49 = vsel %vm2701_vm6, %v2883_v43, %v2882_v46  ;;  %v3016_v11 = vsel %vm3014_vm12, 1, %v8615_v17  ;;  %v3110_v25 = vrot.slane %v3030_v19, 6  ;;  %v3112_v63 = vrot.slane %v3031_v23, 5  ;;  %v3035_v35 = vld [vmem:[#allocation3 + $0xe2] sm:$0x1] }
 0x37b   : > { %v2886_v54 = vsel %vm2704_vm7, %v2885_v47, %v2884_v49  ;;  %v3114_v31 = vrot.slane %v3032_v26, 4  ;;  %v3116_v34 = vrot.slane %v3033_v24, 3  ;;  %v3118_v38 = vrot.slane %v3034_v32, 2  ;;  %v2914_v19 = vld [vmem:[#allocation3 + $0x1c1] sm:$0x1] }
 0x37c   : > { %v2888_v55 = vsel %vm2707_vm8, %v2887_v52, %v2886_v54  ;;  %v3120_v33 = vrot.slane %v3035_v35, 1  ;;  %v9100_v47 = vstv %s3155_s13  ;;  %v2915_v23 = vld [vmem:[#allocation3 + $0x1e1] sm:$0x1]  ;;  %v3004_v26 = vrot.slane %v2914_v19, 2  ;;  %s5587_s13 = sadd.s32 22, %s8864_s1 }
 0x37d   : > { %v2890_v57 = vsel %vm2710_vm9, %v2889_v3, %v2888_v55  ;;  %vm3269_vm4 = vcmp.lt.s32.totalorder %v9100_v47, %v9017_v1 }
 0x37e   : > { %v2892_v15 = vsel %vm2713_vm10, %v2891_v56, %v2890_v57  ;;  %v3271_v48 = vsel %vm3269_vm4, 1, %v8615_v17 }
 0x37f   : > { %v2894_v59 = vsel %vm2716_vm11, %v2893_v58, %v2892_v15 }
 0x380   : > { %v9075_v4 = vsel %vm2850_vm15, %v2894_v59, %v9035_v21 }
 0x381   : > { %2918 = vrot.lane.b32.xlu0 %v9075_v4, %s8614_s12 }
 0x385   : > { %2924 = vrot.lane.b32.xlu0 %v9075_v4, %s8613_s10 }
 0x389   : > { %3021 = vperm.xlu0 %7834, %v3016_v11  }
 0x395   : > { %v3045_v62 = vpop.permute.xlu1 %3044 }
 0x396   : > { %v3048_v0 = vadd.f32 %v3045_v62, %v8901_v44  ;;  %v3029_v44 = vld [vmem:[#allocation3 + $0x22] sm:$0x1] }
 0x397   : > { %v3108_v20 = vrot.slane %v3029_v44, 7  ;;  %v2913_v44 = vld [vmem:[#allocation3 + $0x1a1] sm:$0x1] }
 0x399   : > { %v3051_v51 = vpop.permute.xlu1 %3050  ;;  %v3109_v27 = vsel %vm2698_vm5, %v3108_v20, %v3028_v7  ;;  %v3002_v20 = vrot.slane %v2913_v44, 3 }
 0x39a   : > { %v3054_v50 = vadd.f32 %v3051_v51, %v8896_v42  ;;  %v3111_v28 = vsel %vm2701_vm6, %v3110_v25, %v3109_v27  ;;  %v2909_v51 = vld [vmem:[#allocation3 + $0x121] sm:$0x1] }
 0x39b   : > { %v3113_v22 = vsel %vm2704_vm7, %v3112_v63, %v3111_v28  ;;  %v3006_v63 = vrot.slane %v2915_v23, 1 }
 0x39c   : > { %v3056_v21 = vmax.f32 %v3048_v0, %v3054_v50  ;;  %vm3066_vm1 = vcmp.ge.f32.partialorder %v3048_v0, %v3054_v50  ;;  %v3115_v36 = vsel %vm2707_vm8, %v3114_v31, %v3113_v22 }
 0x39d   : > { %v3117_v30 = vsel %vm2710_vm9, %v3116_v34, %v3115_v36  ;;  %v9129_v36 = vld [vmem:[%s10685_s6 + $0x8] sm:$0xff] }
 0x39e   : > { %v3058_v2 = vmax.f32 %v9008_v60, %v3056_v21  ;;  %vm3060_vm0 = vcmp.ge.f32.partialorder %v9008_v60, %v3056_v21  ;;  %v3119_v40 = vsel %vm2713_vm10, %v3118_v38, %v3117_v30  ;;  %v2910_v21 = vld [vmem:[#allocation3 + $0x141] sm:$0x1]  ;;  %v9139_v30 = vld [vmem:[%s10681_s2] sm:$0xff] }
 0x39f   : > { %v3062_v8 = vsel %vm3060_vm0, %v3048_v0, %v9008_v60  ;;  %vm3068_vm2 = vmor %vm3060_vm0, %vm3066_vm1  ;;  %v3121_v43 = vsel %vm2716_vm11, %v3120_v33, %v3119_v40  ;;  %vm3142_vm0 = vcmp.lt.s32.totalorder %v9010_v61, %v9129_v36 }
 0x3a0   : > { %v3064_v53 = vsub.f32 %v3062_v8, %v3058_v2  ;;  %v3070_v5 = vsel %vm3068_vm2, %v3054_v50, %v3048_v0  ;;  %v2994_v8 = vrot.slane %v2909_v51, 7  ;;  %v3144_v38 = vsel %vm3142_vm0, 1, %v8615_v17 }
 0x3a1   : > { %v3072_v6 = vsub.f32 %v3070_v5, %v3058_v2  ;;  %v2996_v5 = vrot.slane %v2910_v21, 6 }
 0x3a2   : > { %v3074_v9 = vmul.f32 1.442695, %v3064_v53  ;;  %v2911_v53 = vld [vmem:[#allocation3 + $0x161] sm:$0x1] }
 0x3a3   : > { %v3080_v10 = vmul.f32 1.442695, %v3072_v6  ;;  %v2912_v6 = vld [vmem:[#allocation3 + $0x181] sm:$0x1] }
 0x3a4   : > { %8014 = vpow2.f32 %v3074_v9  ;;  %v2908_v9 = vld [vmem:[#allocation3 + $0x101] sm:$0x1] }
 0x3a5   : > { %8016 = vpow2.f32 %v3080_v10  ;;  %v2995_v10 = vsel %vm2698_vm5, %v2994_v8, %v2908_v9  ;;  %v3162_v8 = vld [vmem:[#allocation3 + $0xc3] sm:$0x1] }
 0x3aa   : > { %v3147_v41 = vpop.permute.xlu1 %3146 }
 0x3ab   : > { %vm3151_vm3 = vcmp.eq.s32.totalorder %v3147_v41, 1 }
 0x3ae   : > { %v8015_v14 = vpop.eup %8014 }
 0x3af   : > { %v8017_v18 = vpop.eup %8016  ;;  %v3078_v42 = vadd.f32 1.0, %v8015_v14  ;;  %v2998_v14 = vrot.slane %v2911_v53, 5 }
 0x3b1   : > { %v3084_v16 = vadd.f32 %v8017_v18, %v3078_v42  ;;  %v2997_v18 = vsel %vm2701_vm6, %v2996_v5, %v2995_v10  ;;  %v3000_v42 = vrot.slane %v2912_v6, 4  ;;  %v3163_v6 = vld [vmem:[#allocation3 + $0xe3] sm:$0x1]  ;;  %v3246_v10 = vrot.slane %v3162_v8, 2 }
 0x3b3   : > { %8018 = vlog2.f32 %v3084_v16  ;;  %v2999_v16 = vsel %vm2704_vm7, %v2998_v14, %v2997_v18  ;;  %v3248_v18 = vrot.slane %v3163_v6, 1 }
 0x3b4   : > { %v3001_v25 = vsel %vm2707_vm8, %v3000_v42, %v2999_v16 }
 0x3b5   : > { %v3003_v27 = vsel %vm2710_vm9, %v3002_v20, %v3001_v25 }
 0x3b6   : > { %v3005_v28 = vsel %vm2713_vm10, %v3004_v26, %v3003_v27 }
 0x3b7   : > { %v3007_v22 = vsel %vm2716_vm11, %v3006_v63, %v3005_v28 }
 0x3bd   : > { %v8019_v29 = vpop.eup %8018 }
 0x3be   : > { %v3087_v39 = vmul.f32 0.6931472, %v8019_v29 }
 0x3c0   : > { %v3090_v37 = vadd.f32 %v3087_v39, %v3058_v2  ;;  %v9142_v39 = vld [vmem:[#allocation9] sm:$0xff] }
 0x3c2   : > { %v3138_v45 = vadd.f32 %v3121_v43, %v3090_v37 }
 0x3c4   : > { %v9098_v46 = vsel %vm3151_vm3, %v3138_v45, %v9008_v60 }
 0x3c5   : > { %3172 = vrot.lane.b32.xlu1 %v9098_v46, %s8614_s12 }
 0x3c9   : > { %3178 = vrot.lane.b32.xlu1 %v9098_v46, %s8613_s10 }
 0x3cd   : > { %3274 = vperm.xlu1 %7835, %v3271_v48  }
 0x3f3   : > { %v2919_v49 = vpop.permute.xlu0 %2918 }
 0x3f4   : > { %v2921_v54 = vadd.f32 %v2919_v49, %v9027_v12 }
 0x3f7   : > { %v2925_v52 = vpop.permute.xlu0 %2924 }
 0x3f8   : > { %v2927_v60 = vadd.f32 %v2925_v52, %v9029_v13 }
 0x3fa   : > { %v2929_v3 = vmax.f32 %v2921_v54, %v2927_v60  ;;  %vm2939_vm14 = vcmp.ge.f32.partialorder %v2921_v54, %v2927_v60 }
 0x3fc   : > { %v2931_v55 = vmax.f32 %v9075_v4, %v2929_v3  ;;  %vm2933_vm13 = vcmp.ge.f32.partialorder %v9075_v4, %v2929_v3 }
 0x3fd   : > { %v2935_v56 = vsel %vm2933_vm13, %v2921_v54, %v9075_v4  ;;  %vm2941_vm15 = vmor %vm2933_vm13, %vm2939_vm14 }
 0x3fe   : > { %v2937_v57 = vsub.f32 %v2935_v56, %v2931_v55  ;;  %v2943_v58 = vsel %vm2941_vm15, %v2927_v60, %v2921_v54  ;;  %v3157_v60 = vld [vmem:[#allocation3 + $0x23] sm:$0x1] }
 0x3ff   : > { %v2945_v15 = vsub.f32 %v2943_v58, %v2931_v55  ;;  %v3158_v56 = vld [vmem:[#allocation3 + $0x43] sm:$0x1]  ;;  %v3236_v58 = vrot.slane %v3157_v60, 7  ;;  %v3036_v60 = vld [vmem:[#allocation3 + $0x102] sm:$0x1] }
 0x400   : > { %v2948_v59 = vmul.f32 1.442695, %v2937_v57 }
 0x401   : > { %v2954_v11 = vmul.f32 1.442695, %v2945_v15  ;;  %v3159_v15 = vld [vmem:[#allocation3 + $0x63] sm:$0x1] }
 0x402   : > { %8020 = vpow2.f32 %v2948_v59  ;;  %v3238_v59 = vrot.slane %v3158_v56, 6  ;;  %v3041_v56 = vld [vmem:[#allocation3 + $0x1a2] sm:$0x1] }
 0x403   : > { %8022 = vpow2.f32 %v2954_v11  ;;  %v3160_v11 = vld [vmem:[#allocation3 + $0x83] sm:$0x1] }
 0x408   : > { %v3022_v32 = vpop.permute.xlu0 %3021 }
 0x409   : > { %vm3024_vm12 = vcmp.eq.s32.totalorder %v3022_v32, 1 }
 0x40c   : > { %v8021_v62 = vpop.eup %8020 }
 0x40d   : > { %v8023_v0 = vpop.eup %8022  ;;  %v2951_v50 = vadd.f32 1.0, %v8021_v62  ;;  %v3156_v62 = vld [vmem:[#allocation3 + $0x3] sm:$0x1] }
 0x40e   : > { %v3237_v51 = vsel %vm2698_vm5, %v3236_v58, %v3156_v62  ;;  %v3043_v62 = vld [vmem:[#allocation3 + $0x1e2] sm:$0x1] }
 0x40f   : > { %v2957_v2 = vadd.f32 %v8023_v0, %v2951_v50  ;;  %v3240_v0 = vrot.slane %v3159_v15, 5  ;;  %v3161_v50 = vld [vmem:[#allocation3 + $0xa3] sm:$0x1]  ;;  %v3239_v21 = vsel %vm2701_vm6, %v3238_v59, %v3237_v51  ;;  %v3042_v15 = vld [vmem:[#allocation3 + $0x1c2] sm:$0x1] }
 0x410   : > { %v3244_v5 = vrot.slane %v3161_v50, 3 }
 0x411   : > { %8024 = vlog2.f32 %v2957_v2  ;;  %v3242_v2 = vrot.slane %v3160_v11, 4  ;;  %v3241_v53 = vsel %vm2704_vm7, %v3240_v0, %v3239_v21  ;;  %v3130_v11 = vrot.slane %v3041_v56, 3 }
 0x412   : > { %v3132_v0 = vrot.slane %v3042_v15, 2 }
 0x413   : > { %v3243_v9 = vsel %vm2707_vm8, %v3242_v2, %v3241_v53  ;;  %v3134_v2 = vrot.slane %v3043_v62, 1 }
 0x414   : > { %v3245_v44 = vsel %vm2710_vm9, %v3244_v5, %v3243_v9 }
 0x415   : > { %v3247_v19 = vsel %vm2713_vm10, %v3246_v10, %v3245_v44 }
 0x416   : > { %v3249_v23 = vsel %vm2716_vm11, %v3248_v18, %v3247_v19 }
 0x41b   : > { %v8025_v7 = vpop.eup %8024 }
 0x41c   : > { %v2961_v24 = vmul.f32 0.6931472, %v8025_v7  ;;  %v9159_v7 = vstv %s3283_s19  ;;  %s5075_s19 = sadd.s32 18, %s8864_s1 }
 0x41d   : > { %vm3397_vm13 = vcmp.lt.s32.totalorder %v9159_v7, %v9017_v1 }
 0x41e   : > { %v2963_v31 = vadd.f32 %v2961_v24, %v2931_v55  ;;  %v3399_v27 = vsel %vm3397_vm13, 1, %v8615_v17 }
 0x420   : > { %v3011_v34 = vadd.f32 %v3007_v22, %v2963_v31 }
 0x422   : > { %v9122_v35 = vsel %vm3024_vm12, %v3011_v34, %v9075_v4 }
 0x423   : > { %3046 = vrot.lane.b32.xlu0 %v9122_v35, %s8614_s12 }
 0x427   : > { %3052 = vrot.lane.b32.xlu0 %v9122_v35, %s8613_s10 }
 0x42b   : > { %3149 = vperm.xlu0 %7834, %v3144_v38  }
 0x437   : > { %v3173_v29 = vpop.permute.xlu1 %3172 }
 0x438   : > { %v3176_v33 = vadd.f32 %v9139_v30, %v3173_v29 }
 0x43b   : > { %v3179_v4 = vpop.permute.xlu1 %3178 }
 0x43c   : > { %v3182_v40 = vadd.f32 %v9142_v39, %v3179_v4 }
 0x43e   : > { %v3184_v61 = vmax.f32 %v3176_v33, %v3182_v40  ;;  %vm3194_vm2 = vcmp.ge.f32.partialorder %v3176_v33, %v3182_v40 }
 0x440   : > { %v3186_v37 = vmax.f32 %v9098_v46, %v3184_v61  ;;  %vm3188_vm1 = vcmp.ge.f32.partialorder %v9098_v46, %v3184_v61  ;;  %v3037_v61 = vld [vmem:[#allocation3 + $0x122] sm:$0x1] }
 0x441   : > { %v3190_v41 = vsel %vm3188_vm1, %v3176_v33, %v9098_v46  ;;  %vm3196_vm3 = vmor %vm3188_vm1, %vm3194_vm2  ;;  %vm3270_vm1 = vcmp.lt.s32.totalorder %v9100_v47, %v9129_v36 }
 0x442   : > { %v3192_v43 = vsub.f32 %v3190_v41, %v3186_v37  ;;  %v3198_v45 = vsel %vm3196_vm3, %v3182_v40, %v3176_v33  ;;  %v3272_v44 = vsel %vm3270_vm1, 1, %v8615_v17 }
 0x443   : > { %v3200_v48 = vsub.f32 %v3198_v45, %v3186_v37 }
 0x444   : > { %v3202_v49 = vmul.f32 1.442695, %v3192_v43  ;;  %v3038_v43 = vld [vmem:[#allocation3 + $0x142] sm:$0x1] }
 0x445   : > { %v3208_v52 = vmul.f32 1.442695, %v3200_v48  ;;  %v3122_v48 = vrot.slane %v3037_v61, 7 }
 0x446   : > { %8026 = vpow2.f32 %v3202_v49  ;;  %v3039_v49 = vld [vmem:[#allocation3 + $0x162] sm:$0x1] }
 0x447   : > { %8028 = vpow2.f32 %v3208_v52  ;;  %v3124_v52 = vrot.slane %v3038_v43, 6 }
 0x44c   : > { %v3275_v20 = vpop.permute.xlu1 %3274 }
 0x44d   : > { %vm3279_vm4 = vcmp.eq.s32.totalorder %v3275_v20, 1 }
 0x450   : > { %v8027_v54 = vpop.eup %8026 }
 0x451   : > { %v8029_v3 = vpop.eup %8028  ;;  %v3206_v55 = vadd.f32 1.0, %v8027_v54  ;;  %v3040_v54 = vld [vmem:[#allocation3 + $0x182] sm:$0x1] }
 0x452   : > { %v3128_v58 = vrot.slane %v3040_v54, 4  ;;  %v3291_v54 = vld [vmem:[#allocation3 + $0xe4] sm:$0x1] }
 0x453   : > { %v3212_v57 = vadd.f32 %v8029_v3, %v3206_v55  ;;  %v3123_v3 = vsel %vm2698_vm5, %v3122_v48, %v3036_v60  ;;  %v3126_v55 = vrot.slane %v3039_v49, 5  ;;  %v3290_v48 = vld [vmem:[#allocation3 + $0xc4] sm:$0x1] }
 0x455   : > { %8030 = vlog2.f32 %v3212_v57  ;;  %v3125_v57 = vsel %vm2701_vm6, %v3124_v52, %v3123_v3  ;;  %v3374_v3 = vrot.slane %v3290_v48, 2 }
 0x456   : > { %v3127_v59 = vsel %vm2704_vm7, %v3126_v55, %v3125_v57  ;;  %v3376_v57 = vrot.slane %v3291_v54, 1 }
 0x457   : > { %v3129_v51 = vsel %vm2707_vm8, %v3128_v58, %v3127_v59 }
 0x458   : > { %v3131_v21 = vsel %vm2710_vm9, %v3130_v11, %v3129_v51 }
 0x459   : > { %v3133_v53 = vsel %vm2713_vm10, %v3132_v0, %v3131_v21 }
 0x45a   : > { %v3135_v9 = vsel %vm2716_vm11, %v3134_v2, %v3133_v53 }
 0x45f   : > { %v8031_v14 = vpop.eup %8030 }
 0x460   : > { %v3215_v42 = vmul.f32 0.6931472, %v8031_v14 }
 0x462   : > { %v3218_v16 = vadd.f32 %v3215_v42, %v3186_v37 }
 0x464   : > { %v3266_v25 = vadd.f32 %v3249_v23, %v3218_v16 }
 0x466   : > { %v9157_v26 = vsel %vm3279_vm4, %v3266_v25, %v9098_v46 }
 0x467   : > { %3300 = vrot.lane.b32.xlu1 %v9157_v26, %s8614_s12 }
 0x46b   : > { %3306 = vrot.lane.b32.xlu1 %v9157_v26, %s8613_s10 }
 0x46f   : > { %3402 = vperm.xlu1 %7835, %v3399_v27  }
 0x495   : > { %v3047_v63 = vpop.permute.xlu0 %3046 }
 0x496   : > { %v3049_v28 = vadd.f32 %v3047_v63, %v9027_v12 }
 0x499   : > { %v3053_v24 = vpop.permute.xlu0 %3052 }
 0x49a   : > { %v3055_v46 = vadd.f32 %v3053_v24, %v9029_v13 }
 0x49c   : > { %v3057_v31 = vmax.f32 %v3049_v28, %v3055_v46  ;;  %vm3067_vm15 = vcmp.ge.f32.partialorder %v3049_v28, %v3055_v46 }
 0x49e   : > { %v3059_v32 = vmax.f32 %v9122_v35, %v3057_v31  ;;  %vm3061_vm14 = vcmp.ge.f32.partialorder %v9122_v35, %v3057_v31 }
 0x49f   : > { %v3063_v22 = vsel %vm3061_vm14, %v3049_v28, %v9122_v35  ;;  %vm3069_vm12 = vmor %vm3061_vm14, %vm3067_vm15 }
 0x4a0   : > { %v3065_v34 = vsub.f32 %v3063_v22, %v3059_v32  ;;  %v3071_v38 = vsel %vm3069_vm12, %v3055_v46, %v3049_v28  ;;  %v3285_v46 = vld [vmem:[#allocation3 + $0x24] sm:$0x1] }
 0x4a1   : > { %v3073_v29 = vsub.f32 %v3071_v38, %v3059_v32  ;;  %v3286_v22 = vld [vmem:[#allocation3 + $0x44] sm:$0x1]  ;;  %v3364_v38 = vrot.slane %v3285_v46, 7  ;;  %v3169_v46 = vld [vmem:[#allocation3 + $0x1a3] sm:$0x1] }
 0x4a2   : > { %v3076_v4 = vmul.f32 1.442695, %v3065_v34 }
 0x4a3   : > { %v3082_v33 = vmul.f32 1.442695, %v3073_v29  ;;  %v3287_v29 = vld [vmem:[#allocation3 + $0x64] sm:$0x1] }
 0x4a4   : > { %8032 = vpow2.f32 %v3076_v4  ;;  %v3366_v4 = vrot.slane %v3286_v22, 6  ;;  %v3170_v22 = vld [vmem:[#allocation3 + $0x1c3] sm:$0x1] }
 0x4a5   : > { %8034 = vpow2.f32 %v3082_v33  ;;  %v3288_v33 = vld [vmem:[#allocation3 + $0x84] sm:$0x1] }
 0x4aa   : > { %v3150_v6 = vpop.permute.xlu0 %3149 }
 0x4ab   : > { %vm3152_vm0 = vcmp.eq.s32.totalorder %v3150_v6, 1 }
 0x4ae   : > { %v8033_v40 = vpop.eup %8032 }
 0x4af   : > { %v8035_v37 = vpop.eup %8034  ;;  %v3079_v41 = vadd.f32 1.0, %v8033_v40  ;;  %v3284_v40 = vld [vmem:[#allocation3 + $0x4] sm:$0x1] }
 0x4b0   : > { %v3365_v61 = vsel %vm2698_vm5, %v3364_v38, %v3284_v40  ;;  %v3258_v38 = vrot.slane %v3169_v46, 3 }
 0x4b1   : > { %v3085_v45 = vadd.f32 %v8035_v37, %v3079_v41  ;;  %v3368_v37 = vrot.slane %v3287_v29, 5  ;;  %v3289_v41 = vld [vmem:[#allocation3 + $0xa4] sm:$0x1]  ;;  %v3367_v43 = vsel %vm2701_vm6, %v3366_v4, %v3365_v61  ;;  %v3171_v29 = vld [vmem:[#allocation3 + $0x1e3] sm:$0x1] }
 0x4b2   : > { %v3372_v52 = vrot.slane %v3289_v41, 3 }
 0x4b3   : > { %8036 = vlog2.f32 %v3085_v45  ;;  %v3370_v45 = vrot.slane %v3288_v33, 4  ;;  %v3369_v49 = vsel %vm2704_vm7, %v3368_v37, %v3367_v43  ;;  %v3260_v33 = vrot.slane %v3170_v22, 2 }
 0x4b4   : > { %v3262_v37 = vrot.slane %v3171_v29, 1  ;;  %v9253_v29 = vstv %s3539_s17  ;;  %s5971_s17 = sadd.s32 25, %s8864_s1 }
 0x4b5   : > { %v3371_v60 = vsel %vm2707_vm8, %v3370_v45, %v3369_v49 }
 0x4b6   : > { %v3373_v56 = vsel %vm2710_vm9, %v3372_v52, %v3371_v60 }
 0x4b7   : > { %v3375_v15 = vsel %vm2713_vm10, %v3374_v3, %v3373_v56 }
 0x4b8   : > { %v3377_v62 = vsel %vm2716_vm11, %v3376_v57, %v3375_v15 }
 0x4bd   : > { %v8037_v50 = vpop.eup %8036 }
 0x4be   : > { %v3089_v8 = vmul.f32 0.6931472, %v8037_v50  ;;  %v9206_v50 = vstv %s3411_s21  ;;  %s5843_s21 = sadd.s32 24, %s8864_s1 }
 0x4bf   : > { %vm3525_vm14 = vcmp.lt.s32.totalorder %v9206_v50, %v9017_v1 }
 0x4c0   : > { %v3091_v5 = vadd.f32 %v3089_v8, %v3059_v32  ;;  %v3527_v21 = vsel %vm3525_vm14, 1, %v8615_v17 }
 0x4c2   : > { %v3139_v10 = vadd.f32 %v3135_v9, %v3091_v5 }
 0x4c4   : > { %v9181_v14 = vsel %vm3152_vm0, %v3139_v10, %v9122_v35 }
 0x4c5   : > { %3174 = vrot.lane.b32.xlu0 %v9181_v14, %s8614_s12 }
 0x4c9   : > { %3180 = vrot.lane.b32.xlu0 %v9181_v14, %s8613_s10 }
 0x4cd   : > { %3277 = vperm.xlu0 %7834, %v3272_v44  }
 0x4d9   : > { %v3301_v18 = vpop.permute.xlu1 %3300 }
 0x4da   : > { %v3304_v19 = vadd.f32 %v9139_v30, %v3301_v18 }
 0x4dd   : > { %v3307_v42 = vpop.permute.xlu1 %3306 }
 0x4de   : > { %v3310_v16 = vadd.f32 %v9142_v39, %v3307_v42 }
 0x4e0   : > { %v3312_v35 = vmax.f32 %v3304_v19, %v3310_v16  ;;  %vm3322_vm3 = vcmp.ge.f32.partialorder %v3304_v19, %v3310_v16 }
 0x4e2   : > { %v3314_v20 = vmax.f32 %v9157_v26, %v3312_v35  ;;  %vm3316_vm2 = vcmp.ge.f32.partialorder %v9157_v26, %v3312_v35  ;;  %v3166_v35 = vld [vmem:[#allocation3 + $0x143] sm:$0x1] }
 0x4e3   : > { %v3318_v47 = vsel %vm3316_vm2, %v3304_v19, %v9157_v26  ;;  %vm3324_vm4 = vmor %vm3316_vm2, %vm3322_vm3  ;;  %vm3398_vm2 = vcmp.lt.s32.totalorder %v9159_v7, %v9129_v36 }
 0x4e4   : > { %v3320_v23 = vsub.f32 %v3318_v47, %v3314_v20  ;;  %v3326_v25 = vsel %vm3324_vm4, %v3310_v16, %v3304_v19  ;;  %v3400_v60 = vsel %vm3398_vm2, 1, %v8615_v17 }
 0x4e5   : > { %v3328_v27 = vsub.f32 %v3326_v25, %v3314_v20  ;;  %v3252_v25 = vrot.slane %v3166_v35, 6 }
 0x4e6   : > { %v3330_v63 = vmul.f32 1.442695, %v3320_v23  ;;  %v3167_v23 = vld [vmem:[#allocation3 + $0x163] sm:$0x1] }
 0x4e7   : > { %v3336_v24 = vmul.f32 1.442695, %v3328_v27  ;;  %v3168_v27 = vld [vmem:[#allocation3 + $0x183] sm:$0x1] }
 0x4e8   : > { %8038 = vpow2.f32 %v3330_v63  ;;  %v3164_v63 = vld [vmem:[#allocation3 + $0x103] sm:$0x1] }
 0x4e9   : > { %8040 = vpow2.f32 %v3336_v24 }
 0x4ee   : > { %v3403_v11 = vpop.permute.xlu1 %3402 }
 0x4ef   : > { %vm3407_vm13 = vcmp.eq.s32.totalorder %v3403_v11, 1 }
 0x4f2   : > { %v8039_v28 = vpop.eup %8038 }
 0x4f3   : > { %v8041_v31 = vpop.eup %8040  ;;  %v3334_v32 = vadd.f32 1.0, %v8039_v28  ;;  %v3254_v28 = vrot.slane %v3167_v23, 5 }
 0x4f5   : > { %v3340_v34 = vadd.f32 %v8041_v31, %v3334_v32  ;;  %v3256_v32 = vrot.slane %v3168_v27, 4 }
 0x4f7   : > { %8042 = vlog2.f32 %v3340_v34 }
 0x501   : > { %v8043_v55 = vpop.eup %8042 }
 0x502   : > { %v3343_v58 = vmul.f32 0.6931472, %v8043_v55 }
 0x504   : > { %v3346_v59 = vadd.f32 %v3343_v58, %v3314_v20 }
 0x506   : > { %v3394_v51 = vadd.f32 %v3377_v62, %v3346_v59 }
 0x508   : > { %v9204_v0 = vsel %vm3407_vm13, %v3394_v51, %v9157_v26 }
 0x509   : > { %3428 = vrot.lane.b32.xlu1 %v9204_v0, %s8614_s12 }
 0x50d   : > { %3434 = vrot.lane.b32.xlu1 %v9204_v0, %s8613_s10 }
 0x511   : > { %3530 = vperm.xlu1 %7835, %v3527_v21  }
 0x537   : > { %v3175_v2 = vpop.permute.xlu0 %3174 }
 0x538   : > { %v3177_v53 = vadd.f32 %v3175_v2, %v9027_v12  ;;  %v3165_v12 = vld [vmem:[#allocation3 + $0x123] sm:$0x1]  ;;  %v3413_v2 = vld [vmem:[#allocation3 + $0x25] sm:$0x1] }
 0x539   : > { %v3250_v47 = vrot.slane %v3165_v12, 7 }
 0x53b   : > { %v3181_v8 = vpop.permute.xlu0 %3180  ;;  %v3251_v24 = vsel %vm2698_vm5, %v3250_v47, %v3164_v63  ;;  %v3419_v47 = vld [vmem:[#allocation3 + $0xe5] sm:$0x1] }
 0x53c   : > { %v3183_v26 = vadd.f32 %v3181_v8, %v9029_v13  ;;  %v3253_v31 = vsel %vm2701_vm6, %v3252_v25, %v3251_v24  ;;  %v3504_v24 = vrot.slane %v3419_v47, 1 }
 0x53d   : > { %v3255_v34 = vsel %vm2704_vm7, %v3254_v28, %v3253_v31 }
 0x53e   : > { %v3185_v5 = vmax.f32 %v3177_v53, %v3183_v26  ;;  %vm3195_vm12 = vcmp.ge.f32.partialorder %v3177_v53, %v3183_v26  ;;  %v3257_v4 = vsel %vm2707_vm8, %v3256_v32, %v3255_v34 }
 0x53f   : > { %v3259_v61 = vsel %vm2710_vm9, %v3258_v38, %v3257_v4  ;;  %v9260_v4 = vld [vmem:[%s10685_s6] sm:$0xff] }
 0x540   : > { %v3187_v6 = vmax.f32 %v9181_v14, %v3185_v5  ;;  %vm3189_vm15 = vcmp.ge.f32.partialorder %v9181_v14, %v3185_v5  ;;  %v3261_v43 = vsel %vm2713_vm10, %v3260_v33, %v3259_v61  ;;  %v9270_v61 = vld [vmem:[%s10681_s2 + $0x8] sm:$0xff] }
 0x541   : > { %v3191_v1 = vsel %vm3189_vm15, %v3177_v53, %v9181_v14  ;;  %vm3197_vm0 = vmor %vm3189_vm15, %vm3195_vm12  ;;  %v3263_v49 = vsel %vm2716_vm11, %v3262_v37, %v3261_v43  ;;  %vm3653_vm15 = vcmp.lt.s32.totalorder %v9253_v29, %v9260_v4 }
 0x542   : > { %v3193_v9 = vsub.f32 %v3191_v1, %v3187_v6  ;;  %v3199_v10 = vsel %vm3197_vm0, %v3183_v26, %v3177_v53  ;;  %v3414_v26 = vld [vmem:[#allocation3 + $0x45] sm:$0x1]  ;;  %v3655_v33 = vsel %vm3653_vm15, 1, %v8615_v17 }
 0x543   : > { %v3201_v44 = vsub.f32 %v3199_v10, %v3187_v6  ;;  %v3415_v1 = vld [vmem:[#allocation3 + $0x65] sm:$0x1] }
 0x544   : > { %v3204_v18 = vmul.f32 1.442695, %v3193_v9  ;;  %v3494_v9 = vrot.slane %v3414_v26, 6  ;;  %v3416_v10 = vld [vmem:[#allocation3 + $0x85] sm:$0x1] }
 0x545   : > { %v3210_v42 = vmul.f32 1.442695, %v3201_v44  ;;  %v3412_v44 = vld [vmem:[#allocation3 + $0x5] sm:$0x1]  ;;  %v3297_v26 = vld [vmem:[#allocation3 + $0x1a4] sm:$0x1] }
 0x546   : > { %8044 = vpow2.f32 %v3204_v18 }
 0x547   : > { %8046 = vpow2.f32 %v3210_v42  ;;  %v3496_v42 = vrot.slane %v3415_v1, 5  ;;  %v3298_v1 = vld [vmem:[#allocation3 + $0x1c4] sm:$0x1] }
 0x54c   : > { %v3278_v48 = vpop.permute.xlu0 %3277 }
 0x54d   : > { %vm3280_vm1 = vcmp.eq.s32.totalorder %v3278_v48, 1 }
 0x550   : > { %v8045_v19 = vpop.eup %8044 }
 0x551   : > { %v8047_v16 = vpop.eup %8046  ;;  %v3207_v13 = vadd.f32 1.0, %v8045_v19  ;;  %v3417_v19 = vld [vmem:[#allocation3 + $0xa5] sm:$0x1] }
 0x553   : > { %v3213_v20 = vadd.f32 %v8047_v16, %v3207_v13  ;;  %v3498_v16 = vrot.slane %v3416_v10, 4  ;;  %v3418_v13 = vld [vmem:[#allocation3 + $0xc5] sm:$0x1]  ;;  %v3386_v10 = vrot.slane %v3297_v26, 3 }
 0x554   : > { %v3502_v25 = vrot.slane %v3418_v13, 2 }
 0x555   : > { %8048 = vlog2.f32 %v3213_v20  ;;  %v3500_v20 = vrot.slane %v3417_v19, 3 }
 0x55f   : > { %v8049_v40 = vpop.eup %8048 }
 0x560   : > { %v3217_v41 = vmul.f32 0.6931472, %v8049_v40 }
 0x562   : > { %v3219_v45 = vadd.f32 %v3217_v41, %v3187_v6  ;;  %v3492_v6 = vrot.slane %v3413_v2, 7  ;;  %v9273_v41 = vld [vmem:[#allocation9 + $0x8] sm:$0xff]  ;;  %v3292_v2 = vld [vmem:[#allocation3 + $0x104] sm:$0x1] }
 0x564   : > { %v3267_v52 = vadd.f32 %v3263_v49, %v3219_v45  ;;  %v3493_v18 = vsel %vm2698_vm5, %v3492_v6, %v3412_v44  ;;  %v3299_v44 = vld [vmem:[#allocation3 + $0x1e4] sm:$0x1] }
 0x565   : > { %v3495_v12 = vsel %vm2701_vm6, %v3494_v9, %v3493_v18 }
 0x566   : > { %v9228_v54 = vsel %vm3280_vm1, %v3267_v52, %v9181_v14  ;;  %v3497_v35 = vsel %vm2704_vm7, %v3496_v42, %v3495_v12  ;;  %v3388_v42 = vrot.slane %v3298_v1, 2 }
 0x567   : > { %3302 = vrot.lane.b32.xlu0 %v9228_v54, %s8614_s12  ;;  %v3499_v23 = vsel %vm2707_vm8, %v3498_v16, %v3497_v35  ;;  %v3390_v16 = vrot.slane %v3299_v44, 1 }
 0x568   : > { %v3501_v63 = vsel %vm2710_vm9, %v3500_v20, %v3499_v23 }
 0x569   : > { %v3503_v46 = vsel %vm2713_vm10, %v3502_v25, %v3501_v63 }
 0x56a   : > { %v3505_v22 = vsel %vm2716_vm11, %v3504_v24, %v3503_v46 }
 0x56b   : > { %3308 = vrot.lane.b32.xlu0 %v9228_v54, %s8613_s10 }
 0x56f   : > { %3405 = vperm.xlu0 %7834, %v3400_v60  }
 0x57b   : > { %v3429_v3 = vpop.permute.xlu1 %3428 }
 0x57c   : > { %v3432_v56 = vadd.f32 %v9139_v30, %v3429_v3 }
 0x57f   : > { %v3435_v55 = vpop.permute.xlu1 %3434 }
 0x580   : > { %v3438_v57 = vadd.f32 %v9142_v39, %v3435_v55 }
 0x582   : > { %v3440_v14 = vmax.f32 %v3432_v56, %v3438_v57  ;;  %vm3450_vm4 = vcmp.ge.f32.partialorder %v3432_v56, %v3438_v57 }
 0x584   : > { %v3442_v58 = vmax.f32 %v9204_v0, %v3440_v14  ;;  %vm3444_vm3 = vcmp.ge.f32.partialorder %v9204_v0, %v3440_v14  ;;  %v3293_v14 = vld [vmem:[#allocation3 + $0x124] sm:$0x1] }
 0x585   : > { %v3446_v7 = vsel %vm3444_vm3, %v3432_v56, %v9204_v0  ;;  %vm3452_vm13 = vmor %vm3444_vm3, %vm3450_vm4  ;;  %vm3526_vm3 = vcmp.lt.s32.totalorder %v9206_v50, %v9129_v36 }
 0x586   : > { %v3448_v15 = vsub.f32 %v3446_v7, %v3442_v58  ;;  %v3454_v59 = vsel %vm3452_vm13, %v3438_v57, %v3432_v56  ;;  %v3528_v63 = vsel %vm3526_vm3, 1, %v8615_v17 }
 0x587   : > { %v3456_v11 = vsub.f32 %v3454_v59, %v3442_v58 }
 0x588   : > { %v3458_v62 = vmul.f32 1.442695, %v3448_v15  ;;  %v3294_v15 = vld [vmem:[#allocation3 + $0x144] sm:$0x1] }
 0x589   : > { %v3464_v51 = vmul.f32 1.442695, %v3456_v11  ;;  %v3378_v11 = vrot.slane %v3293_v14, 7 }
 0x58a   : > { %8050 = vpow2.f32 %v3458_v62  ;;  %v3295_v62 = vld [vmem:[#allocation3 + $0x164] sm:$0x1] }
 0x58b   : > { %8052 = vpow2.f32 %v3464_v51  ;;  %v3380_v51 = vrot.slane %v3294_v15, 6 }
 0x590   : > { %v3531_v32 = vpop.permute.xlu1 %3530 }
 0x591   : > { %vm3535_vm14 = vcmp.eq.s32.totalorder %v3531_v32, 1 }
 0x594   : > { %v8051_v21 = vpop.eup %8050 }
 0x595   : > { %v8053_v8 = vpop.eup %8052  ;;  %v3462_v53 = vadd.f32 1.0, %v8051_v21  ;;  %v3296_v21 = vld [vmem:[#allocation3 + $0x184] sm:$0x1] }
 0x596   : > { %v3384_v6 = vrot.slane %v3296_v21, 4  ;;  %v3547_v21 = vld [vmem:[#allocation3 + $0xe6] sm:$0x1] }
 0x597   : > { %v3468_v5 = vadd.f32 %v8053_v8, %v3462_v53  ;;  %v3379_v8 = vsel %vm2698_vm5, %v3378_v11, %v3292_v2  ;;  %v3382_v53 = vrot.slane %v3295_v62, 5  ;;  %v3546_v11 = vld [vmem:[#allocation3 + $0xc6] sm:$0x1] }
 0x599   : > { %8054 = vlog2.f32 %v3468_v5  ;;  %v3381_v5 = vsel %vm2701_vm6, %v3380_v51, %v3379_v8  ;;  %v3630_v8 = vrot.slane %v3546_v11, 2 }
 0x59a   : > { %v3383_v9 = vsel %vm2704_vm7, %v3382_v53, %v3381_v5  ;;  %v3632_v5 = vrot.slane %v3547_v21, 1 }
 0x59b   : > { %v3385_v18 = vsel %vm2707_vm8, %v3384_v6, %v3383_v9 }
 0x59c   : > { %v3387_v12 = vsel %vm2710_vm9, %v3386_v10, %v3385_v18 }
 0x59d   : > { %v3389_v35 = vsel %vm2713_vm10, %v3388_v42, %v3387_v12 }
 0x59e   : > { %v3391_v23 = vsel %vm2716_vm11, %v3390_v16, %v3389_v35 }
 0x5a3   : > { %v8055_v27 = vpop.eup %8054 }
 0x5a4   : > { %v3471_v28 = vmul.f32 0.6931472, %v8055_v27 }
 0x5a6   : > { %v3474_v31 = vadd.f32 %v3471_v28, %v3442_v58 }
 0x5a8   : > { %v3522_v34 = vadd.f32 %v3505_v22, %v3474_v31 }
 0x5aa   : > { %v9251_v38 = vsel %vm3535_vm14, %v3522_v34, %v9204_v0 }
 0x5ab   : > { %3556 = vrot.lane.b32.xlu1 %v9251_v38, %s8614_s12 }
 0x5af   : > { %3562 = vrot.lane.b32.xlu1 %v9251_v38, %s8613_s10 }
 0x5b3   : > { %3658 = vperm.xlu1 %7835, %v3655_v33  }
 0x5d9   : > { %v3303_v0 = vpop.permute.xlu0 %3302 }
 0x5da   : > { %v3305_v37 = vadd.f32 %v9270_v61, %v3303_v0 }
 0x5dd   : > { %v3309_v40 = vpop.permute.xlu0 %3308 }
 0x5de   : > { %v3311_v43 = vadd.f32 %v9273_v41, %v3309_v40 }
 0x5e0   : > { %v3313_v45 = vmax.f32 %v3305_v37, %v3311_v43  ;;  %vm3323_vm0 = vcmp.ge.f32.partialorder %v3305_v37, %v3311_v43 }
 0x5e2   : > { %v3315_v48 = vmax.f32 %v9228_v54, %v3313_v45  ;;  %vm3317_vm12 = vcmp.ge.f32.partialorder %v9228_v54, %v3313_v45 }
 0x5e3   : > { %v3319_v49 = vsel %vm3317_vm12, %v3305_v37, %v9228_v54  ;;  %vm3325_vm1 = vmor %vm3317_vm12, %vm3323_vm0 }
 0x5e4   : > { %v3321_v52 = vsub.f32 %v3319_v49, %v3315_v48  ;;  %v3327_v60 = vsel %vm3325_vm1, %v3311_v43, %v3305_v37  ;;  %v3541_v43 = vld [vmem:[#allocation3 + $0x26] sm:$0x1] }
 0x5e5   : > { %v3329_v3 = vsub.f32 %v3327_v60, %v3315_v48  ;;  %v3542_v49 = vld [vmem:[#allocation3 + $0x46] sm:$0x1]  ;;  %v3620_v60 = vrot.slane %v3541_v43, 7  ;;  %v3420_v43 = vld [vmem:[#allocation3 + $0x105] sm:$0x1] }
 0x5e6   : > { %v3332_v55 = vmul.f32 1.442695, %v3321_v52 }
 0x5e7   : > { %v3338_v56 = vmul.f32 1.442695, %v3329_v3  ;;  %v3543_v3 = vld [vmem:[#allocation3 + $0x66] sm:$0x1] }
 0x5e8   : > { %8056 = vpow2.f32 %v3332_v55  ;;  %v3622_v55 = vrot.slane %v3542_v49, 6  ;;  %v3425_v49 = vld [vmem:[#allocation3 + $0x1a5] sm:$0x1] }
 0x5e9   : > { %8058 = vpow2.f32 %v3338_v56  ;;  %v3544_v56 = vld [vmem:[#allocation3 + $0x86] sm:$0x1] }
 0x5ee   : > { %v3406_v47 = vpop.permute.xlu0 %3405 }
 0x5ef   : > { %vm3408_vm2 = vcmp.eq.s32.totalorder %v3406_v47, 1 }
 0x5f2   : > { %v8057_v57 = vpop.eup %8056 }
 0x5f3   : > { %v8059_v58 = vpop.eup %8058  ;;  %v3335_v7 = vadd.f32 1.0, %v8057_v57  ;;  %v3540_v57 = vld [vmem:[#allocation3 + $0x6] sm:$0x1] }
 0x5f4   : > { %v3621_v14 = vsel %vm2698_vm5, %v3620_v60, %v3540_v57  ;;  %v3427_v57 = vld [vmem:[#allocation3 + $0x1e5] sm:$0x1] }
 0x5f5   : > { %v3341_v59 = vadd.f32 %v8059_v58, %v3335_v7  ;;  %v3624_v58 = vrot.slane %v3543_v3, 5  ;;  %v3545_v7 = vld [vmem:[#allocation3 + $0xa6] sm:$0x1]  ;;  %v3623_v15 = vsel %vm2701_vm6, %v3622_v55, %v3621_v14  ;;  %v3426_v3 = vld [vmem:[#allocation3 + $0x1c5] sm:$0x1] }
 0x5f6   : > { %v3628_v51 = vrot.slane %v3545_v7, 3 }
 0x5f7   : > { %8060 = vlog2.f32 %v3341_v59  ;;  %v3626_v59 = vrot.slane %v3544_v56, 4  ;;  %v3625_v62 = vsel %vm2704_vm7, %v3624_v58, %v3623_v15  ;;  %v3514_v56 = vrot.slane %v3425_v49, 3 }
 0x5f8   : > { %v3516_v58 = vrot.slane %v3426_v3, 2 }
 0x5f9   : > { %v3627_v2 = vsel %vm2707_vm8, %v3626_v59, %v3625_v62  ;;  %v3518_v59 = vrot.slane %v3427_v57, 1  ;;  %v9359_v57 = vstv %s3795_s18  ;;  %s6227_s18 = sadd.s32 27, %s8864_s1 }
 0x5fa   : > { %v3629_v26 = vsel %vm2710_vm9, %v3628_v51, %v3627_v2 }
 0x5fb   : > { %v3631_v1 = vsel %vm2713_vm10, %v3630_v8, %v3629_v26 }
 0x5fc   : > { %v3633_v44 = vsel %vm2716_vm11, %v3632_v5, %v3631_v1 }
 0x601   : > { %v8061_v19 = vpop.eup %8060 }
 0x602   : > { %v3345_v13 = vmul.f32 0.6931472, %v8061_v19  ;;  %v9312_v19 = vstv %s3667_s22  ;;  %s5459_s22 = sadd.s32 21, %s8864_s1 }
 0x603   : > { %vm3781_vm12 = vcmp.lt.s32.totalorder %v9312_v19, %v9260_v4 }
 0x604   : > { %v3347_v20 = vadd.f32 %v3345_v13, %v3315_v48  ;;  %v3783_v12 = vsel %vm3781_vm12, 1, %v8615_v17 }
 0x606   : > { %v3395_v25 = vadd.f32 %v3391_v23, %v3347_v20 }
 0x608   : > { %v9287_v27 = vsel %vm3408_vm2, %v3395_v25, %v9228_v54 }
 0x609   : > { %3430 = vrot.lane.b32.xlu0 %v9287_v27, %s8614_s12 }
 0x60d   : > { %3436 = vrot.lane.b32.xlu0 %v9287_v27, %s8613_s10 }
 0x611   : > { %3533 = vperm.xlu0 %7834, %v3528_v63  }
 0x61d   : > { %v3557_v24 = vpop.permute.xlu1 %3556 }
 0x61e   : > { %v3560_v46 = vadd.f32 %v9139_v30, %v3557_v24 }
 0x621   : > { %v3563_v28 = vpop.permute.xlu1 %3562 }
 0x622   : > { %v3566_v31 = vadd.f32 %v9142_v39, %v3563_v28 }
 0x624   : > { %v3568_v54 = vmax.f32 %v3560_v46, %v3566_v31  ;;  %vm3578_vm13 = vcmp.ge.f32.partialorder %v3560_v46, %v3566_v31 }
 0x626   : > { %v3570_v32 = vmax.f32 %v9251_v38, %v3568_v54  ;;  %vm3572_vm4 = vcmp.ge.f32.partialorder %v9251_v38, %v3568_v54  ;;  %v3421_v54 = vld [vmem:[#allocation3 + $0x125] sm:$0x1] }
 0x627   : > { %v3574_v50 = vsel %vm3572_vm4, %v3560_v46, %v9251_v38  ;;  %vm3580_vm14 = vmor %vm3572_vm4, %vm3578_vm13  ;;  %vm3654_vm4 = vcmp.lt.s32.totalorder %v9253_v29, %v9129_v36 }
 0x628   : > { %v3576_v22 = vsub.f32 %v3574_v50, %v3570_v32  ;;  %v3582_v34 = vsel %vm3580_vm14, %v3566_v31, %v3560_v46  ;;  %v3656_v26 = vsel %vm3654_vm4, 1, %v8615_v17 }
 0x629   : > { %v3584_v33 = vsub.f32 %v3582_v34, %v3570_v32 }
 0x62a   : > { %v3586_v0 = vmul.f32 1.442695, %v3576_v22  ;;  %v3422_v22 = vld [vmem:[#allocation3 + $0x145] sm:$0x1] }
 0x62b   : > { %v3592_v40 = vmul.f32 1.442695, %v3584_v33  ;;  %v3506_v33 = vrot.slane %v3421_v54, 7 }
 0x62c   : > { %8062 = vpow2.f32 %v3586_v0  ;;  %v3423_v0 = vld [vmem:[#allocation3 + $0x165] sm:$0x1] }
 0x62d   : > { %8064 = vpow2.f32 %v3592_v40  ;;  %v3508_v40 = vrot.slane %v3422_v22, 6 }
 0x632   : > { %v3659_v10 = vpop.permute.xlu1 %3658 }
 0x633   : > { %vm3663_vm15 = vcmp.eq.s32.totalorder %v3659_v10, 1 }
 0x636   : > { %v8063_v37 = vpop.eup %8062 }
 0x637   : > { %v8065_v45 = vpop.eup %8064  ;;  %v3590_v48 = vadd.f32 1.0, %v8063_v37  ;;  %v3424_v37 = vld [vmem:[#allocation3 + $0x185] sm:$0x1] }
 0x638   : > { %v3512_v60 = vrot.slane %v3424_v37, 4 }
 0x639   : > { %v3596_v52 = vadd.f32 %v8065_v45, %v3590_v48  ;;  %v3507_v45 = vsel %vm2698_vm5, %v3506_v33, %v3420_v43  ;;  %v3510_v48 = vrot.slane %v3423_v0, 5  ;;  %v3675_v33 = vld [vmem:[#allocation3 + $0xe7] sm:$0x1] }
 0x63b   : > { %8066 = vlog2.f32 %v3596_v52  ;;  %v3509_v52 = vsel %vm2701_vm6, %v3508_v40, %v3507_v45  ;;  %v3760_v45 = vrot.slane %v3675_v33, 1 }
 0x63c   : > { %v3511_v55 = vsel %vm2704_vm7, %v3510_v48, %v3509_v52 }
 0x63d   : > { %v3513_v14 = vsel %vm2707_vm8, %v3512_v60, %v3511_v55 }
 0x63e   : > { %v3515_v15 = vsel %vm2710_vm9, %v3514_v56, %v3513_v14 }
 0x63f   : > { %v3517_v62 = vsel %vm2713_vm10, %v3516_v58, %v3515_v15 }
 0x640   : > { %v3519_v2 = vsel %vm2716_vm11, %v3518_v59, %v3517_v62 }
 0x645   : > { %v8067_v53 = vpop.eup %8066 }
 0x646   : > { %v3599_v6 = vmul.f32 0.6931472, %v8067_v53 }
 0x648   : > { %v3602_v9 = vadd.f32 %v3599_v6, %v3570_v32 }
 0x64a   : > { %v3650_v18 = vadd.f32 %v3633_v44, %v3602_v9 }
 0x64c   : > { %v9310_v42 = vsel %vm3663_vm15, %v3650_v18, %v9251_v38 }
 0x64d   : > { %3684 = vrot.lane.b32.xlu1 %v9310_v42, %s8614_s12 }
 0x651   : > { %3690 = vrot.lane.b32.xlu1 %v9310_v42, %s8613_s10 }
 0x655   : > { %3786 = vperm.xlu1 %7835, %v3783_v12  }
 0x67b   : > { %v3431_v16 = vpop.permute.xlu0 %3430 }
 0x67c   : > { %v3433_v35 = vadd.f32 %v9270_v61, %v3431_v16 }
 0x67f   : > { %v3437_v13 = vpop.permute.xlu0 %3436 }
 0x680   : > { %v3439_v38 = vadd.f32 %v9273_v41, %v3437_v13 }
 0x682   : > { %v3441_v20 = vmax.f32 %v3433_v35, %v3439_v38  ;;  %vm3451_vm1 = vcmp.ge.f32.partialorder %v3433_v35, %v3439_v38 }
 0x684   : > { %v3443_v47 = vmax.f32 %v9287_v27, %v3441_v20  ;;  %vm3445_vm0 = vcmp.ge.f32.partialorder %v9287_v27, %v3441_v20 }
 0x685   : > { %v3447_v23 = vsel %vm3445_vm0, %v3433_v35, %v9287_v27  ;;  %vm3453_vm2 = vmor %vm3445_vm0, %vm3451_vm1  ;;  %vm3909_vm0 = vcmp.lt.s32.totalorder %v9359_v57, %v9260_v4 }
 0x686   : > { %v3449_v25 = vsub.f32 %v3447_v23, %v3443_v47  ;;  %v3455_v63 = vsel %vm3453_vm2, %v3439_v38, %v3433_v35  ;;  %v3670_v38 = vld [vmem:[#allocation3 + $0x47] sm:$0x1]  ;;  %v3911_v14 = vsel %vm3909_vm0, 1, %v8615_v17 }
 0x687   : > { %v3457_v24 = vsub.f32 %v3455_v63, %v3443_v47  ;;  %v3671_v23 = vld [vmem:[#allocation3 + $0x67] sm:$0x1] }
 0x688   : > { %v3460_v28 = vmul.f32 1.442695, %v3449_v25  ;;  %v3750_v25 = vrot.slane %v3670_v38, 6  ;;  %v3672_v63 = vld [vmem:[#allocation3 + $0x87] sm:$0x1] }
 0x689   : > { %v3466_v46 = vmul.f32 1.442695, %v3457_v24  ;;  %v3668_v24 = vld [vmem:[#allocation3 + $0x7] sm:$0x1]  ;;  %v3554_v38 = vld [vmem:[#allocation3 + $0x1c6] sm:$0x1] }
 0x68a   : > { %8068 = vpow2.f32 %v3460_v28 }
 0x68b   : > { %8070 = vpow2.f32 %v3466_v46  ;;  %v3752_v46 = vrot.slane %v3671_v23, 5  ;;  %v3555_v23 = vld [vmem:[#allocation3 + $0x1e6] sm:$0x1] }
 0x690   : > { %v3534_v21 = vpop.permute.xlu0 %3533 }
 0x691   : > { %vm3536_vm3 = vcmp.eq.s32.totalorder %v3534_v21, 1 }
 0x694   : > { %v8069_v31 = vpop.eup %8068 }
 0x695   : > { %v8071_v32 = vpop.eup %8070  ;;  %v3463_v50 = vadd.f32 1.0, %v8069_v31  ;;  %v3673_v31 = vld [vmem:[#allocation3 + $0xa7] sm:$0x1] }
 0x697   : > { %v3469_v34 = vadd.f32 %v8071_v32, %v3463_v50  ;;  %v3754_v32 = vrot.slane %v3672_v63, 4  ;;  %v3674_v50 = vld [vmem:[#allocation3 + $0xc7] sm:$0x1]  ;;  %v3644_v63 = vrot.slane %v3554_v38, 2 }
 0x698   : > { %v3758_v40 = vrot.slane %v3674_v50, 2 }
 0x699   : > { %8072 = vlog2.f32 %v3469_v34  ;;  %v3756_v34 = vrot.slane %v3673_v31, 3 }
 0x6a3   : > { %v8073_v7 = vpop.eup %8072 }
 0x6a4   : > { %v3473_v11 = vmul.f32 0.6931472, %v8073_v7 }
 0x6a6   : > { %v3475_v51 = vadd.f32 %v3473_v11, %v3443_v47 }
 0x6a8   : > { %v3523_v8 = vadd.f32 %v3519_v2, %v3475_v51 }
 0x6aa   : > { %v9334_v53 = vsel %vm3536_vm3, %v3523_v8, %v9287_v27 }
 0x6ab   : > { %3558 = vrot.lane.b32.xlu0 %v9334_v53, %s8614_s12 }
 0x6af   : > { %3564 = vrot.lane.b32.xlu0 %v9334_v53, %s8613_s10 }
 0x6b3   : > { %3661 = vperm.xlu0 %7834, %v3656_v26  }
 0x6bf   : > { %v3685_v5 = vpop.permute.xlu1 %3684 }
 0x6c0   : > { %v3688_v1 = vadd.f32 %v9139_v30, %v3685_v5  ;;  %v3669_v30 = vld [vmem:[#allocation3 + $0x27] sm:$0x1] }
 0x6c1   : > { %v3748_v47 = vrot.slane %v3669_v30, 7  ;;  %v3553_v30 = vld [vmem:[#allocation3 + $0x1a6] sm:$0x1] }
 0x6c3   : > { %v3691_v6 = vpop.permute.xlu1 %3690  ;;  %v3749_v28 = vsel %vm2698_vm5, %v3748_v47, %v3668_v24  ;;  %v3642_v47 = vrot.slane %v3553_v30, 3 }
 0x6c4   : > { %v3694_v9 = vadd.f32 %v9142_v39, %v3691_v6  ;;  %v3751_v54 = vsel %vm2701_vm6, %v3750_v25, %v3749_v28  ;;  %v3549_v6 = vld [vmem:[#allocation3 + $0x126] sm:$0x1] }
 0x6c5   : > { %v3753_v22 = vsel %vm2704_vm7, %v3752_v46, %v3751_v54  ;;  %v3646_v46 = vrot.slane %v3555_v23, 1 }
 0x6c6   : > { %v3696_v27 = vmax.f32 %v3688_v1, %v3694_v9  ;;  %vm3706_vm14 = vcmp.ge.f32.partialorder %v3688_v1, %v3694_v9  ;;  %v3755_v0 = vsel %vm2707_vm8, %v3754_v32, %v3753_v22 }
 0x6c7   : > { %v3757_v43 = vsel %vm2710_vm9, %v3756_v34, %v3755_v0  ;;  %v9388_v0 = vld [vmem:[%s10685_s6 + $0x8] sm:$0xff] }
 0x6c8   : > { %v3698_v10 = vmax.f32 %v9310_v42, %v3696_v27  ;;  %vm3700_vm13 = vcmp.ge.f32.partialorder %v9310_v42, %v3696_v27  ;;  %v3759_v49 = vsel %vm2713_vm10, %v3758_v40, %v3757_v43  ;;  %v3550_v27 = vld [vmem:[#allocation3 + $0x146] sm:$0x1]  ;;  %v9398_v43 = vld [vmem:[%s10681_s2] sm:$0xff] }
 0x6c9   : > { %v3702_v36 = vsel %vm3700_vm13, %v3688_v1, %v9310_v42  ;;  %vm3708_vm15 = vmor %vm3700_vm13, %vm3706_vm14  ;;  %v3761_v3 = vsel %vm2716_vm11, %v3760_v45, %v3759_v49  ;;  %vm3782_vm13 = vcmp.lt.s32.totalorder %v9312_v19, %v9388_v0 }
 0x6ca   : > { %v3704_v29 = vsub.f32 %v3702_v36, %v3698_v10  ;;  %v3710_v44 = vsel %vm3708_vm15, %v3694_v9, %v3688_v1  ;;  %v3634_v36 = vrot.slane %v3549_v6, 7  ;;  %v3784_v40 = vsel %vm3782_vm13, 1, %v8615_v17 }
 0x6cb   : > { %v3712_v18 = vsub.f32 %v3710_v44, %v3698_v10  ;;  %v3636_v44 = vrot.slane %v3550_v27, 6 }
 0x6cc   : > { %v3714_v12 = vmul.f32 1.442695, %v3704_v29  ;;  %v3551_v29 = vld [vmem:[#allocation3 + $0x166] sm:$0x1] }
 0x6cd   : > { %v3720_v16 = vmul.f32 1.442695, %v3712_v18  ;;  %v3552_v18 = vld [vmem:[#allocation3 + $0x186] sm:$0x1] }
 0x6ce   : > { %8074 = vpow2.f32 %v3714_v12  ;;  %v3548_v12 = vld [vmem:[#allocation3 + $0x106] sm:$0x1] }
 0x6cf   : > { %8076 = vpow2.f32 %v3720_v16  ;;  %v3635_v16 = vsel %vm2698_vm5, %v3634_v36, %v3548_v12  ;;  %v3802_v36 = vld [vmem:[#allocation3 + $0xc8] sm:$0x1] }
 0x6d4   : > { %v3787_v60 = vpop.permute.xlu1 %3786 }
 0x6d5   : > { %vm3791_vm12 = vcmp.eq.s32.totalorder %v3787_v60, 1 }
 0x6d8   : > { %v8075_v13 = vpop.eup %8074 }
 0x6d9   : > { %v8077_v35 = vpop.eup %8076  ;;  %v3718_v39 = vadd.f32 1.0, %v8075_v13  ;;  %v3638_v13 = vrot.slane %v3551_v29, 5 }
 0x6db   : > { %v3724_v20 = vadd.f32 %v8077_v35, %v3718_v39  ;;  %v3637_v35 = vsel %vm2701_vm6, %v3636_v44, %v3635_v16  ;;  %v3640_v39 = vrot.slane %v3552_v18, 4  ;;  %v3803_v18 = vld [vmem:[#allocation3 + $0xe8] sm:$0x1]  ;;  %v3886_v16 = vrot.slane %v3802_v36, 2 }
 0x6dd   : > { %8078 = vlog2.f32 %v3724_v20  ;;  %v3639_v20 = vsel %vm2704_vm7, %v3638_v13, %v3637_v35  ;;  %v3888_v35 = vrot.slane %v3803_v18, 1 }
 0x6de   : > { %v3641_v25 = vsel %vm2707_vm8, %v3640_v39, %v3639_v20 }
 0x6df   : > { %v3643_v28 = vsel %vm2710_vm9, %v3642_v47, %v3641_v25 }
 0x6e0   : > { %v3645_v54 = vsel %vm2713_vm10, %v3644_v63, %v3643_v28 }
 0x6e1   : > { %v3647_v22 = vsel %vm2716_vm11, %v3646_v46, %v3645_v54 }
 0x6e7   : > { %v8079_v37 = vpop.eup %8078 }
 0x6e8   : > { %v3727_v48 = vmul.f32 0.6931472, %v8079_v37 }
 0x6ea   : > { %v3730_v52 = vadd.f32 %v3727_v48, %v3698_v10  ;;  %v9401_v48 = vld [vmem:[#allocation9] sm:$0xff] }
 0x6ec   : > { %v3778_v55 = vadd.f32 %v3761_v3, %v3730_v52 }
 0x6ee   : > { %v9357_v56 = vsel %vm3791_vm12, %v3778_v55, %v9310_v42 }
 0x6ef   : > { %3812 = vrot.lane.b32.xlu1 %v9357_v56, %s8614_s12 }
 0x6f3   : > { %3818 = vrot.lane.b32.xlu1 %v9357_v56, %s8613_s10 }
 0x6f7   : > { %3914 = vperm.xlu1 %7835, %v3911_v14  }
 0x71d   : > { %v3559_v58 = vpop.permute.xlu0 %3558 }
 0x71e   : > { %v3561_v15 = vadd.f32 %v9270_v61, %v3559_v58 }
 0x721   : > { %v3565_v7 = vpop.permute.xlu0 %3564 }
 0x722   : > { %v3567_v42 = vadd.f32 %v9273_v41, %v3565_v7 }
 0x724   : > { %v3569_v59 = vmax.f32 %v3561_v15, %v3567_v42  ;;  %vm3579_vm2 = vcmp.ge.f32.partialorder %v3561_v15, %v3567_v42 }
 0x726   : > { %v3571_v11 = vmax.f32 %v9334_v53, %v3569_v59  ;;  %vm3573_vm1 = vcmp.ge.f32.partialorder %v9334_v53, %v3569_v59 }
 0x727   : > { %v3575_v62 = vsel %vm3573_vm1, %v3561_v15, %v9334_v53  ;;  %vm3581_vm3 = vmor %vm3573_vm1, %vm3579_vm2 }
 0x728   : > { %v3577_v51 = vsub.f32 %v3575_v62, %v3571_v11  ;;  %v3583_v21 = vsel %vm3581_vm3, %v3567_v42, %v3561_v15  ;;  %v3797_v42 = vld [vmem:[#allocation3 + $0x28] sm:$0x1] }
 0x729   : > { %v3585_v2 = vsub.f32 %v3583_v21, %v3571_v11  ;;  %v3798_v62 = vld [vmem:[#allocation3 + $0x48] sm:$0x1]  ;;  %v3876_v21 = vrot.slane %v3797_v42, 7  ;;  %v3676_v42 = vld [vmem:[#allocation3 + $0x107] sm:$0x1] }
 0x72a   : > { %v3588_v8 = vmul.f32 1.442695, %v3577_v51 }
 0x72b   : > { %v3594_v26 = vmul.f32 1.442695, %v3585_v2  ;;  %v3799_v2 = vld [vmem:[#allocation3 + $0x68] sm:$0x1] }
 0x72c   : > { %8080 = vpow2.f32 %v3588_v8  ;;  %v3878_v8 = vrot.slane %v3798_v62, 6  ;;  %v3681_v62 = vld [vmem:[#allocation3 + $0x1a7] sm:$0x1] }
 0x72d   : > { %8082 = vpow2.f32 %v3594_v26  ;;  %v3800_v26 = vld [vmem:[#allocation3 + $0x88] sm:$0x1] }
 0x732   : > { %v3662_v50 = vpop.permute.xlu0 %3661 }
 0x733   : > { %vm3664_vm4 = vcmp.eq.s32.totalorder %v3662_v50, 1 }
 0x736   : > { %v8081_v5 = vpop.eup %8080 }
 0x737   : > { %v8083_v1 = vpop.eup %8082  ;;  %v3591_v9 = vadd.f32 1.0, %v8081_v5  ;;  %v3796_v5 = vld [vmem:[#allocation3 + $0x8] sm:$0x1] }
 0x738   : > { %v3877_v6 = vsel %vm2698_vm5, %v3876_v21, %v3796_v5  ;;  %v3683_v5 = vld [vmem:[#allocation3 + $0x1e7] sm:$0x1] }
 0x739   : > { %v3597_v10 = vadd.f32 %v8083_v1, %v3591_v9  ;;  %v3880_v1 = vrot.slane %v3799_v2, 5  ;;  %v3801_v9 = vld [vmem:[#allocation3 + $0xa8] sm:$0x1]  ;;  %v3879_v27 = vsel %vm2701_vm6, %v3878_v8, %v3877_v6  ;;  %v3682_v2 = vld [vmem:[#allocation3 + $0x1c7] sm:$0x1] }
 0x73a   : > { %v3884_v44 = vrot.slane %v3801_v9, 3 }
 0x73b   : > { %8084 = vlog2.f32 %v3597_v10  ;;  %v3882_v10 = vrot.slane %v3800_v26, 4  ;;  %v3881_v29 = vsel %vm2704_vm7, %v3880_v1, %v3879_v27  ;;  %v3770_v26 = vrot.slane %v3681_v62, 3 }
 0x73c   : > { %v3772_v1 = vrot.slane %v3682_v2, 2 }
 0x73d   : > { %v3883_v12 = vsel %vm2707_vm8, %v3882_v10, %v3881_v29  ;;  %v3774_v10 = vrot.slane %v3683_v5, 1 }
 0x73e   : > { %v3885_v30 = vsel %vm2710_vm9, %v3884_v44, %v3883_v12 }
 0x73f   : > { %v3887_v38 = vsel %vm2713_vm10, %v3886_v16, %v3885_v30 }
 0x740   : > { %v3889_v23 = vsel %vm2716_vm11, %v3888_v35, %v3887_v38 }
 0x745   : > { %v8085_v24 = vpop.eup %8084 }
 0x746   : > { %v3601_v31 = vmul.f32 0.6931472, %v8085_v24  ;;  %v9418_v24 = vstv %s3923_s15  ;;  %s5715_s15 = sadd.s32 23, %s8864_s1 }
 0x747   : > { %vm4037_vm1 = vcmp.lt.s32.totalorder %v9418_v24, %v9260_v4 }
 0x748   : > { %v3603_v32 = vadd.f32 %v3601_v31, %v3571_v11  ;;  %v4039_v28 = vsel %vm4037_vm1, 1, %v8615_v17 }
 0x74a   : > { %v3651_v34 = vadd.f32 %v3647_v22, %v3603_v32 }
 0x74c   : > { %v9381_v33 = vsel %vm3664_vm4, %v3651_v34, %v9334_v53 }
 0x74d   : > { %3686 = vrot.lane.b32.xlu0 %v9381_v33, %s8614_s12 }
 0x751   : > { %3692 = vrot.lane.b32.xlu0 %v9381_v33, %s8613_s10 }
 0x755   : > { %3789 = vperm.xlu0 %7834, %v3784_v40  }
 0x761   : > { %v3813_v37 = vpop.permute.xlu1 %3812 }
 0x762   : > { %v3816_v45 = vadd.f32 %v9398_v43, %v3813_v37 }
 0x765   : > { %v3819_v53 = vpop.permute.xlu1 %3818 }
 0x766   : > { %v3822_v49 = vadd.f32 %v9401_v48, %v3819_v53 }
 0x768   : > { %v3824_v19 = vmax.f32 %v3816_v45, %v3822_v49  ;;  %vm3834_vm15 = vcmp.ge.f32.partialorder %v3816_v45, %v3822_v49 }
 0x76a   : > { %v3826_v52 = vmax.f32 %v9357_v56, %v3824_v19  ;;  %vm3828_vm14 = vcmp.ge.f32.partialorder %v9357_v56, %v3824_v19  ;;  %v3677_v19 = vld [vmem:[#allocation3 + $0x127] sm:$0x1] }
 0x76b   : > { %v3830_v60 = vsel %vm3828_vm14, %v3816_v45, %v9357_v56  ;;  %vm3836_vm12 = vmor %vm3828_vm14, %vm3834_vm15  ;;  %vm3910_vm14 = vcmp.lt.s32.totalorder %v9359_v57, %v9388_v0 }
 0x76c   : > { %v3832_v3 = vsub.f32 %v3830_v60, %v3826_v52  ;;  %v3838_v55 = vsel %vm3836_vm12, %v3822_v49, %v3816_v45  ;;  %v3912_v30 = vsel %vm3910_vm14, 1, %v8615_v17 }
 0x76d   : > { %v3840_v14 = vsub.f32 %v3838_v55, %v3826_v52 }
 0x76e   : > { %v3842_v58 = vmul.f32 1.442695, %v3832_v3  ;;  %v3678_v3 = vld [vmem:[#allocation3 + $0x147] sm:$0x1] }
 0x76f   : > { %v3848_v7 = vmul.f32 1.442695, %v3840_v14  ;;  %v3762_v14 = vrot.slane %v3677_v19, 7 }
 0x770   : > { %8086 = vpow2.f32 %v3842_v58  ;;  %v3679_v58 = vld [vmem:[#allocation3 + $0x167] sm:$0x1] }
 0x771   : > { %8088 = vpow2.f32 %v3848_v7  ;;  %v3764_v7 = vrot.slane %v3678_v3, 6 }
 0x776   : > { %v3915_v47 = vpop.permute.xlu1 %3914 }
 0x777   : > { %vm3919_vm0 = vcmp.eq.s32.totalorder %v3915_v47, 1 }
 0x77a   : > { %v8087_v15 = vpop.eup %8086 }
 0x77b   : > { %v8089_v59 = vpop.eup %8088  ;;  %v3846_v11 = vadd.f32 1.0, %v8087_v15  ;;  %v3680_v15 = vld [vmem:[#allocation3 + $0x187] sm:$0x1] }
 0x77c   : > { %v3768_v21 = vrot.slane %v3680_v15, 4  ;;  %v3931_v15 = vld [vmem:[#allocation3 + $0xe9] sm:$0x1] }
 0x77d   : > { %v3852_v51 = vadd.f32 %v8089_v59, %v3846_v11  ;;  %v3763_v59 = vsel %vm2698_vm5, %v3762_v14, %v3676_v42  ;;  %v3766_v11 = vrot.slane %v3679_v58, 5  ;;  %v3930_v14 = vld [vmem:[#allocation3 + $0xc9] sm:$0x1] }
 0x77f   : > { %8090 = vlog2.f32 %v3852_v51  ;;  %v3765_v51 = vsel %vm2701_vm6, %v3764_v7, %v3763_v59  ;;  %v4014_v59 = vrot.slane %v3930_v14, 2 }
 0x780   : > { %v3767_v8 = vsel %vm2704_vm7, %v3766_v11, %v3765_v51  ;;  %v4016_v51 = vrot.slane %v3931_v15, 1 }
 0x781   : > { %v3769_v6 = vsel %vm2707_vm8, %v3768_v21, %v3767_v8 }
 0x782   : > { %v3771_v27 = vsel %vm2710_vm9, %v3770_v26, %v3769_v6 }
 0x783   : > { %v3773_v29 = vsel %vm2713_vm10, %v3772_v1, %v3771_v27 }
 0x784   : > { %v3775_v12 = vsel %vm2716_vm11, %v3774_v10, %v3773_v29 }
 0x789   : > { %v8091_v13 = vpop.eup %8090 }
 0x78a   : > { %v3855_v39 = vmul.f32 0.6931472, %v8091_v13 }
 0x78c   : > { %v3858_v20 = vadd.f32 %v3855_v39, %v3826_v52 }
 0x78e   : > { %v3906_v25 = vadd.f32 %v3889_v23, %v3858_v20 }
 0x790   : > { %v9416_v63 = vsel %vm3919_vm0, %v3906_v25, %v9357_v56 }
 0x791   : > { %3940 = vrot.lane.b32.xlu1 %v9416_v63, %s8614_s12 }
 0x795   : > { %3946 = vrot.lane.b32.xlu1 %v9416_v63, %s8613_s10 }
 0x799   : > { %4042 = vperm.xlu1 %7835, %v4039_v28  }
 0x7bf   : > { %v3687_v46 = vpop.permute.xlu0 %3686 }
 0x7c0   : > { %v3689_v54 = vadd.f32 %v9270_v61, %v3687_v46 }
 0x7c3   : > { %v3693_v31 = vpop.permute.xlu0 %3692 }
 0x7c4   : > { %v3695_v56 = vadd.f32 %v9273_v41, %v3693_v31 }
 0x7c6   : > { %v3697_v32 = vmax.f32 %v3689_v54, %v3695_v56  ;;  %vm3707_vm3 = vcmp.ge.f32.partialorder %v3689_v54, %v3695_v56 }
 0x7c8   : > { %v3699_v50 = vmax.f32 %v9381_v33, %v3697_v32  ;;  %vm3701_vm2 = vcmp.ge.f32.partialorder %v9381_v33, %v3697_v32 }
 0x7c9   : > { %v3703_v22 = vsel %vm3701_vm2, %v3689_v54, %v9381_v33  ;;  %vm3709_vm4 = vmor %vm3701_vm2, %vm3707_vm3 }
 0x7ca   : > { %v3705_v34 = vsub.f32 %v3703_v22, %v3699_v50  ;;  %v3711_v40 = vsel %vm3709_vm4, %v3695_v56, %v3689_v54  ;;  %v3925_v56 = vld [vmem:[#allocation3 + $0x29] sm:$0x1] }
 0x7cb   : > { %v3713_v37 = vsub.f32 %v3711_v40, %v3699_v50  ;;  %v3926_v22 = vld [vmem:[#allocation3 + $0x49] sm:$0x1]  ;;  %v4004_v40 = vrot.slane %v3925_v56, 7  ;;  %v3809_v56 = vld [vmem:[#allocation3 + $0x1a8] sm:$0x1] }
 0x7cc   : > { %v3716_v53 = vmul.f32 1.442695, %v3705_v34 }
 0x7cd   : > { %v3722_v45 = vmul.f32 1.442695, %v3713_v37  ;;  %v3927_v37 = vld [vmem:[#allocation3 + $0x69] sm:$0x1] }
 0x7ce   : > { %8092 = vpow2.f32 %v3716_v53  ;;  %v4006_v53 = vrot.slane %v3926_v22, 6  ;;  %v3810_v22 = vld [vmem:[#allocation3 + $0x1c8] sm:$0x1] }
 0x7cf   : > { %8094 = vpow2.f32 %v3722_v45  ;;  %v3928_v45 = vld [vmem:[#allocation3 + $0x89] sm:$0x1] }
 0x7d4   : > { %v3790_v18 = vpop.permute.xlu0 %3789 }
 0x7d5   : > { %vm3792_vm13 = vcmp.eq.s32.totalorder %v3790_v18, 1 }
 0x7d8   : > { %v8093_v49 = vpop.eup %8092 }
 0x7d9   : > { %v8095_v52 = vpop.eup %8094  ;;  %v3719_v60 = vadd.f32 1.0, %v8093_v49  ;;  %v3924_v49 = vld [vmem:[#allocation3 + $0x9] sm:$0x1] }
 0x7da   : > { %v4005_v19 = vsel %vm2698_vm5, %v4004_v40, %v3924_v49  ;;  %v3898_v40 = vrot.slane %v3809_v56, 3 }
 0x7db   : > { %v3725_v55 = vadd.f32 %v8095_v52, %v3719_v60  ;;  %v4008_v52 = vrot.slane %v3927_v37, 5  ;;  %v3929_v60 = vld [vmem:[#allocation3 + $0xa9] sm:$0x1]  ;;  %v4007_v3 = vsel %vm2701_vm6, %v4006_v53, %v4005_v19  ;;  %v3811_v37 = vld [vmem:[#allocation3 + $0x1e8] sm:$0x1] }
 0x7dc   : > { %v4012_v7 = vrot.slane %v3929_v60, 3 }
 0x7dd   : > { %8096 = vlog2.f32 %v3725_v55  ;;  %v4010_v55 = vrot.slane %v3928_v45, 4  ;;  %v4009_v58 = vsel %vm2704_vm7, %v4008_v52, %v4007_v3  ;;  %v3900_v45 = vrot.slane %v3810_v22, 2 }
 0x7de   : > { %v3902_v52 = vrot.slane %v3811_v37, 1  ;;  %v9512_v37 = vstv %s4179_s7  ;;  %s6611_s7 = sadd.s32 30, %s8864_s1 }
 0x7df   : > { %v4011_v42 = vsel %vm2707_vm8, %v4010_v55, %v4009_v58 }
 0x7e0   : > { %v4013_v62 = vsel %vm2710_vm9, %v4012_v7, %v4011_v42 }
 0x7e1   : > { %v4015_v2 = vsel %vm2713_vm10, %v4014_v59, %v4013_v62 }
 0x7e2   : > { %v4017_v5 = vsel %vm2716_vm11, %v4016_v51, %v4015_v2 }
 0x7e7   : > { %v8097_v9 = vpop.eup %8096 }
 0x7e8   : > { %v3729_v36 = vmul.f32 0.6931472, %v8097_v9  ;;  %v9465_v9 = vstv %s4051_s8  ;;  %s6483_s8 = sadd.s32 29, %s8864_s1 }
 0x7e9   : > { %vm4165_vm2 = vcmp.lt.s32.totalorder %v9465_v9, %v9260_v4 }
 0x7ea   : > { %v3731_v44 = vadd.f32 %v3729_v36, %v3699_v50  ;;  %v4167_v27 = vsel %vm4165_vm2, 1, %v8615_v17 }
 0x7ec   : > { %v3779_v16 = vadd.f32 %v3775_v12, %v3731_v44 }
 0x7ee   : > { %v9440_v13 = vsel %vm3792_vm13, %v3779_v16, %v9381_v33 }
 0x7ef   : > { %3814 = vrot.lane.b32.xlu0 %v9440_v13, %s8614_s12 }
 0x7f3   : > { %3820 = vrot.lane.b32.xlu0 %v9440_v13, %s8613_s10 }
 0x7f7   : > { %3917 = vperm.xlu0 %7834, %v3912_v30  }
 0x803   : > { %v3941_v35 = vpop.permute.xlu1 %3940 }
 0x804   : > { %v3944_v38 = vadd.f32 %v9398_v43, %v3941_v35 }
 0x807   : > { %v3947_v39 = vpop.permute.xlu1 %3946 }
 0x808   : > { %v3950_v20 = vadd.f32 %v9401_v48, %v3947_v39 }
 0x80a   : > { %v3952_v33 = vmax.f32 %v3944_v38, %v3950_v20  ;;  %vm3962_vm12 = vcmp.ge.f32.partialorder %v3944_v38, %v3950_v20 }
 0x80c   : > { %v3954_v47 = vmax.f32 %v9416_v63, %v3952_v33  ;;  %vm3956_vm15 = vcmp.ge.f32.partialorder %v9416_v63, %v3952_v33  ;;  %v3806_v33 = vld [vmem:[#allocation3 + $0x148] sm:$0x1] }
 0x80d   : > { %v3958_v57 = vsel %vm3956_vm15, %v3944_v38, %v9416_v63  ;;  %vm3964_vm0 = vmor %vm3956_vm15, %vm3962_vm12  ;;  %vm4038_vm15 = vcmp.lt.s32.totalorder %v9418_v24, %v9388_v0 }
 0x80e   : > { %v3960_v23 = vsub.f32 %v3958_v57, %v3954_v47  ;;  %v3966_v25 = vsel %vm3964_vm0, %v3950_v20, %v3944_v38  ;;  %v4040_v42 = vsel %vm4038_vm15, 1, %v8615_v17 }
 0x80f   : > { %v3968_v28 = vsub.f32 %v3966_v25, %v3954_v47  ;;  %v3892_v25 = vrot.slane %v3806_v33, 6 }
 0x810   : > { %v3970_v46 = vmul.f32 1.442695, %v3960_v23  ;;  %v3807_v23 = vld [vmem:[#allocation3 + $0x168] sm:$0x1] }
 0x811   : > { %v3976_v31 = vmul.f32 1.442695, %v3968_v28  ;;  %v3808_v28 = vld [vmem:[#allocation3 + $0x188] sm:$0x1] }
 0x812   : > { %8098 = vpow2.f32 %v3970_v46  ;;  %v3804_v46 = vld [vmem:[#allocation3 + $0x108] sm:$0x1] }
 0x813   : > { %8100 = vpow2.f32 %v3976_v31 }
 0x818   : > { %v4043_v26 = vpop.permute.xlu1 %4042 }
 0x819   : > { %vm4047_vm1 = vcmp.eq.s32.totalorder %v4043_v26, 1 }
 0x81c   : > { %v8099_v54 = vpop.eup %8098 }
 0x81d   : > { %v8101_v32 = vpop.eup %8100  ;;  %v3974_v50 = vadd.f32 1.0, %v8099_v54  ;;  %v3894_v54 = vrot.slane %v3807_v23, 5 }
 0x81f   : > { %v3980_v34 = vadd.f32 %v8101_v32, %v3974_v50  ;;  %v3896_v50 = vrot.slane %v3808_v28, 4 }
 0x821   : > { %8102 = vlog2.f32 %v3980_v34 }
 0x82b   : > { %v8103_v11 = vpop.eup %8102 }
 0x82c   : > { %v3983_v21 = vmul.f32 0.6931472, %v8103_v11 }
 0x82e   : > { %v3986_v8 = vadd.f32 %v3983_v21, %v3954_v47 }
 0x830   : > { %v4034_v6 = vadd.f32 %v4017_v5, %v3986_v8 }
 0x832   : > { %v9463_v1 = vsel %vm4047_vm1, %v4034_v6, %v9416_v63 }
 0x833   : > { %4068 = vrot.lane.b32.xlu1 %v9463_v1, %s8614_s12 }
 0x837   : > { %4074 = vrot.lane.b32.xlu1 %v9463_v1, %s8613_s10 }
 0x83b   : > { %4170 = vperm.xlu1 %7835, %v4167_v27  }
 0x861   : > { %v3815_v10 = vpop.permute.xlu0 %3814 }
 0x862   : > { %v3817_v29 = vadd.f32 %v9270_v61, %v3815_v10  ;;  %v3805_v61 = vld [vmem:[#allocation3 + $0x128] sm:$0x1]  ;;  %v4053_v10 = vld [vmem:[#allocation3 + $0x2a] sm:$0x1] }
 0x863   : > { %v3890_v57 = vrot.slane %v3805_v61, 7 }
 0x865   : > { %v3821_v36 = vpop.permute.xlu0 %3820  ;;  %v3891_v31 = vsel %vm2698_vm5, %v3890_v57, %v3804_v46  ;;  %v4059_v57 = vld [vmem:[#allocation3 + $0xea] sm:$0x1] }
 0x866   : > { %v3823_v63 = vadd.f32 %v9273_v41, %v3821_v36  ;;  %v3893_v32 = vsel %vm2701_vm6, %v3892_v25, %v3891_v31  ;;  %v4144_v31 = vrot.slane %v4059_v57, 1 }
 0x867   : > { %v3895_v34 = vsel %vm2704_vm7, %v3894_v54, %v3893_v32 }
 0x868   : > { %v3825_v44 = vmax.f32 %v3817_v29, %v3823_v63  ;;  %vm3835_vm4 = vcmp.ge.f32.partialorder %v3817_v29, %v3823_v63  ;;  %v3897_v53 = vsel %vm2707_vm8, %v3896_v50, %v3895_v34 }
 0x869   : > { %v3899_v19 = vsel %vm2710_vm9, %v3898_v40, %v3897_v53  ;;  %v9519_v53 = vld [vmem:[%s10685_s6] sm:$0xff] }
 0x86a   : > { %v3827_v18 = vmax.f32 %v9440_v13, %v3825_v44  ;;  %vm3829_vm3 = vcmp.ge.f32.partialorder %v9440_v13, %v3825_v44  ;;  %v3901_v3 = vsel %vm2713_vm10, %v3900_v45, %v3899_v19  ;;  %v9529_v19 = vld [vmem:[%s10681_s2 + $0x8] sm:$0xff] }
 0x86b   : > { %v3831_v4 = vsel %vm3829_vm3, %v3817_v29, %v9440_v13  ;;  %vm3837_vm13 = vmor %vm3829_vm3, %vm3835_vm4  ;;  %v3903_v58 = vsel %vm2716_vm11, %v3902_v52, %v3901_v3  ;;  %vm4293_vm3 = vcmp.lt.s32.totalorder %v9512_v37, %v9519_v53 }
 0x86c   : > { %v3833_v12 = vsub.f32 %v3831_v4, %v3827_v18  ;;  %v3839_v16 = vsel %vm3837_vm13, %v3823_v63, %v3817_v29  ;;  %v4054_v63 = vld [vmem:[#allocation3 + $0x4a] sm:$0x1]  ;;  %v4295_v45 = vsel %vm4293_vm3, 1, %v8615_v17 }
 0x86d   : > { %v3841_v30 = vsub.f32 %v3839_v16, %v3827_v18  ;;  %v4055_v4 = vld [vmem:[#allocation3 + $0x6a] sm:$0x1] }
 0x86e   : > { %v3844_v35 = vmul.f32 1.442695, %v3833_v12  ;;  %v4134_v12 = vrot.slane %v4054_v63, 6  ;;  %v4056_v16 = vld [vmem:[#allocation3 + $0x8a] sm:$0x1] }
 0x86f   : > { %v3850_v39 = vmul.f32 1.442695, %v3841_v30  ;;  %v4052_v30 = vld [vmem:[#allocation3 + $0xa] sm:$0x1]  ;;  %v3937_v63 = vld [vmem:[#allocation3 + $0x1a9] sm:$0x1] }
 0x870   : > { %8104 = vpow2.f32 %v3844_v35 }
 0x871   : > { %8106 = vpow2.f32 %v3850_v39  ;;  %v4136_v39 = vrot.slane %v4055_v4, 5  ;;  %v3938_v4 = vld [vmem:[#allocation3 + $0x1c9] sm:$0x1] }
 0x876   : > { %v3918_v14 = vpop.permute.xlu0 %3917 }
 0x877   : > { %vm3920_vm14 = vcmp.eq.s32.totalorder %v3918_v14, 1 }
 0x87a   : > { %v8105_v38 = vpop.eup %8104 }
 0x87b   : > { %v8107_v20 = vpop.eup %8106  ;;  %v3847_v41 = vadd.f32 1.0, %v8105_v38  ;;  %v4057_v38 = vld [vmem:[#allocation3 + $0xaa] sm:$0x1] }
 0x87d   : > { %v3853_v47 = vadd.f32 %v8107_v20, %v3847_v41  ;;  %v4138_v20 = vrot.slane %v4056_v16, 4  ;;  %v4058_v41 = vld [vmem:[#allocation3 + $0xca] sm:$0x1]  ;;  %v4026_v16 = vrot.slane %v3937_v63, 3 }
 0x87e   : > { %v4142_v25 = vrot.slane %v4058_v41, 2 }
 0x87f   : > { %8108 = vlog2.f32 %v3853_v47  ;;  %v4140_v47 = vrot.slane %v4057_v38, 3 }
 0x889   : > { %v8109_v49 = vpop.eup %8108 }
 0x88a   : > { %v3857_v60 = vmul.f32 0.6931472, %v8109_v49 }
 0x88c   : > { %v3859_v55 = vadd.f32 %v3857_v60, %v3827_v18  ;;  %v4132_v18 = vrot.slane %v4053_v10, 7  ;;  %v9532_v60 = vld [vmem:[#allocation9 + $0x8] sm:$0xff] }
 0x88d   : > { %v3932_v10 = vld [vmem:[#allocation3 + $0x109] sm:$0x1] }
 0x88e   : > { %v3907_v7 = vadd.f32 %v3903_v58, %v3859_v55  ;;  %v4133_v35 = vsel %vm2698_vm5, %v4132_v18, %v4052_v30  ;;  %v3939_v30 = vld [vmem:[#allocation3 + $0x1e9] sm:$0x1] }
 0x88f   : > { %v4135_v61 = vsel %vm2701_vm6, %v4134_v12, %v4133_v35 }
 0x890   : > { %v9487_v15 = vsel %vm3920_vm14, %v3907_v7, %v9440_v13  ;;  %v4137_v33 = vsel %vm2704_vm7, %v4136_v39, %v4135_v61  ;;  %v4028_v39 = vrot.slane %v3938_v4, 2 }
 0x891   : > { %3942 = vrot.lane.b32.xlu0 %v9487_v15, %s8614_s12  ;;  %v4139_v23 = vsel %vm2707_vm8, %v4138_v20, %v4137_v33  ;;  %v4030_v20 = vrot.slane %v3939_v30, 1 }
 0x892   : > { %v4141_v46 = vsel %vm2710_vm9, %v4140_v47, %v4139_v23 }
 0x893   : > { %v4143_v56 = vsel %vm2713_vm10, %v4142_v25, %v4141_v46 }
 0x894   : > { %v4145_v22 = vsel %vm2716_vm11, %v4144_v31, %v4143_v56 }
 0x895   : > { %3948 = vrot.lane.b32.xlu0 %v9487_v15, %s8613_s10 }
 0x899   : > { %4045 = vperm.xlu0 %7834, %v4040_v42  }
 0x8a5   : > { %v4069_v59 = vpop.permute.xlu1 %4068 }
 0x8a6   : > { %v4072_v62 = vadd.f32 %v9398_v43, %v4069_v59 }
 0x8a9   : > { %v4075_v11 = vpop.permute.xlu1 %4074 }
 0x8aa   : > { %v4078_v51 = vadd.f32 %v9401_v48, %v4075_v11 }
 0x8ac   : > { %v4080_v13 = vmax.f32 %v4072_v62, %v4078_v51  ;;  %vm4090_vm0 = vcmp.ge.f32.partialorder %v4072_v62, %v4078_v51 }
 0x8ae   : > { %v4082_v21 = vmax.f32 %v9463_v1, %v4080_v13  ;;  %vm4084_vm12 = vcmp.ge.f32.partialorder %v9463_v1, %v4080_v13  ;;  %v3933_v13 = vld [vmem:[#allocation3 + $0x129] sm:$0x1] }
 0x8af   : > { %v4086_v24 = vsel %vm4084_vm12, %v4072_v62, %v9463_v1  ;;  %vm4092_vm1 = vmor %vm4084_vm12, %vm4090_vm0  ;;  %vm4166_vm12 = vcmp.lt.s32.totalorder %v9465_v9, %v9388_v0 }
 0x8b0   : > { %v4088_v2 = vsub.f32 %v4086_v24, %v4082_v21  ;;  %v4094_v8 = vsel %vm4092_vm1, %v4078_v51, %v4072_v62  ;;  %v4168_v46 = vsel %vm4166_vm12, 1, %v8615_v17 }
 0x8b1   : > { %v4096_v26 = vsub.f32 %v4094_v8, %v4082_v21 }
 0x8b2   : > { %v4098_v5 = vmul.f32 1.442695, %v4088_v2  ;;  %v3934_v2 = vld [vmem:[#allocation3 + $0x149] sm:$0x1] }
 0x8b3   : > { %v4104_v6 = vmul.f32 1.442695, %v4096_v26  ;;  %v4018_v26 = vrot.slane %v3933_v13, 7 }
 0x8b4   : > { %8110 = vpow2.f32 %v4098_v5  ;;  %v3935_v5 = vld [vmem:[#allocation3 + $0x169] sm:$0x1] }
 0x8b5   : > { %8112 = vpow2.f32 %v4104_v6  ;;  %v4020_v6 = vrot.slane %v3934_v2, 6 }
 0x8ba   : > { %v4171_v50 = vpop.permute.xlu1 %4170 }
 0x8bb   : > { %vm4175_vm2 = vcmp.eq.s32.totalorder %v4171_v50, 1 }
 0x8be   : > { %v8111_v27 = vpop.eup %8110 }
 0x8bf   : > { %v8113_v36 = vpop.eup %8112  ;;  %v4102_v29 = vadd.f32 1.0, %v8111_v27  ;;  %v3936_v27 = vld [vmem:[#allocation3 + $0x189] sm:$0x1] }
 0x8c0   : > { %v4024_v18 = vrot.slane %v3936_v27, 4  ;;  %v4187_v27 = vld [vmem:[#allocation3 + $0xeb] sm:$0x1] }
 0x8c1   : > { %v4108_v44 = vadd.f32 %v8113_v36, %v4102_v29  ;;  %v4019_v36 = vsel %vm2698_vm5, %v4018_v26, %v3932_v10  ;;  %v4022_v29 = vrot.slane %v3935_v5, 5  ;;  %v4186_v26 = vld [vmem:[#allocation3 + $0xcb] sm:$0x1] }
 0x8c3   : > { %8114 = vlog2.f32 %v4108_v44  ;;  %v4021_v44 = vsel %vm2701_vm6, %v4020_v6, %v4019_v36  ;;  %v4270_v36 = vrot.slane %v4186_v26, 2 }
 0x8c4   : > { %v4023_v12 = vsel %vm2704_vm7, %v4022_v29, %v4021_v44  ;;  %v4272_v44 = vrot.slane %v4187_v27, 1 }
 0x8c5   : > { %v4025_v35 = vsel %vm2707_vm8, %v4024_v18, %v4023_v12 }
 0x8c6   : > { %v4027_v61 = vsel %vm2710_vm9, %v4026_v16, %v4025_v35 }
 0x8c7   : > { %v4029_v33 = vsel %vm2713_vm10, %v4028_v39, %v4027_v61 }
 0x8c8   : > { %v4031_v23 = vsel %vm2716_vm11, %v4030_v20, %v4029_v33 }
 0x8cd   : > { %v8115_v28 = vpop.eup %8114 }
 0x8ce   : > { %v4111_v54 = vmul.f32 0.6931472, %v8115_v28 }
 0x8d0   : > { %v4114_v32 = vadd.f32 %v4111_v54, %v4082_v21 }
 0x8d2   : > { %v4162_v34 = vadd.f32 %v4145_v22, %v4114_v32 }
 0x8d4   : > { %v9510_v40 = vsel %vm4175_vm2, %v4162_v34, %v9463_v1 }
 0x8d5   : > { %4196 = vrot.lane.b32.xlu1 %v9510_v40, %s8614_s12 }
 0x8d9   : > { %4202 = vrot.lane.b32.xlu1 %v9510_v40, %s8613_s10 }
 0x8dd   : > { %4298 = vperm.xlu1 %7835, %v4295_v45  }
 0x903   : > { %v3943_v1 = vpop.permute.xlu0 %3942 }
 0x904   : > { %v3945_v52 = vadd.f32 %v9529_v19, %v3943_v1 }
 0x907   : > { %v3949_v49 = vpop.permute.xlu0 %3948 }
 0x908   : > { %v3951_v3 = vadd.f32 %v9532_v60, %v3949_v49 }
 0x90a   : > { %v3953_v55 = vmax.f32 %v3945_v52, %v3951_v3  ;;  %vm3963_vm13 = vcmp.ge.f32.partialorder %v3945_v52, %v3951_v3 }
 0x90c   : > { %v3955_v14 = vmax.f32 %v9487_v15, %v3953_v55  ;;  %vm3957_vm4 = vcmp.ge.f32.partialorder %v9487_v15, %v3953_v55 }
 0x90d   : > { %v3959_v58 = vsel %vm3957_vm4, %v3945_v52, %v9487_v15  ;;  %vm3965_vm14 = vmor %vm3957_vm4, %vm3963_vm13 }
 0x90e   : > { %v3961_v7 = vsub.f32 %v3959_v58, %v3955_v14  ;;  %v3967_v42 = vsel %vm3965_vm14, %v3951_v3, %v3945_v52  ;;  %v4181_v3 = vld [vmem:[#allocation3 + $0x2b] sm:$0x1] }
 0x90f   : > { %v3969_v59 = vsub.f32 %v3967_v42, %v3955_v14  ;;  %v4182_v58 = vld [vmem:[#allocation3 + $0x4b] sm:$0x1]  ;;  %v4260_v42 = vrot.slane %v4181_v3, 7  ;;  %v4060_v3 = vld [vmem:[#allocation3 + $0x10a] sm:$0x1] }
 0x910   : > { %v3972_v11 = vmul.f32 1.442695, %v3961_v7 }
 0x911   : > { %v3978_v62 = vmul.f32 1.442695, %v3969_v59  ;;  %v4183_v59 = vld [vmem:[#allocation3 + $0x6b] sm:$0x1] }
 0x912   : > { %8116 = vpow2.f32 %v3972_v11  ;;  %v4262_v11 = vrot.slane %v4182_v58, 6  ;;  %v4065_v58 = vld [vmem:[#allocation3 + $0x1aa] sm:$0x1] }
 0x913   : > { %8118 = vpow2.f32 %v3978_v62  ;;  %v4184_v62 = vld [vmem:[#allocation3 + $0x8b] sm:$0x1] }
 0x918   : > { %v4046_v57 = vpop.permute.xlu0 %4045 }
 0x919   : > { %vm4048_vm15 = vcmp.eq.s32.totalorder %v4046_v57, 1 }
 0x91c   : > { %v8117_v51 = vpop.eup %8116 }
 0x91d   : > { %v8119_v21 = vpop.eup %8118  ;;  %v3975_v24 = vadd.f32 1.0, %v8117_v51  ;;  %v4180_v51 = vld [vmem:[#allocation3 + $0xb] sm:$0x1] }
 0x91e   : > { %v4261_v13 = vsel %vm2698_vm5, %v4260_v42, %v4180_v51  ;;  %v4067_v51 = vld [vmem:[#allocation3 + $0x1ea] sm:$0x1] }
 0x91f   : > { %v3981_v8 = vadd.f32 %v8119_v21, %v3975_v24  ;;  %v4264_v21 = vrot.slane %v4183_v59, 5  ;;  %v4185_v24 = vld [vmem:[#allocation3 + $0xab] sm:$0x1]  ;;  %v4263_v2 = vsel %vm2701_vm6, %v4262_v11, %v4261_v13  ;;  %v4066_v59 = vld [vmem:[#allocation3 + $0x1ca] sm:$0x1] }
 0x920   : > { %v4268_v6 = vrot.slane %v4185_v24, 3 }
 0x921   : > { %8120 = vlog2.f32 %v3981_v8  ;;  %v4266_v8 = vrot.slane %v4184_v62, 4  ;;  %v4265_v5 = vsel %vm2704_vm7, %v4264_v21, %v4263_v2  ;;  %v4154_v62 = vrot.slane %v4065_v58, 3 }
 0x922   : > { %v4156_v21 = vrot.slane %v4066_v59, 2 }
 0x923   : > { %v4267_v10 = vsel %vm2707_vm8, %v4266_v8, %v4265_v5  ;;  %v4158_v8 = vrot.slane %v4067_v51, 1  ;;  %v9618_v51 = vstv %s4435_s30 }
 0x924   : > { %v4269_v63 = vsel %vm2710_vm9, %v4268_v6, %v4267_v10 }
 0x925   : > { %v4271_v4 = vsel %vm2713_vm10, %v4270_v36, %v4269_v63 }
 0x926   : > { %v4273_v30 = vsel %vm2716_vm11, %v4272_v44, %v4271_v4 }
 0x92b   : > { %v8121_v38 = vpop.eup %8120 }
 0x92c   : > { %v3985_v41 = vmul.f32 0.6931472, %v8121_v38  ;;  %v9571_v38 = vstv %s4307_s20  ;;  %s6099_s20 = sadd.s32 26, %s8864_s1 }
 0x92d   : > { %vm4421_vm4 = vcmp.lt.s32.totalorder %v9571_v38, %v9519_v53 }
 0x92e   : > { %v3987_v47 = vadd.f32 %v3985_v41, %v3955_v14  ;;  %v4423_v61 = vsel %vm4421_vm4, 1, %v8615_v17 }
 0x930   : > { %v4035_v25 = vadd.f32 %v4031_v23, %v3987_v47 }
 0x932   : > { %v9546_v28 = vsel %vm4048_vm15, %v4035_v25, %v9487_v15 }
 0x933   : > { %4070 = vrot.lane.b32.xlu0 %v9546_v28, %s8614_s12 }
 0x937   : > { %4076 = vrot.lane.b32.xlu0 %v9546_v28, %s8613_s10 }
 0x93b   : > { %4173 = vperm.xlu0 %7834, %v4168_v46  }
 0x947   : > { %v4197_v31 = vpop.permute.xlu1 %4196 }
 0x948   : > { %v4200_v56 = vadd.f32 %v9398_v43, %v4197_v31 }
 0x94b   : > { %v4203_v54 = vpop.permute.xlu1 %4202 }
 0x94c   : > { %v4206_v32 = vadd.f32 %v9401_v48, %v4203_v54 }
 0x94e   : > { %v4208_v15 = vmax.f32 %v4200_v56, %v4206_v32  ;;  %vm4218_vm1 = vcmp.ge.f32.partialorder %v4200_v56, %v4206_v32 }
 0x950   : > { %v4210_v50 = vmax.f32 %v9510_v40, %v4208_v15  ;;  %vm4212_vm0 = vcmp.ge.f32.partialorder %v9510_v40, %v4208_v15  ;;  %v4061_v15 = vld [vmem:[#allocation3 + $0x12a] sm:$0x1] }
 0x951   : > { %v4214_v9 = vsel %vm4212_vm0, %v4200_v56, %v9510_v40  ;;  %vm4220_vm2 = vmor %vm4212_vm0, %vm4218_vm1  ;;  %vm4294_vm0 = vcmp.lt.s32.totalorder %v9512_v37, %v9388_v0 }
 0x952   : > { %v4216_v22 = vsub.f32 %v4214_v9, %v4210_v50  ;;  %v4222_v34 = vsel %vm4220_vm2, %v4206_v32, %v4200_v56  ;;  %v4296_v63 = vsel %vm4294_vm0, 1, %v8615_v17 }
 0x953   : > { %v4224_v45 = vsub.f32 %v4222_v34, %v4210_v50 }
 0x954   : > { %v4226_v1 = vmul.f32 1.442695, %v4216_v22  ;;  %v4062_v22 = vld [vmem:[#allocation3 + $0x14a] sm:$0x1] }
 0x955   : > { %v4232_v49 = vmul.f32 1.442695, %v4224_v45  ;;  %v4146_v45 = vrot.slane %v4061_v15, 7 }
 0x956   : > { %8122 = vpow2.f32 %v4226_v1  ;;  %v4063_v1 = vld [vmem:[#allocation3 + $0x16a] sm:$0x1] }
 0x957   : > { %8124 = vpow2.f32 %v4232_v49  ;;  %v4148_v49 = vrot.slane %v4062_v22, 6 }
 0x95c   : > { %v4299_v16 = vpop.permute.xlu1 %4298 }
 0x95d   : > { %vm4303_vm3 = vcmp.eq.s32.totalorder %v4299_v16, 1 }
 0x960   : > { %v8123_v52 = vpop.eup %8122 }
 0x961   : > { %v8125_v55 = vpop.eup %8124  ;;  %v4230_v14 = vadd.f32 1.0, %v8123_v52  ;;  %v4064_v52 = vld [vmem:[#allocation3 + $0x18a] sm:$0x1] }
 0x962   : > { %v4152_v42 = vrot.slane %v4064_v52, 4 }
 0x963   : > { %v4236_v7 = vadd.f32 %v8125_v55, %v4230_v14  ;;  %v4147_v55 = vsel %vm2698_vm5, %v4146_v45, %v4060_v3  ;;  %v4150_v14 = vrot.slane %v4063_v1, 5  ;;  %v4315_v45 = vld [vmem:[#allocation3 + $0xec] sm:$0x1] }
 0x965   : > { %8126 = vlog2.f32 %v4236_v7  ;;  %v4149_v7 = vsel %vm2701_vm6, %v4148_v49, %v4147_v55  ;;  %v4400_v55 = vrot.slane %v4315_v45, 1 }
 0x966   : > { %v4151_v11 = vsel %vm2704_vm7, %v4150_v14, %v4149_v7 }
 0x967   : > { %v4153_v13 = vsel %vm2707_vm8, %v4152_v42, %v4151_v11 }
 0x968   : > { %v4155_v2 = vsel %vm2710_vm9, %v4154_v62, %v4153_v13 }
 0x969   : > { %v4157_v5 = vsel %vm2713_vm10, %v4156_v21, %v4155_v2 }
 0x96a   : > { %v4159_v10 = vsel %vm2716_vm11, %v4158_v8, %v4157_v5 }
 0x96f   : > { %v8127_v29 = vpop.eup %8126 }
 0x970   : > { %v4239_v18 = vmul.f32 0.6931472, %v8127_v29 }
 0x972   : > { %v4242_v12 = vadd.f32 %v4239_v18, %v4210_v50 }
 0x974   : > { %v4290_v35 = vadd.f32 %v4273_v30, %v4242_v12 }
 0x976   : > { %v9569_v39 = vsel %vm4303_vm3, %v4290_v35, %v9510_v40 }
 0x977   : > { %4324 = vrot.lane.b32.xlu1 %v9569_v39, %s8614_s12 }
 0x97b   : > { %4330 = vrot.lane.b32.xlu1 %v9569_v39, %s8613_s10 }
 0x97f   : > { %4426 = vperm.xlu1 %7835, %v4423_v61  }
 0x9a5   : > { %v4071_v20 = vpop.permute.xlu0 %4070 }
 0x9a6   : > { %v4073_v33 = vadd.f32 %v9529_v19, %v4071_v20 }
 0x9a9   : > { %v4077_v41 = vpop.permute.xlu0 %4076 }
 0x9aa   : > { %v4079_v40 = vadd.f32 %v9532_v60, %v4077_v41 }
 0x9ac   : > { %v4081_v47 = vmax.f32 %v4073_v33, %v4079_v40  ;;  %vm4091_vm14 = vcmp.ge.f32.partialorder %v4073_v33, %v4079_v40 }
 0x9ae   : > { %v4083_v57 = vmax.f32 %v9546_v28, %v4081_v47  ;;  %vm4085_vm13 = vcmp.ge.f32.partialorder %v9546_v28, %v4081_v47 }
 0x9af   : > { %v4087_v23 = vsel %vm4085_vm13, %v4073_v33, %v9546_v28  ;;  %vm4093_vm15 = vmor %vm4085_vm13, %vm4091_vm14  ;;  %vm4549_vm13 = vcmp.lt.s32.totalorder %v9618_v51, %v9519_v53 }
 0x9b0   : > { %v4089_v25 = vsub.f32 %v4087_v23, %v4083_v57  ;;  %v4095_v46 = vsel %vm4093_vm15, %v4079_v40, %v4073_v33  ;;  %v4310_v40 = vld [vmem:[#allocation3 + $0x4c] sm:$0x1]  ;;  %v4551_v13 = vsel %vm4549_vm13, 1, %v8615_v17 }
 0x9b1   : > { %v4097_v31 = vsub.f32 %v4095_v46, %v4083_v57  ;;  %v4311_v23 = vld [vmem:[#allocation3 + $0x6c] sm:$0x1] }
 0x9b2   : > { %v4100_v54 = vmul.f32 1.442695, %v4089_v25  ;;  %v4390_v25 = vrot.slane %v4310_v40, 6  ;;  %v4312_v46 = vld [vmem:[#allocation3 + $0x8c] sm:$0x1] }
 0x9b3   : > { %v4106_v56 = vmul.f32 1.442695, %v4097_v31  ;;  %v4308_v31 = vld [vmem:[#allocation3 + $0xc] sm:$0x1]  ;;  %v4194_v40 = vld [vmem:[#allocation3 + $0x1cb] sm:$0x1] }
 0x9b4   : > { %8128 = vpow2.f32 %v4100_v54 }
 0x9b5   : > { %8130 = vpow2.f32 %v4106_v56  ;;  %v4392_v56 = vrot.slane %v4311_v23, 5  ;;  %v4195_v23 = vld [vmem:[#allocation3 + $0x1eb] sm:$0x1] }
 0x9ba   : > { %v4174_v27 = vpop.permute.xlu0 %4173 }
 0x9bb   : > { %vm4176_vm12 = vcmp.eq.s32.totalorder %v4174_v27, 1 }
 0x9be   : > { %v8129_v32 = vpop.eup %8128 }
 0x9bf   : > { %v8131_v50 = vpop.eup %8130  ;;  %v4103_v9 = vadd.f32 1.0, %v8129_v32  ;;  %v4313_v32 = vld [vmem:[#allocation3 + $0xac] sm:$0x1] }
 0x9c1   : > { %v4109_v34 = vadd.f32 %v8131_v50, %v4103_v9  ;;  %v4394_v50 = vrot.slane %v4312_v46, 4  ;;  %v4314_v9 = vld [vmem:[#allocation3 + $0xcc] sm:$0x1]  ;;  %v4284_v46 = vrot.slane %v4194_v40, 2 }
 0x9c2   : > { %v4398_v49 = vrot.slane %v4314_v9, 2 }
 0x9c3   : > { %8132 = vlog2.f32 %v4109_v34  ;;  %v4396_v34 = vrot.slane %v4313_v32, 3 }
 0x9cd   : > { %v8133_v24 = vpop.eup %8132 }
 0x9ce   : > { %v4113_v26 = vmul.f32 0.6931472, %v8133_v24 }
 0x9d0   : > { %v4115_v6 = vadd.f32 %v4113_v26, %v4083_v57 }
 0x9d2   : > { %v4163_v36 = vadd.f32 %v4159_v10, %v4115_v6 }
 0x9d4   : > { %v9593_v29 = vsel %vm4176_vm12, %v4163_v36, %v9546_v28 }
 0x9d5   : > { %4198 = vrot.lane.b32.xlu0 %v9593_v29, %s8614_s12 }
 0x9d9   : > { %4204 = vrot.lane.b32.xlu0 %v9593_v29, %s8613_s10 }
 0x9dd   : > { %4301 = vperm.xlu0 %7834, %v4296_v63  }
 0x9e9   : > { %v4325_v44 = vpop.permute.xlu1 %4324 }
 0x9ea   : > { %v4328_v4 = vadd.f32 %v9398_v43, %v4325_v44  ;;  %v4309_v43 = vld [vmem:[#allocation3 + $0x2c] sm:$0x1] }
 0x9eb   : > { %v4388_v57 = vrot.slane %v4309_v43, 7  ;;  %v4193_v43 = vld [vmem:[#allocation3 + $0x1ab] sm:$0x1] }
 0x9ed   : > { %v4331_v18 = vpop.permute.xlu1 %4330  ;;  %v4389_v54 = vsel %vm2698_vm5, %v4388_v57, %v4308_v31  ;;  %v4282_v57 = vrot.slane %v4193_v43, 3 }
 0x9ee   : > { %v4334_v12 = vadd.f32 %v9401_v48, %v4331_v18  ;;  %v4391_v15 = vsel %vm2701_vm6, %v4390_v25, %v4389_v54  ;;  %v4189_v18 = vld [vmem:[#allocation3 + $0x12b] sm:$0x1] }
 0x9ef   : > { %v4393_v22 = vsel %vm2704_vm7, %v4392_v56, %v4391_v15  ;;  %v4286_v56 = vrot.slane %v4195_v23, 1 }
 0x9f0   : > { %v4336_v28 = vmax.f32 %v4328_v4, %v4334_v12  ;;  %vm4346_vm2 = vcmp.ge.f32.partialorder %v4328_v4, %v4334_v12  ;;  %v4395_v1 = vsel %vm2707_vm8, %v4394_v50, %v4393_v22 }
 0x9f1   : > { %v4397_v3 = vsel %vm2710_vm9, %v4396_v34, %v4395_v1  ;;  %v9647_v1 = vld [vmem:[%s10685_s6 + $0x8] sm:$0xff] }
 0x9f2   : > { %v4338_v16 = vmax.f32 %v9569_v39, %v4336_v28  ;;  %vm4340_vm1 = vcmp.ge.f32.partialorder %v9569_v39, %v4336_v28  ;;  %v4399_v58 = vsel %vm2713_vm10, %v4398_v49, %v4397_v3  ;;  %v4190_v28 = vld [vmem:[#allocation3 + $0x14b] sm:$0x1]  ;;  %v9657_v3 = vld [vmem:[%s10681_s2] sm:$0xff] }
 0x9f3   : > { %v4342_v0 = vsel %vm4340_vm1, %v4328_v4, %v9569_v39  ;;  %vm4348_vm3 = vmor %vm4340_vm1, %vm4346_vm2  ;;  %v4401_v59 = vsel %vm2716_vm11, %v4400_v55, %v4399_v58  ;;  %vm4422_vm1 = vcmp.lt.s32.totalorder %v9571_v38, %v9647_v1 }
 0x9f4   : > { %v4344_v37 = vsub.f32 %v4342_v0, %v4338_v16  ;;  %v4350_v30 = vsel %vm4348_vm3, %v4334_v12, %v4328_v4  ;;  %v4274_v0 = vrot.slane %v4189_v18, 7  ;;  %v4424_v49 = vsel %vm4422_vm1, 1, %v8615_v17 }
 0x9f5   : > { %v4352_v35 = vsub.f32 %v4350_v30, %v4338_v16  ;;  %v4276_v30 = vrot.slane %v4190_v28, 6 }
 0x9f6   : > { %v4354_v61 = vmul.f32 1.442695, %v4344_v37  ;;  %v4191_v37 = vld [vmem:[#allocation3 + $0x16b] sm:$0x1] }
 0x9f7   : > { %v4360_v20 = vmul.f32 1.442695, %v4352_v35  ;;  %v4192_v35 = vld [vmem:[#allocation3 + $0x18b] sm:$0x1] }
 0x9f8   : > { %8134 = vpow2.f32 %v4354_v61  ;;  %v4188_v61 = vld [vmem:[#allocation3 + $0x10b] sm:$0x1] }
 0x9f9   : > { %8136 = vpow2.f32 %v4360_v20  ;;  %v4275_v20 = vsel %vm2698_vm5, %v4274_v0, %v4188_v61  ;;  %v4442_v0 = vld [vmem:[#allocation3 + $0xcd] sm:$0x1] }
 0x9fe   : > { %v4427_v42 = vpop.permute.xlu1 %4426 }
 0x9ff   : > { %vm4431_vm4 = vcmp.eq.s32.totalorder %v4427_v42, 1 }
 0xa02   : > { %v8135_v41 = vpop.eup %8134 }
 0xa03   : > { %v8137_v33 = vpop.eup %8136  ;;  %v4358_v48 = vadd.f32 1.0, %v8135_v41  ;;  %v4278_v41 = vrot.slane %v4191_v37, 5 }
 0xa05   : > { %v4364_v47 = vadd.f32 %v8137_v33, %v4358_v48  ;;  %v4277_v33 = vsel %vm2701_vm6, %v4276_v30, %v4275_v20  ;;  %v4280_v48 = vrot.slane %v4192_v35, 4  ;;  %v4443_v35 = vld [vmem:[#allocation3 + $0xed] sm:$0x1]  ;;  %v4526_v20 = vrot.slane %v4442_v0, 2 }
 0xa07   : > { %8138 = vlog2.f32 %v4364_v47  ;;  %v4279_v47 = vsel %vm2704_vm7, %v4278_v41, %v4277_v33  ;;  %v4528_v33 = vrot.slane %v4443_v35, 1 }
 0xa08   : > { %v4281_v25 = vsel %vm2707_vm8, %v4280_v48, %v4279_v47 }
 0xa09   : > { %v4283_v54 = vsel %vm2710_vm9, %v4282_v57, %v4281_v25 }
 0xa0a   : > { %v4285_v15 = vsel %vm2713_vm10, %v4284_v46, %v4283_v54 }
 0xa0b   : > { %v4287_v22 = vsel %vm2716_vm11, %v4286_v56, %v4285_v15 }
 0xa11   : > { %v8139_v52 = vpop.eup %8138 }
 0xa12   : > { %v4367_v14 = vmul.f32 0.6931472, %v8139_v52 }
 0xa14   : > { %v4370_v7 = vadd.f32 %v4367_v14, %v4338_v16  ;;  %v9660_v14 = vld [vmem:[#allocation9] sm:$0xff] }
 0xa16   : > { %v4418_v11 = vadd.f32 %v4401_v59, %v4370_v7 }
 0xa18   : > { %v9616_v62 = vsel %vm4431_vm4, %v4418_v11, %v9569_v39 }
 0xa19   : > { %4452 = vrot.lane.b32.xlu1 %v9616_v62, %s8614_s12 }
 0xa1d   : > { %4458 = vrot.lane.b32.xlu1 %v9616_v62, %s8613_s10 }
 0xa21   : > { %4554 = vperm.xlu1 %7835, %v4551_v13  }
 0xa47   : > { %v4199_v21 = vpop.permute.xlu0 %4198 }
 0xa48   : > { %v4201_v2 = vadd.f32 %v9529_v19, %v4199_v21 }
 0xa4b   : > { %v4205_v24 = vpop.permute.xlu0 %4204 }
 0xa4c   : > { %v4207_v39 = vadd.f32 %v9532_v60, %v4205_v24 }
 0xa4e   : > { %v4209_v8 = vmax.f32 %v4201_v2, %v4207_v39  ;;  %vm4219_vm15 = vcmp.ge.f32.partialorder %v4201_v2, %v4207_v39 }
 0xa50   : > { %v4211_v26 = vmax.f32 %v9593_v29, %v4209_v8  ;;  %vm4213_vm14 = vcmp.ge.f32.partialorder %v9593_v29, %v4209_v8 }
 0xa51   : > { %v4215_v5 = vsel %vm4213_vm14, %v4201_v2, %v9593_v29  ;;  %vm4221_vm12 = vmor %vm4213_vm14, %vm4219_vm15 }
 0xa52   : > { %v4217_v6 = vsub.f32 %v4215_v5, %v4211_v26  ;;  %v4223_v27 = vsel %vm4221_vm12, %v4207_v39, %v4201_v2  ;;  %v4437_v39 = vld [vmem:[#allocation3 + $0x2d] sm:$0x1] }
 0xa53   : > { %v4225_v10 = vsub.f32 %v4223_v27, %v4211_v26  ;;  %v4438_v5 = vld [vmem:[#allocation3 + $0x4d] sm:$0x1]  ;;  %v4516_v27 = vrot.slane %v4437_v39, 7  ;;  %v4316_v39 = vld [vmem:[#allocation3 + $0x10c] sm:$0x1] }
 0xa54   : > { %v4228_v36 = vmul.f32 1.442695, %v4217_v6 }
 0xa55   : > { %v4234_v63 = vmul.f32 1.442695, %v4225_v10  ;;  %v4439_v10 = vld [vmem:[#allocation3 + $0x6d] sm:$0x1] }
 0xa56   : > { %8140 = vpow2.f32 %v4228_v36  ;;  %v4518_v36 = vrot.slane %v4438_v5, 6  ;;  %v4321_v5 = vld [vmem:[#allocation3 + $0x1ac] sm:$0x1] }
 0xa57   : > { %8142 = vpow2.f32 %v4234_v63  ;;  %v4440_v63 = vld [vmem:[#allocation3 + $0x8d] sm:$0x1] }
 0xa5c   : > { %v4302_v9 = vpop.permute.xlu0 %4301 }
 0xa5d   : > { %vm4304_vm0 = vcmp.eq.s32.totalorder %v4302_v9, 1 }
 0xa60   : > { %v8141_v44 = vpop.eup %8140 }
 0xa61   : > { %v8143_v4 = vpop.eup %8142  ;;  %v4231_v12 = vadd.f32 1.0, %v8141_v44  ;;  %v4436_v44 = vld [vmem:[#allocation3 + $0xd] sm:$0x1] }
 0xa62   : > { %v4517_v18 = vsel %vm2698_vm5, %v4516_v27, %v4436_v44  ;;  %v4323_v44 = vld [vmem:[#allocation3 + $0x1ec] sm:$0x1] }
 0xa63   : > { %v4237_v16 = vadd.f32 %v8143_v4, %v4231_v12  ;;  %v4520_v4 = vrot.slane %v4439_v10, 5  ;;  %v4441_v12 = vld [vmem:[#allocation3 + $0xad] sm:$0x1]  ;;  %v4519_v28 = vsel %vm2701_vm6, %v4518_v36, %v4517_v18  ;;  %v4322_v10 = vld [vmem:[#allocation3 + $0x1cc] sm:$0x1] }
 0xa64   : > { %v4524_v30 = vrot.slane %v4441_v12, 3 }
 0xa65   : > { %8144 = vlog2.f32 %v4237_v16  ;;  %v4522_v16 = vrot.slane %v4440_v63, 4  ;;  %v4521_v37 = vsel %vm2704_vm7, %v4520_v4, %v4519_v28  ;;  %v4410_v63 = vrot.slane %v4321_v5, 3 }
 0xa66   : > { %v4412_v4 = vrot.slane %v4322_v10, 2 }
 0xa67   : > { %v4523_v61 = vsel %vm2707_vm8, %v4522_v16, %v4521_v37  ;;  %v4414_v16 = vrot.slane %v4323_v44, 1 }
 0xa68   : > { %v4525_v43 = vsel %vm2710_vm9, %v4524_v30, %v4523_v61 }
 0xa69   : > { %v4527_v40 = vsel %vm2713_vm10, %v4526_v20, %v4525_v43 }
 0xa6a   : > { %v4529_v23 = vsel %vm2716_vm11, %v4528_v33, %v4527_v40 }
 0xa6f   : > { %v8145_v31 = vpop.eup %8144 }
 0xa70   : > { %v4241_v32 = vmul.f32 0.6931472, %v8145_v31  ;;  %v9677_v31 = vstv %s4563_s9  ;;  %s6355_s9 = sadd.s32 28, %s8864_s1 }
 0xa71   : > { %vm4677_vm14 = vcmp.lt.s32.totalorder %v9677_v31, %v9519_v53 }
 0xa72   : > { %v4243_v50 = vadd.f32 %v4241_v32, %v4211_v26  ;;  %v4679_v54 = vsel %vm4677_vm14, 1, %v8615_v17 }
 0xa74   : > { %v4291_v34 = vadd.f32 %v4287_v22, %v4243_v50 }
 0xa76   : > { %v9640_v45 = vsel %vm4304_vm0, %v4291_v34, %v9593_v29 }
 0xa77   : > { %4326 = vrot.lane.b32.xlu0 %v9640_v45, %s8614_s12 }
 0xa7b   : > { %4332 = vrot.lane.b32.xlu0 %v9640_v45, %s8613_s10 }
 0xa7f   : > { %4429 = vperm.xlu0 %7834, %v4424_v49  }
 0xa8b   : > { %v4453_v52 = vpop.permute.xlu1 %4452 }
 0xa8c   : > { %v4456_v55 = vadd.f32 %v9657_v3, %v4453_v52 }
 0xa8f   : > { %v4459_v29 = vpop.permute.xlu1 %4458 }
 0xa90   : > { %v4462_v58 = vadd.f32 %v9660_v14, %v4459_v29 }
 0xa92   : > { %v4464_v38 = vmax.f32 %v4456_v55, %v4462_v58  ;;  %vm4474_vm3 = vcmp.ge.f32.partialorder %v4456_v55, %v4462_v58 }
 0xa94   : > { %v4466_v7 = vmax.f32 %v9616_v62, %v4464_v38  ;;  %vm4468_vm2 = vcmp.ge.f32.partialorder %v9616_v62, %v4464_v38  ;;  %v4317_v38 = vld [vmem:[#allocation3 + $0x12c] sm:$0x1] }
 0xa95   : > { %v4470_v42 = vsel %vm4468_vm2, %v4456_v55, %v9616_v62  ;;  %vm4476_vm4 = vmor %vm4468_vm2, %vm4474_vm3  ;;  %vm4550_vm2 = vcmp.lt.s32.totalorder %v9618_v51, %v9647_v1 }
 0xa96   : > { %v4472_v59 = vsub.f32 %v4470_v42, %v4466_v7  ;;  %v4478_v11 = vsel %vm4476_vm4, %v4462_v58, %v4456_v55  ;;  %v4552_v43 = vsel %vm4550_vm2, 1, %v8615_v17 }
 0xa97   : > { %v4480_v13 = vsub.f32 %v4478_v11, %v4466_v7 }
 0xa98   : > { %v4482_v21 = vmul.f32 1.442695, %v4472_v59  ;;  %v4318_v59 = vld [vmem:[#allocation3 + $0x14c] sm:$0x1] }
 0xa99   : > { %v4488_v24 = vmul.f32 1.442695, %v4480_v13  ;;  %v4402_v13 = vrot.slane %v4317_v38, 7 }
 0xa9a   : > { %8146 = vpow2.f32 %v4482_v21  ;;  %v4319_v21 = vld [vmem:[#allocation3 + $0x16c] sm:$0x1] }
 0xa9b   : > { %8148 = vpow2.f32 %v4488_v24  ;;  %v4404_v24 = vrot.slane %v4318_v59, 6 }
 0xaa0   : > { %v4555_v57 = vpop.permute.xlu1 %4554 }
 0xaa1   : > { %vm4559_vm13 = vcmp.eq.s32.totalorder %v4555_v57, 1 }
 0xaa4   : > { %v8147_v2 = vpop.eup %8146 }
 0xaa5   : > { %v8149_v8 = vpop.eup %8148  ;;  %v4486_v26 = vadd.f32 1.0, %v8147_v2  ;;  %v4320_v2 = vld [vmem:[#allocation3 + $0x18c] sm:$0x1] }
 0xaa6   : > { %v4408_v27 = vrot.slane %v4320_v2, 4  ;;  %v4571_v2 = vld [vmem:[#allocation3 + $0xee] sm:$0x1] }
 0xaa7   : > { %v4492_v6 = vadd.f32 %v8149_v8, %v4486_v26  ;;  %v4403_v8 = vsel %vm2698_vm5, %v4402_v13, %v4316_v39  ;;  %v4406_v26 = vrot.slane %v4319_v21, 5  ;;  %v4570_v13 = vld [vmem:[#allocation3 + $0xce] sm:$0x1] }
 0xaa9   : > { %8150 = vlog2.f32 %v4492_v6  ;;  %v4405_v6 = vsel %vm2701_vm6, %v4404_v24, %v4403_v8  ;;  %v4654_v8 = vrot.slane %v4570_v13, 2 }
 0xaaa   : > { %v4407_v36 = vsel %vm2704_vm7, %v4406_v26, %v4405_v6  ;;  %v4656_v6 = vrot.slane %v4571_v2, 1 }
 0xaab   : > { %v4409_v18 = vsel %vm2707_vm8, %v4408_v27, %v4407_v36 }
 0xaac   : > { %v4411_v28 = vsel %vm2710_vm9, %v4410_v63, %v4409_v18 }
 0xaad   : > { %v4413_v37 = vsel %vm2713_vm10, %v4412_v4, %v4411_v28 }
 0xaae   : > { %v4415_v61 = vsel %vm2716_vm11, %v4414_v16, %v4413_v37 }
 0xab3   : > { %v8151_v41 = vpop.eup %8150 }
 0xab4   : > { %v4495_v48 = vmul.f32 0.6931472, %v8151_v41 }
 0xab6   : > { %v4498_v47 = vadd.f32 %v4495_v48, %v4466_v7 }
 0xab8   : > { %v4546_v25 = vadd.f32 %v4529_v23, %v4498_v47 }
 0xaba   : > { %v9675_v46 = vsel %vm4559_vm13, %v4546_v25, %v9616_v62 }
 0xabb   : > { %4580 = vrot.lane.b32.xlu1 %v9675_v46, %s8614_s12 }
 0xabf   : > { %4586 = vrot.lane.b32.xlu1 %v9675_v46, %s8613_s10 }
 0xac3   : > { %4682 = vperm.xlu1 %7835, %v4679_v54  }
 0xae9   : > { %v4327_v56 = vpop.permute.xlu0 %4326 }
 0xaea   : > { %v4329_v15 = vadd.f32 %v9529_v19, %v4327_v56 }
 0xaed   : > { %v4333_v32 = vpop.permute.xlu0 %4332 }
 0xaee   : > { %v4335_v62 = vadd.f32 %v9532_v60, %v4333_v32 }
 0xaf0   : > { %v4337_v50 = vmax.f32 %v4329_v15, %v4335_v62  ;;  %vm4347_vm12 = vcmp.ge.f32.partialorder %v4329_v15, %v4335_v62 }
 0xaf2   : > { %v4339_v9 = vmax.f32 %v9640_v45, %v4337_v50  ;;  %vm4341_vm15 = vcmp.ge.f32.partialorder %v9640_v45, %v4337_v50 }
 0xaf3   : > { %v4343_v22 = vsel %vm4341_vm15, %v4329_v15, %v9640_v45  ;;  %vm4349_vm0 = vmor %vm4341_vm15, %vm4347_vm12 }
 0xaf4   : > { %v4345_v34 = vsub.f32 %v4343_v22, %v4339_v9  ;;  %v4351_v49 = vsel %vm4349_vm0, %v4335_v62, %v4329_v15  ;;  %v4565_v62 = vld [vmem:[#allocation3 + $0x2e] sm:$0x1] }
 0xaf5   : > { %v4353_v52 = vsub.f32 %v4351_v49, %v4339_v9  ;;  %v4566_v22 = vld [vmem:[#allocation3 + $0x4e] sm:$0x1]  ;;  %v4644_v49 = vrot.slane %v4565_v62, 7  ;;  %v4449_v62 = vld [vmem:[#allocation3 + $0x1ad] sm:$0x1] }
 0xaf6   : > { %v4356_v29 = vmul.f32 1.442695, %v4345_v34 }
 0xaf7   : > { %v4362_v55 = vmul.f32 1.442695, %v4353_v52  ;;  %v4567_v52 = vld [vmem:[#allocation3 + $0x6e] sm:$0x1] }
 0xaf8   : > { %8152 = vpow2.f32 %v4356_v29  ;;  %v4646_v29 = vrot.slane %v4566_v22, 6  ;;  %v4450_v22 = vld [vmem:[#allocation3 + $0x1cd] sm:$0x1] }
 0xaf9   : > { %8154 = vpow2.f32 %v4362_v55  ;;  %v4568_v55 = vld [vmem:[#allocation3 + $0x8e] sm:$0x1] }
 0xafe   : > { %v4430_v35 = vpop.permute.xlu0 %4429 }
 0xaff   : > { %vm4432_vm1 = vcmp.eq.s32.totalorder %v4430_v35, 1 }
 0xb02   : > { %v8153_v58 = vpop.eup %8152 }
 0xb03   : > { %v8155_v7 = vpop.eup %8154  ;;  %v4359_v42 = vadd.f32 1.0, %v8153_v58  ;;  %v4564_v58 = vld [vmem:[#allocation3 + $0xe] sm:$0x1] }
 0xb04   : > { %v4645_v38 = vsel %vm2698_vm5, %v4644_v49, %v4564_v58  ;;  %v4538_v49 = vrot.slane %v4449_v62, 3 }
 0xb05   : > { %v4365_v11 = vadd.f32 %v8155_v7, %v4359_v42  ;;  %v4648_v7 = vrot.slane %v4567_v52, 5  ;;  %v4569_v42 = vld [vmem:[#allocation3 + $0xae] sm:$0x1]  ;;  %v4647_v59 = vsel %vm2701_vm6, %v4646_v29, %v4645_v38  ;;  %v4451_v52 = vld [vmem:[#allocation3 + $0x1ed] sm:$0x1] }
 0xb06   : > { %v4652_v24 = vrot.slane %v4569_v42, 3 }
 0xb07   : > { %8156 = vlog2.f32 %v4365_v11  ;;  %v4650_v11 = vrot.slane %v4568_v55, 4  ;;  %v4649_v21 = vsel %vm2704_vm7, %v4648_v7, %v4647_v59  ;;  %v4540_v55 = vrot.slane %v4450_v22, 2 }
 0xb08   : > { %v4542_v7 = vrot.slane %v4451_v52, 1  ;;  %v9771_v52 = vstv %s4819_s24 }
 0xb09   : > { %v4651_v39 = vsel %vm2707_vm8, %v4650_v11, %v4649_v21 }
 0xb0a   : > { %v4653_v5 = vsel %vm2710_vm9, %v4652_v24, %v4651_v39 }
 0xb0b   : > { %v4655_v10 = vsel %vm2713_vm10, %v4654_v8, %v4653_v5 }
 0xb0c   : > { %v4657_v44 = vsel %vm2716_vm11, %v4656_v6, %v4655_v10 }
 0xb11   : > { %v8157_v12 = vpop.eup %8156 }
 0xb12   : > { %v4369_v0 = vmul.f32 0.6931472, %v8157_v12  ;;  %v9724_v12 = vstv %s4691_s23 }
 0xb13   : > { %vm4805_vm15 = vcmp.lt.s32.totalorder %v9724_v12, %v9519_v53 }
 0xb14   : > { %v4371_v30 = vadd.f32 %v4369_v0, %v4339_v9  ;;  %v4807_v28 = vsel %vm4805_vm15, 1, %v8615_v17 }
 0xb16   : > { %v4419_v20 = vadd.f32 %v4415_v61, %v4371_v30 }
 0xb18   : > { %v9699_v41 = vsel %vm4432_vm1, %v4419_v20, %v9640_v45 }
 0xb19   : > { %4454 = vrot.lane.b32.xlu0 %v9699_v41, %s8614_s12 }
 0xb1d   : > { %4460 = vrot.lane.b32.xlu0 %v9699_v41, %s8613_s10 }
 0xb21   : > { %4557 = vperm.xlu0 %7834, %v4552_v43  }
 0xb2d   : > { %v4581_v33 = vpop.permute.xlu1 %4580 }
 0xb2e   : > { %v4584_v40 = vadd.f32 %v9657_v3, %v4581_v33 }
 0xb31   : > { %v4587_v48 = vpop.permute.xlu1 %4586 }
 0xb32   : > { %v4590_v47 = vadd.f32 %v9660_v14, %v4587_v48 }
 0xb34   : > { %v4592_v45 = vmax.f32 %v4584_v40, %v4590_v47  ;;  %vm4602_vm4 = vcmp.ge.f32.partialorder %v4584_v40, %v4590_v47 }
 0xb36   : > { %v4594_v57 = vmax.f32 %v9675_v46, %v4592_v45  ;;  %vm4596_vm3 = vcmp.ge.f32.partialorder %v9675_v46, %v4592_v45  ;;  %v4446_v45 = vld [vmem:[#allocation3 + $0x14d] sm:$0x1] }
 0xb37   : > { %v4598_v51 = vsel %vm4596_vm3, %v4584_v40, %v9675_v46  ;;  %vm4604_vm13 = vmor %vm4596_vm3, %vm4602_vm4  ;;  %vm4678_vm3 = vcmp.lt.s32.totalorder %v9677_v31, %v9647_v1 }
 0xb38   : > { %v4600_v23 = vsub.f32 %v4598_v51, %v4594_v57  ;;  %v4606_v25 = vsel %vm4604_vm13, %v4590_v47, %v4584_v40  ;;  %v4680_v39 = vsel %vm4678_vm3, 1, %v8615_v17 }
 0xb39   : > { %v4608_v54 = vsub.f32 %v4606_v25, %v4594_v57  ;;  %v4532_v25 = vrot.slane %v4446_v45, 6 }
 0xb3a   : > { %v4610_v56 = vmul.f32 1.442695, %v4600_v23  ;;  %v4447_v23 = vld [vmem:[#allocation3 + $0x16d] sm:$0x1] }
 0xb3b   : > { %v4616_v32 = vmul.f32 1.442695, %v4608_v54  ;;  %v4448_v54 = vld [vmem:[#allocation3 + $0x18d] sm:$0x1] }
 0xb3c   : > { %8158 = vpow2.f32 %v4610_v56  ;;  %v4444_v56 = vld [vmem:[#allocation3 + $0x10d] sm:$0x1] }
 0xb3d   : > { %8160 = vpow2.f32 %v4616_v32 }
 0xb42   : > { %v4683_v63 = vpop.permute.xlu1 %4682 }
 0xb43   : > { %vm4687_vm14 = vcmp.eq.s32.totalorder %v4683_v63, 1 }
 0xb46   : > { %v8159_v15 = vpop.eup %8158 }
 0xb47   : > { %v8161_v50 = vpop.eup %8160  ;;  %v4614_v9 = vadd.f32 1.0, %v8159_v15  ;;  %v4534_v15 = vrot.slane %v4447_v23, 5 }
 0xb49   : > { %v4620_v34 = vadd.f32 %v8161_v50, %v4614_v9  ;;  %v4536_v9 = vrot.slane %v4448_v54, 4 }
 0xb4b   : > { %8162 = vlog2.f32 %v4620_v34 }
 0xb55   : > { %v8163_v26 = vpop.eup %8162 }
 0xb56   : > { %v4623_v27 = vmul.f32 0.6931472, %v8163_v26 }
 0xb58   : > { %v4626_v36 = vadd.f32 %v4623_v27, %v4594_v57 }
 0xb5a   : > { %v4674_v18 = vadd.f32 %v4657_v44, %v4626_v36 }
 0xb5c   : > { %v9722_v4 = vsel %vm4687_vm14, %v4674_v18, %v9675_v46 }
 0xb5d   : > { %4708 = vrot.lane.b32.xlu1 %v9722_v4, %s8614_s12 }
 0xb61   : > { %4714 = vrot.lane.b32.xlu1 %v9722_v4, %s8613_s10 }
 0xb65   : > { %4810 = vperm.xlu1 %7835, %v4807_v28  }
 0xb8b   : > { %v4455_v16 = vpop.permute.xlu0 %4454 }
 0xb8c   : > { %v4457_v37 = vadd.f32 %v9529_v19, %v4455_v16  ;;  %v4445_v19 = vld [vmem:[#allocation3 + $0x12d] sm:$0x1]  ;;  %v4693_v16 = vld [vmem:[#allocation3 + $0x2f] sm:$0x1] }
 0xb8d   : > { %v4530_v51 = vrot.slane %v4445_v19, 7 }
 0xb8f   : > { %v4461_v0 = vpop.permute.xlu0 %4460  ;;  %v4531_v32 = vsel %vm2698_vm5, %v4530_v51, %v4444_v56  ;;  %v4699_v51 = vld [vmem:[#allocation3 + $0xef] sm:$0x1] }
 0xb90   : > { %v4463_v46 = vadd.f32 %v9532_v60, %v4461_v0  ;;  %v4533_v50 = vsel %vm2701_vm6, %v4532_v25, %v4531_v32  ;;  %v4784_v32 = vrot.slane %v4699_v51, 1 }
 0xb91   : > { %v4535_v34 = vsel %vm2704_vm7, %v4534_v15, %v4533_v50 }
 0xb92   : > { %v4465_v30 = vmax.f32 %v4457_v37, %v4463_v46  ;;  %vm4475_vm0 = vcmp.ge.f32.partialorder %v4457_v37, %v4463_v46  ;;  %v4537_v29 = vsel %vm2707_vm8, %v4536_v9, %v4535_v34 }
 0xb93   : > { %v4539_v38 = vsel %vm2710_vm9, %v4538_v49, %v4537_v29  ;;  %v9778_v29 = vld [vmem:[%s10685_s6] sm:$0xff] }
 0xb94   : > { %v4467_v35 = vmax.f32 %v9699_v41, %v4465_v30  ;;  %vm4469_vm12 = vcmp.ge.f32.partialorder %v9699_v41, %v4465_v30  ;;  %v4541_v59 = vsel %vm2713_vm10, %v4540_v55, %v4539_v38  ;;  %v9788_v38 = vld [vmem:[%s10681_s2 + $0x8] sm:$0xff] }
 0xb95   : > { %v4471_v53 = vsel %vm4469_vm12, %v4457_v37, %v9699_v41  ;;  %vm4477_vm1 = vmor %vm4469_vm12, %vm4475_vm0  ;;  %v4543_v21 = vsel %vm2716_vm11, %v4542_v7, %v4541_v59  ;;  %vm4933_vm12 = vcmp.lt.s32.totalorder %v9771_v52, %v9778_v29 }
 0xb96   : > { %v4473_v61 = vsub.f32 %v4471_v53, %v4467_v35  ;;  %v4479_v20 = vsel %vm4477_vm1, %v4463_v46, %v4457_v37  ;;  %v4694_v46 = vld [vmem:[#allocation3 + $0x4f] sm:$0x1]  ;;  %v4935_v55 = vsel %vm4933_vm12, 1, %v8615_v17 }
 0xb97   : > { %v4481_v43 = vsub.f32 %v4479_v20, %v4467_v35  ;;  %v4695_v53 = vld [vmem:[#allocation3 + $0x6f] sm:$0x1] }
 0xb98   : > { %v4484_v33 = vmul.f32 1.442695, %v4473_v61  ;;  %v4774_v61 = vrot.slane %v4694_v46, 6  ;;  %v4696_v20 = vld [vmem:[#allocation3 + $0x8f] sm:$0x1] }
 0xb99   : > { %v4490_v48 = vmul.f32 1.442695, %v4481_v43  ;;  %v4692_v43 = vld [vmem:[#allocation3 + $0xf] sm:$0x1]  ;;  %v4577_v46 = vld [vmem:[#allocation3 + $0x1ae] sm:$0x1] }
 0xb9a   : > { %8164 = vpow2.f32 %v4484_v33 }
 0xb9b   : > { %8166 = vpow2.f32 %v4490_v48  ;;  %v4776_v48 = vrot.slane %v4695_v53, 5  ;;  %v4578_v53 = vld [vmem:[#allocation3 + $0x1ce] sm:$0x1] }
 0xba0   : > { %v4558_v13 = vpop.permute.xlu0 %4557 }
 0xba1   : > { %vm4560_vm2 = vcmp.eq.s32.totalorder %v4558_v13, 1 }
 0xba4   : > { %v8165_v40 = vpop.eup %8164 }
 0xba5   : > { %v8167_v47 = vpop.eup %8166  ;;  %v4487_v60 = vadd.f32 1.0, %v8165_v40  ;;  %v4697_v40 = vld [vmem:[#allocation3 + $0xaf] sm:$0x1] }
 0xba7   : > { %v4493_v57 = vadd.f32 %v8167_v47, %v4487_v60  ;;  %v4778_v47 = vrot.slane %v4696_v20, 4  ;;  %v4698_v60 = vld [vmem:[#allocation3 + $0xcf] sm:$0x1]  ;;  %v4666_v20 = vrot.slane %v4577_v46, 3 }
 0xba8   : > { %v4782_v25 = vrot.slane %v4698_v60, 2 }
 0xba9   : > { %8168 = vlog2.f32 %v4493_v57  ;;  %v4780_v57 = vrot.slane %v4697_v40, 3 }
 0xbb3   : > { %v8169_v58 = vpop.eup %8168 }
 0xbb4   : > { %v4497_v42 = vmul.f32 0.6931472, %v8169_v58 }
 0xbb6   : > { %v4499_v11 = vadd.f32 %v4497_v42, %v4467_v35  ;;  %v4772_v35 = vrot.slane %v4693_v16, 7  ;;  %v9791_v42 = vld [vmem:[#allocation9 + $0x8] sm:$0xff] }
 0xbb7   : > { %v4572_v16 = vld [vmem:[#allocation3 + $0x10e] sm:$0x1] }
 0xbb8   : > { %v4547_v24 = vadd.f32 %v4543_v21, %v4499_v11  ;;  %v4773_v33 = vsel %vm2698_vm5, %v4772_v35, %v4692_v43  ;;  %v4579_v43 = vld [vmem:[#allocation3 + $0x1ee] sm:$0x1] }
 0xbb9   : > { %v4775_v19 = vsel %vm2701_vm6, %v4774_v61, %v4773_v33 }
 0xbba   : > { %v9746_v2 = vsel %vm4560_vm2, %v4547_v24, %v9699_v41  ;;  %v4777_v45 = vsel %vm2704_vm7, %v4776_v48, %v4775_v19  ;;  %v4668_v48 = vrot.slane %v4578_v53, 2 }
 0xbbb   : > { %4582 = vrot.lane.b32.xlu0 %v9746_v2, %s8614_s12  ;;  %v4779_v23 = vsel %vm2707_vm8, %v4778_v47, %v4777_v45  ;;  %v4670_v47 = vrot.slane %v4579_v43, 1 }
 0xbbc   : > { %v4781_v56 = vsel %vm2710_vm9, %v4780_v57, %v4779_v23 }
 0xbbd   : > { %v4783_v62 = vsel %vm2713_vm10, %v4782_v25, %v4781_v56 }
 0xbbe   : > { %v4785_v22 = vsel %vm2716_vm11, %v4784_v32, %v4783_v62 }
 0xbbf   : > { %4588 = vrot.lane.b32.xlu0 %v9746_v2, %s8613_s10 }
 0xbc3   : > { %4685 = vperm.xlu0 %7834, %v4680_v39  }
 0xbcf   : > { %v4709_v8 = vpop.permute.xlu1 %4708 }
 0xbd0   : > { %v4712_v5 = vadd.f32 %v9657_v3, %v4709_v8 }
 0xbd3   : > { %v4715_v26 = vpop.permute.xlu1 %4714 }
 0xbd4   : > { %v4718_v6 = vadd.f32 %v9660_v14, %v4715_v26 }
 0xbd6   : > { %v4720_v41 = vmax.f32 %v4712_v5, %v4718_v6  ;;  %vm4730_vm13 = vcmp.ge.f32.partialorder %v4712_v5, %v4718_v6 }
 0xbd8   : > { %v4722_v27 = vmax.f32 %v9722_v4, %v4720_v41  ;;  %vm4724_vm4 = vcmp.ge.f32.partialorder %v9722_v4, %v4720_v41  ;;  %v4573_v41 = vld [vmem:[#allocation3 + $0x12e] sm:$0x1] }
 0xbd9   : > { %v4726_v31 = vsel %vm4724_vm4, %v4712_v5, %v9722_v4  ;;  %vm4732_vm14 = vmor %vm4724_vm4, %vm4730_vm13  ;;  %vm4806_vm4 = vcmp.lt.s32.totalorder %v9724_v12, %v9647_v1 }
 0xbda   : > { %v4728_v10 = vsub.f32 %v4726_v31, %v4722_v27  ;;  %v4734_v36 = vsel %vm4732_vm14, %v4718_v6, %v4712_v5  ;;  %v4808_v56 = vsel %vm4806_vm4, 1, %v8615_v17 }
 0xbdb   : > { %v4736_v63 = vsub.f32 %v4734_v36, %v4722_v27 }
 0xbdc   : > { %v4738_v44 = vmul.f32 1.442695, %v4728_v10  ;;  %v4574_v10 = vld [vmem:[#allocation3 + $0x14e] sm:$0x1] }
 0xbdd   : > { %v4744_v18 = vmul.f32 1.442695, %v4736_v63  ;;  %v4658_v63 = vrot.slane %v4573_v41, 7 }
 0xbde   : > { %8170 = vpow2.f32 %v4738_v44  ;;  %v4575_v44 = vld [vmem:[#allocation3 + $0x16e] sm:$0x1] }
 0xbdf   : > { %8172 = vpow2.f32 %v4744_v18  ;;  %v4660_v18 = vrot.slane %v4574_v10, 6 }
 0xbe4   : > { %v4811_v9 = vpop.permute.xlu1 %4810 }
 0xbe5   : > { %vm4815_vm15 = vcmp.eq.s32.totalorder %v4811_v9, 1 }
 0xbe8   : > { %v8171_v28 = vpop.eup %8170 }
 0xbe9   : > { %v8173_v0 = vpop.eup %8172  ;;  %v4742_v37 = vadd.f32 1.0, %v8171_v28  ;;  %v4576_v28 = vld [vmem:[#allocation3 + $0x18e] sm:$0x1] }
 0xbea   : > { %v4664_v35 = vrot.slane %v4576_v28, 4  ;;  %v4827_v28 = vld [vmem:[#allocation3 + $0xf0] sm:$0x1] }
 0xbeb   : > { %v4748_v30 = vadd.f32 %v8173_v0, %v4742_v37  ;;  %v4659_v0 = vsel %vm2698_vm5, %v4658_v63, %v4572_v16  ;;  %v4662_v37 = vrot.slane %v4575_v44, 5  ;;  %v4826_v63 = vld [vmem:[#allocation3 + $0xd0] sm:$0x1] }
 0xbed   : > { %8174 = vlog2.f32 %v4748_v30  ;;  %v4661_v30 = vsel %vm2701_vm6, %v4660_v18, %v4659_v0  ;;  %v4910_v0 = vrot.slane %v4826_v63, 2 }
 0xbee   : > { %v4663_v61 = vsel %vm2704_vm7, %v4662_v37, %v4661_v30  ;;  %v4912_v30 = vrot.slane %v4827_v28, 1 }
 0xbef   : > { %v4665_v33 = vsel %vm2707_vm8, %v4664_v35, %v4663_v61 }
 0xbf0   : > { %v4667_v19 = vsel %vm2710_vm9, %v4666_v20, %v4665_v33 }
 0xbf1   : > { %v4669_v45 = vsel %vm2713_vm10, %v4668_v48, %v4667_v19 }
 0xbf2   : > { %v4671_v23 = vsel %vm2716_vm11, %v4670_v47, %v4669_v45 }
 0xbf7   : > { %v8175_v54 = vpop.eup %8174 }
 0xbf8   : > { %v4751_v15 = vmul.f32 0.6931472, %v8175_v54 }
 0xbfa   : > { %v4754_v50 = vadd.f32 %v4751_v15, %v4722_v27 }
 0xbfc   : > { %v4802_v34 = vadd.f32 %v4785_v22, %v4754_v50 }
 0xbfe   : > { %v9769_v49 = vsel %vm4815_vm15, %v4802_v34, %v9722_v4 }
 0xbff   : > { %4836 = vrot.lane.b32.xlu1 %v9769_v49, %s8614_s12 }
 0xc03   : > { %4842 = vrot.lane.b32.xlu1 %v9769_v49, %s8613_s10 }
 0xc07   : > { %4938 = vperm.xlu1 %7835, %v4935_v55  }
 0xc2d   : > { %v4583_v4 = vpop.permute.xlu0 %4582 }
 0xc2e   : > { %v4585_v7 = vadd.f32 %v9788_v38, %v4583_v4 }
 0xc31   : > { %v4589_v58 = vpop.permute.xlu0 %4588 }
 0xc32   : > { %v4591_v59 = vadd.f32 %v9791_v42, %v4589_v58 }
 0xc34   : > { %v4593_v11 = vmax.f32 %v4585_v7, %v4591_v59  ;;  %vm4603_vm1 = vcmp.ge.f32.partialorder %v4585_v7, %v4591_v59 }
 0xc36   : > { %v4595_v13 = vmax.f32 %v9746_v2, %v4593_v11  ;;  %vm4597_vm0 = vcmp.ge.f32.partialorder %v9746_v2, %v4593_v11 }
 0xc37   : > { %v4599_v21 = vsel %vm4597_vm0, %v4585_v7, %v9746_v2  ;;  %vm4605_vm2 = vmor %vm4597_vm0, %vm4603_vm1 }
 0xc38   : > { %v4601_v24 = vsub.f32 %v4599_v21, %v4595_v13  ;;  %v4607_v39 = vsel %vm4605_vm2, %v4591_v59, %v4585_v7  ;;  %v4821_v59 = vld [vmem:[#allocation3 + $0x30] sm:$0x1] }
 0xc39   : > { %v4609_v8 = vsub.f32 %v4607_v39, %v4595_v13  ;;  %v4822_v21 = vld [vmem:[#allocation3 + $0x50] sm:$0x1]  ;;  %v4900_v39 = vrot.slane %v4821_v59, 7  ;;  %v4700_v59 = vld [vmem:[#allocation3 + $0x10f] sm:$0x1] }
 0xc3a   : > { %v4612_v26 = vmul.f32 1.442695, %v4601_v24 }
 0xc3b   : > { %v4618_v5 = vmul.f32 1.442695, %v4609_v8  ;;  %v4820_v8 = vld [vmem:[#allocation3 + $0x10] sm:$0x1] }
 0xc3c   : > { %8176 = vpow2.f32 %v4612_v26  ;;  %v4823_v26 = vld [vmem:[#allocation3 + $0x70] sm:$0x1]  ;;  %v4901_v41 = vsel %vm2698_vm5, %v4900_v39, %v4820_v8  ;;  %v4706_v8 = vld [vmem:[#allocation3 + $0x1cf] sm:$0x1] }
 0xc3d   : > { %8178 = vpow2.f32 %v4618_v5  ;;  %v4902_v5 = vrot.slane %v4822_v21, 6  ;;  %v4705_v21 = vld [vmem:[#allocation3 + $0x1af] sm:$0x1] }
 0xc3f   : > { %v4903_v10 = vsel %vm2701_vm6, %v4902_v5, %v4901_v41  ;;  %v4794_v5 = vrot.slane %v4705_v21, 3 }
 0xc42   : > { %v4686_v51 = vpop.permute.xlu0 %4685 }
 0xc43   : > { %vm4688_vm3 = vcmp.eq.s32.totalorder %v4686_v51, 1 }
 0xc46   : > { %v8177_v6 = vpop.eup %8176 }
 0xc47   : > { %v8179_v27 = vpop.eup %8178  ;;  %v4615_v31 = vadd.f32 1.0, %v8177_v6  ;;  %v4824_v6 = vld [vmem:[#allocation3 + $0x90] sm:$0x1] }
 0xc49   : > { %v4621_v36 = vadd.f32 %v8179_v27, %v4615_v31  ;;  %v4904_v27 = vrot.slane %v4823_v26, 5  ;;  %v4825_v31 = vld [vmem:[#allocation3 + $0xb0] sm:$0x1] }
 0xc4a   : > { %v4908_v18 = vrot.slane %v4825_v31, 3 }
 0xc4b   : > { %8180 = vlog2.f32 %v4621_v36  ;;  %v4906_v36 = vrot.slane %v4824_v6, 4  ;;  %v4905_v44 = vsel %vm2704_vm7, %v4904_v27, %v4903_v10  ;;  %v4707_v6 = vld [vmem:[#allocation3 + $0x1ef] sm:$0x1]  ;;  %v4796_v27 = vrot.slane %v4706_v8, 2 }
 0xc4d   : > { %v4907_v16 = vsel %vm2707_vm8, %v4906_v36, %v4905_v44  ;;  %v4798_v36 = vrot.slane %v4707_v6, 1  ;;  %v9877_v6 = vstv %s5075_s19 }
 0xc4e   : > { %v4909_v46 = vsel %vm2710_vm9, %v4908_v18, %v4907_v16 }
 0xc4f   : > { %v4911_v53 = vsel %vm2713_vm10, %v4910_v0, %v4909_v46 }
 0xc50   : > { %v4913_v43 = vsel %vm2716_vm11, %v4912_v30, %v4911_v53 }
 0xc55   : > { %v8181_v40 = vpop.eup %8180 }
 0xc56   : > { %v4625_v60 = vmul.f32 0.6931472, %v8181_v40  ;;  %v9830_v40 = vstv %s4947_s16  ;;  %s6739_s16 = sadd.s32 31, %s8864_s1 }
 0xc57   : > { %vm5061_vm0 = vcmp.lt.s32.totalorder %v9830_v40, %v9778_v29 }
 0xc58   : > { %v4627_v57 = vadd.f32 %v4625_v60, %v4595_v13  ;;  %v5063_v19 = vsel %vm5061_vm0, 1, %v8615_v17 }
 0xc5a   : > { %v4675_v25 = vadd.f32 %v4671_v23, %v4627_v57 }
 0xc5c   : > { %v9805_v54 = vsel %vm4688_vm3, %v4675_v25, %v9746_v2 }
 0xc5d   : > { %4710 = vrot.lane.b32.xlu0 %v9805_v54, %s8614_s12 }
 0xc61   : > { %4716 = vrot.lane.b32.xlu0 %v9805_v54, %s8613_s10 }
 0xc65   : > { %4813 = vperm.xlu0 %7834, %v4808_v56  }
 0xc71   : > { %v4837_v32 = vpop.permute.xlu1 %4836 }
 0xc72   : > { %v4840_v62 = vadd.f32 %v9657_v3, %v4837_v32 }
 0xc75   : > { %v4843_v15 = vpop.permute.xlu1 %4842 }
 0xc76   : > { %v4846_v50 = vadd.f32 %v9660_v14, %v4843_v15 }
 0xc78   : > { %v4848_v2 = vmax.f32 %v4840_v62, %v4846_v50  ;;  %vm4858_vm14 = vcmp.ge.f32.partialorder %v4840_v62, %v4846_v50 }
 0xc7a   : > { %v4850_v9 = vmax.f32 %v9769_v49, %v4848_v2  ;;  %vm4852_vm13 = vcmp.ge.f32.partialorder %v9769_v49, %v4848_v2  ;;  %v4701_v2 = vld [vmem:[#allocation3 + $0x12f] sm:$0x1] }
 0xc7b   : > { %v4854_v12 = vsel %vm4852_vm13, %v4840_v62, %v9769_v49  ;;  %vm4860_vm15 = vmor %vm4852_vm13, %vm4858_vm14  ;;  %vm4934_vm13 = vcmp.lt.s32.totalorder %v9771_v52, %v9647_v1 }
 0xc7c   : > { %v4856_v22 = vsub.f32 %v4854_v12, %v4850_v9  ;;  %v4862_v34 = vsel %vm4860_vm15, %v4846_v50, %v4840_v62  ;;  %v4936_v46 = vsel %vm4934_vm13, 1, %v8615_v17 }
 0xc7d   : > { %v4864_v55 = vsub.f32 %v4862_v34, %v4850_v9 }
 0xc7e   : > { %v4866_v4 = vmul.f32 1.442695, %v4856_v22  ;;  %v4702_v22 = vld [vmem:[#allocation3 + $0x14f] sm:$0x1] }
 0xc7f   : > { %v4872_v58 = vmul.f32 1.442695, %v4864_v55  ;;  %v4786_v55 = vrot.slane %v4701_v2, 7 }
 0xc80   : > { %8182 = vpow2.f32 %v4866_v4  ;;  %v4703_v4 = vld [vmem:[#allocation3 + $0x16f] sm:$0x1] }
 0xc81   : > { %8184 = vpow2.f32 %v4872_v58  ;;  %v4788_v58 = vrot.slane %v4702_v22, 6 }
 0xc86   : > { %v4939_v20 = vpop.permute.xlu1 %4938 }
 0xc87   : > { %vm4943_vm12 = vcmp.eq.s32.totalorder %v4939_v20, 1 }
 0xc8a   : > { %v8183_v7 = vpop.eup %8182 }
 0xc8b   : > { %v8185_v11 = vpop.eup %8184  ;;  %v4870_v13 = vadd.f32 1.0, %v8183_v7  ;;  %v4704_v7 = vld [vmem:[#allocation3 + $0x18f] sm:$0x1] }
 0xc8c   : > { %v4792_v39 = vrot.slane %v4704_v7, 4 }
 0xc8d   : > { %v4876_v24 = vadd.f32 %v8185_v11, %v4870_v13  ;;  %v4787_v11 = vsel %vm2698_vm5, %v4786_v55, %v4700_v59  ;;  %v4790_v13 = vrot.slane %v4703_v4, 5  ;;  %v4955_v55 = vld [vmem:[#allocation3 + $0xf1] sm:$0x1] }
 0xc8f   : > { %8186 = vlog2.f32 %v4876_v24  ;;  %v4789_v24 = vsel %vm2701_vm6, %v4788_v58, %v4787_v11  ;;  %v5040_v11 = vrot.slane %v4955_v55, 1 }
 0xc90   : > { %v4791_v26 = vsel %vm2704_vm7, %v4790_v13, %v4789_v24 }
 0xc91   : > { %v4793_v41 = vsel %vm2707_vm8, %v4792_v39, %v4791_v26 }
 0xc92   : > { %v4795_v10 = vsel %vm2710_vm9, %v4794_v5, %v4793_v41 }
 0xc93   : > { %v4797_v44 = vsel %vm2713_vm10, %v4796_v27, %v4795_v10 }
 0xc94   : > { %v4799_v16 = vsel %vm2716_vm11, %v4798_v36, %v4797_v44 }
 0xc99   : > { %v8187_v37 = vpop.eup %8186 }
 0xc9a   : > { %v4879_v35 = vmul.f32 0.6931472, %v8187_v37 }
 0xc9c   : > { %v4882_v61 = vadd.f32 %v4879_v35, %v4850_v9 }
 0xc9e   : > { %v4930_v33 = vadd.f32 %v4913_v43, %v4882_v61 }
 0xca0   : > { %v9828_v48 = vsel %vm4943_vm12, %v4930_v33, %v9769_v49 }
 0xca1   : > { %4964 = vrot.lane.b32.xlu1 %v9828_v48, %s8614_s12 }
 0xca5   : > { %4970 = vrot.lane.b32.xlu1 %v9828_v48, %s8613_s10 }
 0xca9   : > { %5066 = vperm.xlu1 %7835, %v5063_v19  }
 0xccf   : > { %v4711_v47 = vpop.permute.xlu0 %4710 }
 0xcd0   : > { %v4713_v45 = vadd.f32 %v9788_v38, %v4711_v47 }
 0xcd3   : > { %v4717_v60 = vpop.permute.xlu0 %4716 }
 0xcd4   : > { %v4719_v49 = vadd.f32 %v9791_v42, %v4717_v60 }
 0xcd6   : > { %v4721_v57 = vmax.f32 %v4713_v45, %v4719_v49  ;;  %vm4731_vm2 = vcmp.ge.f32.partialorder %v4713_v45, %v4719_v49 }
 0xcd8   : > { %v4723_v51 = vmax.f32 %v9805_v54, %v4721_v57  ;;  %vm4725_vm1 = vcmp.ge.f32.partialorder %v9805_v54, %v4721_v57 }
 0xcd9   : > { %v4727_v23 = vsel %vm4725_vm1, %v4713_v45, %v9805_v54  ;;  %vm4733_vm3 = vmor %vm4725_vm1, %vm4731_vm2  ;;  %vm5189_vm1 = vcmp.lt.s32.totalorder %v9877_v6, %v9778_v29 }
 0xcda   : > { %v4729_v25 = vsub.f32 %v4727_v23, %v4723_v51  ;;  %v4735_v56 = vsel %vm4733_vm3, %v4719_v49, %v4713_v45  ;;  %v4950_v49 = vld [vmem:[#allocation3 + $0x51] sm:$0x1]  ;;  %v5191_v41 = vsel %vm5189_vm1, 1, %v8615_v17 }
 0xcdb   : > { %v4737_v32 = vsub.f32 %v4735_v56, %v4723_v51  ;;  %v4948_v23 = vld [vmem:[#allocation3 + $0x11] sm:$0x1]  ;;  %v5030_v56 = vrot.slane %v4950_v49, 6  ;;  %v4834_v49 = vld [vmem:[#allocation3 + $0x1d0] sm:$0x1] }
 0xcdc   : > { %v4740_v15 = vmul.f32 1.442695, %v4729_v25  ;;  %v4951_v25 = vld [vmem:[#allocation3 + $0x71] sm:$0x1] }
 0xcdd   : > { %v4746_v62 = vmul.f32 1.442695, %v4737_v32  ;;  %v4952_v32 = vld [vmem:[#allocation3 + $0x91] sm:$0x1] }
 0xcde   : > { %8188 = vpow2.f32 %v4740_v15 }
 0xcdf   : > { %8190 = vpow2.f32 %v4746_v62  ;;  %v5032_v62 = vrot.slane %v4951_v25, 5 }
 0xce4   : > { %v4814_v28 = vpop.permute.xlu0 %4813 }
 0xce5   : > { %vm4816_vm4 = vcmp.eq.s32.totalorder %v4814_v28, 1 }
 0xce8   : > { %v8189_v50 = vpop.eup %8188 }
 0xce9   : > { %v8191_v9 = vpop.eup %8190  ;;  %v4743_v12 = vadd.f32 1.0, %v8189_v50  ;;  %v4953_v50 = vld [vmem:[#allocation3 + $0xb1] sm:$0x1] }
 0xceb   : > { %v4749_v34 = vadd.f32 %v8191_v9, %v4743_v12  ;;  %v5034_v9 = vrot.slane %v4952_v32, 4  ;;  %v4954_v12 = vld [vmem:[#allocation3 + $0xd1] sm:$0x1] }
 0xcec   : > { %v5038_v58 = vrot.slane %v4954_v12, 2 }
 0xced   : > { %8192 = vlog2.f32 %v4749_v34  ;;  %v5036_v34 = vrot.slane %v4953_v50, 3 }
 0xcf7   : > { %v8193_v31 = vpop.eup %8192 }
 0xcf8   : > { %v4753_v63 = vmul.f32 0.6931472, %v8193_v31 }
 0xcfa   : > { %v4755_v18 = vadd.f32 %v4753_v63, %v4723_v51 }
 0xcfc   : > { %v4803_v0 = vadd.f32 %v4799_v16, %v4755_v18 }
 0xcfe   : > { %v9852_v37 = vsel %vm4816_vm4, %v4803_v0, %v9805_v54 }
 0xcff   : > { %4838 = vrot.lane.b32.xlu0 %v9852_v37, %s8614_s12 }
 0xd03   : > { %4844 = vrot.lane.b32.xlu0 %v9852_v37, %s8613_s10 }
 0xd07   : > { %4941 = vperm.xlu0 %7834, %v4936_v46  }
 0xd13   : > { %v4965_v30 = vpop.permute.xlu1 %4964 }
 0xd14   : > { %v4968_v53 = vadd.f32 %v9657_v3, %v4965_v30  ;;  %v4949_v3 = vld [vmem:[#allocation3 + $0x31] sm:$0x1] }
 0xd15   : > { %v5028_v51 = vrot.slane %v4949_v3, 7  ;;  %v4833_v3 = vld [vmem:[#allocation3 + $0x1b0] sm:$0x1] }
 0xd17   : > { %v4971_v35 = vpop.permute.xlu1 %4970  ;;  %v5029_v15 = vsel %vm2698_vm5, %v5028_v51, %v4948_v23  ;;  %v4922_v51 = vrot.slane %v4833_v3, 3  ;;  %v4835_v23 = vld [vmem:[#allocation3 + $0x1f0] sm:$0x1] }
 0xd18   : > { %v4974_v61 = vadd.f32 %v9660_v14, %v4971_v35  ;;  %v5031_v2 = vsel %vm2701_vm6, %v5030_v56, %v5029_v15  ;;  %v4829_v35 = vld [vmem:[#allocation3 + $0x130] sm:$0x1]  ;;  %v4924_v56 = vrot.slane %v4834_v49, 2 }
 0xd19   : > { %v5033_v22 = vsel %vm2704_vm7, %v5032_v62, %v5031_v2  ;;  %v4926_v62 = vrot.slane %v4835_v23, 1 }
 0xd1a   : > { %v4976_v54 = vmax.f32 %v4968_v53, %v4974_v61  ;;  %vm4986_vm15 = vcmp.ge.f32.partialorder %v4968_v53, %v4974_v61  ;;  %v5035_v4 = vsel %vm2707_vm8, %v5034_v9, %v5033_v22 }
 0xd1b   : > { %v5037_v59 = vsel %vm2710_vm9, %v5036_v34, %v5035_v4  ;;  %v9906_v4 = vld [vmem:[%s10685_s6 + $0x8] sm:$0xff] }
 0xd1c   : > { %v4978_v20 = vmax.f32 %v9828_v48, %v4976_v54  ;;  %vm4980_vm14 = vcmp.ge.f32.partialorder %v9828_v48, %v4976_v54  ;;  %v5039_v21 = vsel %vm2713_vm10, %v5038_v58, %v5037_v59  ;;  %v4830_v54 = vld [vmem:[#allocation3 + $0x150] sm:$0x1] }
 0xd1d   : > { %v4982_v1 = vsel %vm4980_vm14, %v4968_v53, %v9828_v48  ;;  %vm4988_vm12 = vmor %vm4980_vm14, %vm4986_vm15  ;;  %v5041_v8 = vsel %vm2716_vm11, %v5040_v11, %v5039_v21  ;;  %vm5062_vm14 = vcmp.lt.s32.totalorder %v9830_v40, %v9906_v4  ;;  %v9916_v59 = vld [vmem:[%s10681_s2] sm:$0xff] }
 0xd1e   : > { %v4984_v52 = vsub.f32 %v4982_v1, %v4978_v20  ;;  %v4990_v43 = vsel %vm4988_vm12, %v4974_v61, %v4968_v53  ;;  %v4914_v1 = vrot.slane %v4829_v35, 7  ;;  %v5064_v58 = vsel %vm5062_vm14, 1, %v8615_v17 }
 0xd1f   : > { %v4992_v33 = vsub.f32 %v4990_v43, %v4978_v20  ;;  %v4831_v43 = vld [vmem:[#allocation3 + $0x170] sm:$0x1] }
 0xd20   : > { %v4994_v19 = vmul.f32 1.442695, %v4984_v52  ;;  %v4828_v52 = vld [vmem:[#allocation3 + $0x110] sm:$0x1] }
 0xd21   : > { %v5000_v47 = vmul.f32 1.442695, %v4992_v33  ;;  %v4916_v33 = vrot.slane %v4830_v54, 6 }
 0xd22   : > { %8194 = vpow2.f32 %v4994_v19  ;;  %v4832_v19 = vld [vmem:[#allocation3 + $0x190] sm:$0x1] }
 0xd23   : > { %8196 = vpow2.f32 %v5000_v47  ;;  %v4915_v47 = vsel %vm2698_vm5, %v4914_v1, %v4828_v52  ;;  %v5082_v1 = vld [vmem:[#allocation3 + $0xd2] sm:$0x1] }
 0xd28   : > { %v5067_v39 = vpop.permute.xlu1 %5066 }
 0xd29   : > { %vm5071_vm0 = vcmp.eq.s32.totalorder %v5067_v39, 1 }
 0xd2c   : > { %v8195_v60 = vpop.eup %8194 }
 0xd2d   : > { %v8197_v45 = vpop.eup %8196  ;;  %v4998_v14 = vadd.f32 1.0, %v8195_v60  ;;  %v4918_v60 = vrot.slane %v4831_v43, 5 }
 0xd2f   : > { %v5004_v57 = vadd.f32 %v8197_v45, %v4998_v14  ;;  %v4917_v45 = vsel %vm2701_vm6, %v4916_v33, %v4915_v47  ;;  %v4920_v14 = vrot.slane %v4832_v19, 4  ;;  %v5083_v33 = vld [vmem:[#allocation3 + $0xf2] sm:$0x1]  ;;  %v5166_v47 = vrot.slane %v5082_v1, 2 }
 0xd31   : > { %8198 = vlog2.f32 %v5004_v57  ;;  %v4919_v57 = vsel %vm2704_vm7, %v4918_v60, %v4917_v45  ;;  %v5168_v45 = vrot.slane %v5083_v33, 1 }
 0xd32   : > { %v4921_v25 = vsel %vm2707_vm8, %v4920_v14, %v4919_v57 }
 0xd33   : > { %v4923_v15 = vsel %vm2710_vm9, %v4922_v51, %v4921_v25 }
 0xd34   : > { %v4925_v2 = vsel %vm2713_vm10, %v4924_v56, %v4923_v15 }
 0xd35   : > { %v4927_v22 = vsel %vm2716_vm11, %v4926_v62, %v4925_v2 }
 0xd3b   : > { %v8199_v7 = vpop.eup %8198 }
 0xd3c   : > { %v5007_v13 = vmul.f32 0.6931472, %v8199_v7 }
 0xd3e   : > { %v5010_v24 = vadd.f32 %v5007_v13, %v4978_v20  ;;  %v9919_v13 = vld [vmem:[#allocation9] sm:$0xff] }
 0xd40   : > { %v5058_v26 = vadd.f32 %v5041_v8, %v5010_v24 }
 0xd42   : > { %v9875_v5 = vsel %vm5071_vm0, %v5058_v26, %v9828_v48 }
 0xd43   : > { %5092 = vrot.lane.b32.xlu1 %v9875_v5, %s8614_s12 }
 0xd47   : > { %5098 = vrot.lane.b32.xlu1 %v9875_v5, %s8613_s10 }
 0xd4b   : > { %5194 = vperm.xlu1 %7835, %v5191_v41  }
 0xd71   : > { %v4839_v27 = vpop.permute.xlu0 %4838 }
 0xd72   : > { %v4841_v10 = vadd.f32 %v9788_v38, %v4839_v27 }
 0xd75   : > { %v4845_v31 = vpop.permute.xlu0 %4844 }
 0xd76   : > { %v4847_v48 = vadd.f32 %v9791_v42, %v4845_v31 }
 0xd78   : > { %v4849_v36 = vmax.f32 %v4841_v10, %v4847_v48  ;;  %vm4859_vm3 = vcmp.ge.f32.partialorder %v4841_v10, %v4847_v48 }
 0xd7a   : > { %v4851_v63 = vmax.f32 %v9852_v37, %v4849_v36  ;;  %vm4853_vm2 = vcmp.ge.f32.partialorder %v9852_v37, %v4849_v36 }
 0xd7b   : > { %v4855_v44 = vsel %vm4853_vm2, %v4841_v10, %v9852_v37  ;;  %vm4861_vm4 = vmor %vm4853_vm2, %vm4859_vm3 }
 0xd7c   : > { %v4857_v18 = vsub.f32 %v4855_v44, %v4851_v63  ;;  %v4863_v28 = vsel %vm4861_vm4, %v4847_v48, %v4841_v10  ;;  %v5077_v48 = vld [vmem:[#allocation3 + $0x32] sm:$0x1] }
 0xd7d   : > { %v4865_v16 = vsub.f32 %v4863_v28, %v4851_v63  ;;  %v5078_v44 = vld [vmem:[#allocation3 + $0x52] sm:$0x1]  ;;  %v5156_v28 = vrot.slane %v5077_v48, 7  ;;  %v4960_v48 = vld [vmem:[#allocation3 + $0x191] sm:$0x1] }
 0xd7e   : > { %v4868_v0 = vmul.f32 1.442695, %v4857_v18 }
 0xd7f   : > { %v4874_v46 = vmul.f32 1.442695, %v4865_v16  ;;  %v5076_v16 = vld [vmem:[#allocation3 + $0x12] sm:$0x1] }
 0xd80   : > { %8200 = vpow2.f32 %v4868_v0  ;;  %v5079_v0 = vld [vmem:[#allocation3 + $0x72] sm:$0x1]  ;;  %v5157_v35 = vsel %vm2698_vm5, %v5156_v28, %v5076_v16  ;;  %v5048_v28 = vrot.slane %v4960_v48, 4  ;;  %v4962_v16 = vld [vmem:[#allocation3 + $0x1d1] sm:$0x1] }
 0xd81   : > { %8202 = vpow2.f32 %v4874_v46  ;;  %v5158_v46 = vrot.slane %v5078_v44, 6  ;;  %v4961_v44 = vld [vmem:[#allocation3 + $0x1b1] sm:$0x1] }
 0xd83   : > { %v5159_v54 = vsel %vm2701_vm6, %v5158_v46, %v5157_v35  ;;  %v5050_v46 = vrot.slane %v4961_v44, 3 }
 0xd86   : > { %v4942_v12 = vpop.permute.xlu0 %4941 }
 0xd87   : > { %vm4944_vm13 = vcmp.eq.s32.totalorder %v4942_v12, 1 }
 0xd8a   : > { %v8201_v30 = vpop.eup %8200 }
 0xd8b   : > { %v8203_v53 = vpop.eup %8202  ;;  %v4871_v61 = vadd.f32 1.0, %v8201_v30  ;;  %v5080_v30 = vld [vmem:[#allocation3 + $0x92] sm:$0x1] }
 0xd8d   : > { %v4877_v20 = vadd.f32 %v8203_v53, %v4871_v61  ;;  %v5160_v53 = vrot.slane %v5079_v0, 5  ;;  %v5081_v61 = vld [vmem:[#allocation3 + $0xb2] sm:$0x1] }
 0xd8e   : > { %v5164_v43 = vrot.slane %v5081_v61, 3 }
 0xd8f   : > { %8204 = vlog2.f32 %v4877_v20  ;;  %v5162_v20 = vrot.slane %v5080_v30, 4  ;;  %v5161_v52 = vsel %vm2704_vm7, %v5160_v53, %v5159_v54  ;;  %v4963_v30 = vld [vmem:[#allocation3 + $0x1f1] sm:$0x1]  ;;  %v5052_v53 = vrot.slane %v4962_v16, 2 }
 0xd91   : > { %v5163_v19 = vsel %vm2707_vm8, %v5162_v20, %v5161_v52  ;;  %v5054_v20 = vrot.slane %v4963_v30, 1 }
 0xd92   : > { %v5165_v3 = vsel %vm2710_vm9, %v5164_v43, %v5163_v19 }
 0xd93   : > { %v5167_v49 = vsel %vm2713_vm10, %v5166_v47, %v5165_v3 }
 0xd94   : > { %v5169_v23 = vsel %vm2716_vm11, %v5168_v45, %v5167_v49 }
 0xd99   : > { %v8205_v32 = vpop.eup %8204 }
 0xd9a   : > { %v4881_v50 = vmul.f32 0.6931472, %v8205_v32  ;;  %v9936_v32 = vstv %s5203_s14 }
 0xd9b   : > { %vm5317_vm2 = vcmp.lt.s32.totalorder %v9936_v32, %v9778_v29 }
 0xd9c   : > { %v4883_v9 = vadd.f32 %v4881_v50, %v4851_v63  ;;  %v5319_v15 = vsel %vm5317_vm2, 1, %v8615_v17 }
 0xd9e   : > { %v4931_v34 = vadd.f32 %v4927_v22, %v4883_v9 }
 0xda0   : > { %v9899_v55 = vsel %vm4944_vm13, %v4931_v34, %v9852_v37 }
 0xda1   : > { %4966 = vrot.lane.b32.xlu0 %v9899_v55, %s8614_s12 }
 0xda5   : > { %4972 = vrot.lane.b32.xlu0 %v9899_v55, %s8613_s10 }
 0xda9   : > { %5069 = vperm.xlu0 %7834, %v5064_v58  }
 0xdb5   : > { %v5093_v7 = vpop.permute.xlu1 %5092 }
 0xdb6   : > { %v5096_v11 = vadd.f32 %v9916_v59, %v5093_v7 }
 0xdb9   : > { %v5099_v37 = vpop.permute.xlu1 %5098 }
 0xdba   : > { %v5102_v21 = vadd.f32 %v9919_v13, %v5099_v37 }
 0xdbc   : > { %v5104_v40 = vmax.f32 %v5096_v11, %v5102_v21  ;;  %vm5114_vm12 = vcmp.ge.f32.partialorder %v5096_v11, %v5102_v21 }
 0xdbe   : > { %v5106_v24 = vmax.f32 %v9875_v5, %v5104_v40  ;;  %vm5108_vm15 = vcmp.ge.f32.partialorder %v9875_v5, %v5104_v40  ;;  %v4957_v40 = vld [vmem:[#allocation3 + $0x131] sm:$0x1] }
 0xdbf   : > { %v5110_v39 = vsel %vm5108_vm15, %v5096_v11, %v9875_v5  ;;  %vm5116_vm0 = vmor %vm5108_vm15, %vm5114_vm12  ;;  %vm5190_vm15 = vcmp.lt.s32.totalorder %v9877_v6, %v9906_v4 }
 0xdc0   : > { %v5112_v8 = vsub.f32 %v5110_v39, %v5106_v24  ;;  %v5118_v26 = vsel %vm5116_vm0, %v5102_v21, %v5096_v11  ;;  %v5192_v3 = vsel %vm5190_vm15, 1, %v8615_v17 }
 0xdc1   : > { %v5120_v41 = vsub.f32 %v5118_v26, %v5106_v24 }
 0xdc2   : > { %v5122_v27 = vmul.f32 1.442695, %v5112_v8  ;;  %v4958_v8 = vld [vmem:[#allocation3 + $0x151] sm:$0x1] }
 0xdc3   : > { %v5128_v31 = vmul.f32 1.442695, %v5120_v41  ;;  %v5042_v41 = vrot.slane %v4957_v40, 7 }
 0xdc4   : > { %8206 = vpow2.f32 %v5122_v27  ;;  %v4956_v27 = vld [vmem:[#allocation3 + $0x111] sm:$0x1] }
 0xdc5   : > { %8208 = vpow2.f32 %v5128_v31  ;;  %v4959_v31 = vld [vmem:[#allocation3 + $0x171] sm:$0x1] }
 0xdca   : > { %v5195_v51 = vpop.permute.xlu1 %5194 }
 0xdcb   : > { %vm5199_vm1 = vcmp.eq.s32.totalorder %v5195_v51, 1 }
 0xdce   : > { %v8207_v10 = vpop.eup %8206 }
 0xdcf   : > { %v8209_v36 = vpop.eup %8208  ;;  %v5126_v63 = vadd.f32 1.0, %v8207_v10  ;;  %v5044_v10 = vrot.slane %v4958_v8, 6 }
 0xdd1   : > { %v5132_v18 = vadd.f32 %v8209_v36, %v5126_v63  ;;  %v5043_v36 = vsel %vm2698_vm5, %v5042_v41, %v4956_v27  ;;  %v5046_v63 = vrot.slane %v4959_v31, 5  ;;  %v5210_v41 = vld [vmem:[#allocation3 + $0xd3] sm:$0x1] }
 0xdd3   : > { %8210 = vlog2.f32 %v5132_v18  ;;  %v5045_v18 = vsel %vm2701_vm6, %v5044_v10, %v5043_v36  ;;  %v5211_v10 = vld [vmem:[#allocation3 + $0xf3] sm:$0x1]  ;;  %v5294_v36 = vrot.slane %v5210_v41, 2 }
 0xdd4   : > { %v5047_v0 = vsel %vm2704_vm7, %v5046_v63, %v5045_v18  ;;  %v5296_v18 = vrot.slane %v5211_v10, 1 }
 0xdd5   : > { %v5049_v35 = vsel %vm2707_vm8, %v5048_v28, %v5047_v0 }
 0xdd6   : > { %v5051_v54 = vsel %vm2710_vm9, %v5050_v46, %v5049_v35 }
 0xdd7   : > { %v5053_v52 = vsel %vm2713_vm10, %v5052_v53, %v5051_v54 }
 0xdd8   : > { %v5055_v19 = vsel %vm2716_vm11, %v5054_v20, %v5053_v52 }
 0xddd   : > { %v8211_v60 = vpop.eup %8210 }
 0xdde   : > { %v5135_v14 = vmul.f32 0.6931472, %v8211_v60 }
 0xde0   : > { %v5138_v57 = vadd.f32 %v5135_v14, %v5106_v24 }
 0xde2   : > { %v5186_v25 = vadd.f32 %v5169_v23, %v5138_v57 }
 0xde4   : > { %v9934_v56 = vsel %vm5199_vm1, %v5186_v25, %v9875_v5 }
 0xde5   : > { %5220 = vrot.lane.b32.xlu1 %v9934_v56, %s8614_s12 }
 0xde9   : > { %5226 = vrot.lane.b32.xlu1 %v9934_v56, %s8613_s10 }
 0xded   : > { %5322 = vperm.xlu1 %7835, %v5319_v15  }
 0xe13   : > { %v4967_v62 = vpop.permute.xlu0 %4966 }
 0xe14   : > { %v4969_v2 = vadd.f32 %v9788_v38, %v4967_v62 }
 0xe17   : > { %v4973_v50 = vpop.permute.xlu0 %4972 }
 0xe18   : > { %v4975_v5 = vadd.f32 %v9791_v42, %v4973_v50 }
 0xe1a   : > { %v4977_v9 = vmax.f32 %v4969_v2, %v4975_v5  ;;  %vm4987_vm4 = vcmp.ge.f32.partialorder %v4969_v2, %v4975_v5 }
 0xe1c   : > { %v4979_v12 = vmax.f32 %v9899_v55, %v4977_v9  ;;  %vm4981_vm3 = vcmp.ge.f32.partialorder %v9899_v55, %v4977_v9 }
 0xe1d   : > { %v4983_v22 = vsel %vm4981_vm3, %v4969_v2, %v9899_v55  ;;  %vm4989_vm13 = vmor %vm4981_vm3, %vm4987_vm4 }
 0xe1e   : > { %v4985_v34 = vsub.f32 %v4983_v22, %v4979_v12  ;;  %v4991_v58 = vsel %vm4989_vm13, %v4975_v5, %v4969_v2  ;;  %v5205_v5 = vld [vmem:[#allocation3 + $0x33] sm:$0x1] }
 0xe1f   : > { %v4993_v7 = vsub.f32 %v4991_v58, %v4979_v12  ;;  %v5206_v22 = vld [vmem:[#allocation3 + $0x53] sm:$0x1]  ;;  %v5284_v58 = vrot.slane %v5205_v5, 7  ;;  %v5089_v5 = vld [vmem:[#allocation3 + $0x1b2] sm:$0x1] }
 0xe20   : > { %v4996_v37 = vmul.f32 1.442695, %v4985_v34 }
 0xe21   : > { %v5002_v11 = vmul.f32 1.442695, %v4993_v7  ;;  %v5204_v7 = vld [vmem:[#allocation3 + $0x13] sm:$0x1] }
 0xe22   : > { %8212 = vpow2.f32 %v4996_v37  ;;  %v5207_v37 = vld [vmem:[#allocation3 + $0x73] sm:$0x1]  ;;  %v5285_v40 = vsel %vm2698_vm5, %v5284_v58, %v5204_v7  ;;  %v5178_v58 = vrot.slane %v5089_v5, 3  ;;  %v5091_v7 = vld [vmem:[#allocation3 + $0x1f2] sm:$0x1] }
 0xe23   : > { %8214 = vpow2.f32 %v5002_v11  ;;  %v5286_v11 = vrot.slane %v5206_v22, 6  ;;  %v5090_v22 = vld [vmem:[#allocation3 + $0x1d2] sm:$0x1] }
 0xe25   : > { %v5287_v8 = vsel %vm2701_vm6, %v5286_v11, %v5285_v40  ;;  %v5180_v11 = vrot.slane %v5090_v22, 2 }
 0xe28   : > { %v5070_v33 = vpop.permute.xlu0 %5069 }
 0xe29   : > { %vm5072_vm14 = vcmp.eq.s32.totalorder %v5070_v33, 1 }
 0xe2c   : > { %v8213_v21 = vpop.eup %8212 }
 0xe2d   : > { %v8215_v24 = vpop.eup %8214  ;;  %v4999_v39 = vadd.f32 1.0, %v8213_v21  ;;  %v5208_v21 = vld [vmem:[#allocation3 + $0x93] sm:$0x1] }
 0xe2f   : > { %v5005_v26 = vadd.f32 %v8215_v24, %v4999_v39  ;;  %v5288_v24 = vrot.slane %v5207_v37, 5  ;;  %v5209_v39 = vld [vmem:[#allocation3 + $0xb3] sm:$0x1] }
 0xe30   : > { %v5292_v31 = vrot.slane %v5209_v39, 3 }
 0xe31   : > { %8216 = vlog2.f32 %v5005_v26  ;;  %v5290_v26 = vrot.slane %v5208_v21, 4  ;;  %v5289_v27 = vsel %vm2704_vm7, %v5288_v24, %v5287_v8  ;;  %v5182_v24 = vrot.slane %v5091_v7, 1 }
 0xe32   : > { %v10030_v7 = vstv %s5459_s22 }
 0xe33   : > { %v5291_v48 = vsel %vm2707_vm8, %v5290_v26, %v5289_v27 }
 0xe34   : > { %v5293_v44 = vsel %vm2710_vm9, %v5292_v31, %v5291_v48 }
 0xe35   : > { %v5295_v16 = vsel %vm2713_vm10, %v5294_v36, %v5293_v44 }
 0xe36   : > { %v5297_v30 = vsel %vm2716_vm11, %v5296_v18, %v5295_v16 }
 0xe3b   : > { %v8217_v61 = vpop.eup %8216 }
 0xe3c   : > { %v5009_v1 = vmul.f32 0.6931472, %v8217_v61  ;;  %v9983_v61 = vstv %s5331_s11 }
 0xe3d   : > { %vm5445_vm3 = vcmp.lt.s32.totalorder %v9983_v61, %v9778_v29 }
 0xe3e   : > { %v5011_v43 = vadd.f32 %v5009_v1, %v4979_v12  ;;  %v5447_v54 = vsel %vm5445_vm3, 1, %v8615_v17 }
 0xe40   : > { %v5059_v47 = vadd.f32 %v5055_v19, %v5011_v43 }
 0xe42   : > { %v9958_v60 = vsel %vm5072_vm14, %v5059_v47, %v9899_v55 }
 0xe43   : > { %5094 = vrot.lane.b32.xlu0 %v9958_v60, %s8614_s12 }
 0xe47   : > { %5100 = vrot.lane.b32.xlu0 %v9958_v60, %s8613_s10 }
 0xe4b   : > { %5197 = vperm.xlu0 %7834, %v5192_v3  }
 0xe57   : > { %v5221_v45 = vpop.permute.xlu1 %5220 }
 0xe58   : > { %v5224_v49 = vadd.f32 %v9916_v59, %v5221_v45 }
 0xe5b   : > { %v5227_v14 = vpop.permute.xlu1 %5226 }
 0xe5c   : > { %v5230_v57 = vadd.f32 %v9919_v13, %v5227_v14 }
 0xe5e   : > { %v5232_v55 = vmax.f32 %v5224_v49, %v5230_v57  ;;  %vm5242_vm0 = vcmp.ge.f32.partialorder %v5224_v49, %v5230_v57 }
 0xe60   : > { %v5234_v51 = vmax.f32 %v9934_v56, %v5232_v55  ;;  %vm5236_vm12 = vcmp.ge.f32.partialorder %v9934_v56, %v5232_v55  ;;  %v5086_v55 = vld [vmem:[#allocation3 + $0x152] sm:$0x1] }
 0xe61   : > { %v5238_v6 = vsel %vm5236_vm12, %v5224_v49, %v9934_v56  ;;  %vm5244_vm1 = vmor %vm5236_vm12, %vm5242_vm0  ;;  %vm5318_vm12 = vcmp.lt.s32.totalorder %v9936_v32, %v9906_v4 }
 0xe62   : > { %v5240_v23 = vsub.f32 %v5238_v6, %v5234_v51  ;;  %v5246_v25 = vsel %vm5244_vm1, %v5230_v57, %v5224_v49  ;;  %v5320_v48 = vsel %vm5318_vm12, 1, %v8615_v17 }
 0xe63   : > { %v5248_v15 = vsub.f32 %v5246_v25, %v5234_v51  ;;  %v5087_v25 = vld [vmem:[#allocation3 + $0x172] sm:$0x1] }
 0xe64   : > { %v5250_v62 = vmul.f32 1.442695, %v5240_v23  ;;  %v5084_v23 = vld [vmem:[#allocation3 + $0x112] sm:$0x1] }
 0xe65   : > { %v5256_v50 = vmul.f32 1.442695, %v5248_v15  ;;  %v5172_v15 = vrot.slane %v5086_v55, 6 }
 0xe66   : > { %8218 = vpow2.f32 %v5250_v62  ;;  %v5088_v62 = vld [vmem:[#allocation3 + $0x192] sm:$0x1] }
 0xe67   : > { %8220 = vpow2.f32 %v5256_v50 }
 0xe6c   : > { %v5323_v46 = vpop.permute.xlu1 %5322 }
 0xe6d   : > { %vm5327_vm2 = vcmp.eq.s32.totalorder %v5323_v46, 1 }
 0xe70   : > { %v8219_v2 = vpop.eup %8218 }
 0xe71   : > { %v8221_v9 = vpop.eup %8220  ;;  %v5254_v12 = vadd.f32 1.0, %v8219_v2  ;;  %v5174_v2 = vrot.slane %v5087_v25, 5 }
 0xe73   : > { %v5260_v34 = vadd.f32 %v8221_v9, %v5254_v12  ;;  %v5176_v12 = vrot.slane %v5088_v62, 4 }
 0xe75   : > { %8222 = vlog2.f32 %v5260_v34 }
 0xe7f   : > { %v8223_v63 = vpop.eup %8222 }
 0xe80   : > { %v5263_v28 = vmul.f32 0.6931472, %v8223_v63 }
 0xe82   : > { %v5266_v0 = vadd.f32 %v5263_v28, %v5234_v51 }
 0xe84   : > { %v5314_v35 = vadd.f32 %v5297_v30, %v5266_v0 }
 0xe86   : > { %v9981_v53 = vsel %vm5327_vm2, %v5314_v35, %v9934_v56 }
 0xe87   : > { %5348 = vrot.lane.b32.xlu1 %v9981_v53, %s8614_s12 }
 0xe8b   : > { %5354 = vrot.lane.b32.xlu1 %v9981_v53, %s8613_s10 }
 0xe8f   : > { %5450 = vperm.xlu1 %7835, %v5447_v54  }
 0xeb5   : > { %v5095_v20 = vpop.permute.xlu0 %5094 }
 0xeb6   : > { %v5097_v52 = vadd.f32 %v9788_v38, %v5095_v20  ;;  %v5085_v38 = vld [vmem:[#allocation3 + $0x132] sm:$0x1]  ;;  %v5333_v20 = vld [vmem:[#allocation3 + $0x34] sm:$0x1] }
 0xeb7   : > { %v5170_v6 = vrot.slane %v5085_v38, 7 }
 0xeb9   : > { %v5101_v1 = vpop.permute.xlu0 %5100  ;;  %v5171_v50 = vsel %vm2698_vm5, %v5170_v6, %v5084_v23  ;;  %v5339_v6 = vld [vmem:[#allocation3 + $0xf4] sm:$0x1] }
 0xeba   : > { %v5103_v56 = vadd.f32 %v9791_v42, %v5101_v1  ;;  %v5173_v9 = vsel %vm2701_vm6, %v5172_v15, %v5171_v50  ;;  %v5424_v50 = vrot.slane %v5339_v6, 1 }
 0xebb   : > { %v5175_v34 = vsel %vm2704_vm7, %v5174_v2, %v5173_v9 }
 0xebc   : > { %v5105_v43 = vmax.f32 %v5097_v52, %v5103_v56  ;;  %vm5115_vm13 = vcmp.ge.f32.partialorder %v5097_v52, %v5103_v56  ;;  %v5177_v37 = vsel %vm2707_vm8, %v5176_v12, %v5175_v34 }
 0xebd   : > { %v5179_v40 = vsel %vm2710_vm9, %v5178_v58, %v5177_v37  ;;  %v10037_v37 = vld [vmem:[%s10685_s6] sm:$0xff] }
 0xebe   : > { %v5107_v33 = vmax.f32 %v9958_v60, %v5105_v43  ;;  %vm5109_vm4 = vcmp.ge.f32.partialorder %v9958_v60, %v5105_v43  ;;  %v5181_v8 = vsel %vm2713_vm10, %v5180_v11, %v5179_v40  ;;  %v10047_v40 = vld [vmem:[%s10681_s2 + $0x8] sm:$0xff] }
 0xebf   : > { %v5111_v29 = vsel %vm5109_vm4, %v5097_v52, %v9958_v60  ;;  %vm5117_vm14 = vmor %vm5109_vm4, %vm5115_vm13  ;;  %v5183_v27 = vsel %vm2716_vm11, %v5182_v24, %v5181_v8  ;;  %vm5573_vm4 = vcmp.lt.s32.totalorder %v10030_v7, %v10037_v37 }
 0xec0   : > { %v5113_v19 = vsub.f32 %v5111_v29, %v5107_v33  ;;  %v5119_v47 = vsel %vm5117_vm14, %v5103_v56, %v5097_v52  ;;  %v5334_v56 = vld [vmem:[#allocation3 + $0x54] sm:$0x1]  ;;  %v5575_v11 = vsel %vm5573_vm4, 1, %v8615_v17 }
 0xec1   : > { %v5121_v3 = vsub.f32 %v5119_v47, %v5107_v33  ;;  %v5332_v29 = vld [vmem:[#allocation3 + $0x14] sm:$0x1]  ;;  %v5414_v47 = vrot.slane %v5334_v56, 6  ;;  %v5217_v56 = vld [vmem:[#allocation3 + $0x1b3] sm:$0x1] }
 0xec2   : > { %v5124_v45 = vmul.f32 1.442695, %v5113_v19  ;;  %v5335_v19 = vld [vmem:[#allocation3 + $0x74] sm:$0x1] }
 0xec3   : > { %v5130_v14 = vmul.f32 1.442695, %v5121_v3  ;;  %v5336_v3 = vld [vmem:[#allocation3 + $0x94] sm:$0x1] }
 0xec4   : > { %8224 = vpow2.f32 %v5124_v45 }
 0xec5   : > { %8226 = vpow2.f32 %v5130_v14  ;;  %v5416_v14 = vrot.slane %v5335_v19, 5 }
 0xeca   : > { %v5198_v41 = vpop.permute.xlu0 %5197 }
 0xecb   : > { %vm5200_vm15 = vcmp.eq.s32.totalorder %v5198_v41, 1 }
 0xece   : > { %v8225_v49 = vpop.eup %8224 }
 0xecf   : > { %v8227_v57 = vpop.eup %8226  ;;  %v5127_v42 = vadd.f32 1.0, %v8225_v49  ;;  %v5337_v49 = vld [vmem:[#allocation3 + $0xb4] sm:$0x1] }
 0xed1   : > { %v5133_v51 = vadd.f32 %v8227_v57, %v5127_v42  ;;  %v5418_v57 = vrot.slane %v5336_v3, 4  ;;  %v5338_v42 = vld [vmem:[#allocation3 + $0xd4] sm:$0x1]  ;;  %v5219_v3 = vld [vmem:[#allocation3 + $0x1f3] sm:$0x1] }
 0xed2   : > { %v5422_v25 = vrot.slane %v5338_v42, 2 }
 0xed3   : > { %8228 = vlog2.f32 %v5133_v51  ;;  %v5420_v51 = vrot.slane %v5337_v49, 3 }
 0xedd   : > { %v8229_v21 = vpop.eup %8228 }
 0xede   : > { %v5137_v39 = vmul.f32 0.6931472, %v8229_v21 }
 0xee0   : > { %v5139_v26 = vadd.f32 %v5137_v39, %v5107_v33  ;;  %v5412_v33 = vrot.slane %v5333_v20, 7  ;;  %v10050_v39 = vld [vmem:[#allocation9 + $0x8] sm:$0xff]  ;;  %v5216_v20 = vld [vmem:[#allocation3 + $0x193] sm:$0x1] }
 0xee2   : > { %v5187_v31 = vadd.f32 %v5183_v27, %v5139_v26  ;;  %v5413_v45 = vsel %vm2698_vm5, %v5412_v33, %v5332_v29  ;;  %v5304_v33 = vrot.slane %v5216_v20, 4  ;;  %v5218_v29 = vld [vmem:[#allocation3 + $0x1d3] sm:$0x1] }
 0xee3   : > { %v5415_v38 = vsel %vm2701_vm6, %v5414_v47, %v5413_v45  ;;  %v5306_v47 = vrot.slane %v5217_v56, 3 }
 0xee4   : > { %v10005_v10 = vsel %vm5200_vm15, %v5187_v31, %v9958_v60  ;;  %v5417_v55 = vsel %vm2704_vm7, %v5416_v14, %v5415_v38  ;;  %v5308_v14 = vrot.slane %v5218_v29, 2 }
 0xee5   : > { %5222 = vrot.lane.b32.xlu0 %v10005_v10, %s8614_s12  ;;  %v5419_v23 = vsel %vm2707_vm8, %v5418_v57, %v5417_v55  ;;  %v5310_v57 = vrot.slane %v5219_v3, 1 }
 0xee6   : > { %v5421_v62 = vsel %vm2710_vm9, %v5420_v51, %v5419_v23 }
 0xee7   : > { %v5423_v5 = vsel %vm2713_vm10, %v5422_v25, %v5421_v62 }
 0xee8   : > { %v5425_v22 = vsel %vm2716_vm11, %v5424_v50, %v5423_v5 }
 0xee9   : > { %5228 = vrot.lane.b32.xlu0 %v10005_v10, %s8613_s10 }
 0xeed   : > { %5325 = vperm.xlu0 %7834, %v5320_v48  }
 0xef9   : > { %v5349_v36 = vpop.permute.xlu1 %5348 }
 0xefa   : > { %v5352_v44 = vadd.f32 %v9916_v59, %v5349_v36 }
 0xefd   : > { %v5355_v63 = vpop.permute.xlu1 %5354 }
 0xefe   : > { %v5358_v18 = vadd.f32 %v9919_v13, %v5355_v63 }
 0xf00   : > { %v5360_v60 = vmax.f32 %v5352_v44, %v5358_v18  ;;  %vm5370_vm1 = vcmp.ge.f32.partialorder %v5352_v44, %v5358_v18 }
 0xf02   : > { %v5362_v28 = vmax.f32 %v9981_v53, %v5360_v60  ;;  %vm5364_vm0 = vcmp.ge.f32.partialorder %v9981_v53, %v5360_v60  ;;  %v5213_v60 = vld [vmem:[#allocation3 + $0x133] sm:$0x1] }
 0xf03   : > { %v5366_v32 = vsel %vm5364_vm0, %v5352_v44, %v9981_v53  ;;  %vm5372_vm2 = vmor %vm5364_vm0, %vm5370_vm1  ;;  %vm5446_vm0 = vcmp.lt.s32.totalorder %v9983_v61, %v9906_v4 }
 0xf04   : > { %v5368_v16 = vsub.f32 %v5366_v32, %v5362_v28  ;;  %v5374_v0 = vsel %vm5372_vm2, %v5358_v18, %v5352_v44  ;;  %v5448_v62 = vsel %vm5446_vm0, 1, %v8615_v17 }
 0xf05   : > { %v5376_v46 = vsub.f32 %v5374_v0, %v5362_v28 }
 0xf06   : > { %v5378_v30 = vmul.f32 1.442695, %v5368_v16  ;;  %v5214_v16 = vld [vmem:[#allocation3 + $0x153] sm:$0x1] }
 0xf07   : > { %v5384_v35 = vmul.f32 1.442695, %v5376_v46  ;;  %v5298_v46 = vrot.slane %v5213_v60, 7 }
 0xf08   : > { %8230 = vpow2.f32 %v5378_v30  ;;  %v5212_v30 = vld [vmem:[#allocation3 + $0x113] sm:$0x1] }
 0xf09   : > { %8232 = vpow2.f32 %v5384_v35  ;;  %v5215_v35 = vld [vmem:[#allocation3 + $0x173] sm:$0x1] }
 0xf0e   : > { %v5451_v12 = vpop.permute.xlu1 %5450 }
 0xf0f   : > { %vm5455_vm3 = vcmp.eq.s32.totalorder %v5451_v12, 1 }
 0xf12   : > { %v8231_v54 = vpop.eup %8230 }
 0xf13   : > { %v8233_v1 = vpop.eup %8232  ;;  %v5382_v52 = vadd.f32 1.0, %v8231_v54  ;;  %v5300_v54 = vrot.slane %v5214_v16, 6 }
 0xf15   : > { %v5388_v43 = vadd.f32 %v8233_v1, %v5382_v52  ;;  %v5299_v1 = vsel %vm2698_vm5, %v5298_v46, %v5212_v30  ;;  %v5302_v52 = vrot.slane %v5215_v35, 5  ;;  %v5466_v46 = vld [vmem:[#allocation3 + $0xd5] sm:$0x1] }
 0xf17   : > { %8234 = vlog2.f32 %v5388_v43  ;;  %v5301_v43 = vsel %vm2701_vm6, %v5300_v54, %v5299_v1  ;;  %v5467_v54 = vld [vmem:[#allocation3 + $0xf5] sm:$0x1]  ;;  %v5550_v1 = vrot.slane %v5466_v46, 2 }
 0xf18   : > { %v5303_v19 = vsel %vm2704_vm7, %v5302_v52, %v5301_v43  ;;  %v5552_v43 = vrot.slane %v5467_v54, 1 }
 0xf19   : > { %v5305_v45 = vsel %vm2707_vm8, %v5304_v33, %v5303_v19 }
 0xf1a   : > { %v5307_v38 = vsel %vm2710_vm9, %v5306_v47, %v5305_v45 }
 0xf1b   : > { %v5309_v55 = vsel %vm2713_vm10, %v5308_v14, %v5307_v38 }
 0xf1c   : > { %v5311_v23 = vsel %vm2716_vm11, %v5310_v57, %v5309_v55 }
 0xf21   : > { %v8235_v15 = vpop.eup %8234 }
 0xf22   : > { %v5391_v2 = vmul.f32 0.6931472, %v8235_v15 }
 0xf24   : > { %v5394_v9 = vadd.f32 %v5391_v2, %v5362_v28 }
 0xf26   : > { %v5442_v34 = vadd.f32 %v5425_v22, %v5394_v9 }
 0xf28   : > { %v10028_v58 = vsel %vm5455_vm3, %v5442_v34, %v9981_v53 }
 0xf29   : > { %5476 = vrot.lane.b32.xlu1 %v10028_v58, %s8614_s12 }
 0xf2d   : > { %5482 = vrot.lane.b32.xlu1 %v10028_v58, %s8613_s10 }
 0xf31   : > { %5578 = vperm.xlu1 %7835, %v5575_v11  }
 0xf57   : > { %v5223_v53 = vpop.permute.xlu0 %5222 }
 0xf58   : > { %v5225_v24 = vadd.f32 %v10047_v40, %v5223_v53 }
 0xf5b   : > { %v5229_v21 = vpop.permute.xlu0 %5228 }
 0xf5c   : > { %v5231_v8 = vadd.f32 %v10050_v39, %v5229_v21 }
 0xf5e   : > { %v5233_v26 = vmax.f32 %v5225_v24, %v5231_v8  ;;  %vm5243_vm14 = vcmp.ge.f32.partialorder %v5225_v24, %v5231_v8 }
 0xf60   : > { %v5235_v41 = vmax.f32 %v10005_v10, %v5233_v26  ;;  %vm5237_vm13 = vcmp.ge.f32.partialorder %v10005_v10, %v5233_v26 }
 0xf61   : > { %v5239_v27 = vsel %vm5237_vm13, %v5225_v24, %v10005_v10  ;;  %vm5245_vm15 = vmor %vm5237_vm13, %vm5243_vm14 }
 0xf62   : > { %v5241_v31 = vsub.f32 %v5239_v27, %v5235_v41  ;;  %v5247_v48 = vsel %vm5245_vm15, %v5231_v8, %v5225_v24  ;;  %v5461_v8 = vld [vmem:[#allocation3 + $0x35] sm:$0x1] }
 0xf63   : > { %v5249_v36 = vsub.f32 %v5247_v48, %v5235_v41  ;;  %v5462_v27 = vld [vmem:[#allocation3 + $0x55] sm:$0x1]  ;;  %v5540_v48 = vrot.slane %v5461_v8, 7  ;;  %v5344_v8 = vld [vmem:[#allocation3 + $0x194] sm:$0x1] }
 0xf64   : > { %v5252_v63 = vmul.f32 1.442695, %v5241_v31 }
 0xf65   : > { %v5258_v44 = vmul.f32 1.442695, %v5249_v36  ;;  %v5460_v36 = vld [vmem:[#allocation3 + $0x15] sm:$0x1] }
 0xf66   : > { %8236 = vpow2.f32 %v5252_v63  ;;  %v5463_v63 = vld [vmem:[#allocation3 + $0x75] sm:$0x1]  ;;  %v5541_v60 = vsel %vm2698_vm5, %v5540_v48, %v5460_v36  ;;  %v5432_v48 = vrot.slane %v5344_v8, 4  ;;  %v5346_v36 = vld [vmem:[#allocation3 + $0x1d4] sm:$0x1] }
 0xf67   : > { %8238 = vpow2.f32 %v5258_v44  ;;  %v5542_v44 = vrot.slane %v5462_v27, 6  ;;  %v5345_v27 = vld [vmem:[#allocation3 + $0x1b4] sm:$0x1] }
 0xf69   : > { %v5543_v16 = vsel %vm2701_vm6, %v5542_v44, %v5541_v60  ;;  %v5434_v44 = vrot.slane %v5345_v27, 3 }
 0xf6c   : > { %v5326_v6 = vpop.permute.xlu0 %5325 }
 0xf6d   : > { %vm5328_vm12 = vcmp.eq.s32.totalorder %v5326_v6, 1 }
 0xf70   : > { %v8237_v18 = vpop.eup %8236 }
 0xf71   : > { %v8239_v28 = vpop.eup %8238  ;;  %v5255_v32 = vadd.f32 1.0, %v8237_v18  ;;  %v5464_v18 = vld [vmem:[#allocation3 + $0x95] sm:$0x1] }
 0xf73   : > { %v5261_v0 = vadd.f32 %v8239_v28, %v5255_v32  ;;  %v5544_v28 = vrot.slane %v5463_v63, 5  ;;  %v5465_v32 = vld [vmem:[#allocation3 + $0xb5] sm:$0x1] }
 0xf74   : > { %v5548_v35 = vrot.slane %v5465_v32, 3 }
 0xf75   : > { %8240 = vlog2.f32 %v5261_v0  ;;  %v5546_v0 = vrot.slane %v5464_v18, 4  ;;  %v5545_v30 = vsel %vm2704_vm7, %v5544_v28, %v5543_v16  ;;  %v5347_v18 = vld [vmem:[#allocation3 + $0x1f4] sm:$0x1]  ;;  %v5436_v28 = vrot.slane %v5346_v36, 2 }
 0xf77   : > { %v5547_v20 = vsel %vm2707_vm8, %v5546_v0, %v5545_v30  ;;  %v5438_v0 = vrot.slane %v5347_v18, 1  ;;  %v10136_v18 = vstv %s5715_s15 }
 0xf78   : > { %v5549_v56 = vsel %vm2710_vm9, %v5548_v35, %v5547_v20 }
 0xf79   : > { %v5551_v29 = vsel %vm2713_vm10, %v5550_v1, %v5549_v56 }
 0xf7a   : > { %v5553_v3 = vsel %vm2716_vm11, %v5552_v43, %v5551_v29 }
 0xf7f   : > { %v8241_v49 = vpop.eup %8240 }
 0xf80   : > { %v5265_v42 = vmul.f32 0.6931472, %v8241_v49  ;;  %v10089_v49 = vstv %s5587_s13 }
 0xf81   : > { %vm5701_vm13 = vcmp.lt.s32.totalorder %v10089_v49, %v10037_v37 }
 0xf82   : > { %v5267_v51 = vadd.f32 %v5265_v42, %v5235_v41  ;;  %v5703_v38 = vsel %vm5701_vm13, 1, %v8615_v17 }
 0xf84   : > { %v5315_v25 = vadd.f32 %v5311_v23, %v5267_v51 }
 0xf86   : > { %v10064_v15 = vsel %vm5328_vm12, %v5315_v25, %v10005_v10 }
 0xf87   : > { %5350 = vrot.lane.b32.xlu0 %v10064_v15, %s8614_s12 }
 0xf8b   : > { %5356 = vrot.lane.b32.xlu0 %v10064_v15, %s8613_s10 }
 0xf8f   : > { %5453 = vperm.xlu0 %7834, %v5448_v62  }
 0xf9b   : > { %v5477_v50 = vpop.permute.xlu1 %5476 }
 0xf9c   : > { %v5480_v5 = vadd.f32 %v9916_v59, %v5477_v50 }
 0xf9f   : > { %v5483_v2 = vpop.permute.xlu1 %5482 }
 0xfa0   : > { %v5486_v9 = vadd.f32 %v9919_v13, %v5483_v2 }
 0xfa2   : > { %v5488_v10 = vmax.f32 %v5480_v5, %v5486_v9  ;;  %vm5498_vm2 = vcmp.ge.f32.partialorder %v5480_v5, %v5486_v9 }
 0xfa4   : > { %v5490_v12 = vmax.f32 %v10028_v58, %v5488_v10  ;;  %vm5492_vm1 = vcmp.ge.f32.partialorder %v10028_v58, %v5488_v10  ;;  %v5341_v10 = vld [vmem:[#allocation3 + $0x134] sm:$0x1] }
 0xfa5   : > { %v5494_v61 = vsel %vm5492_vm1, %v5480_v5, %v10028_v58  ;;  %vm5500_vm3 = vmor %vm5492_vm1, %vm5498_vm2  ;;  %vm5574_vm1 = vcmp.lt.s32.totalorder %v10030_v7, %v9906_v4 }
 0xfa6   : > { %v5496_v22 = vsub.f32 %v5494_v61, %v5490_v12  ;;  %v5502_v34 = vsel %vm5500_vm3, %v5486_v9, %v5480_v5  ;;  %v5576_v56 = vsel %vm5574_vm1, 1, %v8615_v17 }
 0xfa7   : > { %v5504_v11 = vsub.f32 %v5502_v34, %v5490_v12 }
 0xfa8   : > { %v5506_v53 = vmul.f32 1.442695, %v5496_v22  ;;  %v5342_v22 = vld [vmem:[#allocation3 + $0x154] sm:$0x1] }
 0xfa9   : > { %v5512_v21 = vmul.f32 1.442695, %v5504_v11  ;;  %v5426_v11 = vrot.slane %v5341_v10, 7 }
 0xfaa   : > { %8242 = vpow2.f32 %v5506_v53  ;;  %v5340_v53 = vld [vmem:[#allocation3 + $0x114] sm:$0x1] }
 0xfab   : > { %8244 = vpow2.f32 %v5512_v21  ;;  %v5343_v21 = vld [vmem:[#allocation3 + $0x174] sm:$0x1] }
 0xfb0   : > { %v5579_v47 = vpop.permute.xlu1 %5578 }
 0xfb1   : > { %vm5583_vm4 = vcmp.eq.s32.totalorder %v5579_v47, 1 }
 0xfb4   : > { %v8243_v24 = vpop.eup %8242 }
 0xfb5   : > { %v8245_v26 = vpop.eup %8244  ;;  %v5510_v41 = vadd.f32 1.0, %v8243_v24  ;;  %v5428_v24 = vrot.slane %v5342_v22, 6 }
 0xfb7   : > { %v5516_v31 = vadd.f32 %v8245_v26, %v5510_v41  ;;  %v5427_v26 = vsel %vm2698_vm5, %v5426_v11, %v5340_v53  ;;  %v5430_v41 = vrot.slane %v5343_v21, 5  ;;  %v5595_v11 = vld [vmem:[#allocation3 + $0xf6] sm:$0x1] }
 0xfb9   : > { %8246 = vlog2.f32 %v5516_v31  ;;  %v5429_v31 = vsel %vm2701_vm6, %v5428_v24, %v5427_v26  ;;  %v5680_v26 = vrot.slane %v5595_v11, 1 }
 0xfba   : > { %v5431_v63 = vsel %vm2704_vm7, %v5430_v41, %v5429_v31 }
 0xfbb   : > { %v5433_v60 = vsel %vm2707_vm8, %v5432_v48, %v5431_v63 }
 0xfbc   : > { %v5435_v16 = vsel %vm2710_vm9, %v5434_v44, %v5433_v60 }
 0xfbd   : > { %v5437_v30 = vsel %vm2713_vm10, %v5436_v28, %v5435_v16 }
 0xfbe   : > { %v5439_v20 = vsel %vm2716_vm11, %v5438_v0, %v5437_v30 }
 0xfc3   : > { %v8247_v52 = vpop.eup %8246 }
 0xfc4   : > { %v5519_v33 = vmul.f32 0.6931472, %v8247_v52 }
 0xfc6   : > { %v5522_v19 = vadd.f32 %v5519_v33, %v5490_v12 }
 0xfc8   : > { %v5570_v45 = vadd.f32 %v5553_v3, %v5522_v19 }
 0xfca   : > { %v10087_v14 = vsel %vm5583_vm4, %v5570_v45, %v10028_v58 }
 0xfcb   : > { %5604 = vrot.lane.b32.xlu1 %v10087_v14, %s8614_s12 }
 0xfcf   : > { %5610 = vrot.lane.b32.xlu1 %v10087_v14, %s8613_s10 }
 0xfd3   : > { %5706 = vperm.xlu1 %7835, %v5703_v38  }
 0xff9   : > { %v5351_v57 = vpop.permute.xlu0 %5350 }
 0xffa   : > { %v5353_v55 = vadd.f32 %v10047_v40, %v5351_v57 }
 0xffd   : > { %v5357_v42 = vpop.permute.xlu0 %5356 }
 0xffe   : > { %v5359_v58 = vadd.f32 %v10050_v39, %v5357_v42 }
0x1000   : > { %v5361_v51 = vmax.f32 %v5353_v55, %v5359_v58  ;;  %vm5371_vm15 = vcmp.ge.f32.partialorder %v5353_v55, %v5359_v58 }
0x1002   : > { %v5363_v6 = vmax.f32 %v10064_v15, %v5361_v51  ;;  %vm5365_vm14 = vcmp.ge.f32.partialorder %v10064_v15, %v5361_v51 }
0x1003   : > { %v5367_v23 = vsel %vm5365_vm14, %v5353_v55, %v10064_v15  ;;  %vm5373_vm12 = vmor %vm5365_vm14, %vm5371_vm15  ;;  %vm5829_vm14 = vcmp.lt.s32.totalorder %v10136_v18, %v10037_v37 }
0x1004   : > { %v5369_v25 = vsub.f32 %v5367_v23, %v5363_v6  ;;  %v5375_v62 = vsel %vm5373_vm12, %v5359_v58, %v5353_v55  ;;  %v5590_v58 = vld [vmem:[#allocation3 + $0x56] sm:$0x1]  ;;  %v5831_v60 = vsel %vm5829_vm14, 1, %v8615_v17 }
0x1005   : > { %v5377_v50 = vsub.f32 %v5375_v62, %v5363_v6  ;;  %v5588_v23 = vld [vmem:[#allocation3 + $0x16] sm:$0x1]  ;;  %v5670_v62 = vrot.slane %v5590_v58, 6  ;;  %v5474_v58 = vld [vmem:[#allocation3 + $0x1d5] sm:$0x1] }
0x1006   : > { %v5380_v2 = vmul.f32 1.442695, %v5369_v25  ;;  %v5591_v25 = vld [vmem:[#allocation3 + $0x76] sm:$0x1] }
0x1007   : > { %v5386_v5 = vmul.f32 1.442695, %v5377_v50  ;;  %v5592_v50 = vld [vmem:[#allocation3 + $0x96] sm:$0x1] }
0x1008   : > { %8248 = vpow2.f32 %v5380_v2 }
0x1009   : > { %8250 = vpow2.f32 %v5386_v5  ;;  %v5672_v5 = vrot.slane %v5591_v25, 5 }
0x100e   : > { %v5454_v54 = vpop.permute.xlu0 %5453 }
0x100f   : > { %vm5456_vm0 = vcmp.eq.s32.totalorder %v5454_v54, 1 }
0x1012   : > { %v8249_v9 = vpop.eup %8248 }
0x1013   : > { %v8251_v12 = vpop.eup %8250  ;;  %v5383_v61 = vadd.f32 1.0, %v8249_v9  ;;  %v5593_v9 = vld [vmem:[#allocation3 + $0xb6] sm:$0x1] }
0x1015   : > { %v5389_v34 = vadd.f32 %v8251_v12, %v5383_v61  ;;  %v5674_v12 = vrot.slane %v5592_v50, 4  ;;  %v5594_v61 = vld [vmem:[#allocation3 + $0xd6] sm:$0x1] }
0x1016   : > { %v5678_v21 = vrot.slane %v5594_v61, 2 }
0x1017   : > { %8252 = vlog2.f32 %v5389_v34  ;;  %v5676_v34 = vrot.slane %v5593_v9, 3 }
0x1021   : > { %v8253_v32 = vpop.eup %8252 }
0x1022   : > { %v5393_v46 = vmul.f32 0.6931472, %v8253_v32 }
0x1024   : > { %v5395_v35 = vadd.f32 %v5393_v46, %v5363_v6 }
0x1026   : > { %v5443_v1 = vadd.f32 %v5439_v20, %v5395_v35 }
0x1028   : > { %v10111_v52 = vsel %vm5456_vm0, %v5443_v1, %v10064_v15 }
0x1029   : > { %5478 = vrot.lane.b32.xlu0 %v10111_v52, %s8614_s12 }
0x102d   : > { %5484 = vrot.lane.b32.xlu0 %v10111_v52, %s8613_s10 }
0x1031   : > { %5581 = vperm.xlu0 %7834, %v5576_v56  }
0x103d   : > { %v5605_v43 = vpop.permute.xlu1 %5604 }
0x103e   : > { %v5608_v29 = vadd.f32 %v9916_v59, %v5605_v43  ;;  %v5589_v59 = vld [vmem:[#allocation3 + $0x36] sm:$0x1] }
0x103f   : > { %v5668_v6 = vrot.slane %v5589_v59, 7  ;;  %v5473_v59 = vld [vmem:[#allocation3 + $0x1b5] sm:$0x1] }
0x1041   : > { %v5611_v33 = vpop.permute.xlu1 %5610  ;;  %v5669_v2 = vsel %vm2698_vm5, %v5668_v6, %v5588_v23  ;;  %v5562_v6 = vrot.slane %v5473_v59, 3  ;;  %v5475_v23 = vld [vmem:[#allocation3 + $0x1f5] sm:$0x1] }
0x1042   : > { %v5614_v19 = vadd.f32 %v9919_v13, %v5611_v33  ;;  %v5671_v10 = vsel %vm2701_vm6, %v5670_v62, %v5669_v2  ;;  %v5469_v33 = vld [vmem:[#allocation3 + $0x135] sm:$0x1]  ;;  %v5564_v62 = vrot.slane %v5474_v58, 2 }
0x1043   : > { %v5673_v22 = vsel %vm2704_vm7, %v5672_v5, %v5671_v10  ;;  %v5566_v5 = vrot.slane %v5475_v23, 1 }
0x1044   : > { %v5616_v15 = vmax.f32 %v5608_v29, %v5614_v19  ;;  %vm5626_vm3 = vcmp.ge.f32.partialorder %v5608_v29, %v5614_v19  ;;  %v5675_v53 = vsel %vm2707_vm8, %v5674_v12, %v5673_v22 }
0x1045   : > { %v5677_v8 = vsel %vm2710_vm9, %v5676_v34, %v5675_v53  ;;  %v10165_v53 = vld [vmem:[%s10685_s6 + $0x8] sm:$0xff] }
0x1046   : > { %v5618_v47 = vmax.f32 %v10087_v14, %v5616_v15  ;;  %vm5620_vm2 = vcmp.ge.f32.partialorder %v10087_v14, %v5616_v15  ;;  %v5679_v27 = vsel %vm2713_vm10, %v5678_v21, %v5677_v8  ;;  %v5470_v15 = vld [vmem:[#allocation3 + $0x155] sm:$0x1] }
0x1047   : > { %v5622_v4 = vsel %vm5620_vm2, %v5608_v29, %v10087_v14  ;;  %vm5628_vm4 = vmor %vm5620_vm2, %vm5626_vm3  ;;  %v5681_v36 = vsel %vm2716_vm11, %v5680_v26, %v5679_v27  ;;  %vm5702_vm2 = vcmp.lt.s32.totalorder %v10089_v49, %v10165_v53  ;;  %v10175_v8 = vld [vmem:[%s10681_s2] sm:$0xff] }
0x1048   : > { %v5624_v7 = vsub.f32 %v5622_v4, %v5618_v47  ;;  %v5630_v3 = vsel %vm5628_vm4, %v5614_v19, %v5608_v29  ;;  %v5554_v4 = vrot.slane %v5469_v33, 7  ;;  %v5704_v21 = vsel %vm5702_vm2, 1, %v8615_v17 }
0x1049   : > { %v5632_v45 = vsub.f32 %v5630_v3, %v5618_v47  ;;  %v5471_v3 = vld [vmem:[#allocation3 + $0x175] sm:$0x1] }
0x104a   : > { %v5634_v38 = vmul.f32 1.442695, %v5624_v7  ;;  %v5468_v7 = vld [vmem:[#allocation3 + $0x115] sm:$0x1] }
0x104b   : > { %v5640_v57 = vmul.f32 1.442695, %v5632_v45  ;;  %v5556_v45 = vrot.slane %v5470_v15, 6 }
0x104c   : > { %8254 = vpow2.f32 %v5634_v38  ;;  %v5472_v38 = vld [vmem:[#allocation3 + $0x195] sm:$0x1] }
0x104d   : > { %8256 = vpow2.f32 %v5640_v57  ;;  %v5555_v57 = vsel %vm2698_vm5, %v5554_v4, %v5468_v7  ;;  %v5722_v4 = vld [vmem:[#allocation3 + $0xd7] sm:$0x1] }
0x1052   : > { %v5707_v48 = vpop.permute.xlu1 %5706 }
0x1053   : > { %vm5711_vm13 = vcmp.eq.s32.totalorder %v5707_v48, 1 }
0x1056   : > { %v8255_v42 = vpop.eup %8254 }
0x1057   : > { %v8257_v55 = vpop.eup %8256  ;;  %v5638_v13 = vadd.f32 1.0, %v8255_v42  ;;  %v5558_v42 = vrot.slane %v5471_v3, 5 }
0x1059   : > { %v5644_v51 = vadd.f32 %v8257_v55, %v5638_v13  ;;  %v5557_v55 = vsel %vm2701_vm6, %v5556_v45, %v5555_v57  ;;  %v5560_v13 = vrot.slane %v5472_v38, 4  ;;  %v5723_v45 = vld [vmem:[#allocation3 + $0xf7] sm:$0x1]  ;;  %v5806_v57 = vrot.slane %v5722_v4, 2 }
0x105b   : > { %8258 = vlog2.f32 %v5644_v51  ;;  %v5559_v51 = vsel %vm2704_vm7, %v5558_v42, %v5557_v55  ;;  %v5808_v55 = vrot.slane %v5723_v45, 1 }
0x105c   : > { %v5561_v25 = vsel %vm2707_vm8, %v5560_v13, %v5559_v51 }
0x105d   : > { %v5563_v2 = vsel %vm2710_vm9, %v5562_v6, %v5561_v25 }
0x105e   : > { %v5565_v10 = vsel %vm2713_vm10, %v5564_v62, %v5563_v2 }
0x105f   : > { %v5567_v22 = vsel %vm2716_vm11, %v5566_v5, %v5565_v10 }
0x1065   : > { %v8259_v24 = vpop.eup %8258 }
0x1066   : > { %v5647_v41 = vmul.f32 0.6931472, %v8259_v24 }
0x1068   : > { %v5650_v31 = vadd.f32 %v5647_v41, %v5618_v47  ;;  %v10178_v41 = vld [vmem:[#allocation9] sm:$0xff] }
0x106a   : > { %v5698_v63 = vadd.f32 %v5681_v36, %v5650_v31 }
0x106c   : > { %v10134_v44 = vsel %vm5711_vm13, %v5698_v63, %v10087_v14 }
0x106d   : > { %5732 = vrot.lane.b32.xlu1 %v10134_v44, %s8614_s12 }
0x1071   : > { %5738 = vrot.lane.b32.xlu1 %v10134_v44, %s8613_s10 }
0x1075   : > { %5834 = vperm.xlu1 %7835, %v5831_v60  }
0x109b   : > { %v5479_v28 = vpop.permute.xlu0 %5478 }
0x109c   : > { %v5481_v16 = vadd.f32 %v10047_v40, %v5479_v28 }
0x109f   : > { %v5485_v32 = vpop.permute.xlu0 %5484 }
0x10a0   : > { %v5487_v14 = vadd.f32 %v10050_v39, %v5485_v32 }
0x10a2   : > { %v5489_v0 = vmax.f32 %v5481_v16, %v5487_v14  ;;  %vm5499_vm12 = vcmp.ge.f32.partialorder %v5481_v16, %v5487_v14 }
0x10a4   : > { %v5491_v46 = vmax.f32 %v10111_v52, %v5489_v0  ;;  %vm5493_vm15 = vcmp.ge.f32.partialorder %v10111_v52, %v5489_v0 }
0x10a5   : > { %v5495_v30 = vsel %vm5493_vm15, %v5481_v16, %v10111_v52  ;;  %vm5501_vm0 = vmor %vm5493_vm15, %vm5499_vm12 }
0x10a6   : > { %v5497_v35 = vsub.f32 %v5495_v30, %v5491_v46  ;;  %v5503_v54 = vsel %vm5501_vm0, %v5487_v14, %v5481_v16  ;;  %v5717_v14 = vld [vmem:[#allocation3 + $0x37] sm:$0x1] }
0x10a7   : > { %v5505_v20 = vsub.f32 %v5503_v54, %v5491_v46  ;;  %v5718_v30 = vld [vmem:[#allocation3 + $0x57] sm:$0x1]  ;;  %v5796_v54 = vrot.slane %v5717_v14, 7  ;;  %v5600_v14 = vld [vmem:[#allocation3 + $0x196] sm:$0x1] }
0x10a8   : > { %v5508_v1 = vmul.f32 1.442695, %v5497_v35 }
0x10a9   : > { %v5514_v56 = vmul.f32 1.442695, %v5505_v20  ;;  %v5716_v20 = vld [vmem:[#allocation3 + $0x17] sm:$0x1] }
0x10aa   : > { %8260 = vpow2.f32 %v5508_v1  ;;  %v5719_v1 = vld [vmem:[#allocation3 + $0x77] sm:$0x1]  ;;  %v5797_v33 = vsel %vm2698_vm5, %v5796_v54, %v5716_v20  ;;  %v5688_v54 = vrot.slane %v5600_v14, 4  ;;  %v5602_v20 = vld [vmem:[#allocation3 + $0x1d6] sm:$0x1] }
0x10ab   : > { %8262 = vpow2.f32 %v5514_v56  ;;  %v5798_v56 = vrot.slane %v5718_v30, 6  ;;  %v5601_v30 = vld [vmem:[#allocation3 + $0x1b6] sm:$0x1] }
0x10ad   : > { %v5799_v15 = vsel %vm2701_vm6, %v5798_v56, %v5797_v33  ;;  %v5690_v56 = vrot.slane %v5601_v30, 3 }
0x10b0   : > { %v5582_v61 = vpop.permute.xlu0 %5581 }
0x10b1   : > { %vm5584_vm1 = vcmp.eq.s32.totalorder %v5582_v61, 1 }
0x10b4   : > { %v8261_v43 = vpop.eup %8260 }
0x10b5   : > { %v8263_v29 = vpop.eup %8262  ;;  %v5511_v19 = vadd.f32 1.0, %v8261_v43  ;;  %v5720_v43 = vld [vmem:[#allocation3 + $0x97] sm:$0x1] }
0x10b7   : > { %v5517_v47 = vadd.f32 %v8263_v29, %v5511_v19  ;;  %v5800_v29 = vrot.slane %v5719_v1, 5  ;;  %v5721_v19 = vld [vmem:[#allocation3 + $0xb7] sm:$0x1] }
0x10b8   : > { %v5804_v3 = vrot.slane %v5721_v19, 3 }
0x10b9   : > { %8264 = vlog2.f32 %v5517_v47  ;;  %v5802_v47 = vrot.slane %v5720_v43, 4  ;;  %v5801_v7 = vsel %vm2704_vm7, %v5800_v29, %v5799_v15  ;;  %v5603_v43 = vld [vmem:[#allocation3 + $0x1f6] sm:$0x1]  ;;  %v5692_v29 = vrot.slane %v5602_v20, 2 }
0x10bb   : > { %v5803_v38 = vsel %vm2707_vm8, %v5802_v47, %v5801_v7  ;;  %v5694_v47 = vrot.slane %v5603_v43, 1 }
0x10bc   : > { %v5805_v59 = vsel %vm2710_vm9, %v5804_v3, %v5803_v38 }
0x10bd   : > { %v5807_v58 = vsel %vm2713_vm10, %v5806_v57, %v5805_v59 }
0x10be   : > { %v5809_v23 = vsel %vm2716_vm11, %v5808_v55, %v5807_v58 }
0x10c3   : > { %v8265_v50 = vpop.eup %8264 }
0x10c4   : > { %v5521_v9 = vmul.f32 0.6931472, %v8265_v50  ;;  %v10195_v50 = vstv %s5843_s21 }
0x10c5   : > { %vm5957_vm15 = vcmp.lt.s32.totalorder %v10195_v50, %v10037_v37 }
0x10c6   : > { %v5523_v12 = vadd.f32 %v5521_v9, %v5491_v46  ;;  %v5959_v2 = vsel %vm5957_vm15, 1, %v8615_v17 }
0x10c8   : > { %v5571_v34 = vadd.f32 %v5567_v22, %v5523_v12 }
0x10ca   : > { %v10158_v11 = vsel %vm5584_vm1, %v5571_v34, %v10111_v52 }
0x10cb   : > { %5606 = vrot.lane.b32.xlu0 %v10158_v11, %s8614_s12 }
0x10cf   : > { %5612 = vrot.lane.b32.xlu0 %v10158_v11, %s8613_s10 }
0x10d3   : > { %5709 = vperm.xlu0 %7834, %v5704_v21  }
0x10df   : > { %v5733_v24 = vpop.permute.xlu1 %5732 }
0x10e0   : > { %v5736_v26 = vadd.f32 %v10175_v8, %v5733_v24 }
0x10e3   : > { %v5739_v52 = vpop.permute.xlu1 %5738 }
0x10e4   : > { %v5742_v27 = vadd.f32 %v10178_v41, %v5739_v52 }
0x10e6   : > { %v5744_v49 = vmax.f32 %v5736_v26, %v5742_v27  ;;  %vm5754_vm4 = vcmp.ge.f32.partialorder %v5736_v26, %v5742_v27 }
0x10e8   : > { %v5746_v31 = vmax.f32 %v10134_v44, %v5744_v49  ;;  %vm5748_vm3 = vcmp.ge.f32.partialorder %v10134_v44, %v5744_v49  ;;  %v5597_v49 = vld [vmem:[#allocation3 + $0x136] sm:$0x1] }
0x10e9   : > { %v5750_v48 = vsel %vm5748_vm3, %v5736_v26, %v10134_v44  ;;  %vm5756_vm13 = vmor %vm5748_vm3, %vm5754_vm4  ;;  %vm5830_vm3 = vcmp.lt.s32.totalorder %v10136_v18, %v10165_v53 }
0x10ea   : > { %v5752_v36 = vsub.f32 %v5750_v48, %v5746_v31  ;;  %v5758_v63 = vsel %vm5756_vm13, %v5742_v27, %v5736_v26  ;;  %v5832_v59 = vsel %vm5830_vm3, 1, %v8615_v17 }
0x10eb   : > { %v5760_v60 = vsub.f32 %v5758_v63, %v5746_v31 }
0x10ec   : > { %v5762_v28 = vmul.f32 1.442695, %v5752_v36  ;;  %v5598_v36 = vld [vmem:[#allocation3 + $0x156] sm:$0x1] }
0x10ed   : > { %v5768_v32 = vmul.f32 1.442695, %v5760_v60  ;;  %v5682_v60 = vrot.slane %v5597_v49, 7 }
0x10ee   : > { %8266 = vpow2.f32 %v5762_v28  ;;  %v5596_v28 = vld [vmem:[#allocation3 + $0x116] sm:$0x1] }
0x10ef   : > { %8268 = vpow2.f32 %v5768_v32  ;;  %v5599_v32 = vld [vmem:[#allocation3 + $0x176] sm:$0x1] }
0x10f4   : > { %v5835_v6 = vpop.permute.xlu1 %5834 }
0x10f5   : > { %vm5839_vm14 = vcmp.eq.s32.totalorder %v5835_v6, 1 }
0x10f8   : > { %v8267_v16 = vpop.eup %8266 }
0x10f9   : > { %v8269_v0 = vpop.eup %8268  ;;  %v5766_v46 = vadd.f32 1.0, %v8267_v16  ;;  %v5684_v16 = vrot.slane %v5598_v36, 6 }
0x10fb   : > { %v5772_v35 = vadd.f32 %v8269_v0, %v5766_v46  ;;  %v5683_v0 = vsel %vm2698_vm5, %v5682_v60, %v5596_v28  ;;  %v5686_v46 = vrot.slane %v5599_v32, 5  ;;  %v5850_v60 = vld [vmem:[#allocation3 + $0xd8] sm:$0x1] }
0x10fd   : > { %8270 = vlog2.f32 %v5772_v35  ;;  %v5685_v35 = vsel %vm2701_vm6, %v5684_v16, %v5683_v0  ;;  %v5851_v16 = vld [vmem:[#allocation3 + $0xf8] sm:$0x1]  ;;  %v5934_v0 = vrot.slane %v5850_v60, 2 }
0x10fe   : > { %v5687_v1 = vsel %vm2704_vm7, %v5686_v46, %v5685_v35  ;;  %v5936_v35 = vrot.slane %v5851_v16, 1 }
0x10ff   : > { %v5689_v33 = vsel %vm2707_vm8, %v5688_v54, %v5687_v1 }
0x1100   : > { %v5691_v15 = vsel %vm2710_vm9, %v5690_v56, %v5689_v33 }
0x1101   : > { %v5693_v7 = vsel %vm2713_vm10, %v5692_v29, %v5691_v15 }
0x1102   : > { %v5695_v38 = vsel %vm2716_vm11, %v5694_v47, %v5693_v7 }
0x1107   : > { %v8271_v42 = vpop.eup %8270 }
0x1108   : > { %v5775_v13 = vmul.f32 0.6931472, %v8271_v42 }
0x110a   : > { %v5778_v51 = vadd.f32 %v5775_v13, %v5746_v31 }
0x110c   : > { %v5826_v25 = vadd.f32 %v5809_v23, %v5778_v51 }
0x110e   : > { %v10193_v62 = vsel %vm5839_vm14, %v5826_v25, %v10134_v44 }
0x110f   : > { %5860 = vrot.lane.b32.xlu1 %v10193_v62, %s8614_s12 }
0x1113   : > { %5866 = vrot.lane.b32.xlu1 %v10193_v62, %s8613_s10 }
0x1117   : > { %5962 = vperm.xlu1 %7835, %v5959_v2  }
0x113d   : > { %v5607_v5 = vpop.permute.xlu0 %5606 }
0x113e   : > { %v5609_v10 = vadd.f32 %v10047_v40, %v5607_v5 }
0x1141   : > { %v5613_v9 = vpop.permute.xlu0 %5612 }
0x1142   : > { %v5615_v44 = vadd.f32 %v10050_v39, %v5613_v9 }
0x1144   : > { %v5617_v12 = vmax.f32 %v5609_v10, %v5615_v44  ;;  %vm5627_vm0 = vcmp.ge.f32.partialorder %v5609_v10, %v5615_v44 }
0x1146   : > { %v5619_v61 = vmax.f32 %v10158_v11, %v5617_v12  ;;  %vm5621_vm12 = vcmp.ge.f32.partialorder %v10158_v11, %v5617_v12 }
0x1147   : > { %v5623_v22 = vsel %vm5621_vm12, %v5609_v10, %v10158_v11  ;;  %vm5629_vm1 = vmor %vm5621_vm12, %vm5627_vm0 }
0x1148   : > { %v5625_v34 = vsub.f32 %v5623_v22, %v5619_v61  ;;  %v5631_v21 = vsel %vm5629_vm1, %v5615_v44, %v5609_v10  ;;  %v5845_v44 = vld [vmem:[#allocation3 + $0x38] sm:$0x1] }
0x1149   : > { %v5633_v24 = vsub.f32 %v5631_v21, %v5619_v61  ;;  %v5846_v22 = vld [vmem:[#allocation3 + $0x58] sm:$0x1]  ;;  %v5924_v21 = vrot.slane %v5845_v44, 7  ;;  %v5729_v44 = vld [vmem:[#allocation3 + $0x1b7] sm:$0x1] }
0x114a   : > { %v5636_v52 = vmul.f32 1.442695, %v5625_v34 }
0x114b   : > { %v5642_v26 = vmul.f32 1.442695, %v5633_v24  ;;  %v5847_v24 = vld [vmem:[#allocation3 + $0x78] sm:$0x1] }
0x114c   : > { %8272 = vpow2.f32 %v5636_v52  ;;  %v5926_v52 = vrot.slane %v5846_v22, 6  ;;  %v5730_v22 = vld [vmem:[#allocation3 + $0x1d7] sm:$0x1] }
0x114d   : > { %8274 = vpow2.f32 %v5642_v26  ;;  %v5848_v26 = vld [vmem:[#allocation3 + $0x98] sm:$0x1] }
0x1152   : > { %v5710_v45 = vpop.permute.xlu0 %5709 }
0x1153   : > { %vm5712_vm2 = vcmp.eq.s32.totalorder %v5710_v45, 1 }
0x1156   : > { %v8273_v27 = vpop.eup %8272 }
0x1157   : > { %v8275_v31 = vpop.eup %8274  ;;  %v5639_v48 = vadd.f32 1.0, %v8273_v27  ;;  %v5844_v27 = vld [vmem:[#allocation3 + $0x18] sm:$0x1] }
0x1158   : > { %v5925_v49 = vsel %vm2698_vm5, %v5924_v21, %v5844_v27  ;;  %v5818_v21 = vrot.slane %v5729_v44, 3 }
0x1159   : > { %v5645_v63 = vadd.f32 %v8275_v31, %v5639_v48  ;;  %v5928_v31 = vrot.slane %v5847_v24, 5  ;;  %v5849_v48 = vld [vmem:[#allocation3 + $0xb8] sm:$0x1]  ;;  %v5927_v36 = vsel %vm2701_vm6, %v5926_v52, %v5925_v49  ;;  %v5731_v24 = vld [vmem:[#allocation3 + $0x1f7] sm:$0x1] }
0x115a   : > { %v5932_v32 = vrot.slane %v5849_v48, 3 }
0x115b   : > { %8276 = vlog2.f32 %v5645_v63  ;;  %v5930_v63 = vrot.slane %v5848_v26, 4  ;;  %v5929_v28 = vsel %vm2704_vm7, %v5928_v31, %v5927_v36  ;;  %v5820_v26 = vrot.slane %v5730_v22, 2 }
0x115c   : > { %v5822_v31 = vrot.slane %v5731_v24, 1  ;;  %v10289_v24 = vstv %s6099_s20 }
0x115d   : > { %v5931_v14 = vsel %vm2707_vm8, %v5930_v63, %v5929_v28 }
0x115e   : > { %v5933_v30 = vsel %vm2710_vm9, %v5932_v32, %v5931_v14 }
0x115f   : > { %v5935_v20 = vsel %vm2713_vm10, %v5934_v0, %v5933_v30 }
0x1160   : > { %v5937_v43 = vsel %vm2716_vm11, %v5936_v35, %v5935_v20 }
0x1165   : > { %v8277_v19 = vpop.eup %8276 }
0x1166   : > { %v5649_v4 = vmul.f32 0.6931472, %v8277_v19  ;;  %v10242_v19 = vstv %s5971_s17 }
0x1167   : > { %vm6085_vm12 = vcmp.lt.s32.totalorder %v10242_v19, %v10037_v37 }
0x1168   : > { %v5651_v3 = vadd.f32 %v5649_v4, %v5619_v61  ;;  %v6087_v15 = vsel %vm6085_vm12, 1, %v8615_v17 }
0x116a   : > { %v5699_v57 = vadd.f32 %v5695_v38, %v5651_v3 }
0x116c   : > { %v10217_v42 = vsel %vm5712_vm2, %v5699_v57, %v10158_v11 }
0x116d   : > { %5734 = vrot.lane.b32.xlu0 %v10217_v42, %s8614_s12 }
0x1171   : > { %5740 = vrot.lane.b32.xlu0 %v10217_v42, %s8613_s10 }
0x1175   : > { %5837 = vperm.xlu0 %7834, %v5832_v59  }
0x1181   : > { %v5861_v55 = vpop.permute.xlu1 %5860 }
0x1182   : > { %v5864_v58 = vadd.f32 %v10175_v8, %v5861_v55 }
0x1185   : > { %v5867_v13 = vpop.permute.xlu1 %5866 }
0x1186   : > { %v5870_v51 = vadd.f32 %v10178_v41, %v5867_v13 }
0x1188   : > { %v5872_v11 = vmax.f32 %v5864_v58, %v5870_v51  ;;  %vm5882_vm13 = vcmp.ge.f32.partialorder %v5864_v58, %v5870_v51 }
0x118a   : > { %v5874_v6 = vmax.f32 %v10193_v62, %v5872_v11  ;;  %vm5876_vm4 = vcmp.ge.f32.partialorder %v10193_v62, %v5872_v11  ;;  %v5726_v11 = vld [vmem:[#allocation3 + $0x157] sm:$0x1] }
0x118b   : > { %v5878_v18 = vsel %vm5876_vm4, %v5864_v58, %v10193_v62  ;;  %vm5884_vm14 = vmor %vm5876_vm4, %vm5882_vm13  ;;  %vm5958_vm4 = vcmp.lt.s32.totalorder %v10195_v50, %v10165_v53 }
0x118c   : > { %v5880_v23 = vsub.f32 %v5878_v18, %v5874_v6  ;;  %v5886_v25 = vsel %vm5884_vm14, %v5870_v51, %v5864_v58  ;;  %v5960_v14 = vsel %vm5958_vm4, 1, %v8615_v17 }
0x118d   : > { %v5888_v2 = vsub.f32 %v5886_v25, %v5874_v6  ;;  %v5727_v25 = vld [vmem:[#allocation3 + $0x177] sm:$0x1] }
0x118e   : > { %v5890_v5 = vmul.f32 1.442695, %v5880_v23  ;;  %v5724_v23 = vld [vmem:[#allocation3 + $0x117] sm:$0x1] }
0x118f   : > { %v5896_v9 = vmul.f32 1.442695, %v5888_v2  ;;  %v5812_v2 = vrot.slane %v5726_v11, 6 }
0x1190   : > { %8278 = vpow2.f32 %v5890_v5  ;;  %v5728_v5 = vld [vmem:[#allocation3 + $0x197] sm:$0x1] }
0x1191   : > { %8280 = vpow2.f32 %v5896_v9 }
0x1196   : > { %v5963_v56 = vpop.permute.xlu1 %5962 }
0x1197   : > { %vm5967_vm15 = vcmp.eq.s32.totalorder %v5963_v56, 1 }
0x119a   : > { %v8279_v10 = vpop.eup %8278 }
0x119b   : > { %v8281_v12 = vpop.eup %8280  ;;  %v5894_v61 = vadd.f32 1.0, %v8279_v10  ;;  %v5814_v10 = vrot.slane %v5727_v25, 5 }
0x119d   : > { %v5900_v34 = vadd.f32 %v8281_v12, %v5894_v61  ;;  %v5816_v61 = vrot.slane %v5728_v5, 4 }
0x119f   : > { %8282 = vlog2.f32 %v5900_v34 }
0x11a9   : > { %v8283_v46 = vpop.eup %8282 }
0x11aa   : > { %v5903_v54 = vmul.f32 0.6931472, %v8283_v46 }
0x11ac   : > { %v5906_v1 = vadd.f32 %v5903_v54, %v5874_v6 }
0x11ae   : > { %v5954_v33 = vadd.f32 %v5937_v43, %v5906_v1 }
0x11b0   : > { %v10240_v29 = vsel %vm5967_vm15, %v5954_v33, %v10193_v62 }
0x11b1   : > { %5988 = vrot.lane.b32.xlu1 %v10240_v29, %s8614_s12 }
0x11b5   : > { %5994 = vrot.lane.b32.xlu1 %v10240_v29, %s8613_s10 }
0x11b9   : > { %6090 = vperm.xlu1 %7835, %v6087_v15  }
0x11df   : > { %v5735_v47 = vpop.permute.xlu0 %5734 }
0x11e0   : > { %v5737_v7 = vadd.f32 %v10047_v40, %v5735_v47  ;;  %v5725_v40 = vld [vmem:[#allocation3 + $0x137] sm:$0x1]  ;;  %v5973_v47 = vld [vmem:[#allocation3 + $0x39] sm:$0x1] }
0x11e1   : > { %v5810_v18 = vrot.slane %v5725_v40, 7 }
0x11e3   : > { %v5741_v4 = vpop.permute.xlu0 %5740  ;;  %v5811_v9 = vsel %vm2698_vm5, %v5810_v18, %v5724_v23  ;;  %v5979_v18 = vld [vmem:[#allocation3 + $0xf9] sm:$0x1] }
0x11e4   : > { %v5743_v62 = vadd.f32 %v10050_v39, %v5741_v4  ;;  %v5813_v12 = vsel %vm2701_vm6, %v5812_v2, %v5811_v9  ;;  %v6064_v9 = vrot.slane %v5979_v18, 1 }
0x11e5   : > { %v5815_v34 = vsel %vm2704_vm7, %v5814_v10, %v5813_v12 }
0x11e6   : > { %v5745_v3 = vmax.f32 %v5737_v7, %v5743_v62  ;;  %vm5755_vm1 = vcmp.ge.f32.partialorder %v5737_v7, %v5743_v62  ;;  %v5817_v52 = vsel %vm2707_vm8, %v5816_v61, %v5815_v34 }
0x11e7   : > { %v5819_v49 = vsel %vm2710_vm9, %v5818_v21, %v5817_v52  ;;  %v10296_v52 = vld [vmem:[%s10685_s6] sm:$0xff] }
0x11e8   : > { %v5747_v45 = vmax.f32 %v10217_v42, %v5745_v3  ;;  %vm5749_vm0 = vcmp.ge.f32.partialorder %v10217_v42, %v5745_v3  ;;  %v5821_v36 = vsel %vm2713_vm10, %v5820_v26, %v5819_v49  ;;  %v10306_v49 = vld [vmem:[%s10681_s2 + $0x8] sm:$0xff] }
0x11e9   : > { %v5751_v37 = vsel %vm5749_vm0, %v5737_v7, %v10217_v42  ;;  %vm5757_vm2 = vmor %vm5749_vm0, %vm5755_vm1  ;;  %v5823_v28 = vsel %vm2716_vm11, %v5822_v31, %v5821_v36  ;;  %vm6213_vm0 = vcmp.lt.s32.totalorder %v10289_v24, %v10296_v52 }
0x11ea   : > { %v5753_v38 = vsub.f32 %v5751_v37, %v5747_v45  ;;  %v5759_v57 = vsel %vm5757_vm2, %v5743_v62, %v5737_v7  ;;  %v5974_v62 = vld [vmem:[#allocation3 + $0x59] sm:$0x1]  ;;  %v6215_v26 = vsel %vm6213_vm0, 1, %v8615_v17 }
0x11eb   : > { %v5761_v59 = vsub.f32 %v5759_v57, %v5747_v45  ;;  %v5975_v37 = vld [vmem:[#allocation3 + $0x79] sm:$0x1] }
0x11ec   : > { %v5764_v55 = vmul.f32 1.442695, %v5753_v38  ;;  %v6054_v38 = vrot.slane %v5974_v62, 6  ;;  %v5976_v57 = vld [vmem:[#allocation3 + $0x99] sm:$0x1] }
0x11ed   : > { %v5770_v13 = vmul.f32 1.442695, %v5761_v59  ;;  %v5972_v59 = vld [vmem:[#allocation3 + $0x19] sm:$0x1]  ;;  %v5857_v62 = vld [vmem:[#allocation3 + $0x1b8] sm:$0x1] }
0x11ee   : > { %8284 = vpow2.f32 %v5764_v55 }
0x11ef   : > { %8286 = vpow2.f32 %v5770_v13  ;;  %v6056_v13 = vrot.slane %v5975_v37, 5  ;;  %v5858_v37 = vld [vmem:[#allocation3 + $0x1d8] sm:$0x1] }
0x11f4   : > { %v5838_v60 = vpop.permute.xlu0 %5837 }
0x11f5   : > { %vm5840_vm3 = vcmp.eq.s32.totalorder %v5838_v60, 1 }
0x11f8   : > { %v8285_v58 = vpop.eup %8284 }
0x11f9   : > { %v8287_v51 = vpop.eup %8286  ;;  %v5767_v39 = vadd.f32 1.0, %v8285_v58  ;;  %v5977_v58 = vld [vmem:[#allocation3 + $0xb9] sm:$0x1] }
0x11fb   : > { %v5773_v6 = vadd.f32 %v8287_v51, %v5767_v39  ;;  %v6058_v51 = vrot.slane %v5976_v57, 4  ;;  %v5978_v39 = vld [vmem:[#allocation3 + $0xd9] sm:$0x1]  ;;  %v5946_v57 = vrot.slane %v5857_v62, 3 }
0x11fc   : > { %v6062_v25 = vrot.slane %v5978_v39, 2 }
0x11fd   : > { %8288 = vlog2.f32 %v5773_v6  ;;  %v6060_v6 = vrot.slane %v5977_v58, 3 }
0x1207   : > { %v8289_v27 = vpop.eup %8288 }
0x1208   : > { %v5777_v48 = vmul.f32 0.6931472, %v8289_v27 }
0x120a   : > { %v5779_v63 = vadd.f32 %v5777_v48, %v5747_v45  ;;  %v6052_v45 = vrot.slane %v5973_v47, 7  ;;  %v10309_v48 = vld [vmem:[#allocation9 + $0x8] sm:$0xff]  ;;  %v5852_v47 = vld [vmem:[#allocation3 + $0x118] sm:$0x1] }
0x120c   : > { %v5827_v32 = vadd.f32 %v5823_v28, %v5779_v63  ;;  %v6053_v55 = vsel %vm2698_vm5, %v6052_v45, %v5972_v59  ;;  %v5859_v59 = vld [vmem:[#allocation3 + $0x1f8] sm:$0x1] }
0x120d   : > { %v6055_v40 = vsel %vm2701_vm6, %v6054_v38, %v6053_v55 }
0x120e   : > { %v10264_v16 = vsel %vm5840_vm3, %v5827_v32, %v10217_v42  ;;  %v6057_v11 = vsel %vm2704_vm7, %v6056_v13, %v6055_v40  ;;  %v5948_v13 = vrot.slane %v5858_v37, 2 }
0x120f   : > { %5862 = vrot.lane.b32.xlu0 %v10264_v16, %s8614_s12  ;;  %v6059_v23 = vsel %vm2707_vm8, %v6058_v51, %v6057_v11  ;;  %v5950_v51 = vrot.slane %v5859_v59, 1 }
0x1210   : > { %v6061_v5 = vsel %vm2710_vm9, %v6060_v6, %v6059_v23 }
0x1211   : > { %v6063_v44 = vsel %vm2713_vm10, %v6062_v25, %v6061_v5 }
0x1212   : > { %v6065_v22 = vsel %vm2716_vm11, %v6064_v9, %v6063_v44 }
0x1213   : > { %5868 = vrot.lane.b32.xlu0 %v10264_v16, %s8613_s10 }
0x1217   : > { %5965 = vperm.xlu0 %7834, %v5960_v14  }
0x1223   : > { %v5989_v0 = vpop.permute.xlu1 %5988 }
0x1224   : > { %v5992_v30 = vadd.f32 %v10175_v8, %v5989_v0 }
0x1227   : > { %v5995_v46 = vpop.permute.xlu1 %5994 }
0x1228   : > { %v5998_v35 = vadd.f32 %v10178_v41, %v5995_v46 }
0x122a   : > { %v6000_v42 = vmax.f32 %v5992_v30, %v5998_v35  ;;  %vm6010_vm14 = vcmp.ge.f32.partialorder %v5992_v30, %v5998_v35 }
0x122c   : > { %v6002_v54 = vmax.f32 %v10240_v29, %v6000_v42  ;;  %vm6004_vm13 = vcmp.ge.f32.partialorder %v10240_v29, %v6000_v42  ;;  %v5853_v42 = vld [vmem:[#allocation3 + $0x138] sm:$0x1] }
0x122d   : > { %v6006_v50 = vsel %vm6004_vm13, %v5992_v30, %v10240_v29  ;;  %vm6012_vm15 = vmor %vm6004_vm13, %vm6010_vm14  ;;  %vm6086_vm13 = vcmp.lt.s32.totalorder %v10242_v19, %v10165_v53 }
0x122e   : > { %v6008_v20 = vsub.f32 %v6006_v50, %v6002_v54  ;;  %v6014_v1 = vsel %vm6012_vm15, %v5998_v35, %v5992_v30  ;;  %v6088_v5 = vsel %vm6086_vm13, 1, %v8615_v17 }
0x122f   : > { %v6016_v56 = vsub.f32 %v6014_v1, %v6002_v54 }
0x1230   : > { %v6018_v43 = vmul.f32 1.442695, %v6008_v20  ;;  %v5854_v20 = vld [vmem:[#allocation3 + $0x158] sm:$0x1] }
0x1231   : > { %v6024_v33 = vmul.f32 1.442695, %v6016_v56  ;;  %v5938_v56 = vrot.slane %v5853_v42, 7 }
0x1232   : > { %8290 = vpow2.f32 %v6018_v43  ;;  %v5855_v43 = vld [vmem:[#allocation3 + $0x178] sm:$0x1] }
0x1233   : > { %8292 = vpow2.f32 %v6024_v33  ;;  %v5940_v33 = vrot.slane %v5854_v20, 6 }
0x1238   : > { %v6091_v61 = vpop.permute.xlu1 %6090 }
0x1239   : > { %vm6095_vm12 = vcmp.eq.s32.totalorder %v6091_v61, 1 }
0x123c   : > { %v8291_v15 = vpop.eup %8290 }
0x123d   : > { %v8293_v4 = vpop.eup %8292  ;;  %v6022_v7 = vadd.f32 1.0, %v8291_v15  ;;  %v5856_v15 = vld [vmem:[#allocation3 + $0x198] sm:$0x1] }
0x123e   : > { %v5944_v45 = vrot.slane %v5856_v15, 4  ;;  %v6107_v15 = vld [vmem:[#allocation3 + $0xfa] sm:$0x1] }
0x123f   : > { %v6028_v3 = vadd.f32 %v8293_v4, %v6022_v7  ;;  %v5939_v4 = vsel %vm2698_vm5, %v5938_v56, %v5852_v47  ;;  %v5942_v7 = vrot.slane %v5855_v43, 5  ;;  %v6106_v56 = vld [vmem:[#allocation3 + $0xda] sm:$0x1] }
0x1241   : > { %8294 = vlog2.f32 %v6028_v3  ;;  %v5941_v3 = vsel %vm2701_vm6, %v5940_v33, %v5939_v4  ;;  %v6190_v4 = vrot.slane %v6106_v56, 2 }
0x1242   : > { %v5943_v38 = vsel %vm2704_vm7, %v5942_v7, %v5941_v3  ;;  %v6192_v3 = vrot.slane %v6107_v15, 1 }
0x1243   : > { %v5945_v55 = vsel %vm2707_vm8, %v5944_v45, %v5943_v38 }
0x1244   : > { %v5947_v40 = vsel %vm2710_vm9, %v5946_v57, %v5945_v55 }
0x1245   : > { %v5949_v11 = vsel %vm2713_vm10, %v5948_v13, %v5947_v40 }
0x1246   : > { %v5951_v23 = vsel %vm2716_vm11, %v5950_v51, %v5949_v11 }
0x124b   : > { %v8295_v2 = vpop.eup %8294 }
0x124c   : > { %v6031_v10 = vmul.f32 0.6931472, %v8295_v2 }
0x124e   : > { %v6034_v12 = vadd.f32 %v6031_v10, %v6002_v54 }
0x1250   : > { %v6082_v34 = vadd.f32 %v6065_v22, %v6034_v12 }
0x1252   : > { %v10287_v21 = vsel %vm6095_vm12, %v6082_v34, %v10240_v29 }
0x1253   : > { %6116 = vrot.lane.b32.xlu1 %v10287_v21, %s8614_s12 }
0x1257   : > { %6122 = vrot.lane.b32.xlu1 %v10287_v21, %s8613_s10 }
0x125b   : > { %6218 = vperm.xlu1 %7835, %v6215_v26  }
0x1281   : > { %v5863_v29 = vpop.permute.xlu0 %5862 }
0x1282   : > { %v5865_v31 = vadd.f32 %v10306_v49, %v5863_v29 }
0x1285   : > { %v5869_v27 = vpop.permute.xlu0 %5868 }
0x1286   : > { %v5871_v36 = vadd.f32 %v10309_v48, %v5869_v27 }
0x1288   : > { %v5873_v63 = vmax.f32 %v5865_v31, %v5871_v36  ;;  %vm5883_vm2 = vcmp.ge.f32.partialorder %v5865_v31, %v5871_v36 }
0x128a   : > { %v5875_v60 = vmax.f32 %v10264_v16, %v5873_v63  ;;  %vm5877_vm1 = vcmp.ge.f32.partialorder %v10264_v16, %v5873_v63 }
0x128b   : > { %v5879_v28 = vsel %vm5877_vm1, %v5865_v31, %v10264_v16  ;;  %vm5885_vm3 = vmor %vm5877_vm1, %vm5883_vm2 }
0x128c   : > { %v5881_v32 = vsub.f32 %v5879_v28, %v5875_v60  ;;  %v5887_v14 = vsel %vm5885_vm3, %v5871_v36, %v5865_v31  ;;  %v6101_v36 = vld [vmem:[#allocation3 + $0x3a] sm:$0x1] }
0x128d   : > { %v5889_v0 = vsub.f32 %v5887_v14, %v5875_v60  ;;  %v6102_v28 = vld [vmem:[#allocation3 + $0x5a] sm:$0x1]  ;;  %v6180_v14 = vrot.slane %v6101_v36, 7  ;;  %v5980_v36 = vld [vmem:[#allocation3 + $0x119] sm:$0x1] }
0x128e   : > { %v5892_v46 = vmul.f32 1.442695, %v5881_v32 }
0x128f   : > { %v5898_v30 = vmul.f32 1.442695, %v5889_v0  ;;  %v6103_v0 = vld [vmem:[#allocation3 + $0x7a] sm:$0x1] }
0x1290   : > { %8296 = vpow2.f32 %v5892_v46  ;;  %v6182_v46 = vrot.slane %v6102_v28, 6  ;;  %v5985_v28 = vld [vmem:[#allocation3 + $0x1b9] sm:$0x1] }
0x1291   : > { %8298 = vpow2.f32 %v5898_v30  ;;  %v6104_v30 = vld [vmem:[#allocation3 + $0x9a] sm:$0x1] }
0x1296   : > { %v5966_v18 = vpop.permute.xlu0 %5965 }
0x1297   : > { %vm5968_vm4 = vcmp.eq.s32.totalorder %v5966_v18, 1 }
0x129a   : > { %v8297_v35 = vpop.eup %8296 }
0x129b   : > { %v8299_v54 = vpop.eup %8298  ;;  %v5895_v50 = vadd.f32 1.0, %v8297_v35  ;;  %v6100_v35 = vld [vmem:[#allocation3 + $0x1a] sm:$0x1] }
0x129c   : > { %v6181_v42 = vsel %vm2698_vm5, %v6180_v14, %v6100_v35  ;;  %v5987_v35 = vld [vmem:[#allocation3 + $0x1f9] sm:$0x1] }
0x129d   : > { %v5901_v1 = vadd.f32 %v8299_v54, %v5895_v50  ;;  %v6184_v54 = vrot.slane %v6103_v0, 5  ;;  %v6105_v50 = vld [vmem:[#allocation3 + $0xba] sm:$0x1]  ;;  %v6183_v20 = vsel %vm2701_vm6, %v6182_v46, %v6181_v42  ;;  %v5986_v0 = vld [vmem:[#allocation3 + $0x1d9] sm:$0x1] }
0x129e   : > { %v6188_v33 = vrot.slane %v6105_v50, 3 }
0x129f   : > { %8300 = vlog2.f32 %v5901_v1  ;;  %v6186_v1 = vrot.slane %v6104_v30, 4  ;;  %v6185_v43 = vsel %vm2704_vm7, %v6184_v54, %v6183_v20  ;;  %v6074_v30 = vrot.slane %v5985_v28, 3 }
0x12a0   : > { %v6076_v54 = vrot.slane %v5986_v0, 2 }
0x12a1   : > { %v6187_v47 = vsel %vm2707_vm8, %v6186_v1, %v6185_v43  ;;  %v6078_v1 = vrot.slane %v5987_v35, 1  ;;  %v10395_v35 = vstv %s6355_s9 }
0x12a2   : > { %v6189_v62 = vsel %vm2710_vm9, %v6188_v33, %v6187_v47 }
0x12a3   : > { %v6191_v37 = vsel %vm2713_vm10, %v6190_v4, %v6189_v62 }
0x12a4   : > { %v6193_v59 = vsel %vm2716_vm11, %v6192_v3, %v6191_v37 }
0x12a9   : > { %v8301_v58 = vpop.eup %8300 }
0x12aa   : > { %v5905_v39 = vmul.f32 0.6931472, %v8301_v58  ;;  %v10348_v58 = vstv %s6227_s18 }
0x12ab   : > { %vm6341_vm1 = vcmp.lt.s32.totalorder %v10348_v58, %v10296_v52 }
0x12ac   : > { %v5907_v6 = vadd.f32 %v5905_v39, %v5875_v60  ;;  %v6343_v40 = vsel %vm6341_vm1, 1, %v8615_v17 }
0x12ae   : > { %v5955_v25 = vadd.f32 %v5951_v23, %v5907_v6 }
0x12b0   : > { %v10323_v2 = vsel %vm5968_vm4, %v5955_v25, %v10264_v16 }
0x12b1   : > { %5990 = vrot.lane.b32.xlu0 %v10323_v2, %s8614_s12 }
0x12b5   : > { %5996 = vrot.lane.b32.xlu0 %v10323_v2, %s8613_s10 }
0x12b9   : > { %6093 = vperm.xlu0 %7834, %v6088_v5  }
0x12c5   : > { %v6117_v9 = vpop.permute.xlu1 %6116 }
0x12c6   : > { %v6120_v44 = vadd.f32 %v10175_v8, %v6117_v9 }
0x12c9   : > { %v6123_v10 = vpop.permute.xlu1 %6122 }
0x12ca   : > { %v6126_v12 = vadd.f32 %v10178_v41, %v6123_v10 }
0x12cc   : > { %v6128_v16 = vmax.f32 %v6120_v44, %v6126_v12  ;;  %vm6138_vm15 = vcmp.ge.f32.partialorder %v6120_v44, %v6126_v12 }
0x12ce   : > { %v6130_v61 = vmax.f32 %v10287_v21, %v6128_v16  ;;  %vm6132_vm14 = vcmp.ge.f32.partialorder %v10287_v21, %v6128_v16  ;;  %v5981_v16 = vld [vmem:[#allocation3 + $0x139] sm:$0x1] }
0x12cf   : > { %v6134_v19 = vsel %vm6132_vm14, %v6120_v44, %v10287_v21  ;;  %vm6140_vm12 = vmor %vm6132_vm14, %vm6138_vm15  ;;  %vm6214_vm14 = vcmp.lt.s32.totalorder %v10289_v24, %v10165_v53 }
0x12d0   : > { %v6136_v22 = vsub.f32 %v6134_v19, %v6130_v61  ;;  %v6142_v34 = vsel %vm6140_vm12, %v6126_v12, %v6120_v44  ;;  %v6216_v62 = vsel %vm6214_vm14, 1, %v8615_v17 }
0x12d1   : > { %v6144_v26 = vsub.f32 %v6142_v34, %v6130_v61 }
0x12d2   : > { %v6146_v29 = vmul.f32 1.442695, %v6136_v22  ;;  %v5982_v22 = vld [vmem:[#allocation3 + $0x159] sm:$0x1] }
0x12d3   : > { %v6152_v27 = vmul.f32 1.442695, %v6144_v26  ;;  %v6066_v26 = vrot.slane %v5981_v16, 7 }
0x12d4   : > { %8302 = vpow2.f32 %v6146_v29  ;;  %v5983_v29 = vld [vmem:[#allocation3 + $0x179] sm:$0x1] }
0x12d5   : > { %8304 = vpow2.f32 %v6152_v27  ;;  %v6068_v27 = vrot.slane %v5982_v22, 6 }
0x12da   : > { %v6219_v57 = vpop.permute.xlu1 %6218 }
0x12db   : > { %vm6223_vm0 = vcmp.eq.s32.totalorder %v6219_v57, 1 }
0x12de   : > { %v8303_v31 = vpop.eup %8302 }
0x12df   : > { %v8305_v63 = vpop.eup %8304  ;;  %v6150_v60 = vadd.f32 1.0, %v8303_v31  ;;  %v5984_v31 = vld [vmem:[#allocation3 + $0x199] sm:$0x1] }
0x12e0   : > { %v6072_v14 = vrot.slane %v5984_v31, 4 }
0x12e1   : > { %v6156_v32 = vadd.f32 %v8305_v63, %v6150_v60  ;;  %v6067_v63 = vsel %vm2698_vm5, %v6066_v26, %v5980_v36  ;;  %v6070_v60 = vrot.slane %v5983_v29, 5  ;;  %v6235_v26 = vld [vmem:[#allocation3 + $0xfb] sm:$0x1] }
0x12e3   : > { %8306 = vlog2.f32 %v6156_v32  ;;  %v6069_v32 = vsel %vm2701_vm6, %v6068_v27, %v6067_v63  ;;  %v6320_v63 = vrot.slane %v6235_v26, 1 }
0x12e4   : > { %v6071_v46 = vsel %vm2704_vm7, %v6070_v60, %v6069_v32 }
0x12e5   : > { %v6073_v42 = vsel %vm2707_vm8, %v6072_v14, %v6071_v46 }
0x12e6   : > { %v6075_v20 = vsel %vm2710_vm9, %v6074_v30, %v6073_v42 }
0x12e7   : > { %v6077_v43 = vsel %vm2713_vm10, %v6076_v54, %v6075_v20 }
0x12e8   : > { %v6079_v47 = vsel %vm2716_vm11, %v6078_v1, %v6077_v43 }
0x12ed   : > { %v8307_v7 = vpop.eup %8306 }
0x12ee   : > { %v6159_v45 = vmul.f32 0.6931472, %v8307_v7 }
0x12f0   : > { %v6162_v38 = vadd.f32 %v6159_v45, %v6130_v61 }
0x12f2   : > { %v6210_v55 = vadd.f32 %v6193_v59, %v6162_v38 }
0x12f4   : > { %v10346_v13 = vsel %vm6223_vm0, %v6210_v55, %v10287_v21 }
0x12f5   : > { %6244 = vrot.lane.b32.xlu1 %v10346_v13, %s8614_s12 }
0x12f9   : > { %6250 = vrot.lane.b32.xlu1 %v10346_v13, %s8613_s10 }
0x12fd   : > { %6346 = vperm.xlu1 %7835, %v6343_v40  }
0x1323   : > { %v5991_v51 = vpop.permute.xlu0 %5990 }
0x1324   : > { %v5993_v11 = vadd.f32 %v10306_v49, %v5991_v51 }
0x1327   : > { %v5997_v39 = vpop.permute.xlu0 %5996 }
0x1328   : > { %v5999_v21 = vadd.f32 %v10309_v48, %v5997_v39 }
0x132a   : > { %v6001_v6 = vmax.f32 %v5993_v11, %v5999_v21  ;;  %vm6011_vm3 = vcmp.ge.f32.partialorder %v5993_v11, %v5999_v21 }
0x132c   : > { %v6003_v18 = vmax.f32 %v10323_v2, %v6001_v6  ;;  %vm6005_vm2 = vcmp.ge.f32.partialorder %v10323_v2, %v6001_v6 }
0x132d   : > { %v6007_v23 = vsel %vm6005_vm2, %v5993_v11, %v10323_v2  ;;  %vm6013_vm4 = vmor %vm6005_vm2, %vm6011_vm3  ;;  %vm6469_vm2 = vcmp.lt.s32.totalorder %v10395_v35, %v10296_v52 }
0x132e   : > { %v6009_v25 = vsub.f32 %v6007_v23, %v6003_v18  ;;  %v6015_v5 = vsel %vm6013_vm4, %v5999_v21, %v5993_v11  ;;  %v6230_v21 = vld [vmem:[#allocation3 + $0x5b] sm:$0x1]  ;;  %v6471_v42 = vsel %vm6469_vm2, 1, %v8615_v17 }
0x132f   : > { %v6017_v9 = vsub.f32 %v6015_v5, %v6003_v18  ;;  %v6231_v23 = vld [vmem:[#allocation3 + $0x7b] sm:$0x1] }
0x1330   : > { %v6020_v10 = vmul.f32 1.442695, %v6009_v25  ;;  %v6310_v25 = vrot.slane %v6230_v21, 6  ;;  %v6232_v5 = vld [vmem:[#allocation3 + $0x9b] sm:$0x1] }
0x1331   : > { %v6026_v44 = vmul.f32 1.442695, %v6017_v9  ;;  %v6228_v9 = vld [vmem:[#allocation3 + $0x1b] sm:$0x1]  ;;  %v6114_v21 = vld [vmem:[#allocation3 + $0x1da] sm:$0x1] }
0x1332   : > { %8308 = vpow2.f32 %v6020_v10 }
0x1333   : > { %8310 = vpow2.f32 %v6026_v44  ;;  %v6312_v44 = vrot.slane %v6231_v23, 5  ;;  %v6115_v23 = vld [vmem:[#allocation3 + $0x1fa] sm:$0x1] }
0x1338   : > { %v6094_v15 = vpop.permute.xlu0 %6093 }
0x1339   : > { %vm6096_vm13 = vcmp.eq.s32.totalorder %v6094_v15, 1 }
0x133c   : > { %v8309_v12 = vpop.eup %8308 }
0x133d   : > { %v8311_v61 = vpop.eup %8310  ;;  %v6023_v19 = vadd.f32 1.0, %v8309_v12  ;;  %v6233_v12 = vld [vmem:[#allocation3 + $0xbb] sm:$0x1] }
0x133f   : > { %v6029_v34 = vadd.f32 %v8311_v61, %v6023_v19  ;;  %v6314_v61 = vrot.slane %v6232_v5, 4  ;;  %v6234_v19 = vld [vmem:[#allocation3 + $0xdb] sm:$0x1]  ;;  %v6204_v5 = vrot.slane %v6114_v21, 2 }
0x1340   : > { %v6318_v27 = vrot.slane %v6234_v19, 2 }
0x1341   : > { %8312 = vlog2.f32 %v6029_v34  ;;  %v6316_v34 = vrot.slane %v6233_v12, 3 }
0x134b   : > { %v8313_v50 = vpop.eup %8312 }
0x134c   : > { %v6033_v56 = vmul.f32 0.6931472, %v8313_v50 }
0x134e   : > { %v6035_v33 = vadd.f32 %v6033_v56, %v6003_v18 }
0x1350   : > { %v6083_v4 = vadd.f32 %v6079_v47, %v6035_v33 }
0x1352   : > { %v10370_v7 = vsel %vm6096_vm13, %v6083_v4, %v10323_v2 }
0x1353   : > { %6118 = vrot.lane.b32.xlu0 %v10370_v7, %s8614_s12 }
0x1357   : > { %6124 = vrot.lane.b32.xlu0 %v10370_v7, %s8613_s10 }
0x135b   : > { %6221 = vperm.xlu0 %7834, %v6216_v62  }
0x1367   : > { %v6245_v3 = vpop.permute.xlu1 %6244 }
0x1368   : > { %v6248_v37 = vadd.f32 %v10175_v8, %v6245_v3  ;;  %v6229_v8 = vld [vmem:[#allocation3 + $0x3b] sm:$0x1] }
0x1369   : > { %v6308_v18 = vrot.slane %v6229_v8, 7  ;;  %v6113_v8 = vld [vmem:[#allocation3 + $0x1ba] sm:$0x1] }
0x136b   : > { %v6251_v45 = vpop.permute.xlu1 %6250  ;;  %v6309_v10 = vsel %vm2698_vm5, %v6308_v18, %v6228_v9  ;;  %v6202_v18 = vrot.slane %v6113_v8, 3 }
0x136c   : > { %v6254_v38 = vadd.f32 %v10178_v41, %v6251_v45  ;;  %v6311_v16 = vsel %vm2701_vm6, %v6310_v25, %v6309_v10  ;;  %v6109_v45 = vld [vmem:[#allocation3 + $0x13a] sm:$0x1] }
0x136d   : > { %v6313_v22 = vsel %vm2704_vm7, %v6312_v44, %v6311_v16  ;;  %v6206_v44 = vrot.slane %v6115_v23, 1 }
0x136e   : > { %v6256_v2 = vmax.f32 %v6248_v37, %v6254_v38  ;;  %vm6266_vm12 = vcmp.ge.f32.partialorder %v6248_v37, %v6254_v38  ;;  %v6315_v29 = vsel %vm2707_vm8, %v6314_v61, %v6313_v22 }
0x136f   : > { %v6317_v36 = vsel %vm2710_vm9, %v6316_v34, %v6315_v29  ;;  %v10424_v29 = vld [vmem:[%s10685_s6 + $0x8] sm:$0xff] }
0x1370   : > { %v6258_v57 = vmax.f32 %v10346_v13, %v6256_v2  ;;  %vm6260_vm15 = vcmp.ge.f32.partialorder %v10346_v13, %v6256_v2  ;;  %v6319_v28 = vsel %vm2713_vm10, %v6318_v27, %v6317_v36  ;;  %v6110_v2 = vld [vmem:[#allocation3 + $0x15a] sm:$0x1]  ;;  %v10434_v36 = vld [vmem:[%s10681_s2] sm:$0xff] }
0x1371   : > { %v6262_v53 = vsel %vm6260_vm15, %v6248_v37, %v10346_v13  ;;  %vm6268_vm0 = vmor %vm6260_vm15, %vm6266_vm12  ;;  %v6321_v0 = vsel %vm2716_vm11, %v6320_v63, %v6319_v28  ;;  %vm6342_vm15 = vcmp.lt.s32.totalorder %v10348_v58, %v10424_v29 }
0x1372   : > { %v6264_v24 = vsub.f32 %v6262_v53, %v6258_v57  ;;  %v6270_v59 = vsel %vm6268_vm0, %v6254_v38, %v6248_v37  ;;  %v6194_v53 = vrot.slane %v6109_v45, 7  ;;  %v6344_v27 = vsel %vm6342_vm15, 1, %v8615_v17 }
0x1373   : > { %v6272_v55 = vsub.f32 %v6270_v59, %v6258_v57  ;;  %v6196_v59 = vrot.slane %v6110_v2, 6 }
0x1374   : > { %v6274_v40 = vmul.f32 1.442695, %v6264_v24  ;;  %v6111_v24 = vld [vmem:[#allocation3 + $0x17a] sm:$0x1] }
0x1375   : > { %v6280_v51 = vmul.f32 1.442695, %v6272_v55  ;;  %v6112_v55 = vld [vmem:[#allocation3 + $0x19a] sm:$0x1] }
0x1376   : > { %8314 = vpow2.f32 %v6274_v40  ;;  %v6108_v40 = vld [vmem:[#allocation3 + $0x11a] sm:$0x1] }
0x1377   : > { %8316 = vpow2.f32 %v6280_v51  ;;  %v6195_v51 = vsel %vm2698_vm5, %v6194_v53, %v6108_v40  ;;  %v6362_v53 = vld [vmem:[#allocation3 + $0xdc] sm:$0x1] }
0x137c   : > { %v6347_v14 = vpop.permute.xlu1 %6346 }
0x137d   : > { %vm6351_vm1 = vcmp.eq.s32.totalorder %v6347_v14, 1 }
0x1380   : > { %v8315_v39 = vpop.eup %8314 }
0x1381   : > { %v8317_v11 = vpop.eup %8316  ;;  %v6278_v41 = vadd.f32 1.0, %v8315_v39  ;;  %v6198_v39 = vrot.slane %v6111_v24, 5 }
0x1383   : > { %v6284_v6 = vadd.f32 %v8317_v11, %v6278_v41  ;;  %v6197_v11 = vsel %vm2701_vm6, %v6196_v59, %v6195_v51  ;;  %v6200_v41 = vrot.slane %v6112_v55, 4  ;;  %v6363_v55 = vld [vmem:[#allocation3 + $0xfc] sm:$0x1]  ;;  %v6446_v51 = vrot.slane %v6362_v53, 2 }
0x1385   : > { %8318 = vlog2.f32 %v6284_v6  ;;  %v6199_v6 = vsel %vm2704_vm7, %v6198_v39, %v6197_v11  ;;  %v6448_v11 = vrot.slane %v6363_v55, 1 }
0x1386   : > { %v6201_v25 = vsel %vm2707_vm8, %v6200_v41, %v6199_v6 }
0x1387   : > { %v6203_v10 = vsel %vm2710_vm9, %v6202_v18, %v6201_v25 }
0x1388   : > { %v6205_v16 = vsel %vm2713_vm10, %v6204_v5, %v6203_v10 }
0x1389   : > { %v6207_v22 = vsel %vm2716_vm11, %v6206_v44, %v6205_v16 }
0x138f   : > { %v8319_v31 = vpop.eup %8318 }
0x1390   : > { %v6287_v60 = vmul.f32 0.6931472, %v8319_v31 }
0x1392   : > { %v6290_v32 = vadd.f32 %v6287_v60, %v6258_v57  ;;  %v10437_v60 = vld [vmem:[#allocation9] sm:$0xff] }
0x1394   : > { %v6338_v46 = vadd.f32 %v6321_v0, %v6290_v32 }
0x1396   : > { %v10393_v30 = vsel %vm6351_vm1, %v6338_v46, %v10346_v13 }
0x1397   : > { %6372 = vrot.lane.b32.xlu1 %v10393_v30, %s8614_s12 }
0x139b   : > { %6378 = vrot.lane.b32.xlu1 %v10393_v30, %s8613_s10 }
0x139f   : > { %6474 = vperm.xlu1 %7835, %v6471_v42  }
0x13c5   : > { %v6119_v54 = vpop.permute.xlu0 %6118 }
0x13c6   : > { %v6121_v20 = vadd.f32 %v10306_v49, %v6119_v54 }
0x13c9   : > { %v6125_v50 = vpop.permute.xlu0 %6124 }
0x13ca   : > { %v6127_v13 = vadd.f32 %v10309_v48, %v6125_v50 }
0x13cc   : > { %v6129_v1 = vmax.f32 %v6121_v20, %v6127_v13  ;;  %vm6139_vm4 = vcmp.ge.f32.partialorder %v6121_v20, %v6127_v13 }
0x13ce   : > { %v6131_v56 = vmax.f32 %v10370_v7, %v6129_v1  ;;  %vm6133_vm3 = vcmp.ge.f32.partialorder %v10370_v7, %v6129_v1 }
0x13cf   : > { %v6135_v43 = vsel %vm6133_vm3, %v6121_v20, %v10370_v7  ;;  %vm6141_vm13 = vmor %vm6133_vm3, %vm6139_vm4 }
0x13d0   : > { %v6137_v33 = vsub.f32 %v6135_v43, %v6131_v56  ;;  %v6143_v15 = vsel %vm6141_vm13, %v6127_v13, %v6121_v20  ;;  %v6357_v13 = vld [vmem:[#allocation3 + $0x3c] sm:$0x1] }
0x13d1   : > { %v6145_v47 = vsub.f32 %v6143_v15, %v6131_v56  ;;  %v6358_v43 = vld [vmem:[#allocation3 + $0x5c] sm:$0x1]  ;;  %v6436_v15 = vrot.slane %v6357_v13, 7  ;;  %v6236_v13 = vld [vmem:[#allocation3 + $0x11b] sm:$0x1] }
0x13d2   : > { %v6148_v4 = vmul.f32 1.442695, %v6137_v33 }
0x13d3   : > { %v6154_v62 = vmul.f32 1.442695, %v6145_v47  ;;  %v6359_v47 = vld [vmem:[#allocation3 + $0x7c] sm:$0x1] }
0x13d4   : > { %8320 = vpow2.f32 %v6148_v4  ;;  %v6438_v4 = vrot.slane %v6358_v43, 6  ;;  %v6241_v43 = vld [vmem:[#allocation3 + $0x1bb] sm:$0x1] }
0x13d5   : > { %8322 = vpow2.f32 %v6154_v62  ;;  %v6360_v62 = vld [vmem:[#allocation3 + $0x9c] sm:$0x1] }
0x13da   : > { %v6222_v19 = vpop.permute.xlu0 %6221 }
0x13db   : > { %vm6224_vm14 = vcmp.eq.s32.totalorder %v6222_v19, 1 }
0x13de   : > { %v8321_v3 = vpop.eup %8320 }
0x13df   : > { %v8323_v37 = vpop.eup %8322  ;;  %v6151_v38 = vadd.f32 1.0, %v8321_v3  ;;  %v6356_v3 = vld [vmem:[#allocation3 + $0x1c] sm:$0x1] }
0x13e0   : > { %v6437_v45 = vsel %vm2698_vm5, %v6436_v15, %v6356_v3  ;;  %v6243_v3 = vld [vmem:[#allocation3 + $0x1fb] sm:$0x1] }
0x13e1   : > { %v6157_v57 = vadd.f32 %v8323_v37, %v6151_v38  ;;  %v6440_v37 = vrot.slane %v6359_v47, 5  ;;  %v6361_v38 = vld [vmem:[#allocation3 + $0xbc] sm:$0x1]  ;;  %v6439_v2 = vsel %vm2701_vm6, %v6438_v4, %v6437_v45  ;;  %v6242_v47 = vld [vmem:[#allocation3 + $0x1db] sm:$0x1] }
0x13e2   : > { %v6444_v59 = vrot.slane %v6361_v38, 3 }
0x13e3   : > { %8324 = vlog2.f32 %v6157_v57  ;;  %v6442_v57 = vrot.slane %v6360_v62, 4  ;;  %v6441_v24 = vsel %vm2704_vm7, %v6440_v37, %v6439_v2  ;;  %v6330_v62 = vrot.slane %v6241_v43, 3 }
0x13e4   : > { %v6332_v37 = vrot.slane %v6242_v47, 2 }
0x13e5   : > { %v6443_v40 = vsel %vm2707_vm8, %v6442_v57, %v6441_v24  ;;  %v6334_v57 = vrot.slane %v6243_v3, 1 }
0x13e6   : > { %v6445_v8 = vsel %vm2710_vm9, %v6444_v59, %v6443_v40 }
0x13e7   : > { %v6447_v21 = vsel %vm2713_vm10, %v6446_v51, %v6445_v8 }
0x13e8   : > { %v6449_v23 = vsel %vm2716_vm11, %v6448_v11, %v6447_v21 }
0x13ed   : > { %v8325_v9 = vpop.eup %8324 }
0x13ee   : > { %v6161_v12 = vmul.f32 0.6931472, %v8325_v9  ;;  %v10454_v9 = vstv %s6483_s8 }
0x13ef   : > { %vm6597_vm3 = vcmp.lt.s32.totalorder %v10454_v9, %v10296_v52 }
0x13f0   : > { %v6163_v61 = vadd.f32 %v6161_v12, %v6131_v56  ;;  %v6599_v10 = vsel %vm6597_vm3, 1, %v8615_v17 }
0x13f2   : > { %v6211_v34 = vadd.f32 %v6207_v22, %v6163_v61 }
0x13f4   : > { %v10417_v26 = vsel %vm6224_vm14, %v6211_v34, %v10370_v7 }
0x13f5   : > { %6246 = vrot.lane.b32.xlu0 %v10417_v26, %s8614_s12 }
0x13f9   : > { %6252 = vrot.lane.b32.xlu0 %v10417_v26, %s8613_s10 }
0x13fd   : > { %6349 = vperm.xlu0 %7834, %v6344_v27  }
0x1409   : > { %v6373_v31 = vpop.permute.xlu1 %6372 }
0x140a   : > { %v6376_v63 = vadd.f32 %v10434_v36, %v6373_v31 }
0x140d   : > { %v6379_v7 = vpop.permute.xlu1 %6378 }
0x140e   : > { %v6382_v28 = vadd.f32 %v10437_v60, %v6379_v7 }
0x1410   : > { %v6384_v58 = vmax.f32 %v6376_v63, %v6382_v28  ;;  %vm6394_vm0 = vcmp.ge.f32.partialorder %v6376_v63, %v6382_v28 }
0x1412   : > { %v6386_v32 = vmax.f32 %v10393_v30, %v6384_v58  ;;  %vm6388_vm12 = vcmp.ge.f32.partialorder %v10393_v30, %v6384_v58  ;;  %v6237_v58 = vld [vmem:[#allocation3 + $0x13b] sm:$0x1] }
0x1413   : > { %v6390_v14 = vsel %vm6388_vm12, %v6376_v63, %v10393_v30  ;;  %vm6396_vm1 = vmor %vm6388_vm12, %vm6394_vm0  ;;  %vm6470_vm12 = vcmp.lt.s32.totalorder %v10395_v35, %v10424_v29 }
0x1414   : > { %v6392_v0 = vsub.f32 %v6390_v14, %v6386_v32  ;;  %v6398_v46 = vsel %vm6396_vm1, %v6382_v28, %v6376_v63  ;;  %v6472_v8 = vsel %vm6470_vm12, 1, %v8615_v17 }
0x1415   : > { %v6400_v42 = vsub.f32 %v6398_v46, %v6386_v32 }
0x1416   : > { %v6402_v54 = vmul.f32 1.442695, %v6392_v0  ;;  %v6238_v0 = vld [vmem:[#allocation3 + $0x15b] sm:$0x1] }
0x1417   : > { %v6408_v50 = vmul.f32 1.442695, %v6400_v42  ;;  %v6322_v42 = vrot.slane %v6237_v58, 7 }
0x1418   : > { %8326 = vpow2.f32 %v6402_v54  ;;  %v6239_v54 = vld [vmem:[#allocation3 + $0x17b] sm:$0x1] }
0x1419   : > { %8328 = vpow2.f32 %v6408_v50  ;;  %v6324_v50 = vrot.slane %v6238_v0, 6 }
0x141e   : > { %v6475_v18 = vpop.permute.xlu1 %6474 }
0x141f   : > { %vm6479_vm2 = vcmp.eq.s32.totalorder %v6475_v18, 1 }
0x1422   : > { %v8327_v20 = vpop.eup %8326 }
0x1423   : > { %v8329_v1 = vpop.eup %8328  ;;  %v6406_v56 = vadd.f32 1.0, %v8327_v20  ;;  %v6240_v20 = vld [vmem:[#allocation3 + $0x19b] sm:$0x1] }
0x1424   : > { %v6328_v15 = vrot.slane %v6240_v20, 4  ;;  %v6491_v20 = vld [vmem:[#allocation3 + $0xfd] sm:$0x1] }
0x1425   : > { %v6412_v33 = vadd.f32 %v8329_v1, %v6406_v56  ;;  %v6323_v1 = vsel %vm2698_vm5, %v6322_v42, %v6236_v13  ;;  %v6326_v56 = vrot.slane %v6239_v54, 5  ;;  %v6490_v42 = vld [vmem:[#allocation3 + $0xdd] sm:$0x1] }
0x1427   : > { %8330 = vlog2.f32 %v6412_v33  ;;  %v6325_v33 = vsel %vm2701_vm6, %v6324_v50, %v6323_v1  ;;  %v6574_v1 = vrot.slane %v6490_v42, 2 }
0x1428   : > { %v6327_v4 = vsel %vm2704_vm7, %v6326_v56, %v6325_v33  ;;  %v6576_v33 = vrot.slane %v6491_v20, 1 }
0x1429   : > { %v6329_v45 = vsel %vm2707_vm8, %v6328_v15, %v6327_v4 }
0x142a   : > { %v6331_v2 = vsel %vm2710_vm9, %v6330_v62, %v6329_v45 }
0x142b   : > { %v6333_v24 = vsel %vm2713_vm10, %v6332_v37, %v6331_v2 }
0x142c   : > { %v6335_v40 = vsel %vm2716_vm11, %v6334_v57, %v6333_v24 }
0x1431   : > { %v8331_v39 = vpop.eup %8330 }
0x1432   : > { %v6415_v41 = vmul.f32 0.6931472, %v8331_v39 }
0x1434   : > { %v6418_v6 = vadd.f32 %v6415_v41, %v6386_v32 }
0x1436   : > { %v6466_v25 = vadd.f32 %v6449_v23, %v6418_v6 }
0x1438   : > { %v10452_v5 = vsel %vm6479_vm2, %v6466_v25, %v10393_v30 }
0x1439   : > { %6500 = vrot.lane.b32.xlu1 %v10452_v5, %s8614_s12 }
0x143d   : > { %6506 = vrot.lane.b32.xlu1 %v10452_v5, %s8613_s10 }
0x1441   : > { %6602 = vperm.xlu1 %7835, %v6599_v10  }
0x1467   : > { %v6247_v44 = vpop.permute.xlu0 %6246 }
0x1468   : > { %v6249_v16 = vadd.f32 %v10306_v49, %v6247_v44 }
0x146b   : > { %v6253_v12 = vpop.permute.xlu0 %6252 }
0x146c   : > { %v6255_v30 = vadd.f32 %v10309_v48, %v6253_v12 }
0x146e   : > { %v6257_v61 = vmax.f32 %v6249_v16, %v6255_v30  ;;  %vm6267_vm13 = vcmp.ge.f32.partialorder %v6249_v16, %v6255_v30 }
0x1470   : > { %v6259_v19 = vmax.f32 %v10417_v26, %v6257_v61  ;;  %vm6261_vm4 = vcmp.ge.f32.partialorder %v10417_v26, %v6257_v61 }
0x1471   : > { %v6263_v22 = vsel %vm6261_vm4, %v6249_v16, %v10417_v26  ;;  %vm6269_vm14 = vmor %vm6261_vm4, %vm6267_vm13 }
0x1472   : > { %v6265_v34 = vsub.f32 %v6263_v22, %v6259_v19  ;;  %v6271_v27 = vsel %vm6269_vm14, %v6255_v30, %v6249_v16  ;;  %v6485_v30 = vld [vmem:[#allocation3 + $0x3d] sm:$0x1] }
0x1473   : > { %v6273_v31 = vsub.f32 %v6271_v27, %v6259_v19  ;;  %v6486_v22 = vld [vmem:[#allocation3 + $0x5d] sm:$0x1]  ;;  %v6564_v27 = vrot.slane %v6485_v30, 7  ;;  %v6369_v30 = vld [vmem:[#allocation3 + $0x1bc] sm:$0x1] }
0x1474   : > { %v6276_v7 = vmul.f32 1.442695, %v6265_v34 }
0x1475   : > { %v6282_v63 = vmul.f32 1.442695, %v6273_v31  ;;  %v6487_v31 = vld [vmem:[#allocation3 + $0x7d] sm:$0x1] }
0x1476   : > { %8332 = vpow2.f32 %v6276_v7  ;;  %v6566_v7 = vrot.slane %v6486_v22, 6  ;;  %v6370_v22 = vld [vmem:[#allocation3 + $0x1dc] sm:$0x1] }
0x1477   : > { %8334 = vpow2.f32 %v6282_v63  ;;  %v6488_v63 = vld [vmem:[#allocation3 + $0x9d] sm:$0x1] }
0x147c   : > { %v6350_v55 = vpop.permute.xlu0 %6349 }
0x147d   : > { %vm6352_vm15 = vcmp.eq.s32.totalorder %v6350_v55, 1 }
0x1480   : > { %v8333_v28 = vpop.eup %8332 }
0x1481   : > { %v8335_v32 = vpop.eup %8334  ;;  %v6279_v14 = vadd.f32 1.0, %v8333_v28  ;;  %v6484_v28 = vld [vmem:[#allocation3 + $0x1d] sm:$0x1] }
0x1482   : > { %v6565_v58 = vsel %vm2698_vm5, %v6564_v27, %v6484_v28  ;;  %v6458_v27 = vrot.slane %v6369_v30, 3 }
0x1483   : > { %v6285_v46 = vadd.f32 %v8335_v32, %v6279_v14  ;;  %v6568_v32 = vrot.slane %v6487_v31, 5  ;;  %v6489_v14 = vld [vmem:[#allocation3 + $0xbd] sm:$0x1]  ;;  %v6567_v0 = vsel %vm2701_vm6, %v6566_v7, %v6565_v58  ;;  %v6371_v31 = vld [vmem:[#allocation3 + $0x1fc] sm:$0x1] }
0x1484   : > { %v6572_v50 = vrot.slane %v6489_v14, 3 }
0x1485   : > { %8336 = vlog2.f32 %v6285_v46  ;;  %v6570_v46 = vrot.slane %v6488_v63, 4  ;;  %v6569_v54 = vsel %vm2704_vm7, %v6568_v32, %v6567_v0  ;;  %v6460_v63 = vrot.slane %v6370_v22, 2 }
0x1486   : > { %v6462_v32 = vrot.slane %v6371_v31, 1  ;;  %v10548_v31 = vstv %s6739_s16 }
0x1487   : > { %v6571_v13 = vsel %vm2707_vm8, %v6570_v46, %v6569_v54 }
0x1488   : > { %v6573_v43 = vsel %vm2710_vm9, %v6572_v50, %v6571_v13 }
0x1489   : > { %v6575_v47 = vsel %vm2713_vm10, %v6574_v1, %v6573_v43 }
0x148a   : > { %v6577_v3 = vsel %vm2716_vm11, %v6576_v33, %v6575_v47 }
0x148f   : > { %v8337_v38 = vpop.eup %8336 }
0x1490   : > { %v6289_v53 = vmul.f32 0.6931472, %v8337_v38  ;;  %v10501_v38 = vstv %s6611_s7 }
0x1491   : > { %vm6725_vm4 = vcmp.lt.s32.totalorder %v10501_v38, %v10296_v52 }
0x1492   : > { %v6291_v59 = vadd.f32 %v6289_v53, %v6259_v19  ;;  %v6727_v2 = vsel %vm6725_vm4, 1, %v8615_v17 }
0x1494   : > { %v6339_v51 = vadd.f32 %v6335_v40, %v6291_v59 }
0x1496   : > { %v10476_v39 = vsel %vm6352_vm15, %v6339_v51, %v10417_v26 }
0x1497   : > { %6374 = vrot.lane.b32.xlu0 %v10476_v39, %s8614_s12 }
0x149b   : > { %6380 = vrot.lane.b32.xlu0 %v10476_v39, %s8613_s10 }
0x149f   : > { %6477 = vperm.xlu0 %7834, %v6472_v8  }
0x14ab   : > { %v6501_v11 = vpop.permute.xlu1 %6500 }
0x14ac   : > { %v6504_v21 = vadd.f32 %v10434_v36, %v6501_v11 }
0x14af   : > { %v6507_v41 = vpop.permute.xlu1 %6506 }
0x14b0   : > { %v6510_v6 = vadd.f32 %v10437_v60, %v6507_v41 }
0x14b2   : > { %v6512_v26 = vmax.f32 %v6504_v21, %v6510_v6  ;;  %vm6522_vm1 = vcmp.ge.f32.partialorder %v6504_v21, %v6510_v6 }
0x14b4   : > { %v6514_v18 = vmax.f32 %v10452_v5, %v6512_v26  ;;  %vm6516_vm0 = vcmp.ge.f32.partialorder %v10452_v5, %v6512_v26  ;;  %v6366_v26 = vld [vmem:[#allocation3 + $0x15c] sm:$0x1] }
0x14b5   : > { %v6518_v35 = vsel %vm6516_vm0, %v6504_v21, %v10452_v5  ;;  %vm6524_vm2 = vmor %vm6516_vm0, %vm6522_vm1  ;;  %vm6598_vm0 = vcmp.lt.s32.totalorder %v10454_v9, %v10424_v29 }
0x14b6   : > { %v6520_v23 = vsub.f32 %v6518_v35, %v6514_v18  ;;  %v6526_v25 = vsel %vm6524_vm2, %v6510_v6, %v6504_v21  ;;  %v6600_v13 = vsel %vm6598_vm0, 1, %v8615_v17 }
0x14b7   : > { %v6528_v10 = vsub.f32 %v6526_v25, %v6514_v18  ;;  %v6452_v25 = vrot.slane %v6366_v26, 6 }
0x14b8   : > { %v6530_v44 = vmul.f32 1.442695, %v6520_v23  ;;  %v6367_v23 = vld [vmem:[#allocation3 + $0x17c] sm:$0x1] }
0x14b9   : > { %v6536_v12 = vmul.f32 1.442695, %v6528_v10  ;;  %v6368_v10 = vld [vmem:[#allocation3 + $0x19c] sm:$0x1] }
0x14ba   : > { %8338 = vpow2.f32 %v6530_v44  ;;  %v6364_v44 = vld [vmem:[#allocation3 + $0x11c] sm:$0x1] }
0x14bb   : > { %8340 = vpow2.f32 %v6536_v12 }
0x14c0   : > { %v6603_v62 = vpop.permute.xlu1 %6602 }
0x14c1   : > { %vm6607_vm3 = vcmp.eq.s32.totalorder %v6603_v62, 1 }
0x14c4   : > { %v8339_v16 = vpop.eup %8338 }
0x14c5   : > { %v8341_v61 = vpop.eup %8340  ;;  %v6534_v19 = vadd.f32 1.0, %v8339_v16  ;;  %v6454_v16 = vrot.slane %v6367_v23, 5 }
0x14c7   : > { %v6540_v34 = vadd.f32 %v8341_v61, %v6534_v19  ;;  %v6456_v19 = vrot.slane %v6368_v10, 4 }
0x14c9   : > { %8342 = vlog2.f32 %v6540_v34 }
0x14d3   : > { %v8343_v56 = vpop.eup %8342 }
0x14d4   : > { %v6543_v15 = vmul.f32 0.6931472, %v8343_v56 }
0x14d6   : > { %v6546_v4 = vadd.f32 %v6543_v15, %v6514_v18 }
0x14d8   : > { %v6594_v45 = vadd.f32 %v6577_v3, %v6546_v4 }
0x14da   : > { %v10499_v37 = vsel %vm6607_vm3, %v6594_v45, %v10452_v5 }
0x14db   : > { %6628 = vrot.lane.b32.xlu1 %v10499_v37, %s8614_s12 }
0x14df   : > { %6634 = vrot.lane.b32.xlu1 %v10499_v37, %s8613_s10 }
0x14e3   : > { %6730 = vperm.xlu1 %7835, %v6727_v2  }
0x1509   : > { %v6375_v57 = vpop.permute.xlu0 %6374 }
0x150a   : > { %v6377_v24 = vadd.f32 %v10306_v49, %v6375_v57  ;;  %v6365_v49 = vld [vmem:[#allocation3 + $0x13c] sm:$0x1]  ;;  %v6613_v57 = vld [vmem:[#allocation3 + $0x3e] sm:$0x1] }
0x150b   : > { %v6450_v35 = vrot.slane %v6365_v49, 7 }
0x150d   : > { %v6381_v53 = vpop.permute.xlu0 %6380  ;;  %v6451_v12 = vsel %vm2698_vm5, %v6450_v35, %v6364_v44  ;;  %v6619_v35 = vld [vmem:[#allocation3 + $0xfe] sm:$0x1] }
0x150e   : > { %v6383_v5 = vadd.f32 %v10309_v48, %v6381_v53  ;;  %v6453_v61 = vsel %vm2701_vm6, %v6452_v25, %v6451_v12  ;;  %v6704_v12 = vrot.slane %v6619_v35, 1 }
0x150f   : > { %v6455_v34 = vsel %vm2704_vm7, %v6454_v16, %v6453_v61 }
0x1510   : > { %v6385_v59 = vmax.f32 %v6377_v24, %v6383_v5  ;;  %vm6395_vm14 = vcmp.ge.f32.partialorder %v6377_v24, %v6383_v5  ;;  %v6457_v7 = vsel %vm2707_vm8, %v6456_v19, %v6455_v34 }
0x1511   : > { %v6459_v58 = vsel %vm2710_vm9, %v6458_v27, %v6457_v7  ;;  %v8415_v7 = vld [vmem:[%s10685_s6] sm:$0xff] }
0x1512   : > { %v6387_v55 = vmax.f32 %v10476_v39, %v6385_v59  ;;  %vm6389_vm13 = vcmp.ge.f32.partialorder %v10476_v39, %v6385_v59  ;;  %v6461_v0 = vsel %vm2713_vm10, %v6460_v63, %v6459_v58  ;;  %v10562_v58 = vld [vmem:[%s10681_s2 + $0x8] sm:$0xff] }
0x1513   : > { %v6391_v52 = vsel %vm6389_vm13, %v6377_v24, %v10476_v39  ;;  %vm6397_vm15 = vmor %vm6389_vm13, %vm6395_vm14  ;;  %v6463_v54 = vsel %vm2716_vm11, %v6462_v32, %v6461_v0  ;;  %vm6853_vm13 = vcmp.lt.s32.totalorder %v10548_v31, %v8415_v7 }
0x1514   : > { %v6393_v40 = vsub.f32 %v6391_v52, %v6387_v55  ;;  %v6399_v51 = vsel %vm6397_vm15, %v6383_v5, %v6377_v24  ;;  %v6614_v5 = vld [vmem:[#allocation3 + $0x5e] sm:$0x1]  ;;  %v6855_v63 = vsel %vm6853_vm13, 1, %v8615_v17 }
0x1515   : > { %v6401_v8 = vsub.f32 %v6399_v51, %v6387_v55  ;;  %v6615_v52 = vld [vmem:[#allocation3 + $0x7e] sm:$0x1] }
0x1516   : > { %v6404_v11 = vmul.f32 1.442695, %v6393_v40  ;;  %v6694_v40 = vrot.slane %v6614_v5, 6  ;;  %v6616_v51 = vld [vmem:[#allocation3 + $0x9e] sm:$0x1] }
0x1517   : > { %v6410_v41 = vmul.f32 1.442695, %v6401_v8  ;;  %v6612_v8 = vld [vmem:[#allocation3 + $0x1e] sm:$0x1]  ;;  %v6497_v5 = vld [vmem:[#allocation3 + $0x1bd] sm:$0x1] }
0x1518   : > { %8344 = vpow2.f32 %v6404_v11 }
0x1519   : > { %8346 = vpow2.f32 %v6410_v41  ;;  %v6696_v41 = vrot.slane %v6615_v52, 5  ;;  %v6498_v52 = vld [vmem:[#allocation3 + $0x1dd] sm:$0x1] }
0x151e   : > { %v6478_v42 = vpop.permute.xlu0 %6477 }
0x151f   : > { %vm6480_vm12 = vcmp.eq.s32.totalorder %v6478_v42, 1 }
0x1522   : > { %v8345_v21 = vpop.eup %8344 }
0x1523   : > { %v8347_v6 = vpop.eup %8346  ;;  %v6407_v48 = vadd.f32 1.0, %v8345_v21  ;;  %v6617_v21 = vld [vmem:[#allocation3 + $0xbe] sm:$0x1] }
0x1525   : > { %v6413_v18 = vadd.f32 %v8347_v6, %v6407_v48  ;;  %v6698_v6 = vrot.slane %v6616_v51, 4  ;;  %v6618_v48 = vld [vmem:[#allocation3 + $0xde] sm:$0x1]  ;;  %v6586_v51 = vrot.slane %v6497_v5, 3 }
0x1526   : > { %v6702_v25 = vrot.slane %v6618_v48, 2 }
0x1527   : > { %8348 = vlog2.f32 %v6413_v18  ;;  %v6700_v18 = vrot.slane %v6617_v21, 3 }
0x1531   : > { %v8349_v28 = vpop.eup %8348 }
0x1532   : > { %v6417_v14 = vmul.f32 0.6931472, %v8349_v28 }
0x1534   : > { %v6419_v46 = vadd.f32 %v6417_v14, %v6387_v55  ;;  %v6692_v55 = vrot.slane %v6613_v57, 7  ;;  %v10565_v14 = vld [vmem:[#allocation9 + $0x8] sm:$0xff]  ;;  %v6492_v57 = vld [vmem:[#allocation3 + $0x11d] sm:$0x1] }
0x1536   : > { %v6467_v50 = vadd.f32 %v6463_v54, %v6419_v46  ;;  %v6693_v11 = vsel %vm2698_vm5, %v6692_v55, %v6612_v8  ;;  %v6499_v8 = vld [vmem:[#allocation3 + $0x1fd] sm:$0x1] }
0x1537   : > { %v6695_v49 = vsel %vm2701_vm6, %v6694_v40, %v6693_v11 }
0x1538   : > { %v10523_v20 = vsel %vm6480_vm12, %v6467_v50, %v10476_v39  ;;  %v6697_v26 = vsel %vm2704_vm7, %v6696_v41, %v6695_v49  ;;  %v6588_v41 = vrot.slane %v6498_v52, 2 }
0x1539   : > { %6502 = vrot.lane.b32.xlu0 %v10523_v20, %s8614_s12  ;;  %v6699_v23 = vsel %vm2707_vm8, %v6698_v6, %v6697_v26  ;;  %v6590_v6 = vrot.slane %v6499_v8, 1 }
0x153a   : > { %v6701_v44 = vsel %vm2710_vm9, %v6700_v18, %v6699_v23 }
0x153b   : > { %v6703_v30 = vsel %vm2713_vm10, %v6702_v25, %v6701_v44 }
0x153c   : > { %v6705_v22 = vsel %vm2716_vm11, %v6704_v12, %v6703_v30 }
0x153d   : > { %6508 = vrot.lane.b32.xlu0 %v10523_v20, %s8613_s10 }
0x1541   : > { %6605 = vperm.xlu0 %7834, %v6600_v13  }
0x154d   : > { %v6629_v1 = vpop.permute.xlu1 %6628 }
0x154e   : > { %v6632_v43 = vadd.f32 %v10434_v36, %v6629_v1 }
0x1551   : > { %v6635_v56 = vpop.permute.xlu1 %6634 }
0x1552   : > { %v6638_v33 = vadd.f32 %v10437_v60, %v6635_v56 }
0x1554   : > { %v6640_v39 = vmax.f32 %v6632_v43, %v6638_v33  ;;  %vm6650_vm2 = vcmp.ge.f32.partialorder %v6632_v43, %v6638_v33 }
0x1556   : > { %v6642_v15 = vmax.f32 %v10499_v37, %v6640_v39  ;;  %vm6644_vm1 = vcmp.ge.f32.partialorder %v10499_v37, %v6640_v39  ;;  %v6493_v39 = vld [vmem:[#allocation3 + $0x13d] sm:$0x1] }
0x1557   : > { %v6646_v9 = vsel %vm6644_vm1, %v6632_v43, %v10499_v37  ;;  %vm6652_vm3 = vmor %vm6644_vm1, %vm6650_vm2  ;;  %vm6726_vm1 = vcmp.lt.s32.totalorder %v10501_v38, %v10424_v29 }
0x1558   : > { %v6648_v47 = vsub.f32 %v6646_v9, %v6642_v15  ;;  %v6654_v4 = vsel %vm6652_vm3, %v6638_v33, %v6632_v43  ;;  %v6728_v44 = vsel %vm6726_vm1, 1, %v8615_v17  ;;  %vm6854_vm1 = vcmp.lt.s32.totalorder %v10548_v31, %v10424_v29 }
0x1559   : > { %v6656_v62 = vsub.f32 %v6654_v4, %v6642_v15 }
0x155a   : > { %v6658_v3 = vmul.f32 1.442695, %v6648_v47  ;;  %v6494_v47 = vld [vmem:[#allocation3 + $0x15d] sm:$0x1] }
0x155b   : > { %v6664_v45 = vmul.f32 1.442695, %v6656_v62  ;;  %v6578_v62 = vrot.slane %v6493_v39, 7 }
0x155c   : > { %8350 = vpow2.f32 %v6658_v3  ;;  %v6495_v3 = vld [vmem:[#allocation3 + $0x17d] sm:$0x1] }
0x155d   : > { %8352 = vpow2.f32 %v6664_v45  ;;  %v6580_v45 = vrot.slane %v6494_v47, 6 }
0x1562   : > { %v6731_v19 = vpop.permute.xlu1 %6730 }
0x1563   : > { %vm6735_vm4 = vcmp.eq.s32.totalorder %v6731_v19, 1 }
0x1566   : > { %v8351_v2 = vpop.eup %8350 }
0x1567   : > { %v8353_v53 = vpop.eup %8352  ;;  %v6662_v24 = vadd.f32 1.0, %v8351_v2  ;;  %v6496_v2 = vld [vmem:[#allocation3 + $0x19d] sm:$0x1] }
0x1568   : > { %v6584_v55 = vrot.slane %v6496_v2, 4 }
0x1569   : > { %v6668_v59 = vadd.f32 %v8353_v53, %v6662_v24  ;;  %v6579_v53 = vsel %vm2698_vm5, %v6578_v62, %v6492_v57  ;;  %v6582_v24 = vrot.slane %v6495_v3, 5  ;;  %v6747_v62 = vld [vmem:[#allocation3 + $0xff] sm:$0x1] }
0x156b   : > { %8354 = vlog2.f32 %v6668_v59  ;;  %v6581_v59 = vsel %vm2701_vm6, %v6580_v45, %v6579_v53  ;;  %v6832_v53 = vrot.slane %v6747_v62, 1 }
0x156c   : > { %v6583_v40 = vsel %vm2704_vm7, %v6582_v24, %v6581_v59 }
0x156d   : > { %v6585_v11 = vsel %vm2707_vm8, %v6584_v55, %v6583_v40 }
0x156e   : > { %v6587_v49 = vsel %vm2710_vm9, %v6586_v51, %v6585_v11 }
0x156f   : > { %v6589_v26 = vsel %vm2713_vm10, %v6588_v41, %v6587_v49 }
0x1570   : > { %v6591_v23 = vsel %vm2716_vm11, %v6590_v6, %v6589_v26 }
0x1575   : > { %v8355_v10 = vpop.eup %8354 }
0x1576   : > { %v6671_v16 = vmul.f32 0.6931472, %v8355_v10 }
0x1578   : > { %v6674_v61 = vadd.f32 %v6671_v16, %v6642_v15 }
0x157a   : > { %v6722_v34 = vadd.f32 %v6705_v22, %v6674_v61 }
0x157c   : > { %v10546_v27 = vsel %vm6735_vm4, %v6722_v34, %v10499_v37 }
0x157d   : > { %6756 = vrot.lane.b32.xlu1 %v10546_v27, %s8614_s12 }
0x1581   : > { %6762 = vrot.lane.b32.xlu1 %v10546_v27, %s8613_s10 }
0x1585   : > { %6858 = vperm.xlu1 %7835, %v6855_v63  }
0x15ab   : > { %v6503_v28 = vpop.permute.xlu0 %6502 }
0x15ac   : > { %v6505_v32 = vadd.f32 %v10562_v58, %v6503_v28 }
0x15af   : > { %v6509_v37 = vpop.permute.xlu0 %6508 }
0x15b0   : > { %v6511_v0 = vadd.f32 %v10565_v14, %v6509_v37 }
0x15b2   : > { %v6513_v46 = vmax.f32 %v6505_v32, %v6511_v0  ;;  %vm6523_vm15 = vcmp.ge.f32.partialorder %v6505_v32, %v6511_v0 }
0x15b4   : > { %v6515_v42 = vmax.f32 %v10523_v20, %v6513_v46  ;;  %vm6517_vm14 = vcmp.ge.f32.partialorder %v10523_v20, %v6513_v46 }
0x15b5   : > { %v6519_v54 = vsel %vm6517_vm14, %v6505_v32, %v10523_v20  ;;  %vm6525_vm12 = vmor %vm6517_vm14, %vm6523_vm15 }
0x15b6   : > { %v6521_v50 = vsub.f32 %v6519_v54, %v6515_v42  ;;  %v6527_v13 = vsel %vm6525_vm12, %v6511_v0, %v6505_v32  ;;  %v6742_v0 = vld [vmem:[#allocation3 + $0x5f] sm:$0x1] }
0x15b7   : > { %v6529_v1 = vsub.f32 %v6527_v13, %v6515_v42  ;;  %v6743_v54 = vld [vmem:[#allocation3 + $0x7f] sm:$0x1] }
0x15b8   : > { %v6532_v56 = vmul.f32 1.442695, %v6521_v50  ;;  %v6822_v50 = vrot.slane %v6742_v0, 6  ;;  %v6744_v13 = vld [vmem:[#allocation3 + $0x9f] sm:$0x1] }
0x15b9   : > { %v6538_v43 = vmul.f32 1.442695, %v6529_v1  ;;  %v6740_v1 = vld [vmem:[#allocation3 + $0x1f] sm:$0x1] }
0x15ba   : > { %8356 = vpow2.f32 %v6532_v56 }
0x15bb   : > { %8358 = vpow2.f32 %v6538_v43  ;;  %v6824_v43 = vrot.slane %v6743_v54, 5 }
0x15c0   : > { %v6606_v35 = vpop.permute.xlu0 %6605 }
0x15c1   : > { %vm6608_vm0 = vcmp.eq.s32.totalorder %v6606_v35, 1 }
0x15c4   : > { %v8357_v33 = vpop.eup %8356 }
0x15c5   : > { %v8359_v15 = vpop.eup %8358  ;;  %v6535_v9 = vadd.f32 1.0, %v8357_v33  ;;  %v6745_v33 = vld [vmem:[#allocation3 + $0xbf] sm:$0x1] }
0x15c7   : > { %v6541_v4 = vadd.f32 %v8359_v15, %v6535_v9  ;;  %v6826_v15 = vrot.slane %v6744_v13, 4  ;;  %v6746_v9 = vld [vmem:[#allocation3 + $0xdf] sm:$0x1] }
0x15c8   : > { %v6830_v45 = vrot.slane %v6746_v9, 2 }
0x15c9   : > { %8360 = vlog2.f32 %v6541_v4  ;;  %v6828_v4 = vrot.slane %v6745_v33, 3 }
0x15d3   : > { %v8361_v21 = vpop.eup %8360 }
0x15d4   : > { %v6545_v48 = vmul.f32 0.6931472, %v8361_v21 }
0x15d6   : > { %v6547_v18 = vadd.f32 %v6545_v48, %v6515_v42 }
0x15d8   : > { %v6595_v25 = vadd.f32 %v6591_v23, %v6547_v18 }
0x15da   : > { %v10579_v10 = vsel %vm6608_vm0, %v6595_v25, %v10523_v20 }
0x15db   : > { %6630 = vrot.lane.b32.xlu0 %v10579_v10, %s8614_s12 }
0x15df   : > { %6636 = vrot.lane.b32.xlu0 %v10579_v10, %s8613_s10 }
0x15e3   : > { %6733 = vperm.xlu0 %7834, %v6728_v44   ;;  %v6621_v44 = vld [vmem:[#allocation3 + $0x13e] sm:$0x1] }
0x15ef   : > { %v6757_v12 = vpop.permute.xlu1 %6756 }
0x15f0   : > { %v6760_v30 = vadd.f32 %v10434_v36, %v6757_v12  ;;  %v6741_v36 = vld [vmem:[#allocation3 + $0x3f] sm:$0x1] }
0x15f1   : > { %v6820_v42 = vrot.slane %v6741_v36, 7 }
0x15f3   : > { %v6763_v16 = vpop.permute.xlu1 %6762  ;;  %v6821_v56 = vsel %vm2698_vm5, %v6820_v42, %v6740_v1 }
0x15f4   : > { %v6766_v61 = vadd.f32 %v10437_v60, %v6763_v16  ;;  %v6823_v39 = vsel %vm2701_vm6, %v6822_v50, %v6821_v56 }
0x15f5   : > { %v6825_v47 = vsel %vm2704_vm7, %v6824_v43, %v6823_v39 }
0x15f6   : > { %v6768_v20 = vmax.f32 %v6760_v30, %v6766_v61  ;;  %vm6778_vm3 = vcmp.ge.f32.partialorder %v6760_v30, %v6766_v61  ;;  %v6827_v3 = vsel %vm2707_vm8, %v6826_v15, %v6825_v47 }
0x15f7   : > { %v6829_v57 = vsel %vm2710_vm9, %v6828_v4, %v6827_v3  ;;  %v6856_v4 = vsel %vm6854_vm1, 1, %v8615_v17 }
0x15f8   : > { %v6770_v19 = vmax.f32 %v10546_v27, %v6768_v20  ;;  %vm6772_vm2 = vcmp.ge.f32.partialorder %v10546_v27, %v6768_v20  ;;  %v6831_v5 = vsel %vm2713_vm10, %v6830_v45, %v6829_v57  ;;  %v6706_v20 = vrot.slane %v6621_v44, 7  ;;  %v6755_v44 = vld [vmem:[#allocation3 + $0x1ff] sm:$0x1] }
0x15f9   : > { %v6774_v38 = vsel %vm6772_vm2, %v6760_v30, %v10546_v27  ;;  %vm6780_vm4 = vmor %vm6772_vm2, %vm6778_vm3  ;;  %v6833_v52 = vsel %vm2716_vm11, %v6832_v53, %v6831_v5 }
0x15fa   : > { %v6776_v22 = vsub.f32 %v6774_v38, %v6770_v19  ;;  %v6782_v34 = vsel %vm6780_vm4, %v6766_v61, %v6760_v30  ;;  %v6622_v30 = vld [vmem:[#allocation3 + $0x15e] sm:$0x1] }
0x15fb   : > { %v6784_v7 = vsub.f32 %v6782_v34, %v6770_v19  ;;  %v6708_v38 = vrot.slane %v6622_v30, 6  ;;  %v6620_v34 = vld [vmem:[#allocation3 + $0x11e] sm:$0x1] }
0x15fc   : > { %v6786_v63 = vmul.f32 1.442695, %v6776_v22  ;;  %v6624_v22 = vld [vmem:[#allocation3 + $0x19e] sm:$0x1] }
0x15fd   : > { %v6792_v28 = vmul.f32 1.442695, %v6784_v7  ;;  %v6707_v7 = vsel %vm2698_vm5, %v6706_v20, %v6620_v34  ;;  %v6712_v36 = vrot.slane %v6624_v22, 4  ;;  %v6846_v20 = vrot.slane %v6755_v44, 1 }
0x15fe   : > { %8362 = vpow2.f32 %v6786_v63 }
0x15ff   : > { %8364 = vpow2.f32 %v6792_v28  ;;  %v6625_v28 = vld [vmem:[#allocation3 + $0x1be] sm:$0x1] }
0x1600   : > { %v6714_v0 = vrot.slane %v6625_v28, 3 }
0x1604   : > { %v6859_v55 = vpop.permute.xlu1 %6858 }
0x1605   : > { %vm6863_vm13 = vcmp.eq.s32.totalorder %v6859_v55, 1  ;;  %v6749_v55 = vld [vmem:[#allocation3 + $0x13f] sm:$0x1] }
0x1608   : > { %v8363_v37 = vpop.eup %8362 }
0x1609   : > { %v8365_v32 = vpop.eup %8364  ;;  %v6790_v60 = vadd.f32 1.0, %v8363_v37  ;;  %v6709_v37 = vsel %vm2701_vm6, %v6708_v38, %v6707_v7 }
0x160b   : > { %v6796_v46 = vadd.f32 %v8365_v32, %v6790_v60  ;;  %v6626_v32 = vld [vmem:[#allocation3 + $0x1de] sm:$0x1] }
0x160c   : > { %v6716_v54 = vrot.slane %v6626_v32, 2 }
0x160d   : > { %8366 = vlog2.f32 %v6796_v46  ;;  %v6627_v46 = vld [vmem:[#allocation3 + $0x1fe] sm:$0x1] }
0x160e   : > { %v6718_v1 = vrot.slane %v6627_v46, 1 }
0x1617   : > { %v8367_v2 = vpop.eup %8366 }
0x1618   : > { %v6799_v24 = vmul.f32 0.6931472, %v8367_v2 }
0x161a   : > { %v6802_v59 = vadd.f32 %v6799_v24, %v6770_v19  ;;  %v6623_v19 = vld [vmem:[#allocation3 + $0x17e] sm:$0x1] }
0x161b   : > { %v6710_v63 = vrot.slane %v6623_v19, 5 }
0x161c   : > { %v6850_v40 = vadd.f32 %v6833_v52, %v6802_v59 }
0x161d   : > { %v6711_v60 = vsel %vm2704_vm7, %v6710_v63, %v6709_v37  ;;  %v6873_v37 = vld [vmem:[#allocation10] sm:$0xff] (!%p7238_p1) }
0x161e   : > { %v10601_v51 = vsel %vm6863_vm13, %v6850_v40, %v10546_v27  ;;  %v6713_v42 = vsel %vm2707_vm8, %v6712_v36, %v6711_v60  ;;  %v6874_v36 = vld [vmem:[#allocation10 + $0x8] sm:$0xff] (!%p7238_p1) }
0x161f   : > { %6867 = vst [vmem:[#allocation2] sm:$0xff] %v10601_v51  ;;  %v6715_v13 = vsel %vm2710_vm9, %v6714_v0, %v6713_v42  ;;  %v6875_v32 = vadd.f32 (!%p7238_p1), %v6873_v37, %v10601_v51 }
0x1620   : > { %v6717_v43 = vsel %vm2713_vm10, %v6716_v54, %v6715_v13 }
0x1621   : > { %v6719_v15 = vsel %vm2716_vm11, %v6718_v1, %v6717_v43 }
0x164d   : > { %v6631_v8 = vpop.permute.xlu0 %6630 }
0x164e   : > { %v6633_v41 = vadd.f32 %v10562_v58, %v6631_v8 }
0x1651   : > { %v6637_v11 = vpop.permute.xlu0 %6636 }
0x1652   : > { %v6639_v21 = vadd.f32 %v10565_v14, %v6637_v11  ;;  %v6751_v11 = vld [vmem:[#allocation3 + $0x17f] sm:$0x1] }
0x1654   : > { %v6641_v49 = vmax.f32 %v6633_v41, %v6639_v21  ;;  %vm6651_vm15 = vcmp.ge.f32.partialorder %v6633_v41, %v6639_v21 }
0x1656   : > { %v6643_v6 = vmax.f32 %v10579_v10, %v6641_v49  ;;  %vm6645_vm14 = vcmp.ge.f32.partialorder %v10579_v10, %v6641_v49  ;;  %v6748_v49 = vld [vmem:[#allocation3 + $0x11f] sm:$0x1] }
0x1657   : > { %v6647_v48 = vsel %vm6645_vm14, %v6633_v41, %v10579_v10  ;;  %vm6653_vm12 = vmor %vm6645_vm14, %vm6651_vm15 }
0x1658   : > { %v6649_v26 = vsub.f32 %v6647_v48, %v6643_v6  ;;  %v6655_v27 = vsel %vm6653_vm12, %v6639_v21, %v6633_v41  ;;  %v6752_v21 = vld [vmem:[#allocation3 + $0x19f] sm:$0x1]  ;;  %v6838_v48 = vrot.slane %v6751_v11, 5 }
0x1659   : > { %v6657_v18 = vsub.f32 %v6655_v27, %v6643_v6 }
0x165a   : > { %v6660_v35 = vmul.f32 1.442695, %v6649_v26  ;;  %v6753_v26 = vld [vmem:[#allocation3 + $0x1bf] sm:$0x1] }
0x165b   : > { %v6666_v23 = vmul.f32 1.442695, %v6657_v18  ;;  %v6840_v18 = vrot.slane %v6752_v21, 4 }
0x165c   : > { %8368 = vpow2.f32 %v6660_v35  ;;  %v6754_v35 = vld [vmem:[#allocation3 + $0x1df] sm:$0x1] }
0x165d   : > { %8370 = vpow2.f32 %v6666_v23 }
0x1662   : > { %v6734_v39 = vpop.permute.xlu0 %6733 }
0x1663   : > { %vm6736_vm0 = vcmp.eq.s32.totalorder %v6734_v39, 1 }
0x1666   : > { %v8369_v25 = vpop.eup %8368 }
0x1667   : > { %v8371_v12 = vpop.eup %8370  ;;  %v6663_v16 = vadd.f32 1.0, %v8369_v25  ;;  %v6842_v25 = vrot.slane %v6753_v26, 3 }
0x1669   : > { %v6669_v61 = vadd.f32 %v8371_v12, %v6663_v16  ;;  %v6844_v16 = vrot.slane %v6754_v35, 2 }
0x166b   : > { %8372 = vlog2.f32 %v6669_v61 }
0x1675   : > { %v8373_v50 = vpop.eup %8372 }
0x1676   : > { %v6673_v56 = vmul.f32 0.6931472, %v8373_v50 }
0x1678   : > { %v6675_v33 = vadd.f32 %v6673_v56, %v6643_v6 }
0x167a   : > { %v6723_v9 = vadd.f32 %v6719_v15, %v6675_v33 }
0x167c   : > { %v6738_v47 = vsel %vm6736_vm0, %v6723_v9, %v10579_v10 }
0x167d   : > { %6758 = vrot.lane.b32.xlu0 %v6738_v47, %s8614_s12 }
0x1681   : > { %6764 = vrot.lane.b32.xlu0 %v6738_v47, %s8613_s10 }
0x1685   : > { %6861 = vperm.xlu0 %7834, %v6856_v4  }
0x16a4   : > { %6877 = vmax.xlane.f32.xlu0 (!%p7238_p1), %v6875_v32 }
0x16ef   : > { %v6759_v62 = vpop.permute.xlu0 %6758 }
0x16f0   : > { %v6761_v45 = vadd.f32 %v10562_v58, %v6759_v62  ;;  %v6750_v58 = vld [vmem:[#allocation3 + $0x15f] sm:$0x1] }
0x16f1   : > { %v6836_v41 = vrot.slane %v6750_v58, 6 }
0x16f3   : > { %v6765_v3 = vpop.permute.xlu0 %6764 }
0x16f4   : > { %v6767_v2 = vadd.f32 %v10565_v14, %v6765_v3  ;;  %v6834_v14 = vrot.slane %v6749_v55, 7 }
0x16f6   : > { %v6769_v57 = vmax.f32 %v6761_v45, %v6767_v2  ;;  %vm6779_vm3 = vcmp.ge.f32.partialorder %v6761_v45, %v6767_v2  ;;  %v6835_v6 = vsel %vm2698_vm5, %v6834_v14, %v6748_v49 }
0x16f7   : > { %v6837_v27 = vsel %vm2701_vm6, %v6836_v41, %v6835_v6 }
0x16f8   : > { %v6771_v53 = vmax.f32 %v6738_v47, %v6769_v57  ;;  %vm6773_vm2 = vcmp.ge.f32.partialorder %v6738_v47, %v6769_v57  ;;  %v6839_v23 = vsel %vm2704_vm7, %v6838_v48, %v6837_v27 }
0x16f9   : > { %v6775_v10 = vsel %vm6773_vm2, %v6761_v45, %v6738_v47  ;;  %vm6781_vm4 = vmor %vm6773_vm2, %vm6779_vm3  ;;  %v6841_v12 = vsel %vm2707_vm8, %v6840_v18, %v6839_v23 }
0x16fa   : > { %v6777_v24 = vsub.f32 %v6775_v10, %v6771_v53  ;;  %v6783_v5 = vsel %vm6781_vm4, %v6767_v2, %v6761_v45  ;;  %v6843_v61 = vsel %vm2710_vm9, %v6842_v25, %v6841_v12 }
0x16fb   : > { %v6785_v29 = vsub.f32 %v6783_v5, %v6771_v53  ;;  %v6845_v38 = vsel %vm2713_vm10, %v6844_v16, %v6843_v61 }
0x16fc   : > { %v6788_v31 = vmul.f32 1.442695, %v6777_v24  ;;  %v6847_v7 = vsel %vm2716_vm11, %v6846_v20, %v6845_v38 }
0x16fd   : > { %v6794_v59 = vmul.f32 1.442695, %v6785_v29 }
0x16fe   : > { %8374 = vpow2.f32 %v6788_v31 }
0x16ff   : > { %8376 = vpow2.f32 %v6794_v59 }
0x1704   : > { %v6862_v34 = vpop.permute.xlu0 %6861 }
0x1705   : > { %vm6864_vm5 = vcmp.eq.s32.totalorder %v6862_v34, 1 }
0x1708   : > { %v8375_v17 = vpop.eup %8374 }
0x1709   : > { %v8377_v52 = vpop.eup %8376  ;;  %v6791_v40 = vadd.f32 1.0, %v8375_v17 }
0x170b   : > { %v6797_v8 = vadd.f32 %v8377_v52, %v6791_v40 }
0x170d   : > { %8378 = vlog2.f32 %v6797_v8 }
0x1717   : > { %v8379_v30 = vpop.eup %8378 }
0x1718   : > { %v6801_v19 = vmul.f32 0.6931472, %v8379_v30 }
0x1719   : > { %6872 = sbr.rel (%p7238_p1) target bundleno = 6238 (0x185e), region = 72 }
0x171a   : > { %v6803_v22 = vadd.f32 %v6801_v19, %v6771_v53 }
0x171c   : > { %v6851_v63 = vadd.f32 %v6847_v7, %v6803_v22 }
0x171e   : > { %v6866_v28 = vsel %vm6864_vm5, %v6851_v63, %v6738_v47 }
0x171f   : > { %6868 = vst [vmem:[#allocation2 + $0x8] sm:$0xff] %v6866_v28  ;;  %v6876_v60 = vadd.f32 (!%p7238_p1), %v6874_v36, %v6866_v28 }
0x1721   : > { %6879 = vmax.xlane.f32.xlu0 %v6876_v60 }
0x1731   : > { %v6878_v0 = vpop.xlane.xlu0 %6877 }
0x1732   : > { %v6881_v46 = vsub.f32 %v6875_v32, %v6878_v0 }
0x1734   : > { %v6883_v42 = vmul.f32 1.442695, %v6881_v46 }
0x1736   : > { %8418 = vpow2.f32 %v6883_v42 }
0x1740   : > { %v8419_v1 = vpop.eup %8418 }
0x1741   : > { %6887 = vadd.xlane.f32.xlu1 %v8419_v1 }
0x17ae   : > { %v6880_v54 = vpop.xlane.xlu0 %6879 }
0x17af   : > { %v6882_v50 = vsub.f32 %v6876_v60, %v6880_v54 }
0x17b1   : > { %v6885_v13 = vmul.f32 1.442695, %v6882_v50 }
0x17b3   : > { %8420 = vpow2.f32 %v6885_v13 }
0x17bd   : > { %v8421_v56 = vpop.eup %8420 }
0x17be   : > { %6889 = vadd.xlane.f32.xlu1 %v8421_v56 }
0x17ce   : > { %v6888_v43 = vpop.xlane.xlu1 %6887 }
0x17cf   : > { %8422 = vlog2.f32 %v6888_v43 }
0x17d9   : > { %v8423_v51 = vpop.eup %8422 }
0x17da   : > { %v6892_v39 = vmul.f32 0.6931472, %v8423_v51 }
0x17dc   : > { %v6895_v15 = vadd.f32 %v6892_v39, %v6878_v0 }
0x17de   : > { %v6897_v47 = vsub.f32 0.0, %v6895_v15 }
0x17e0   : > { %6899 = vst [vmem:[#allocation12] sm:$0xff] %v6897_v47 }
0x184b   : > { %v6890_v33 = vpop.xlane.xlu1 %6889 }
0x184c   : > { %8424 = vlog2.f32 %v6890_v33 }
0x1856   : > { %v8425_v9 = vpop.eup %8424 }
0x1857   : > { %v6894_v4 = vmul.f32 0.6931472, %v8425_v9 }
0x1859   : > { %v6896_v62 = vadd.f32 %v6894_v4, %v6880_v54 }
0x185b   : > { %v6898_v3 = vsub.f32 0.0, %v6896_v62 }
0x185d   : > { %6900 = vst [vmem:[#allocation12 + $0x8] sm:$0xff] %v6898_v3 }
0x185e PF: > { %s10712_s27 = sadd.s32 4294967295, %s8598_s29   ;;  %s8616_s12 = smov [#allocation12]  }
0x185f   : > { %p10635_p2 = scmp.eq.s32.totalorder %s10712_s27, 1  ;;  %s6910_s20 = sshll.u32 %s8616_s12, 4  ;;  %s6911_s20 = int_to_ptr.vmem [resolvable:$true] %s6910_s20 }
0x1860   : > { %s8510_s30 = scalar_lea.vmem %s6911_s20, 256  ;;  %p8517_p9 = scmp.lt.s32.totalorder %s6911_s20, %s6911_s20 }
0x1861   : > { %p8511_p4 = scmp.ne.s32.totalorder %s6911_s20, %s8510_s30  ;;  %p8518_p11 = scmp.lt.s32.totalorder %s8510_s30, %s8510_s30 }
0x1863   : > { %p8512_p6 = pnand %p8511_p4, %p10635_p2  ;;  %p8519_p13 = por %p8518_p11, %p8517_p9 }
0x1865   : > { %p8513_p7 = pneg %p8512_p6 }
0x1867   : > { %p8520_p0 = pnand %p8519_p13, %p8513_p7 }
0x1869   : > { %8523 = shalt.err (!%p8520_p0)
}
0x186a   : > { %s10714_s22 = sld [smem:[#allocation23_spill]] }
0x1870   : > { %s8524_s18 = scalar_lea.hbm %s10714_s22, 256 }
0x1871   : > { %p8525_p12 = scmp.ne.s32.totalorder %s10714_s22, %s8524_s18  ;;  %p8530_p8 = scmp.lt.u32.totalorder %s8524_s18, %s10714_s22 }
0x1873   : > { %p8526_p5 = pnand %p8525_p12, %p10635_p2 }
0x1875   : > { %p8527_p3 = pneg %p8526_p5 }
0x1877   : > { %p8532_p10 = pnand %p8530_p8, %p8527_p3 }
0x1879   : > { %8535 = shalt.err (!%p8532_p10)
}
0x187a   : > { %s8617_s15 = smov 128   ;;  %s8618_s8 = smov 8  }
0x187b   : > { %7746 = dma.vmem_to_hbm [thread:$0]  (%p10635_p2), %s6911_s20, 256, %s10714_s22, [#allocation6], %s8617_s15, %s8617_s15, %s8618_s8  }
0x187c   : > { %8573 = dma.done.wait (%p10635_p2), [#allocation6], 256  }
0x187d   : > { %8575 = vsyncadd (%p10635_p2), [#allocation6], 4294967040 }
0x187e PF: > { %s23_s29 = sadd.s32 1, %s8598_s29   ;;  %s10715_s19 = sld [smem:[#allocation21_spill]] }
0x187f   : > { %p20_p1 = scmp.ge.s32.totalorder %s23_s29, 4   ;;  %s10716_s21 = sld [smem:[#allocation20_spill]] }
0x1880   : > { %s10717_s24 = smov %s8582_s25  ;;  %s10718_s25 = smov %s8586_s26 }
0x1881   : > { %s10720_s27 = smov %s8594_s28  ;;  %22 = sbr.rel (!%p20_p1) target bundleno = 10 (0xa), region = 123 }
0x1884   : > { %s10719_s26 = smov %s10715_s19 }
0x1885   : > { %s10721_s28 = smov %s10716_s21 }
0x1888   :  { %6926 = vsyncpa [#allocation5], 1 }
0x1889   :  { %6928 = vsyncpa [#allocation5 + $0x1], 1 }
0x188a   :  { %6929 = vsyncpa [#allocation8], 1 }
0x188b   :  { %6930 = vsyncpa [#allocation11], 1 }
0x188c   :  { %6931 = vsyncpa [#allocation6], 1 }
0x188d   :  { %6933 = vsyncpa [#allocation6 + $0x1], 1 }

</bundles_post_ra>
